<compile_context>
chip_gen: v7x
topology: tpu7x:2x2x1
jax: 0.10.0
libtpu: 0.0.40
codegen_flags: <defaults>
</compile_context>

<pallas_src>
import numpy as np
import jax
import jax.numpy as jnp
from jax import lax
from jax.scipy.special import erf as _erf_exact
from jax.experimental import pallas as pl
from jax.experimental.pallas import tpu as pltpu

_SQRT_HALF = 0.7071067811865476


def _erf_approx(x):
    # Abramowitz & Stegun 7.1.26 polynomial (max abs err ~1.5e-7).  The divide is
    # an EUP approx reciprocal + one Newton refinement (rel err ~1e-7), keeping
    # the end-to-end 1e-4 tolerance while freeing the VALU slot.
    a1, a2, a3, a4, a5 = 0.254829592, -0.284496736, 1.421413741, -1.453152027, 1.061405429
    p = 0.3275911
    sgn = jnp.where(x >= 0.0, 1.0, -1.0)
    ax = jnp.abs(x)
    d = 1.0 + p * ax
    r = pl.reciprocal(d, approx=True)
    t = r * (2.0 - d * r)                        # one Newton step
    poly = ((((a5 * t + a4) * t + a3) * t + a2) * t + a1) * t
    return sgn * (1.0 - poly * jnp.exp(-ax * ax))


def _gelu(x):
    return 0.5 * x * (1.0 + _erf_approx(x * _SQRT_HALF))


def _gelu_exact(x):
    return 0.5 * x * (1.0 + _erf_exact(x * _SQRT_HALF))


def _interp_matrix(out_size, in_size):
    """Bilinear interpolation matrix matching F.interpolate(align_corners=False)."""
    m = np.zeros((out_size, in_size), dtype=np.float32)
    scale = in_size / out_size
    for i in range(out_size):
        src = (i + 0.5) * scale - 0.5
        if src < 0.0:
            src = 0.0
        i0 = min(int(np.floor(src)), in_size - 1)
        i1 = min(i0 + 1, in_size - 1)
        lam = src - i0
        m[i, i0] += 1.0 - lam
        m[i, i1] += lam
    return m


def _safm_kernel(x_ref, wp_ref, wdw_ref, wk_ref, wo1p_ref, wo2_ref,
                 out_ref, xpad_ref, pp_ref):
    _, H, W, C = out_ref.shape
    Cc = wo2_ref.shape[0]
    Hs = pp_ref.shape[0] - 2
    Ws = pp_ref.shape[1] - 2

    # ---- zero-pad the input plane in VMEM (conv padding=1) ----
    xpad_ref[...] = jnp.zeros_like(xpad_ref)
    xpad_ref[pl.ds(1, H), pl.ds(1, W), :] = x_ref[0]

    # ---- proj: 3x3 conv as 9 shifted MXU matmuls with one fused (C -> C) weight.
    #      The W (sublane) shift is hoisted: only 3 shifted loads, H-shifts are
    #      free major-dim slices. ----
    acc = None
    for dx in range(3):
        xw = xpad_ref[:, dx:dx + W, :]                       # (H+2, W, C)
        for dy in range(3):
            patch = xw[dy:dy + H].reshape(H * W, C)          # major-dim slice
            contrib = jnp.dot(patch, wp_ref[dy * 3 + dx],
                              preferred_element_type=jnp.float32)
            acc = contrib if acc is None else acc + contrib
    y = acc                                                  # (H*W, C) = [x0 | x1]
    x0f = y[:, :Cc]                                          # (H*W, Cc)
    x0 = x0f.reshape(H, W, Cc)

    # ---- adaptive_max_pool2d(x0, (H//8, W//8)) == non-overlapping 8x8 max,
    #      fully vectorized (no per-element stores) ----
    x0r = x0.reshape(Hs, 8, W, Cc)                           # leading-dim split (free)
    hmax = x0r[:, 0]
    for i in range(1, 8):
        hmax = jnp.maximum(hmax, x0r[:, i])                  # (Hs, W, Cc)
    hr = hmax.reshape(Hs, Ws, 8, Cc)                         # sublane-compatible split
    pooled = hr[:, :, 0, :]
    for j in range(1, 8):
        pooled = jnp.maximum(pooled, hr[:, :, j, :])         # (Hs, Ws, Cc)

    # zero-ring padded pooled map for the depthwise conv -- one vectorized store
    pp_ref[...] = jnp.zeros_like(pp_ref)
    pp_ref[pl.ds(1, Hs), pl.ds(1, Ws), :] = pooled
    pp = pp_ref[...]                                         # (Hs+2, Ws+2, Cc)

    # ---- depthwise 3x3 conv on the (tiny) pooled map ----
    z = None
    for dy in range(3):
        for dx in range(3):
            t = dy * 3 + dx
            c = pp[dy:dy + Hs, dx:dx + Ws, :] * wdw_ref[t].reshape(1, 1, Cc)
            z = c if z is None else z + c                    # (Hs, Ws, Cc)

    # ---- bilinear upsample (align_corners=False) as ONE MXU matmul with the
    #      precomputed kron(My, Mx) matrix: (H*W, Hs*Ws) @ (Hs*Ws, Cc) ----
    upf = jnp.dot(wk_ref[...], z.reshape(Hs * Ws, Cc),
                  preferred_element_type=jnp.float32)        # (H*W, Cc)

    # ---- x2 = gelu(up) * x0 ; out = gelu(x1) @ Wo1 + gelu(x2) @ Wo2.
    #      Wo1 is zero-padded on the x0 rows so gelu(y) @ Wo1p == gelu(x1) @ Wo1
    #      (avoids an unaligned lane-slice of x1). ----
    x2f = _gelu(upf) * x0f
    outf = jnp.dot(_gelu(y), wo1p_ref[...], preferred_element_type=jnp.float32)
    outf = outf + jnp.dot(_gelu(x2f), wo2_ref[...],
                          preferred_element_type=jnp.float32)
    out_ref[0] = outf.reshape(H, W, C).astype(out_ref.dtype)


def simple_safm_pallas(x, w_proj, w_dw, w_out, *, ratio=4):
    B, C, H, W = x.shape
    assert C % ratio == 0 and H % 8 == 0 and W % 8 == 0
    Cc = C // ratio
    Hs, Ws = H // 8, W // 8

    # NCHW -> NHWC (channels on lanes). Zero-padding happens inside the kernel.
    # TODO(synk): fuse this transpose into the pallas_call input and add H-band
    # tiling (with 1-row halo) for planes that exceed v7x's 64 MiB VMEM; also a
    # lane-dense repack for production C < 128.
    x_nhwc = jnp.transpose(x, (0, 2, 3, 1)).astype(jnp.float32)

    wp = jnp.transpose(w_proj, (2, 3, 1, 0)).reshape(9, C, C)     # (tap, cin, cout)
    wdw = jnp.transpose(w_dw[:, 0, :, :], (1, 2, 0)).reshape(9, Cc)
    wo = jnp.transpose(w_out[:, :, 0, 0])                         # (cin_cat, cout)
    wo1 = wo[:C - Cc, :]                                          # rows acting on x1
    wo2 = wo[C - Cc:, :]                                          # rows acting on x2
    wo1p = jnp.concatenate([jnp.zeros((Cc, C), jnp.float32), wo1], axis=0)  # conv-out order [x0|x1]
    wk = jnp.asarray(np.kron(_interp_matrix(H, Hs), _interp_matrix(W, Ws)))  # (H*W, Hs*Ws)

    grid_spec = pltpu.PrefetchScalarGridSpec(
        num_scalar_prefetch=0,
        grid=(B,),
        in_specs=[
            pl.BlockSpec((1, H, W, C), lambda b: (b, 0, 0, 0)),
            pl.BlockSpec((9, C, C), lambda b: (0, 0, 0)),
            pl.BlockSpec((9, Cc), lambda b: (0, 0)),
            pl.BlockSpec((H * W, Hs * Ws), lambda b: (0, 0)),
            pl.BlockSpec((C, C), lambda b: (0, 0)),
            pl.BlockSpec((Cc, C), lambda b: (0, 0)),
        ],
        out_specs=pl.BlockSpec((1, H, W, C), lambda b: (b, 0, 0, 0)),
        scratch_shapes=[
            pltpu.VMEM((H + 2, W + 2, C), jnp.float32),           # padded input plane
            pltpu.VMEM((Hs + 2, Ws + 2, Cc), jnp.float32),        # padded pooled map
        ],
    )

    # Raise the scoped-VMEM limit only when full-plane residency needs it.
    plane = H * W * C * 4
    weights = (9 * C * C + 9 * Cc + H * W * Hs * Ws + C * C + Cc * C) * 4
    scratch = (H + 2) * (W + 2) * C * 4 + (Hs + 2) * (Ws + 2) * Cc * 4
    vmem_need = 4 * plane + 4 * plane + scratch + weights   # dbl-buffered io + temps
    cp_kwargs = dict(dimension_semantics=("parallel",))
    if vmem_need > (28 << 20):
        cp_kwargs["vmem_limit_bytes"] = int(min(vmem_need + (4 << 20), 64 << 20))

    out_nhwc = pl.pallas_call(
        _safm_kernel,
        out_shape=jax.ShapeDtypeStruct((B, H, W, C), jnp.float32),
        grid_spec=grid_spec,
        compiler_params=pltpu.CompilerParams(**cp_kwargs),
    )(x_nhwc, wp, wdw, wk, wo1p, wo2)
    return jnp.transpose(out_nhwc, (0, 3, 1, 2))


def ref_forward(x, w_proj, w_dw, w_out, *, ratio=4):
    """Pure-JAX reference of SimpleSAFM.forward (NCHW, exact-erf GELU)."""
    B, C, H, W = x.shape
    Cc = C // ratio
    Hs, Ws = H // 8, W // 8
    dn = ('NCHW', 'OIHW', 'NCHW')
    y = lax.conv_general_dilated(x, w_proj, (1, 1), ((1, 1), (1, 1)),
                                 dimension_numbers=dn)
    x0, x1 = y[:, :Cc], y[:, Cc:]
    pooled = x0.reshape(B, Cc, Hs, 8, Ws, 8).max(axis=(3, 5))
    z = lax.conv_general_dilated(pooled, w_dw, (1, 1), ((1, 1), (1, 1)),
                                 dimension_numbers=dn, feature_group_count=Cc)
    My = jnp.asarray(_interp_matrix(H, Hs))
    Mx = jnp.asarray(_interp_matrix(W, Ws))
    up = jnp.einsum('ip,bcpq,jq->bcij', My, z, Mx)
    x2 = _gelu_exact(up) * x0
    cat = jnp.concatenate([x1, x2], axis=1)
    out = jnp.einsum('oc,bchw->bohw', w_out[:, :, 0, 0], _gelu_exact(cat))
    return out


if __name__ == "__main__":
    B, dim, H, W = 2, 8, 16, 16
    ratio = 4
    Cc = dim // ratio
    key = jax.random.PRNGKey(0)
    kx, k1, k2, k3 = jax.random.split(key, 4)
    x = jax.random.normal(kx, (B, dim, H, W), jnp.float32)
    w_proj = 0.25 * jax.random.normal(k1, (dim, dim, 3, 3), jnp.float32)
    w_dw = 0.4 * jax.random.normal(k2, (Cc, 1, 3, 3), jnp.float32)
    w_out = 0.25 * jax.random.normal(k3, (dim, dim, 1, 1), jnp.float32)

    out = jax.block_until_ready(simple_safm_pallas(x, w_proj, w_dw, w_out, ratio=ratio))
    ref = jax.block_until_ready(ref_forward(x, w_proj, w_dw, w_out, ratio=ratio))

    assert out.shape == (B, dim, H, W)
    err = float(jnp.max(jnp.abs(out - ref)))
    assert err < 1e-4, f"max abs err {err}"
    print("KERNEL_OK")
</pallas_src>

<mosaic_0001>
module attributes {stable_mosaic.version = 11 : i64} {
  func.func @_safm_kernel(%arg0: i32, %arg1: memref<1x16x16x8xf32, #tpu.memory_space<vmem>>, %arg2: memref<9x8x8xf32, #tpu.memory_space<vmem>>, %arg3: memref<9x2xf32, #tpu.memory_space<vmem>>, %arg4: memref<256x4xf32, #tpu.memory_space<vmem>>, %arg5: memref<8x8xf32, #tpu.memory_space<vmem>>, %arg6: memref<2x8xf32, #tpu.memory_space<vmem>>, %arg7: memref<1x16x16x8xf32, #tpu.memory_space<vmem>>, %arg8: memref<18x18x8xf32, #tpu.memory_space<vmem>>, %arg9: memref<4x4x2xf32, #tpu.memory_space<vmem>>) attributes {dimension_semantics = [#tpu.dimension_semantics<parallel>], iteration_bounds = array<i64: 2>, scalar_prefetch = 0 : i64, scratch_operands = 2 : i64, tpu.core_type = #tpu.core_type<tc>, window_params = [{transform_indices = @transform_0, window_bounds = array<i64: 1, 16, 16, 8>}, {pipeline_mode = #tpu.pipeline_mode<synchronous>, transform_indices = @transform_1, window_bounds = array<i64: 9, 8, 8>}, {pipeline_mode = #tpu.pipeline_mode<synchronous>, transform_indices = @transform_2, window_bounds = array<i64: 9, 2>}, {pipeline_mode = #tpu.pipeline_mode<synchronous>, transform_indices = @transform_3, window_bounds = array<i64: 256, 4>}, {pipeline_mode = #tpu.pipeline_mode<synchronous>, transform_indices = @transform_4, window_bounds = array<i64: 8, 8>}, {pipeline_mode = #tpu.pipeline_mode<synchronous>, transform_indices = @transform_5, window_bounds = array<i64: 2, 8>}, {transform_indices = @transform_6, window_bounds = array<i64: 1, 16, 16, 8>}]} {
    %cst = arith.constant 0.000000e+00 : f32
    %0 = vector.broadcast %cst : f32 to vector<18x18x8xf32>
    %c0 = arith.constant 0 : index
    %c0_0 = arith.constant 0 : index
    %c0_1 = arith.constant 0 : index
    %1 = vector.load %arg8[%c0, %c0_0, %c0_1] : memref<18x18x8xf32, #tpu.memory_space<vmem>>, vector<18x18x8xf32>
    tpu.vector_store %arg8[%c0, %c0_0, %c0_1], %0 {strides = array<i32>} : memref<18x18x8xf32, #tpu.memory_space<vmem>>, vector<18x18x8xf32>,
    %c0_2 = arith.constant 0 : index
    %c0_3 = arith.constant 0 : index
    %c0_4 = arith.constant 0 : index
    %c0_5 = arith.constant 0 : index
    %2 = vector.load %arg1[%c0_2, %c0_3, %c0_4, %c0_5] : memref<1x16x16x8xf32, #tpu.memory_space<vmem>>, vector<1x16x16x8xf32>
    %3 = vector.shape_cast %2 : vector<1x16x16x8xf32> to vector<16x16x8xf32>
    %c1 = arith.constant 1 : index
    %c1_6 = arith.constant 1 : index
    %c0_7 = arith.constant 0 : index
    %4 = vector.load %arg8[%c1, %c1_6, %c0_7] : memref<18x18x8xf32, #tpu.memory_space<vmem>>, vector<16x16x8xf32>
    tpu.vector_store %arg8[%c1, %c1_6, %c0_7], %3 {strides = array<i32>} : memref<18x18x8xf32, #tpu.memory_space<vmem>>, vector<16x16x8xf32>,
    %c0_8 = arith.constant 0 : index
    %c0_9 = arith.constant 0 : index
    %c0_10 = arith.constant 0 : index
    %5 = vector.load %arg8[%c0_8, %c0_9, %c0_10] : memref<18x18x8xf32, #tpu.memory_space<vmem>>, vector<18x16x8xf32>
    %6 = vector.extract_strided_slice %5 {offsets = [0, 0, 0], sizes = [16, 16, 8], strides = [1, 1, 1]} : vector<18x16x8xf32> to vector<16x16x8xf32>
    %7 = vector.shape_cast %6 : vector<16x16x8xf32> to vector<256x8xf32>
    %c0_11 = arith.constant 0 : index
    %c0_12 = arith.constant 0 : index
    %c0_13 = arith.constant 0 : index
    %8 = vector.load %arg2[%c0_11, %c0_12, %c0_13] : memref<9x8x8xf32, #tpu.memory_space<vmem>>, vector<1x8x8xf32>
    %9 = vector.shape_cast %8 : vector<1x8x8xf32> to vector<8x8xf32>
    %cst_14 = arith.constant dense<0.000000e+00> : vector<256x8xf32>
    %10 = tpu.matmul %7, %9, %cst_14 {dimension_numbers = #tpu.dot_dimension_numbers<[1], [0], [0], [1], [0, 0, 1, 1], [], []>} : vector<256x8xf32>, vector<8x8xf32>, vector<256x8xf32> -> vector<256x8xf32>
    %11 = vector.extract_strided_slice %5 {offsets = [1, 0, 0], sizes = [16, 16, 8], strides = [1, 1, 1]} : vector<18x16x8xf32> to vector<16x16x8xf32>
    %12 = vector.shape_cast %11 : vector<16x16x8xf32> to vector<256x8xf32>
    %c3 = arith.constant 3 : index
    %c0_15 = arith.constant 0 : index
    %c0_16 = arith.constant 0 : index
    %13 = vector.load %arg2[%c3, %c0_15, %c0_16] : memref<9x8x8xf32, #tpu.memory_space<vmem>>, vector<1x8x8xf32>
    %14 = vector.shape_cast %13 : vector<1x8x8xf32> to vector<8x8xf32>
    %cst_17 = arith.constant dense<0.000000e+00> : vector<256x8xf32>
    %15 = tpu.matmul %12, %14, %cst_17 {dimension_numbers = #tpu.dot_dimension_numbers<[1], [0], [0], [1], [0, 0, 1, 1], [], []>} : vector<256x8xf32>, vector<8x8xf32>, vector<256x8xf32> -> vector<256x8xf32>
    %16 = arith.addf %10, %15 : vector<256x8xf32>
    %17 = vector.extract_strided_slice %5 {offsets = [2, 0, 0], sizes = [16, 16, 8], strides = [1, 1, 1]} : vector<18x16x8xf32> to vector<16x16x8xf32>
    %18 = vector.shape_cast %17 : vector<16x16x8xf32> to vector<256x8xf32>
    %c6 = arith.constant 6 : index
    %c0_18 = arith.constant 0 : index
    %c0_19 = arith.constant 0 : index
    %19 = vector.load %arg2[%c6, %c0_18, %c0_19] : memref<9x8x8xf32, #tpu.memory_space<vmem>>, vector<1x8x8xf32>
    %20 = vector.shape_cast %19 : vector<1x8x8xf32> to vector<8x8xf32>
    %cst_20 = arith.constant dense<0.000000e+00> : vector<256x8xf32>
    %21 = tpu.matmul %18, %20, %cst_20 {dimension_numbers = #tpu.dot_dimension_numbers<[1], [0], [0], [1], [0, 0, 1, 1], [], []>} : vector<256x8xf32>, vector<8x8xf32>, vector<256x8xf32> -> vector<256x8xf32>
    %22 = arith.addf %16, %21 : vector<256x8xf32>
    %c0_21 = arith.constant 0 : index
    %c1_22 = arith.constant 1 : index
    %c0_23 = arith.constant 0 : index
    %23 = vector.load %arg8[%c0_21, %c1_22, %c0_23] : memref<18x18x8xf32, #tpu.memory_space<vmem>>, vector<18x16x8xf32>
    %24 = vector.extract_strided_slice %23 {offsets = [0, 0, 0], sizes = [16, 16, 8], strides = [1, 1, 1]} : vector<18x16x8xf32> to vector<16x16x8xf32>
    %25 = vector.shape_cast %24 : vector<16x16x8xf32> to vector<256x8xf32>
    %c1_24 = arith.constant 1 : index
    %c0_25 = arith.constant 0 : index
    %c0_26 = arith.constant 0 : index
    %26 = vector.load %arg2[%c1_24, %c0_25, %c0_26] : memref<9x8x8xf32, #tpu.memory_space<vmem>>, vector<1x8x8xf32>
    %27 = vector.shape_cast %26 : vector<1x8x8xf32> to vector<8x8xf32>
    %cst_27 = arith.constant dense<0.000000e+00> : vector<256x8xf32>
    %28 = tpu.matmul %25, %27, %cst_27 {dimension_numbers = #tpu.dot_dimension_numbers<[1], [0], [0], [1], [0, 0, 1, 1], [], []>} : vector<256x8xf32>, vector<8x8xf32>, vector<256x8xf32> -> vector<256x8xf32>
    %29 = arith.addf %22, %28 : vector<256x8xf32>
    %30 = vector.extract_strided_slice %23 {offsets = [1, 0, 0], sizes = [16, 16, 8], strides = [1, 1, 1]} : vector<18x16x8xf32> to vector<16x16x8xf32>
    %31 = vector.shape_cast %30 : vector<16x16x8xf32> to vector<256x8xf32>
    %c4 = arith.constant 4 : index
    %c0_28 = arith.constant 0 : index
    %c0_29 = arith.constant 0 : index
    %32 = vector.load %arg2[%c4, %c0_28, %c0_29] : memref<9x8x8xf32, #tpu.memory_space<vmem>>, vector<1x8x8xf32>
    %33 = vector.shape_cast %32 : vector<1x8x8xf32> to vector<8x8xf32>
    %cst_30 = arith.constant dense<0.000000e+00> : vector<256x8xf32>
    %34 = tpu.matmul %31, %33, %cst_30 {dimension_numbers = #tpu.dot_dimension_numbers<[1], [0], [0], [1], [0, 0, 1, 1], [], []>} : vector<256x8xf32>, vector<8x8xf32>, vector<256x8xf32> -> vector<256x8xf32>
    %35 = arith.addf %29, %34 : vector<256x8xf32>
    %36 = vector.extract_strided_slice %23 {offsets = [2, 0, 0], sizes = [16, 16, 8], strides = [1, 1, 1]} : vector<18x16x8xf32> to vector<16x16x8xf32>
    %37 = vector.shape_cast %36 : vector<16x16x8xf32> to vector<256x8xf32>
    %c7 = arith.constant 7 : index
    %c0_31 = arith.constant 0 : index
    %c0_32 = arith.constant 0 : index
    %38 = vector.load %arg2[%c7, %c0_31, %c0_32] : memref<9x8x8xf32, #tpu.memory_space<vmem>>, vector<1x8x8xf32>
    %39 = vector.shape_cast %38 : vector<1x8x8xf32> to vector<8x8xf32>
    %cst_33 = arith.constant dense<0.000000e+00> : vector<256x8xf32>
    %40 = tpu.matmul %37, %39, %cst_33 {dimension_numbers = #tpu.dot_dimension_numbers<[1], [0], [0], [1], [0, 0, 1, 1], [], []>} : vector<256x8xf32>, vector<8x8xf32>, vector<256x8xf32> -> vector<256x8xf32>
    %41 = arith.addf %35, %40 : vector<256x8xf32>
    %c0_34 = arith.constant 0 : index
    %c2 = arith.constant 2 : index
    %c0_35 = arith.constant 0 : index
    %42 = vector.load %arg8[%c0_34, %c2, %c0_35] : memref<18x18x8xf32, #tpu.memory_space<vmem>>, vector<18x16x8xf32>
    %43 = vector.extract_strided_slice %42 {offsets = [0, 0, 0], sizes = [16, 16, 8], strides = [1, 1, 1]} : vector<18x16x8xf32> to vector<16x16x8xf32>
    %44 = vector.shape_cast %43 : vector<16x16x8xf32> to vector<256x8xf32>
    %c2_36 = arith.constant 2 : index
    %c0_37 = arith.constant 0 : index
    %c0_38 = arith.constant 0 : index
    %45 = vector.load %arg2[%c2_36, %c0_37, %c0_38] : memref<9x8x8xf32, #tpu.memory_space<vmem>>, vector<1x8x8xf32>
    %46 = vector.shape_cast %45 : vector<1x8x8xf32> to vector<8x8xf32>
    %cst_39 = arith.constant dense<0.000000e+00> : vector<256x8xf32>
    %47 = tpu.matmul %44, %46, %cst_39 {dimension_numbers = #tpu.dot_dimension_numbers<[1], [0], [0], [1], [0, 0, 1, 1], [], []>} : vector<256x8xf32>, vector<8x8xf32>, vector<256x8xf32> -> vector<256x8xf32>
    %48 = arith.addf %41, %47 : vector<256x8xf32>
    %49 = vector.extract_strided_slice %42 {offsets = [1, 0, 0], sizes = [16, 16, 8], strides = [1, 1, 1]} : vector<18x16x8xf32> to vector<16x16x8xf32>
    %50 = vector.shape_cast %49 : vector<16x16x8xf32> to vector<256x8xf32>
    %c5 = arith.constant 5 : index
    %c0_40 = arith.constant 0 : index
    %c0_41 = arith.constant 0 : index
    %51 = vector.load %arg2[%c5, %c0_40, %c0_41] : memref<9x8x8xf32, #tpu.memory_space<vmem>>, vector<1x8x8xf32>
    %52 = vector.shape_cast %51 : vector<1x8x8xf32> to vector<8x8xf32>
    %cst_42 = arith.constant dense<0.000000e+00> : vector<256x8xf32>
    %53 = tpu.matmul %50, %52, %cst_42 {dimension_numbers = #tpu.dot_dimension_numbers<[1], [0], [0], [1], [0, 0, 1, 1], [], []>} : vector<256x8xf32>, vector<8x8xf32>, vector<256x8xf32> -> vector<256x8xf32>
    %54 = arith.addf %48, %53 : vector<256x8xf32>
    %55 = vector.extract_strided_slice %42 {offsets = [2, 0, 0], sizes = [16, 16, 8], strides = [1, 1, 1]} : vector<18x16x8xf32> to vector<16x16x8xf32>
    %56 = vector.shape_cast %55 : vector<16x16x8xf32> to vector<256x8xf32>
    %c8 = arith.constant 8 : index
    %c0_43 = arith.constant 0 : index
    %c0_44 = arith.constant 0 : index
    %57 = vector.load %arg2[%c8, %c0_43, %c0_44] : memref<9x8x8xf32, #tpu.memory_space<vmem>>, vector<1x8x8xf32>
    %58 = vector.shape_cast %57 : vector<1x8x8xf32> to vector<8x8xf32>
    %cst_45 = arith.constant dense<0.000000e+00> : vector<256x8xf32>
    %59 = tpu.matmul %56, %58, %cst_45 {dimension_numbers = #tpu.dot_dimension_numbers<[1], [0], [0], [1], [0, 0, 1, 1], [], []>} : vector<256x8xf32>, vector<8x8xf32>, vector<256x8xf32> -> vector<256x8xf32>
    %60 = arith.addf %54, %59 : vector<256x8xf32>
    %61 = vector.extract_strided_slice %60 {offsets = [0, 0], sizes = [256, 2], strides = [1, 1]} : vector<256x8xf32> to vector<256x2xf32>
    %62 = vector.shape_cast %61 : vector<256x2xf32> to vector<16x16x2xf32>
    %63 = vector.shape_cast %62 : vector<16x16x2xf32> to vector<2x8x16x2xf32>
    %64 = vector.extract_strided_slice %63 {offsets = [0, 0, 0, 0], sizes = [2, 1, 16, 2], strides = [1, 1, 1, 1]} : vector<2x8x16x2xf32> to vector<2x1x16x2xf32>
    %65 = vector.shape_cast %64 : vector<2x1x16x2xf32> to vector<2x16x2xf32>
    %66 = vector.extract_strided_slice %63 {offsets = [0, 1, 0, 0], sizes = [2, 1, 16, 2], strides = [1, 1, 1, 1]} : vector<2x8x16x2xf32> to vector<2x1x16x2xf32>
    %67 = vector.shape_cast %66 : vector<2x1x16x2xf32> to vector<2x16x2xf32>
    %68 = arith.maximumf %65, %67 : vector<2x16x2xf32>
    %69 = vector.extract_strided_slice %63 {offsets = [0, 2, 0, 0], sizes = [2, 1, 16, 2], strides = [1, 1, 1, 1]} : vector<2x8x16x2xf32> to vector<2x1x16x2xf32>
    %70 = vector.shape_cast %69 : vector<2x1x16x2xf32> to vector<2x16x2xf32>
    %71 = arith.maximumf %68, %70 : vector<2x16x2xf32>
    %72 = vector.extract_strided_slice %63 {offsets = [0, 3, 0, 0], sizes = [2, 1, 16, 2], strides = [1, 1, 1, 1]} : vector<2x8x16x2xf32> to vector<2x1x16x2xf32>
    %73 = vector.shape_cast %72 : vector<2x1x16x2xf32> to vector<2x16x2xf32>
    %74 = arith.maximumf %71, %73 : vector<2x16x2xf32>
    %75 = vector.extract_strided_slice %63 {offsets = [0, 4, 0, 0], sizes = [2, 1, 16, 2], strides = [1, 1, 1, 1]} : vector<2x8x16x2xf32> to vector<2x1x16x2xf32>
    %76 = vector.shape_cast %75 : vector<2x1x16x2xf32> to vector<2x16x2xf32>
    %77 = arith.maximumf %74, %76 : vector<2x16x2xf32>
    %78 = vector.extract_strided_slice %63 {offsets = [0, 5, 0, 0], sizes = [2, 1, 16, 2], strides = [1, 1, 1, 1]} : vector<2x8x16x2xf32> to vector<2x1x16x2xf32>
    %79 = vector.shape_cast %78 : vector<2x1x16x2xf32> to vector<2x16x2xf32>
    %80 = arith.maximumf %77, %79 : vector<2x16x2xf32>
    %81 = vector.extract_strided_slice %63 {offsets = [0, 6, 0, 0], sizes = [2, 1, 16, 2], strides = [1, 1, 1, 1]} : vector<2x8x16x2xf32> to vector<2x1x16x2xf32>
    %82 = vector.shape_cast %81 : vector<2x1x16x2xf32> to vector<2x16x2xf32>
    %83 = arith.maximumf %80, %82 : vector<2x16x2xf32>
    %84 = vector.extract_strided_slice %63 {offsets = [0, 7, 0, 0], sizes = [2, 1, 16, 2], strides = [1, 1, 1, 1]} : vector<2x8x16x2xf32> to vector<2x1x16x2xf32>
    %85 = vector.shape_cast %84 : vector<2x1x16x2xf32> to vector<2x16x2xf32>
    %86 = arith.maximumf %83, %85 : vector<2x16x2xf32>
    %87 = vector.shape_cast %86 : vector<2x16x2xf32> to vector<2x2x8x2xf32>
    %88 = vector.extract_strided_slice %87 {offsets = [0, 0, 0, 0], sizes = [2, 2, 1, 2], strides = [1, 1, 1, 1]} : vector<2x2x8x2xf32> to vector<2x2x1x2xf32>
    %89 = vector.shape_cast %88 : vector<2x2x1x2xf32> to vector<2x2x2xf32>
    %90 = vector.extract_strided_slice %87 {offsets = [0, 0, 1, 0], sizes = [2, 2, 1, 2], strides = [1, 1, 1, 1]} : vector<2x2x8x2xf32> to vector<2x2x1x2xf32>
    %91 = vector.shape_cast %90 : vector<2x2x1x2xf32> to vector<2x2x2xf32>
    %92 = arith.maximumf %89, %91 : vector<2x2x2xf32>
    %93 = vector.extract_strided_slice %87 {offsets = [0, 0, 2, 0], sizes = [2, 2, 1, 2], strides = [1, 1, 1, 1]} : vector<2x2x8x2xf32> to vector<2x2x1x2xf32>
    %94 = vector.shape_cast %93 : vector<2x2x1x2xf32> to vector<2x2x2xf32>
    %95 = arith.maximumf %92, %94 : vector<2x2x2xf32>
    %96 = vector.extract_strided_slice %87 {offsets = [0, 0, 3, 0], sizes = [2, 2, 1, 2], strides = [1, 1, 1, 1]} : vector<2x2x8x2xf32> to vector<2x2x1x2xf32>
    %97 = vector.shape_cast %96 : vector<2x2x1x2xf32> to vector<2x2x2xf32>
    %98 = arith.maximumf %95, %97 : vector<2x2x2xf32>
    %99 = vector.extract_strided_slice %87 {offsets = [0, 0, 4, 0], sizes = [2, 2, 1, 2], strides = [1, 1, 1, 1]} : vector<2x2x8x2xf32> to vector<2x2x1x2xf32>
    %100 = vector.shape_cast %99 : vector<2x2x1x2xf32> to vector<2x2x2xf32>
    %101 = arith.maximumf %98, %100 : vector<2x2x2xf32>
    %102 = vector.extract_strided_slice %87 {offsets = [0, 0, 5, 0], sizes = [2, 2, 1, 2], strides = [1, 1, 1, 1]} : vector<2x2x8x2xf32> to vector<2x2x1x2xf32>
    %103 = vector.shape_cast %102 : vector<2x2x1x2xf32> to vector<2x2x2xf32>
    %104 = arith.maximumf %101, %103 : vector<2x2x2xf32>
    %105 = vector.extract_strided_slice %87 {offsets = [0, 0, 6, 0], sizes = [2, 2, 1, 2], strides = [1, 1, 1, 1]} : vector<2x2x8x2xf32> to vector<2x2x1x2xf32>
    %106 = vector.shape_cast %105 : vector<2x2x1x2xf32> to vector<2x2x2xf32>
    %107 = arith.maximumf %104, %106 : vector<2x2x2xf32>
    %108 = vector.extract_strided_slice %87 {offsets = [0, 0, 7, 0], sizes = [2, 2, 1, 2], strides = [1, 1, 1, 1]} : vector<2x2x8x2xf32> to vector<2x2x1x2xf32>
    %109 = vector.shape_cast %108 : vector<2x2x1x2xf32> to vector<2x2x2xf32>
    %110 = arith.maximumf %107, %109 : vector<2x2x2xf32>
    %cst_46 = arith.constant 0.000000e+00 : f32
    %111 = vector.broadcast %cst_46 : f32 to vector<4x4x2xf32>
    %c0_47 = arith.constant 0 : index
    %c0_48 = arith.constant 0 : index
    %c0_49 = arith.constant 0 : index
    %112 = vector.load %arg9[%c0_47, %c0_48, %c0_49] : memref<4x4x2xf32, #tpu.memory_space<vmem>>, vector<4x4x2xf32>
    tpu.vector_store %arg9[%c0_47, %c0_48, %c0_49], %111 {strides = array<i32>} : memref<4x4x2xf32, #tpu.memory_space<vmem>>, vector<4x4x2xf32>,
    %c1_50 = arith.constant 1 : index
    %c1_51 = arith.constant 1 : index
    %c0_52 = arith.constant 0 : index
    %113 = vector.load %arg9[%c1_50, %c1_51, %c0_52] : memref<4x4x2xf32, #tpu.memory_space<vmem>>, vector<2x2x2xf32>
    tpu.vector_store %arg9[%c1_50, %c1_51, %c0_52], %110 {strides = array<i32>} : memref<4x4x2xf32, #tpu.memory_space<vmem>>, vector<2x2x2xf32>,
    %c0_53 = arith.constant 0 : index
    %c0_54 = arith.constant 0 : index
    %c0_55 = arith.constant 0 : index
    %114 = vector.load %arg9[%c0_53, %c0_54, %c0_55] : memref<4x4x2xf32, #tpu.memory_space<vmem>>, vector<4x4x2xf32>
    %115 = vector.extract_strided_slice %114 {offsets = [0, 0, 0], sizes = [2, 2, 2], strides = [1, 1, 1]} : vector<4x4x2xf32> to vector<2x2x2xf32>
    %c0_56 = arith.constant 0 : index
    %c0_57 = arith.constant 0 : index
    %116 = vector.load %arg3[%c0_56, %c0_57] : memref<9x2xf32, #tpu.memory_space<vmem>>, vector<1x2xf32>
    %117 = vector.shape_cast %116 : vector<1x2xf32> to vector<2xf32>
    %118 = vector.shape_cast %117 : vector<2xf32> to vector<1x1x2xf32>
    %119 = vector.broadcast %118 : vector<1x1x2xf32> to vector<2x2x2xf32>
    %120 = arith.mulf %115, %119 : vector<2x2x2xf32>
    %121 = vector.extract_strided_slice %114 {offsets = [0, 1, 0], sizes = [2, 2, 2], strides = [1, 1, 1]} : vector<4x4x2xf32> to vector<2x2x2xf32>
    %c1_58 = arith.constant 1 : index
    %c0_59 = arith.constant 0 : index
    %122 = vector.load %arg3[%c1_58, %c0_59] : memref<9x2xf32, #tpu.memory_space<vmem>>, vector<1x2xf32>
    %123 = vector.shape_cast %122 : vector<1x2xf32> to vector<2xf32>
    %124 = vector.shape_cast %123 : vector<2xf32> to vector<1x1x2xf32>
    %125 = vector.broadcast %124 : vector<1x1x2xf32> to vector<2x2x2xf32>
    %126 = arith.mulf %121, %125 : vector<2x2x2xf32>
    %127 = arith.addf %120, %126 : vector<2x2x2xf32>
    %128 = vector.extract_strided_slice %114 {offsets = [0, 2, 0], sizes = [2, 2, 2], strides = [1, 1, 1]} : vector<4x4x2xf32> to vector<2x2x2xf32>
    %c2_60 = arith.constant 2 : index
    %c0_61 = arith.constant 0 : index
    %129 = vector.load %arg3[%c2_60, %c0_61] : memref<9x2xf32, #tpu.memory_space<vmem>>, vector<1x2xf32>
    %130 = vector.shape_cast %129 : vector<1x2xf32> to vector<2xf32>
    %131 = vector.shape_cast %130 : vector<2xf32> to vector<1x1x2xf32>
    %132 = vector.broadcast %131 : vector<1x1x2xf32> to vector<2x2x2xf32>
    %133 = arith.mulf %128, %132 : vector<2x2x2xf32>
    %134 = arith.addf %127, %133 : vector<2x2x2xf32>
    %135 = vector.extract_strided_slice %114 {offsets = [1, 0, 0], sizes = [2, 2, 2], strides = [1, 1, 1]} : vector<4x4x2xf32> to vector<2x2x2xf32>
    %c3_62 = arith.constant 3 : index
    %c0_63 = arith.constant 0 : index
    %136 = vector.load %arg3[%c3_62, %c0_63] : memref<9x2xf32, #tpu.memory_space<vmem>>, vector<1x2xf32>
    %137 = vector.shape_cast %136 : vector<1x2xf32> to vector<2xf32>
    %138 = vector.shape_cast %137 : vector<2xf32> to vector<1x1x2xf32>
    %139 = vector.broadcast %138 : vector<1x1x2xf32> to vector<2x2x2xf32>
    %140 = arith.mulf %135, %139 : vector<2x2x2xf32>
    %141 = arith.addf %134, %140 : vector<2x2x2xf32>
    %142 = vector.extract_strided_slice %114 {offsets = [1, 1, 0], sizes = [2, 2, 2], strides = [1, 1, 1]} : vector<4x4x2xf32> to vector<2x2x2xf32>
    %c4_64 = arith.constant 4 : index
    %c0_65 = arith.constant 0 : index
    %143 = vector.load %arg3[%c4_64, %c0_65] : memref<9x2xf32, #tpu.memory_space<vmem>>, vector<1x2xf32>
    %144 = vector.shape_cast %143 : vector<1x2xf32> to vector<2xf32>
    %145 = vector.shape_cast %144 : vector<2xf32> to vector<1x1x2xf32>
    %146 = vector.broadcast %145 : vector<1x1x2xf32> to vector<2x2x2xf32>
    %147 = arith.mulf %142, %146 : vector<2x2x2xf32>
    %148 = arith.addf %141, %147 : vector<2x2x2xf32>
    %149 = vector.extract_strided_slice %114 {offsets = [1, 2, 0], sizes = [2, 2, 2], strides = [1, 1, 1]} : vector<4x4x2xf32> to vector<2x2x2xf32>
    %c5_66 = arith.constant 5 : index
    %c0_67 = arith.constant 0 : index
    %150 = vector.load %arg3[%c5_66, %c0_67] : memref<9x2xf32, #tpu.memory_space<vmem>>, vector<1x2xf32>
    %151 = vector.shape_cast %150 : vector<1x2xf32> to vector<2xf32>
    %152 = vector.shape_cast %151 : vector<2xf32> to vector<1x1x2xf32>
    %153 = vector.broadcast %152 : vector<1x1x2xf32> to vector<2x2x2xf32>
    %154 = arith.mulf %149, %153 : vector<2x2x2xf32>
    %155 = arith.addf %148, %154 : vector<2x2x2xf32>
    %156 = vector.extract_strided_slice %114 {offsets = [2, 0, 0], sizes = [2, 2, 2], strides = [1, 1, 1]} : vector<4x4x2xf32> to vector<2x2x2xf32>
    %c6_68 = arith.constant 6 : index
    %c0_69 = arith.constant 0 : index
    %157 = vector.load %arg3[%c6_68, %c0_69] : memref<9x2xf32, #tpu.memory_space<vmem>>, vector<1x2xf32>
    %158 = vector.shape_cast %157 : vector<1x2xf32> to vector<2xf32>
    %159 = vector.shape_cast %158 : vector<2xf32> to vector<1x1x2xf32>
    %160 = vector.broadcast %159 : vector<1x1x2xf32> to vector<2x2x2xf32>
    %161 = arith.mulf %156, %160 : vector<2x2x2xf32>
    %162 = arith.addf %155, %161 : vector<2x2x2xf32>
    %163 = vector.extract_strided_slice %114 {offsets = [2, 1, 0], sizes = [2, 2, 2], strides = [1, 1, 1]} : vector<4x4x2xf32> to vector<2x2x2xf32>
    %c7_70 = arith.constant 7 : index
    %c0_71 = arith.constant 0 : index
    %164 = vector.load %arg3[%c7_70, %c0_71] : memref<9x2xf32, #tpu.memory_space<vmem>>, vector<1x2xf32>
    %165 = vector.shape_cast %164 : vector<1x2xf32> to vector<2xf32>
    %166 = vector.shape_cast %165 : vector<2xf32> to vector<1x1x2xf32>
    %167 = vector.broadcast %166 : vector<1x1x2xf32> to vector<2x2x2xf32>
    %168 = arith.mulf %163, %167 : vector<2x2x2xf32>
    %169 = arith.addf %162, %168 : vector<2x2x2xf32>
    %170 = vector.extract_strided_slice %114 {offsets = [2, 2, 0], sizes = [2, 2, 2], strides = [1, 1, 1]} : vector<4x4x2xf32> to vector<2x2x2xf32>
    %c8_72 = arith.constant 8 : index
    %c0_73 = arith.constant 0 : index
    %171 = vector.load %arg3[%c8_72, %c0_73] : memref<9x2xf32, #tpu.memory_space<vmem>>, vector<1x2xf32>
    %172 = vector.shape_cast %171 : vector<1x2xf32> to vector<2xf32>
    %173 = vector.shape_cast %172 : vector<2xf32> to vector<1x1x2xf32>
    %174 = vector.broadcast %173 : vector<1x1x2xf32> to vector<2x2x2xf32>
    %175 = arith.mulf %170, %174 : vector<2x2x2xf32>
    %176 = arith.addf %169, %175 : vector<2x2x2xf32>
    %c0_74 = arith.constant 0 : index
    %c0_75 = arith.constant 0 : index
    %177 = vector.load %arg4[%c0_74, %c0_75] : memref<256x4xf32, #tpu.memory_space<vmem>>, vector<256x4xf32>
    %178 = vector.shape_cast %176 : vector<2x2x2xf32> to vector<4x2xf32>
    %cst_76 = arith.constant dense<0.000000e+00> : vector<256x2xf32>
    %179 = tpu.matmul %177, %178, %cst_76 {dimension_numbers = #tpu.dot_dimension_numbers<[1], [0], [0], [1], [0, 0, 1, 1], [], []>} : vector<256x4xf32>, vector<4x2xf32>, vector<256x2xf32> -> vector<256x2xf32>
    %cst_77 = arith.constant 5.000000e-01 : f32
    %180 = vector.broadcast %cst_77 : f32 to vector<256x2xf32>
    %181 = arith.mulf %180, %179 : vector<256x2xf32>
    %cst_78 = arith.constant 0.707106769 : f32
    %182 = vector.broadcast %cst_78 : f32 to vector<256x2xf32>
    %183 = arith.mulf %179, %182 : vector<256x2xf32>
    %cst_79 = arith.constant 0.000000e+00 : f32
    %184 = vector.broadcast %cst_79 : f32 to vector<256x2xf32>
    %185 = arith.cmpf oge, %183, %184 : vector<256x2xf32>
    %cst_80 = arith.constant 1.000000e+00 : f32
    %cst_81 = arith.constant -1.000000e+00 : f32
    %186 = vector.broadcast %cst_80 : f32 to vector<256x2xf32>
    %187 = vector.broadcast %cst_81 : f32 to vector<256x2xf32>
    %188 = arith.select %185, %186, %187 : vector<256x2xi1>, vector<256x2xf32>
    %189 = math.absf %183 : vector<256x2xf32>
    %cst_82 = arith.constant 0.327591091 : f32
    %190 = vector.broadcast %cst_82 : f32 to vector<256x2xf32>
    %191 = arith.mulf %190, %189 : vector<256x2xf32>
    %cst_83 = arith.constant 1.000000e+00 : f32
    %192 = vector.broadcast %cst_83 : f32 to vector<256x2xf32>
    %193 = arith.addf %192, %191 : vector<256x2xf32>
    %194 = tpu.reciprocal %193 {approx = true} : vector<256x2xf32> -> vector<256x2xf32>
    %195 = arith.mulf %193, %194 : vector<256x2xf32>
    %cst_84 = arith.constant 2.000000e+00 : f32
    %196 = vector.broadcast %cst_84 : f32 to vector<256x2xf32>
    %197 = arith.subf %196, %195 : vector<256x2xf32>
    %198 = arith.mulf %194, %197 : vector<256x2xf32>
    %cst_85 = arith.constant 1.06140542 : f32
    %199 = vector.broadcast %cst_85 : f32 to vector<256x2xf32>
    %200 = arith.mulf %199, %198 : vector<256x2xf32>
    %cst_86 = arith.constant -1.45315206 : f32
    %201 = vector.broadcast %cst_86 : f32 to vector<256x2xf32>
    %202 = arith.addf %200, %201 : vector<256x2xf32>
    %203 = arith.mulf %202, %198 : vector<256x2xf32>
    %cst_87 = arith.constant 1.42141378 : f32
    %204 = vector.broadcast %cst_87 : f32 to vector<256x2xf32>
    %205 = arith.addf %203, %204 : vector<256x2xf32>
    %206 = arith.mulf %205, %198 : vector<256x2xf32>
    %cst_88 = arith.constant -0.284496725 : f32
    %207 = vector.broadcast %cst_88 : f32 to vector<256x2xf32>
    %208 = arith.addf %206, %207 : vector<256x2xf32>
    %209 = arith.mulf %208, %198 : vector<256x2xf32>
    %cst_89 = arith.constant 0.254829586 : f32
    %210 = vector.broadcast %cst_89 : f32 to vector<256x2xf32>
    %211 = arith.addf %209, %210 : vector<256x2xf32>
    %212 = arith.mulf %211, %198 : vector<256x2xf32>
    %cst_90 = arith.constant 0.000000e+00 : f32
    %213 = vector.broadcast %cst_90 : f32 to vector<256x2xf32>
    %214 = arith.subf %213, %189 : vector<256x2xf32>
    %215 = arith.mulf %214, %189 : vector<256x2xf32>
    %216 = math.exp %215 : vector<256x2xf32>
    %217 = arith.mulf %212, %216 : vector<256x2xf32>
    %cst_91 = arith.constant 1.000000e+00 : f32
    %218 = vector.broadcast %cst_91 : f32 to vector<256x2xf32>
    %219 = arith.subf %218, %217 : vector<256x2xf32>
    %220 = arith.mulf %188, %219 : vector<256x2xf32>
    %cst_92 = arith.constant 1.000000e+00 : f32
    %221 = vector.broadcast %cst_92 : f32 to vector<256x2xf32>
    %222 = arith.addf %221, %220 : vector<256x2xf32>
    %223 = arith.mulf %181, %222 : vector<256x2xf32>
    %224 = arith.mulf %223, %61 : vector<256x2xf32>
    %cst_93 = arith.constant 5.000000e-01 : f32
    %225 = vector.broadcast %cst_93 : f32 to vector<256x8xf32>
    %226 = arith.mulf %225, %60 : vector<256x8xf32>
    %cst_94 = arith.constant 0.707106769 : f32
    %227 = vector.broadcast %cst_94 : f32 to vector<256x8xf32>
    %228 = arith.mulf %60, %227 : vector<256x8xf32>
    %cst_95 = arith.constant 0.000000e+00 : f32
    %229 = vector.broadcast %cst_95 : f32 to vector<256x8xf32>
    %230 = arith.cmpf oge, %228, %229 : vector<256x8xf32>
    %cst_96 = arith.constant 1.000000e+00 : f32
    %cst_97 = arith.constant -1.000000e+00 : f32
    %231 = vector.broadcast %cst_96 : f32 to vector<256x8xf32>
    %232 = vector.broadcast %cst_97 : f32 to vector<256x8xf32>
    %233 = arith.select %230, %231, %232 : vector<256x8xi1>, vector<256x8xf32>
    %234 = math.absf %228 : vector<256x8xf32>
    %cst_98 = arith.constant 0.327591091 : f32
    %235 = vector.broadcast %cst_98 : f32 to vector<256x8xf32>
    %236 = arith.mulf %235, %234 : vector<256x8xf32>
    %cst_99 = arith.constant 1.000000e+00 : f32
    %237 = vector.broadcast %cst_99 : f32 to vector<256x8xf32>
    %238 = arith.addf %237, %236 : vector<256x8xf32>
    %239 = tpu.reciprocal %238 {approx = true} : vector<256x8xf32> -> vector<256x8xf32>
    %240 = arith.mulf %238, %239 : vector<256x8xf32>
    %cst_100 = arith.constant 2.000000e+00 : f32
    %241 = vector.broadcast %cst_100 : f32 to vector<256x8xf32>
    %242 = arith.subf %241, %240 : vector<256x8xf32>
    %243 = arith.mulf %239, %242 : vector<256x8xf32>
    %cst_101 = arith.constant 1.06140542 : f32
    %244 = vector.broadcast %cst_101 : f32 to vector<256x8xf32>
    %245 = arith.mulf %244, %243 : vector<256x8xf32>
    %cst_102 = arith.constant -1.45315206 : f32
    %246 = vector.broadcast %cst_102 : f32 to vector<256x8xf32>
    %247 = arith.addf %245, %246 : vector<256x8xf32>
    %248 = arith.mulf %247, %243 : vector<256x8xf32>
    %cst_103 = arith.constant 1.42141378 : f32
    %249 = vector.broadcast %cst_103 : f32 to vector<256x8xf32>
    %250 = arith.addf %248, %249 : vector<256x8xf32>
    %251 = arith.mulf %250, %243 : vector<256x8xf32>
    %cst_104 = arith.constant -0.284496725 : f32
    %252 = vector.broadcast %cst_104 : f32 to vector<256x8xf32>
    %253 = arith.addf %251, %252 : vector<256x8xf32>
    %254 = arith.mulf %253, %243 : vector<256x8xf32>
    %cst_105 = arith.constant 0.254829586 : f32
    %255 = vector.broadcast %cst_105 : f32 to vector<256x8xf32>
    %256 = arith.addf %254, %255 : vector<256x8xf32>
    %257 = arith.mulf %256, %243 : vector<256x8xf32>
    %cst_106 = arith.constant 0.000000e+00 : f32
    %258 = vector.broadcast %cst_106 : f32 to vector<256x8xf32>
    %259 = arith.subf %258, %234 : vector<256x8xf32>
    %260 = arith.mulf %259, %234 : vector<256x8xf32>
    %261 = math.exp %260 : vector<256x8xf32>
    %262 = arith.mulf %257, %261 : vector<256x8xf32>
    %cst_107 = arith.constant 1.000000e+00 : f32
    %263 = vector.broadcast %cst_107 : f32 to vector<256x8xf32>
    %264 = arith.subf %263, %262 : vector<256x8xf32>
    %265 = arith.mulf %233, %264 : vector<256x8xf32>
    %cst_108 = arith.constant 1.000000e+00 : f32
    %266 = vector.broadcast %cst_108 : f32 to vector<256x8xf32>
    %267 = arith.addf %266, %265 : vector<256x8xf32>
    %268 = arith.mulf %226, %267 : vector<256x8xf32>
    %c0_109 = arith.constant 0 : index
    %c0_110 = arith.constant 0 : index
    %269 = vector.load %arg5[%c0_109, %c0_110] : memref<8x8xf32, #tpu.memory_space<vmem>>, vector<8x8xf32>
    %cst_111 = arith.constant dense<0.000000e+00> : vector<256x8xf32>
    %270 = tpu.matmul %268, %269, %cst_111 {dimension_numbers = #tpu.dot_dimension_numbers<[1], [0], [0], [1], [0, 0, 1, 1], [], []>} : vector<256x8xf32>, vector<8x8xf32>, vector<256x8xf32> -> vector<256x8xf32>
    %cst_112 = arith.constant 5.000000e-01 : f32
    %271 = vector.broadcast %cst_112 : f32 to vector<256x2xf32>
    %272 = arith.mulf %271, %224 : vector<256x2xf32>
    %cst_113 = arith.constant 0.707106769 : f32
    %273 = vector.broadcast %cst_113 : f32 to vector<256x2xf32>
    %274 = arith.mulf %224, %273 : vector<256x2xf32>
    %cst_114 = arith.constant 0.000000e+00 : f32
    %275 = vector.broadcast %cst_114 : f32 to vector<256x2xf32>
    %276 = arith.cmpf oge, %274, %275 : vector<256x2xf32>
    %cst_115 = arith.constant 1.000000e+00 : f32
    %cst_116 = arith.constant -1.000000e+00 : f32
    %277 = vector.broadcast %cst_115 : f32 to vector<256x2xf32>
    %278 = vector.broadcast %cst_116 : f32 to vector<256x2xf32>
    %279 = arith.select %276, %277, %278 : vector<256x2xi1>, vector<256x2xf32>
    %280 = math.absf %274 : vector<256x2xf32>
    %cst_117 = arith.constant 0.327591091 : f32
    %281 = vector.broadcast %cst_117 : f32 to vector<256x2xf32>
    %282 = arith.mulf %281, %280 : vector<256x2xf32>
    %cst_118 = arith.constant 1.000000e+00 : f32
    %283 = vector.broadcast %cst_118 : f32 to vector<256x2xf32>
    %284 = arith.addf %283, %282 : vector<256x2xf32>
    %285 = tpu.reciprocal %284 {approx = true} : vector<256x2xf32> -> vector<256x2xf32>
    %286 = arith.mulf %284, %285 : vector<256x2xf32>
    %cst_119 = arith.constant 2.000000e+00 : f32
    %287 = vector.broadcast %cst_119 : f32 to vector<256x2xf32>
    %288 = arith.subf %287, %286 : vector<256x2xf32>
    %289 = arith.mulf %285, %288 : vector<256x2xf32>
    %cst_120 = arith.constant 1.06140542 : f32
    %290 = vector.broadcast %cst_120 : f32 to vector<256x2xf32>
    %291 = arith.mulf %290, %289 : vector<256x2xf32>
    %cst_121 = arith.constant -1.45315206 : f32
    %292 = vector.broadcast %cst_121 : f32 to vector<256x2xf32>
    %293 = arith.addf %291, %292 : vector<256x2xf32>
    %294 = arith.mulf %293, %289 : vector<256x2xf32>
    %cst_122 = arith.constant 1.42141378 : f32
    %295 = vector.broadcast %cst_122 : f32 to vector<256x2xf32>
    %296 = arith.addf %294, %295 : vector<256x2xf32>
    %297 = arith.mulf %296, %289 : vector<256x2xf32>
    %cst_123 = arith.constant -0.284496725 : f32
    %298 = vector.broadcast %cst_123 : f32 to vector<256x2xf32>
    %299 = arith.addf %297, %298 : vector<256x2xf32>
    %300 = arith.mulf %299, %289 : vector<256x2xf32>
    %cst_124 = arith.constant 0.254829586 : f32
    %301 = vector.broadcast %cst_124 : f32 to vector<256x2xf32>
    %302 = arith.addf %300, %301 : vector<256x2xf32>
    %303 = arith.mulf %302, %289 : vector<256x2xf32>
    %cst_125 = arith.constant 0.000000e+00 : f32
    %304 = vector.broadcast %cst_125 : f32 to vector<256x2xf32>
    %305 = arith.subf %304, %280 : vector<256x2xf32>
    %306 = arith.mulf %305, %280 : vector<256x2xf32>
    %307 = math.exp %306 : vector<256x2xf32>
    %308 = arith.mulf %303, %307 : vector<256x2xf32>
    %cst_126 = arith.constant 1.000000e+00 : f32
    %309 = vector.broadcast %cst_126 : f32 to vector<256x2xf32>
    %310 = arith.subf %309, %308 : vector<256x2xf32>
    %311 = arith.mulf %279, %310 : vector<256x2xf32>
    %cst_127 = arith.constant 1.000000e+00 : f32
    %312 = vector.broadcast %cst_127 : f32 to vector<256x2xf32>
    %313 = arith.addf %312, %311 : vector<256x2xf32>
    %314 = arith.mulf %272, %313 : vector<256x2xf32>
    %c0_128 = arith.constant 0 : index
    %c0_129 = arith.constant 0 : index
    %315 = vector.load %arg6[%c0_128, %c0_129] : memref<2x8xf32, #tpu.memory_space<vmem>>, vector<2x8xf32>
    %cst_130 = arith.constant dense<0.000000e+00> : vector<256x8xf32>
    %316 = tpu.matmul %314, %315, %cst_130 {dimension_numbers = #tpu.dot_dimension_numbers<[1], [0], [0], [1], [0, 0, 1, 1], [], []>} : vector<256x2xf32>, vector<2x8xf32>, vector<256x8xf32> -> vector<256x8xf32>
    %317 = arith.addf %270, %316 : vector<256x8xf32>
    %318 = vector.shape_cast %317 : vector<256x8xf32> to vector<16x16x8xf32>
    %c0_131 = arith.constant 0 : index
    %c0_132 = arith.constant 0 : index
    %c0_133 = arith.constant 0 : index
    %c0_134 = arith.constant 0 : index
    %319 = vector.load %arg7[%c0_131, %c0_132, %c0_133, %c0_134] : memref<1x16x16x8xf32, #tpu.memory_space<vmem>>, vector<1x16x16x8xf32>
    %320 = vector.shape_cast %319 : vector<1x16x16x8xf32> to vector<16x16x8xf32>
    %321 = vector.shape_cast %318 : vector<16x16x8xf32> to vector<1x16x16x8xf32>
    tpu.vector_store %arg7[%c0_131, %c0_132, %c0_133, %c0_134], %321 {strides = array<i32>} : memref<1x16x16x8xf32, #tpu.memory_space<vmem>>, vector<1x16x16x8xf32>,
    return
  }
  func.func @transform_0(%arg0: i32) -> (i32, i32, i32, i32) {
    %c0_i32 = arith.constant 0 : i32
    %c0_i32_0 = arith.constant 0 : i32
    %c0_i32_1 = arith.constant 0 : i32
    %c0_i32_2 = arith.constant 0 : i32
    return %arg0, %c0_i32, %c0_i32_0, %c0_i32_1 : i32, i32, i32, i32
  }
  func.func @transform_1(%arg0: i32) -> (i32, i32, i32) {
    %c0_i32 = arith.constant 0 : i32
    %c0_i32_0 = arith.constant 0 : i32
    %c0_i32_1 = arith.constant 0 : i32
    %c0_i32_2 = arith.constant 0 : i32
    return %c0_i32, %c0_i32_0, %c0_i32_1 : i32, i32, i32
  }
  func.func @transform_2(%arg0: i32) -> (i32, i32) {
    %c0_i32 = arith.constant 0 : i32
    %c0_i32_0 = arith.constant 0 : i32
    %c0_i32_1 = arith.constant 0 : i32
    return %c0_i32, %c0_i32_0 : i32, i32
  }
  func.func @transform_3(%arg0: i32) -> (i32, i32) {
    %c0_i32 = arith.constant 0 : i32
    %c0_i32_0 = arith.constant 0 : i32
    %c0_i32_1 = arith.constant 0 : i32
    return %c0_i32, %c0_i32_0 : i32, i32
  }
  func.func @transform_4(%arg0: i32) -> (i32, i32) {
    %c0_i32 = arith.constant 0 : i32
    %c0_i32_0 = arith.constant 0 : i32
    %c0_i32_1 = arith.constant 0 : i32
    return %c0_i32, %c0_i32_0 : i32, i32
  }
  func.func @transform_5(%arg0: i32) -> (i32, i32) {
    %c0_i32 = arith.constant 0 : i32
    %c0_i32_0 = arith.constant 0 : i32
    %c0_i32_1 = arith.constant 0 : i32
    return %c0_i32, %c0_i32_0 : i32, i32
  }
  func.func @transform_6(%arg0: i32) -> (i32, i32, i32, i32) {
    %c0_i32 = arith.constant 0 : i32
    %c0_i32_0 = arith.constant 0 : i32
    %c0_i32_1 = arith.constant 0 : i32
    %c0_i32_2 = arith.constant 0 : i32
    return %arg0, %c0_i32, %c0_i32_0, %c0_i32_1 : i32, i32, i32, i32
  }
}

</mosaic_0001>

<bundles_post_ra>
// kernel: tpu_custom_call.1
= control target key start
LH: loop header
LB: loop body
LE: loop exit
PB: predicated region body
PF: predicated region fallthrough
CT: control target
= control target key end

     0   :  { %s9386_s21 = smov 0   ;;  %s13692_s0 = inlined_call_operand.vmem [shape: f32[2,16,16,8], index: 0, kind: input, shape index: {}]   ;;  %s13693_s1 = inlined_call_operand.vmem [shape: f32[9,8,8], index: 1, kind: input, shape index: {}]   ;;  %s13694_s2 = inlined_call_operand.vmem [shape: f32[9,2], index: 2, kind: input, shape index: {}]   ;;  %s13695_s3 = inlined_call_operand.vmem [shape: f32[256,4], index: 3, kind: input, shape index: {}]   ;;  %s13696_s4 = inlined_call_operand.vmem [shape: f32[8,8], index: 4, kind: input, shape index: {}]   ;;  %s13697_s5 = inlined_call_operand.vmem [shape: f32[2,8], index: 5, kind: input, shape index: {}]   ;;  %s13698_s6 = inlined_call_operand.vmem [shape: f32[2,16,16,8], index: 6, kind: output, shape index: {}]  }
   0x1 LB: > { %s7245_s22 = sadd.s32 4294967295, %s9346_s21   ;;  %p7249_p0 = scmp.ge.s32.totalorder %s9346_s21, 1  ;;  %s9346_s21 = sphi %s9386_s21, %s16_s21  }
   0x2   : > { %p212_p1 = scmp.lt.s32.totalorder %s9346_s21, 3 }
   0x4   : > { %p213_p2 = pnand %p7249_p0, %p212_p1 }
   0x6   : > { %216 = sbr.rel (%p213_p2) target bundleno = 1672 (0x688), region = 44 }
   0xd   : > { %v7352_v0 = vld [vmem:[%s13693_s1 + $0x8] sm:$0xff]  ;;  %vm252_vm0 = vcmask 64512   ;;  %vm255_vm1 = vcmask 58368   ;;  %p9399_p3 = scmp.lt.s32.totalorder %s7245_s22, 1  ;;  %v7254_v1 = vld [vmem:[%s13693_s1 + $0x18] sm:$0xff]  ;;  %v13699_v2 = vmov 0.0  }
   0xe   : > { %8207 = vmatprep.subr.mxu0 %v7352_v0  ;;  %253 = vst.msk [vmem:[#allocation2] sm:$0xff] %vm252_vm0, %v13699_v2  ;;  %254 = vst.msk [vmem:[#allocation2 + $0x8] sm:$0xff] %vm252_vm0, %v13699_v2  ;;  %8057 = vmatprep.subr.mxu1 %v7254_v1  ;;  %v7385_v3 = vld [vmem:[%s13693_s1 + $0x20] sm:$0xff]  ;;  %v9693_v63 = vld [vmem:[%s13693_s1 + $0x38] sm:$0xff]  ;;  %vm3187_vm2 = vcmask 11264   ;;  %vm3197_vm3 = vcmask 1041409  }
   0xf   : > { %257 = vst.msk [vmem:[#allocation2 + $0x18] sm:$0xff] %vm252_vm0, %v13699_v2  ;;  %258 = vst.msk [vmem:[#allocation2 + $0x20] sm:$0xff] %vm252_vm0, %v13699_v2  ;;  %8208 = vmatpush3.msra.mxu0 %v7352_v0  ;;  %s14353_s22 = smov (!%p9399_p3, %s7245_s22), 1  ;;  %8058 = vmatpush3.msra.mxu1 %v7254_v1  ;;  %v409_v61 = vld [vmem:[%s13693_s1] sm:$0xff]  ;;  %vm3204_vm4 = vcmask 9216   ;;  %vm3368_vm5 = vcmask 31744  }
  0x10   : > { %260 = vst.msk [vmem:[#allocation2 + $0x30] sm:$0xff] %vm252_vm0, %v13699_v2  ;;  %261 = vst.msk [vmem:[#allocation2 + $0x38] sm:$0xff] %vm252_vm0, %v13699_v2  ;;  %8257 = vmatprep.subr.mxu0 %v7385_v3  ;;  %s7659_s30 = sshll.u32 %s14353_s22, 8  ;;  %8107 = vmatprep.subr.mxu1 %v409_v61  ;;  %vm3465_vm6 = vcmask 1043456  }
  0x11   : > { %263 = vst.msk [vmem:[#allocation2 + $0x48] sm:$0xff] %vm252_vm0, %v13699_v2  ;;  %264 = vst.msk [vmem:[#allocation2 + $0x50] sm:$0xff] %vm252_vm0, %v13699_v2  ;;  %s9529_s9 = scalar_lea.vmem %s13692_s0, %s7659_s30  ;;  %s13623_s28 = scalar_lea.vmem %s13698_s6, %s7659_s30 }
  0x12   : > { %266 = vst.msk [vmem:[#allocation2 + $0x60] sm:$0xff] %vm252_vm0, %v13699_v2  ;;  %267 = vst.msk [vmem:[#allocation2 + $0x68] sm:$0xff] %vm252_vm0, %v13699_v2  ;;  %v308_v4 = vld [vmem:[%s9529_s9] sm:$0xff]  ;;  %v309_v5 = vld [vmem:[%s9529_s9 + $0x8] sm:$0xff] }
  0x13   : > { %269 = vst.msk [vmem:[#allocation2 + $0x78] sm:$0xff] %vm252_vm0, %v13699_v2  ;;  %270 = vst.msk [vmem:[#allocation2 + $0x80] sm:$0xff] %vm252_vm0, %v13699_v2  ;;  %v310_v6 = vld [vmem:[%s9529_s9 + $0x10] sm:$0xff]  ;;  %v311_v7 = vld [vmem:[%s9529_s9 + $0x18] sm:$0xff] }
  0x14   : > { %272 = vst.msk [vmem:[#allocation2 + $0x90] sm:$0xff] %vm252_vm0, %v13699_v2  ;;  %273 = vst.msk [vmem:[#allocation2 + $0x98] sm:$0xff] %vm252_vm0, %v13699_v2  ;;  %v312_v8 = vld [vmem:[%s9529_s9 + $0x20] sm:$0xff]  ;;  %v313_v9 = vld [vmem:[%s9529_s9 + $0x28] sm:$0xff] }
  0x15   : > { %275 = vst.msk [vmem:[#allocation2 + $0xa8] sm:$0xff] %vm252_vm0, %v13699_v2  ;;  %276 = vst.msk [vmem:[#allocation2 + $0xb0] sm:$0xff] %vm252_vm0, %v13699_v2  ;;  %v1229_v10 = vld [vmem:[#allocation2 + $0x1] sm:$0xff]  ;;  %v314_v12 = vld [vmem:[%s9529_s9 + $0x30] sm:$0xff] }
  0x16   : > { %278 = vst.msk [vmem:[#allocation2 + $0xc0] sm:$0xff] %vm252_vm0, %v13699_v2  ;;  %279 = vst.msk [vmem:[#allocation2 + $0xc8] sm:$0xff] %vm252_vm0, %v13699_v2  ;;  %8209 = vmatprep.mubr.msk.f32.mxu0 %vm252_vm0, %v1229_v10  ;;  %v315_v13 = vld [vmem:[%s9529_s9 + $0x38] sm:$0xff]  ;;  %v316_v14 = vld [vmem:[%s9529_s9 + $0x40] sm:$0xff] }
  0x17   : > { %281 = vst.msk [vmem:[#allocation2 + $0xd8] sm:$0xff] %vm252_vm0, %v13699_v2  ;;  %282 = vst.msk [vmem:[#allocation2 + $0xe0] sm:$0xff] %vm252_vm0, %v13699_v2  ;;  %v317_v15 = vld [vmem:[%s9529_s9 + $0x48] sm:$0xff]  ;;  %v318_v16 = vld [vmem:[%s9529_s9 + $0x50] sm:$0xff] }
  0x18   : > { %284 = vst.msk [vmem:[#allocation2 + $0xf0] sm:$0xff] %vm252_vm0, %v13699_v2  ;;  %285 = vst.msk [vmem:[#allocation2 + $0xf8] sm:$0xff] %vm252_vm0, %v13699_v2  ;;  %v319_v17 = vld [vmem:[%s9529_s9 + $0x58] sm:$0xff]  ;;  %v320_v18 = vld [vmem:[%s9529_s9 + $0x60] sm:$0xff] }
  0x19   : > { %287 = vst.msk [vmem:[#allocation2 + $0x108] sm:$0xff] %vm252_vm0, %v13699_v2  ;;  %288 = vst.msk [vmem:[#allocation2 + $0x110] sm:$0xff] %vm252_vm0, %v13699_v2  ;;  %v321_v19 = vld [vmem:[%s9529_s9 + $0x68] sm:$0xff]  ;;  %v322_v20 = vld [vmem:[%s9529_s9 + $0x70] sm:$0xff] }
  0x1a   : > { %290 = vst.msk [vmem:[#allocation2 + $0x120] sm:$0xff] %vm252_vm0, %v13699_v2  ;;  %291 = vst.msk [vmem:[#allocation2 + $0x128] sm:$0xff] %vm252_vm0, %v13699_v2  ;;  %v323_v21 = vld [vmem:[%s9529_s9 + $0x78] sm:$0xff]  ;;  %v324_v22 = vld [vmem:[%s9529_s9 + $0x80] sm:$0xff] }
  0x1b   : > { %293 = vst.msk [vmem:[#allocation2 + $0x138] sm:$0xff] %vm252_vm0, %v13699_v2  ;;  %294 = vst.msk [vmem:[#allocation2 + $0x140] sm:$0xff] %vm252_vm0, %v13699_v2  ;;  %v325_v23 = vld [vmem:[%s9529_s9 + $0x88] sm:$0xff]  ;;  %v326_v24 = vld [vmem:[%s9529_s9 + $0x90] sm:$0xff] }
  0x1c   : > { %296 = vst.msk [vmem:[#allocation2 + $0x150] sm:$0xff] %vm252_vm0, %v13699_v2  ;;  %297 = vst.msk [vmem:[#allocation2 + $0x158] sm:$0xff] %vm252_vm0, %v13699_v2  ;;  %v327_v25 = vld [vmem:[%s9529_s9 + $0x98] sm:$0xff]  ;;  %v328_v26 = vld [vmem:[%s9529_s9 + $0xa0] sm:$0xff] }
  0x1d   : > { %299 = vst.msk [vmem:[#allocation2 + $0x168] sm:$0xff] %vm252_vm0, %v13699_v2  ;;  %300 = vst.msk [vmem:[#allocation2 + $0x170] sm:$0xff] %vm252_vm0, %v13699_v2  ;;  %v329_v27 = vld [vmem:[%s9529_s9 + $0xa8] sm:$0xff]  ;;  %v330_v31 = vld [vmem:[%s9529_s9 + $0xb0] sm:$0xff] }
  0x1e   : > { %302 = vst.msk [vmem:[#allocation2 + $0x180] sm:$0xff] %vm252_vm0, %v13699_v2  ;;  %303 = vst.msk [vmem:[#allocation2 + $0x188] sm:$0xff] %vm252_vm0, %v13699_v2  ;;  %v331_v32 = vld [vmem:[%s9529_s9 + $0xb8] sm:$0xff]  ;;  %v332_v37 = vld [vmem:[%s9529_s9 + $0xc0] sm:$0xff] }
  0x1f   : > { %305 = vst.msk [vmem:[#allocation2 + $0x198] sm:$0xff] %vm252_vm0, %v13699_v2  ;;  %306 = vst.msk [vmem:[#allocation2 + $0x1a0] sm:$0xff] %vm252_vm0, %v13699_v2  ;;  %v333_v38 = vld [vmem:[%s9529_s9 + $0xc8] sm:$0xff]  ;;  %v334_v39 = vld [vmem:[%s9529_s9 + $0xd0] sm:$0xff] }
  0x20   : > { %256 = vst.msk [vmem:[#allocation2 + $0x10] sm:$0x3] %vm255_vm1, %v13699_v2  ;;  %259 = vst.msk [vmem:[#allocation2 + $0x28] sm:$0x3] %vm255_vm1, %v13699_v2  ;;  %v335_v40 = vld [vmem:[%s9529_s9 + $0xd8] sm:$0xff]  ;;  %v336_v41 = vld [vmem:[%s9529_s9 + $0xe0] sm:$0xff] }
  0x21   : > { %262 = vst.msk [vmem:[#allocation2 + $0x40] sm:$0x3] %vm255_vm1, %v13699_v2  ;;  %265 = vst.msk [vmem:[#allocation2 + $0x58] sm:$0x3] %vm255_vm1, %v13699_v2  ;;  %v337_v42 = vld [vmem:[%s9529_s9 + $0xe8] sm:$0xff]  ;;  %v338_v58 = vld [vmem:[%s9529_s9 + $0xf0] sm:$0xff] }
  0x22   : > { %268 = vst.msk [vmem:[#allocation2 + $0x70] sm:$0x3] %vm255_vm1, %v13699_v2  ;;  %271 = vst.msk [vmem:[#allocation2 + $0x88] sm:$0x3] %vm255_vm1, %v13699_v2  ;;  %v339_v60 = vld [vmem:[%s9529_s9 + $0xf8] sm:$0xff] }
  0x23   : > { %274 = vst.msk [vmem:[#allocation2 + $0xa0] sm:$0x3] %vm255_vm1, %v13699_v2  ;;  %277 = vst.msk [vmem:[#allocation2 + $0xb8] sm:$0x3] %vm255_vm1, %v13699_v2 }
  0x24   : > { %280 = vst.msk [vmem:[#allocation2 + $0xd0] sm:$0x3] %vm255_vm1, %v13699_v2  ;;  %283 = vst.msk [vmem:[#allocation2 + $0xe8] sm:$0x3] %vm255_vm1, %v13699_v2 }
  0x25   : > { %286 = vst.msk [vmem:[#allocation2 + $0x100] sm:$0x3] %vm255_vm1, %v13699_v2  ;;  %289 = vst.msk [vmem:[#allocation2 + $0x118] sm:$0x3] %vm255_vm1, %v13699_v2 }
  0x26   : > { %292 = vst.msk [vmem:[#allocation2 + $0x130] sm:$0x3] %vm255_vm1, %v13699_v2  ;;  %295 = vst.msk [vmem:[#allocation2 + $0x148] sm:$0x3] %vm255_vm1, %v13699_v2 }
  0x27   : > { %298 = vst.msk [vmem:[#allocation2 + $0x160] sm:$0x3] %vm255_vm1, %v13699_v2  ;;  %301 = vst.msk [vmem:[#allocation2 + $0x178] sm:$0x3] %vm255_vm1, %v13699_v2  ;;  %v1230_v11 = vld [vmem:[#allocation2 + $0x9] sm:$0xff] }
  0x28   : > { %304 = vst.msk [vmem:[#allocation2 + $0x190] sm:$0x3] %vm255_vm1, %v13699_v2  ;;  %307 = vst.msk [vmem:[#allocation2 + $0x1a8] sm:$0x3] %vm255_vm1, %v13699_v2  ;;  %8210 = vmatmul.mubr.msk.f32.vlgmr.msra.gmra.mrb[0].mxu0 %vm252_vm0, %v1230_v11  ;;  %v374_v2 = vld [vmem:[#allocation2 + $0x8] sm:$0xff] }
  0x29   : > { %341 = vst.msk [vmem:[#allocation2 + $0x19] sm:$0xff] %vm252_vm0, %v308_v4  ;;  %342 = vst.msk [vmem:[#allocation2 + $0x21] sm:$0xff] %vm252_vm0, %v309_v5  ;;  %8258 = vmatpush3.msra.mxu0 %v7385_v3 }
  0x2a   : > { %343 = vst.msk [vmem:[#allocation2 + $0x31] sm:$0xff] %vm252_vm0, %v310_v6  ;;  %344 = vst.msk [vmem:[#allocation2 + $0x39] sm:$0xff] %vm252_vm0, %v311_v7  ;;  %8307 = vmatprep.subr.mxu0 %v9693_v63 }
  0x2b   : > { %345 = vst.msk [vmem:[#allocation2 + $0x49] sm:$0xff] %vm252_vm0, %v312_v8  ;;  %346 = vst.msk [vmem:[#allocation2 + $0x51] sm:$0xff] %vm252_vm0, %v313_v9 }
  0x2c   : > { %347 = vst.msk [vmem:[#allocation2 + $0x61] sm:$0xff] %vm252_vm0, %v314_v12  ;;  %348 = vst.msk [vmem:[#allocation2 + $0x69] sm:$0xff] %vm252_vm0, %v315_v13 }
  0x2d   : > { %349 = vst.msk [vmem:[#allocation2 + $0x79] sm:$0xff] %vm252_vm0, %v316_v14  ;;  %350 = vst.msk [vmem:[#allocation2 + $0x81] sm:$0xff] %vm252_vm0, %v317_v15 }
  0x2e   : > { %351 = vst.msk [vmem:[#allocation2 + $0x91] sm:$0xff] %vm252_vm0, %v318_v16  ;;  %352 = vst.msk [vmem:[#allocation2 + $0x99] sm:$0xff] %vm252_vm0, %v319_v17 }
  0x2f   : > { %353 = vst.msk [vmem:[#allocation2 + $0xa9] sm:$0xff] %vm252_vm0, %v320_v18  ;;  %354 = vst.msk [vmem:[#allocation2 + $0xb1] sm:$0xff] %vm252_vm0, %v321_v19 }
  0x30   : > { %355 = vst.msk [vmem:[#allocation2 + $0xc1] sm:$0xff] %vm252_vm0, %v322_v20  ;;  %356 = vst.msk [vmem:[#allocation2 + $0xc9] sm:$0xff] %vm252_vm0, %v323_v21  ;;  %v9574_v28 = vld [vmem:[#allocation2 + $0x19] sm:$0xff]  ;;  %v9576_v29 = vld [vmem:[#allocation2 + $0x21] sm:$0xff] }
  0x31   : > { %357 = vst.msk [vmem:[#allocation2 + $0xd9] sm:$0xff] %vm252_vm0, %v324_v22  ;;  %358 = vst.msk [vmem:[#allocation2 + $0xe1] sm:$0xff] %vm252_vm0, %v325_v23  ;;  %v9578_v30 = vld [vmem:[#allocation2 + $0x31] sm:$0xff]  ;;  %8212 = vmatprep.mubr.msk.f32.mxu0 %vm252_vm0, %v9574_v28  ;;  %v9591_v33 = vld [vmem:[#allocation2 + $0x39] sm:$0xff] }
  0x32   : > { %359 = vst.msk [vmem:[#allocation2 + $0xf1] sm:$0xff] %vm252_vm0, %v326_v24  ;;  %360 = vst.msk [vmem:[#allocation2 + $0xf9] sm:$0xff] %vm252_vm0, %v327_v25  ;;  %8213 = vmatmul.mubr.msk.f32.gmra.mrb[2].mxu0 %vm252_vm0, %v9576_v29  ;;  %v9595_v34 = vld [vmem:[#allocation2 + $0x49] sm:$0xff]  ;;  %v9601_v35 = vld [vmem:[#allocation2 + $0x51] sm:$0xff] }
  0x33   : > { %361 = vst.msk [vmem:[#allocation2 + $0x109] sm:$0xff] %vm252_vm0, %v328_v26  ;;  %362 = vst.msk [vmem:[#allocation2 + $0x111] sm:$0xff] %vm252_vm0, %v329_v27  ;;  %8215 = vmatprep.mubr.msk.f32.mxu0 %vm252_vm0, %v9578_v30  ;;  %v9603_v36 = vld [vmem:[#allocation2 + $0x61] sm:$0xff]  ;;  %v9619_v43 = vld [vmem:[#allocation2 + $0x18] sm:$0xff] }
  0x34   : > { %363 = vst.msk [vmem:[#allocation2 + $0x121] sm:$0xff] %vm252_vm0, %v330_v31  ;;  %364 = vst.msk [vmem:[#allocation2 + $0x129] sm:$0xff] %vm252_vm0, %v331_v32  ;;  %v9623_v44 = vld [vmem:[#allocation2 + $0x69] sm:$0xff]  ;;  %8059 = vmatprep.mubr.msk.f32.mxu1 %vm252_vm0, %v9619_v43  ;;  %v9627_v45 = vld [vmem:[#allocation2 + $0x20] sm:$0xff] }
  0x35   : > { %365 = vst.msk [vmem:[#allocation2 + $0x139] sm:$0xff] %vm252_vm0, %v332_v37  ;;  %366 = vst.msk [vmem:[#allocation2 + $0x141] sm:$0xff] %vm252_vm0, %v333_v38  ;;  %v9629_v46 = vld [vmem:[#allocation2 + $0x30] sm:$0xff]  ;;  %v9631_v47 = vld [vmem:[#allocation2 + $0x79] sm:$0xff]  ;;  %8060 = vmatmul.mubr.msk.f32.vlgmr.msra.gmra.mrb[0].mxu1 %vm252_vm0, %v9627_v45 }
  0x36   : > { %8216 = vmatmul.mubr.msk.f32.gmra.mrb[4].mxu0 %vm252_vm0, %v9591_v33  ;;  %367 = vst.msk [vmem:[#allocation2 + $0x151] sm:$0xff] %vm252_vm0, %v334_v39  ;;  %368 = vst.msk [vmem:[#allocation2 + $0x159] sm:$0xff] %vm252_vm0, %v335_v40  ;;  %8062 = vmatprep.mubr.msk.f32.mxu1 %vm252_vm0, %v9629_v46  ;;  %v9637_v48 = vld [vmem:[#allocation2 + $0x38] sm:$0xff]  ;;  %v9641_v49 = vld [vmem:[#allocation2 + $0x48] sm:$0xff] }
  0x37   : > { %8218 = vmatprep.mubr.msk.f32.mxu0 %vm252_vm0, %v9595_v34  ;;  %369 = vst.msk [vmem:[#allocation2 + $0x169] sm:$0xff] %vm252_vm0, %v336_v41  ;;  %370 = vst.msk [vmem:[#allocation2 + $0x171] sm:$0xff] %vm252_vm0, %v337_v42  ;;  %v9645_v50 = vld [vmem:[#allocation2 + $0x81] sm:$0xff]  ;;  %v9647_v51 = vld [vmem:[#allocation2 + $0x91] sm:$0xff]  ;;  %8108 = vmatpush3.msra.mxu1 %v409_v61 }
  0x38   : > { %v9653_v52 = vld [vmem:[#allocation2 + $0x50] sm:$0xff]  ;;  %v9657_v53 = vld [vmem:[#allocation2 + $0x60] sm:$0xff]  ;;  %v9669_v56 = vld [vmem:[#allocation2 + $0x68] sm:$0xff]  ;;  %371 = vst.msk [vmem:[#allocation2 + $0x181] sm:$0xff] %vm252_vm0, %v338_v58 }
  0x39   : > { %8063 = vmatmul.mubr.msk.f32.gmra.mrb[2].mxu1 %vm252_vm0, %v9637_v48  ;;  %v9661_v54 = vld [vmem:[#allocation2 + $0x99] sm:$0xff]  ;;  %v9663_v55 = vld [vmem:[#allocation2 + $0xa9] sm:$0xff]  ;;  %v9678_v59 = vld [vmem:[#allocation2 + $0xb1] sm:$0xff]  ;;  %372 = vst.msk [vmem:[#allocation2 + $0x189] sm:$0xff] %vm252_vm0, %v339_v60 }
  0x3a   : > { %8219 = vmatmul.mubr.msk.f32.gmra.mrb[6].mxu0 %vm252_vm0, %v9601_v35  ;;  %8065 = vmatprep.mubr.msk.f32.mxu1 %vm252_vm0, %v9641_v49  ;;  %v9673_v57 = vld [vmem:[#allocation2 + $0x78] sm:$0xff]  ;;  %v9685_v62 = vld [vmem:[#allocation2 + $0xc1] sm:$0xff]  ;;  %v9701_v1 = vld [vmem:[#allocation2 + $0x90] sm:$0xff] }
  0x3b   : > { %8221 = vmatprep.mubr.msk.f32.mxu0 %vm252_vm0, %v9603_v36  ;;  %v9697_v0 = vld [vmem:[#allocation2 + $0x80] sm:$0xff]  ;;  %v9706_v3 = vld [vmem:[#allocation2 + $0xc9] sm:$0xff]  ;;  %v9714_v5 = vld [vmem:[#allocation2 + $0x98] sm:$0xff] }
  0x3c   : > { %v9708_v4 = vld [vmem:[#allocation2 + $0xd9] sm:$0xff]  ;;  %v9718_v6 = vld [vmem:[#allocation2 + $0xa8] sm:$0xff]  ;;  %v9724_v8 = vld [vmem:[#allocation2 + $0xf1] sm:$0xff] }
  0x3d   : > { %8066 = vmatmul.mubr.msk.f32.gmra.mrb[4].mxu1 %vm252_vm0, %v9653_v52  ;;  %v9722_v7 = vld [vmem:[#allocation2 + $0xe1] sm:$0xff]  ;;  %v9730_v9 = vld [vmem:[#allocation2 + $0xb0] sm:$0xff]  ;;  %v9738_v11 = vld [vmem:[#allocation2 + $0xf9] sm:$0xff] }
  0x3e   : > { %8222 = vmatmul.mubr.msk.f32.gmra.mrb[8].mxu0 %vm252_vm0, %v9623_v44  ;;  %8068 = vmatprep.mubr.msk.f32.mxu1 %vm252_vm0, %v9657_v53  ;;  %v9734_v10 = vld [vmem:[#allocation2 + $0xc0] sm:$0xff]  ;;  %v9740_v12 = vld [vmem:[#allocation2 + $0x109] sm:$0xff]  ;;  %v9750_v14 = vld [vmem:[#allocation2 + $0xd8] sm:$0xff] }
  0x3f   : > { %8224 = vmatprep.mubr.msk.f32.mxu0 %vm252_vm0, %v9631_v47  ;;  %v9746_v13 = vld [vmem:[#allocation2 + $0xc8] sm:$0xff]  ;;  %v9754_v15 = vld [vmem:[#allocation2 + $0x111] sm:$0xff]  ;;  %v9762_v17 = vld [vmem:[#allocation2 + $0xe0] sm:$0xff] }
  0x40   : > { %v9756_v16 = vld [vmem:[#allocation2 + $0x121] sm:$0xff]  ;;  %v9766_v18 = vld [vmem:[#allocation2 + $0xf0] sm:$0xff]  ;;  %v9772_v20 = vld [vmem:[#allocation2 + $0x139] sm:$0xff] }
  0x41   : > { %8069 = vmatmul.mubr.msk.f32.gmra.mrb[6].mxu1 %vm252_vm0, %v9669_v56  ;;  %v9770_v19 = vld [vmem:[#allocation2 + $0x129] sm:$0xff]  ;;  %v9778_v21 = vld [vmem:[#allocation2 + $0xf8] sm:$0xff]  ;;  %v9786_v23 = vld [vmem:[#allocation2 + $0x141] sm:$0xff] }
  0x42   : > { %8225 = vmatmul.mubr.msk.f32.gmra.mrb[10].mxu0 %vm252_vm0, %v9645_v50  ;;  %8071 = vmatprep.mubr.msk.f32.mxu1 %vm252_vm0, %v9673_v57  ;;  %v9782_v22 = vld [vmem:[#allocation2 + $0x108] sm:$0xff]  ;;  %v9788_v24 = vld [vmem:[#allocation2 + $0x151] sm:$0xff]  ;;  %v9798_v26 = vld [vmem:[#allocation2 + $0x120] sm:$0xff] }
  0x43   : > { %8227 = vmatprep.mubr.msk.f32.mxu0 %vm252_vm0, %v9647_v51  ;;  %v9794_v25 = vld [vmem:[#allocation2 + $0x110] sm:$0xff]  ;;  %v9802_v27 = vld [vmem:[#allocation2 + $0x159] sm:$0xff]  ;;  %v9810_v32 = vld [vmem:[#allocation2 + $0x128] sm:$0xff] }
  0x44   : > { %v9804_v31 = vld [vmem:[#allocation2 + $0x169] sm:$0xff]  ;;  %v9814_v37 = vld [vmem:[#allocation2 + $0x138] sm:$0xff]  ;;  %v9824_v39 = vld [vmem:[#allocation2 + $0x140] sm:$0xff] }
  0x45   : > { %8072 = vmatmul.mubr.msk.f32.gmra.mrb[8].mxu1 %vm252_vm0, %v9697_v0  ;;  %v9818_v38 = vld [vmem:[#allocation2 + $0x171] sm:$0xff]  ;;  %v9848_v60 = vld [vmem:[#allocation2 + $0x168] sm:$0xff] }
  0x46   : > { %8228 = vmatmul.mubr.msk.f32.gmra.mrb[12].mxu0 %vm252_vm0, %v9661_v54  ;;  %8074 = vmatprep.mubr.msk.f32.mxu1 %vm252_vm0, %v9701_v1  ;;  %v9828_v40 = vld [vmem:[#allocation2 + $0x150] sm:$0xff]  ;;  %v9839_v42 = vld [vmem:[#allocation2 + $0x158] sm:$0xff]  ;;  %v9870_v61 = vld [vmem:[#allocation2 + $0x188] sm:$0xff] }
  0x47   : > { %8230 = vmatprep.mubr.msk.f32.mxu0 %vm252_vm0, %v9663_v55  ;;  %v7319_v41 = vld [vmem:[%s13693_s1 + $0x30] sm:$0xff] }
  0x48   : > { %8157 = vmatprep.subr.mxu1 %v7319_v41  ;;  %v9844_v58 = vld [vmem:[%s13693_s1 + $0x10] sm:$0xff] }
  0x49   : > { %8075 = vmatmul.mubr.msk.f32.gmra.mrb[10].mxu1 %vm252_vm0, %v9714_v5 }
  0x4a   : > { %8231 = vmatmul.mubr.msk.f32.gmra.mrb[14].mxu0 %vm252_vm0, %v9678_v59  ;;  %8077 = vmatprep.mubr.msk.f32.mxu1 %vm252_vm0, %v9718_v6 }
  0x4b   : > { %8233 = vmatprep.mubr.msk.f32.mxu0 %vm252_vm0, %v9685_v62 }
  0x4d   : > { %8078 = vmatmul.mubr.msk.f32.gmra.mrb[12].mxu1 %vm252_vm0, %v9730_v9 }
  0x4e   : > { %8234 = vmatmul.mubr.msk.f32.gmra.mrb[16].mxu0 %vm252_vm0, %v9706_v3  ;;  %8080 = vmatprep.mubr.msk.f32.mxu1 %vm252_vm0, %v9734_v10 }
  0x4f   : > { %8236 = vmatprep.mubr.msk.f32.mxu0 %vm252_vm0, %v9708_v4 }
  0x51   : > { %8081 = vmatmul.mubr.msk.f32.gmra.mrb[14].mxu1 %vm252_vm0, %v9746_v13 }
  0x52   : > { %8237 = vmatmul.mubr.msk.f32.gmra.mrb[18].mxu0 %vm252_vm0, %v9722_v7  ;;  %8083 = vmatprep.mubr.msk.f32.mxu1 %vm252_vm0, %v9750_v14 }
  0x53   : > { %8239 = vmatprep.mubr.msk.f32.mxu0 %vm252_vm0, %v9724_v8 }
  0x55   : > { %8084 = vmatmul.mubr.msk.f32.gmra.mrb[16].mxu1 %vm252_vm0, %v9762_v17 }
  0x56   : > { %8240 = vmatmul.mubr.msk.f32.gmra.mrb[20].mxu0 %vm252_vm0, %v9738_v11  ;;  %8086 = vmatprep.mubr.msk.f32.mxu1 %vm252_vm0, %v9766_v18 }
  0x57   : > { %8242 = vmatprep.mubr.msk.f32.mxu0 %vm252_vm0, %v9740_v12 }
  0x59   : > { %8087 = vmatmul.mubr.msk.f32.gmra.mrb[18].mxu1 %vm252_vm0, %v9778_v21 }
  0x5a   : > { %8243 = vmatmul.mubr.msk.f32.gmra.mrb[22].mxu0 %vm252_vm0, %v9754_v15  ;;  %8089 = vmatprep.mubr.msk.f32.mxu1 %vm252_vm0, %v9782_v22 }
  0x5b   : > { %8245 = vmatprep.mubr.msk.f32.mxu0 %vm252_vm0, %v9756_v16 }
  0x5d   : > { %8090 = vmatmul.mubr.msk.f32.gmra.mrb[20].mxu1 %vm252_vm0, %v9794_v25 }
  0x5e   : > { %8246 = vmatmul.mubr.msk.f32.gmra.mrb[24].mxu0 %vm252_vm0, %v9770_v19  ;;  %8092 = vmatprep.mubr.msk.f32.mxu1 %vm252_vm0, %v9798_v26 }
  0x5f   : > { %8248 = vmatprep.mubr.msk.f32.mxu0 %vm252_vm0, %v9772_v20 }
  0x61   : > { %8093 = vmatmul.mubr.msk.f32.gmra.mrb[22].mxu1 %vm252_vm0, %v9810_v32 }
  0x62   : > { %8249 = vmatmul.mubr.msk.f32.gmra.mrb[26].mxu0 %vm252_vm0, %v9786_v23  ;;  %8095 = vmatprep.mubr.msk.f32.mxu1 %vm252_vm0, %v9814_v37 }
  0x63   : > { %8251 = vmatprep.mubr.msk.f32.mxu0 %vm252_vm0, %v9788_v24 }
  0x65   : > { %8096 = vmatmul.mubr.msk.f32.gmra.mrb[24].mxu1 %vm252_vm0, %v9824_v39 }
  0x66   : > { %8252 = vmatmul.mubr.msk.f32.gmra.mrb[28].mxu0 %vm252_vm0, %v9802_v27  ;;  %8098 = vmatprep.mubr.msk.f32.mxu1 %vm252_vm0, %v9828_v40 }
  0x67   : > { %8254 = vmatprep.mubr.msk.f32.mxu0 %vm252_vm0, %v9804_v31 }
  0x69   : > { %8099 = vmatmul.mubr.msk.f32.gmra.mrb[26].mxu1 %vm252_vm0, %v9839_v42 }
  0x6a   : > { %8255 = vmatmul.mubr.msk.f32.gmra.mrb[30].mxu0 %vm252_vm0, %v9818_v38  ;;  %8101 = vmatprep.mubr.msk.f32.mxu1 %vm252_vm0, %v9848_v60 }
  0x6b   : > { %8259 = vmatprep.mubr.msk.f32.mxu0 %vm252_vm0, %v9574_v28  ;;  %v9858_v28 = vld [vmem:[#allocation2 + $0x170] sm:$0xff] }
  0x6d   : > { %8102 = vmatmul.mubr.msk.f32.gmra.mrb[28].mxu1 %vm252_vm0, %v9858_v28 }
  0x6e   : > { %8260 = vmatmul.mubr.msk.f32.vlgmr.msra.gmra.mrb[0].mxu0 %vm252_vm0, %v9576_v29  ;;  %v9862_v29 = vld [vmem:[#allocation2 + $0x180] sm:$0xff] }
  0x6f   : > { %8262 = vmatprep.mubr.msk.f32.mxu0 %vm252_vm0, %v9578_v30  ;;  %8308 = vmatpush3.msra.mxu0 %v9693_v63  ;;  %v373_v63 = vld [vmem:[#allocation2] sm:$0xff] }
  0x70   : > { %8357 = vmatprep.subr.mxu0 %v9844_v58  ;;  %8104 = vmatprep.mubr.msk.f32.mxu1 %vm252_vm0, %v9862_v29 }
  0x71   : > { %8105 = vmatmul.mubr.msk.f32.gmra.mrb[30].mxu1 %vm252_vm0, %v9870_v61 }
  0x72   : > { %8263 = vmatmul.mubr.msk.f32.gmra.mrb[2].mxu0 %vm252_vm0, %v9591_v33  ;;  %8109 = vmatprep.mubr.msk.f32.mxu1 %vm252_vm0, %v373_v63 }
  0x73   : > { %8265 = vmatprep.mubr.msk.f32.mxu0 %vm252_vm0, %v9595_v34 }
  0x75   : > { %8110 = vmatmul.mubr.msk.f32.vlgmr.msra.gmra.mrb[0].mxu1 %vm252_vm0, %v374_v2  ;;  %v9962_v2 = vld [vmem:[#allocation2 + $0x181] sm:$0xff] }
  0x76   : > { %8266 = vmatmul.mubr.msk.f32.gmra.mrb[4].mxu0 %vm252_vm0, %v9601_v35  ;;  %8112 = vmatprep.mubr.msk.f32.mxu1 %vm252_vm0, %v9619_v43  ;;  %v9972_v43 = vld [vmem:[#allocation2 + $0x189] sm:$0xff] }
  0x77   : > { %8268 = vmatprep.mubr.msk.f32.mxu0 %vm252_vm0, %v9603_v36  ;;  %8158 = vmatpush3.msra.mxu1 %v7319_v41 }
  0x79   : > { %8113 = vmatmul.mubr.msk.f32.gmra.mrb[2].mxu1 %vm252_vm0, %v9627_v45  ;;  %v9989_v45 = vld [vmem:[%s13693_s1 + $0x28] sm:$0xff] }
  0x7a   : > { %8269 = vmatmul.mubr.msk.f32.gmra.mrb[6].mxu0 %vm252_vm0, %v9623_v44  ;;  %8115 = vmatprep.mubr.msk.f32.mxu1 %vm252_vm0, %v9629_v46 }
  0x7b   : > { %8271 = vmatprep.mubr.msk.f32.mxu0 %vm252_vm0, %v9631_v47 }
  0x7d   : > { %8116 = vmatmul.mubr.msk.f32.gmra.mrb[4].mxu1 %vm252_vm0, %v9637_v48 }
  0x7e   : > { %8272 = vmatmul.mubr.msk.f32.gmra.mrb[8].mxu0 %vm252_vm0, %v9645_v50  ;;  %8118 = vmatprep.mubr.msk.f32.mxu1 %vm252_vm0, %v9641_v49 }
  0x7f   : > { %8274 = vmatprep.mubr.msk.f32.mxu0 %vm252_vm0, %v9647_v51 }
  0x81   : > { %8119 = vmatmul.mubr.msk.f32.gmra.mrb[6].mxu1 %vm252_vm0, %v9653_v52 }
  0x82   : > { %8275 = vmatmul.mubr.msk.f32.gmra.mrb[10].mxu0 %vm252_vm0, %v9661_v54  ;;  %8121 = vmatprep.mubr.msk.f32.mxu1 %vm252_vm0, %v9657_v53 }
  0x83   : > { %8277 = vmatprep.mubr.msk.f32.mxu0 %vm252_vm0, %v9663_v55 }
  0x85   : > { %8122 = vmatmul.mubr.msk.f32.gmra.mrb[8].mxu1 %vm252_vm0, %v9669_v56 }
  0x86   : > { %8278 = vmatmul.mubr.msk.f32.gmra.mrb[12].mxu0 %vm252_vm0, %v9678_v59  ;;  %8124 = vmatprep.mubr.msk.f32.mxu1 %vm252_vm0, %v9673_v57 }
  0x87   : > { %8280 = vmatprep.mubr.msk.f32.mxu0 %vm252_vm0, %v9685_v62 }
  0x89   : > { %8125 = vmatmul.mubr.msk.f32.gmra.mrb[10].mxu1 %vm252_vm0, %v9697_v0 }
  0x8a   : > { %8281 = vmatmul.mubr.msk.f32.gmra.mrb[14].mxu0 %vm252_vm0, %v9706_v3  ;;  %8127 = vmatprep.mubr.msk.f32.mxu1 %vm252_vm0, %v9701_v1 }
  0x8b   : > { %8283 = vmatprep.mubr.msk.f32.mxu0 %vm252_vm0, %v9708_v4 }
  0x8d   : > { %8128 = vmatmul.mubr.msk.f32.gmra.mrb[12].mxu1 %vm252_vm0, %v9714_v5 }
  0x8e   : > { %8284 = vmatmul.mubr.msk.f32.gmra.mrb[16].mxu0 %vm252_vm0, %v9722_v7  ;;  %8130 = vmatprep.mubr.msk.f32.mxu1 %vm252_vm0, %v9718_v6 }
  0x8f   : > { %8286 = vmatprep.mubr.msk.f32.mxu0 %vm252_vm0, %v9724_v8 }
  0x91   : > { %8131 = vmatmul.mubr.msk.f32.gmra.mrb[14].mxu1 %vm252_vm0, %v9730_v9 }
  0x92   : > { %8287 = vmatmul.mubr.msk.f32.gmra.mrb[18].mxu0 %vm252_vm0, %v9738_v11  ;;  %8133 = vmatprep.mubr.msk.f32.mxu1 %vm252_vm0, %v9734_v10 }
  0x93   : > { %8289 = vmatprep.mubr.msk.f32.mxu0 %vm252_vm0, %v9740_v12 }
  0x95   : > { %8134 = vmatmul.mubr.msk.f32.gmra.mrb[16].mxu1 %vm252_vm0, %v9746_v13 }
  0x96   : > { %8290 = vmatmul.mubr.msk.f32.gmra.mrb[20].mxu0 %vm252_vm0, %v9754_v15  ;;  %8136 = vmatprep.mubr.msk.f32.mxu1 %vm252_vm0, %v9750_v14 }
  0x97   : > { %8292 = vmatprep.mubr.msk.f32.mxu0 %vm252_vm0, %v9756_v16 }
  0x99   : > { %8137 = vmatmul.mubr.msk.f32.gmra.mrb[18].mxu1 %vm252_vm0, %v9762_v17 }
  0x9a   : > { %8293 = vmatmul.mubr.msk.f32.gmra.mrb[22].mxu0 %vm252_vm0, %v9770_v19  ;;  %8139 = vmatprep.mubr.msk.f32.mxu1 %vm252_vm0, %v9766_v18 }
  0x9b   : > { %8295 = vmatprep.mubr.msk.f32.mxu0 %vm252_vm0, %v9772_v20 }
  0x9d   : > { %8140 = vmatmul.mubr.msk.f32.gmra.mrb[20].mxu1 %vm252_vm0, %v9778_v21 }
  0x9e   : > { %8296 = vmatmul.mubr.msk.f32.gmra.mrb[24].mxu0 %vm252_vm0, %v9786_v23  ;;  %8142 = vmatprep.mubr.msk.f32.mxu1 %vm252_vm0, %v9782_v22 }
  0x9f   : > { %8298 = vmatprep.mubr.msk.f32.mxu0 %vm252_vm0, %v9788_v24 }
  0xa1   : > { %8143 = vmatmul.mubr.msk.f32.gmra.mrb[22].mxu1 %vm252_vm0, %v9794_v25 }
  0xa2   : > { %8299 = vmatmul.mubr.msk.f32.gmra.mrb[26].mxu0 %vm252_vm0, %v9802_v27  ;;  %8145 = vmatprep.mubr.msk.f32.mxu1 %vm252_vm0, %v9798_v26 }
  0xa3   : > { %8301 = vmatprep.mubr.msk.f32.mxu0 %vm252_vm0, %v9804_v31 }
  0xa5   : > { %8146 = vmatmul.mubr.msk.f32.gmra.mrb[24].mxu1 %vm252_vm0, %v9810_v32 }
  0xa6   : > { %8302 = vmatmul.mubr.msk.f32.gmra.mrb[28].mxu0 %vm252_vm0, %v9818_v38  ;;  %8148 = vmatprep.mubr.msk.f32.mxu1 %vm252_vm0, %v9814_v37 }
  0xa7   : > { %8304 = vmatprep.mubr.msk.f32.mxu0 %vm252_vm0, %v9962_v2 }
  0xa9   : > { %8149 = vmatmul.mubr.msk.f32.gmra.mrb[26].mxu1 %vm252_vm0, %v9824_v39 }
  0xaa   : > { %8305 = vmatmul.mubr.msk.f32.gmra.mrb[30].mxu0 %vm252_vm0, %v9972_v43  ;;  %8151 = vmatprep.mubr.msk.f32.mxu1 %vm252_vm0, %v9828_v40 }
  0xab   : > { %8309 = vmatprep.mubr.msk.f32.mxu0 %vm252_vm0, %v9578_v30  ;;  %v1263_v30 = vld [vmem:[#allocation2 + $0x199] sm:$0xff] }
  0xad   : > { %8152 = vmatmul.mubr.msk.f32.gmra.mrb[28].mxu1 %vm252_vm0, %v9839_v42 }
  0xae   : > { %8310 = vmatmul.mubr.msk.f32.vlgmr.msra.gmra.mrb[0].mxu0 %vm252_vm0, %v9591_v33  ;;  %8154 = vmatprep.mubr.msk.f32.mxu1 %vm252_vm0, %v9848_v60  ;;  %v1264_v33 = vld [vmem:[#allocation2 + $0x1a1] sm:$0xff] }
  0xaf   : > { %8312 = vmatprep.mubr.msk.f32.mxu0 %vm252_vm0, %v9595_v34  ;;  %8358 = vmatpush3.msra.mxu0 %v9844_v58  ;;  %v2150_v34 = vld [vmem:[#allocation2 + $0x2] sm:$0xff] }
  0xb0   : > { %8407 = vmatprep.subr.mxu0 %v9989_v45 }
  0xb1   : > { %8155 = vmatmul.mubr.msk.f32.gmra.mrb[30].mxu1 %vm252_vm0, %v9858_v28 }
  0xb2   : > { %8313 = vmatmul.mubr.msk.f32.gmra.mrb[2].mxu0 %vm252_vm0, %v9601_v35  ;;  %8159 = vmatprep.mubr.msk.f32.mxu1 %vm252_vm0, %v9629_v46  ;;  %v2151_v35 = vld [vmem:[#allocation2 + $0xa] sm:$0xff]  ;;  %v10128_v46 = vld [vmem:[#allocation2 + $0x22] sm:$0xff] }
  0xb3   : > { %8315 = vmatprep.mubr.msk.f32.mxu0 %vm252_vm0, %v9603_v36  ;;  %v10114_v36 = vld [vmem:[#allocation2 + $0x1a] sm:$0xff] }
  0xb5   : > { %8160 = vmatmul.mubr.msk.f32.vlgmr.msra.gmra.mrb[0].mxu1 %vm252_vm0, %v9637_v48  ;;  %v407_v48 = vld [vmem:[#allocation2 + $0x198] sm:$0xff] }
  0xb6   : > { %8316 = vmatmul.mubr.msk.f32.gmra.mrb[4].mxu0 %vm252_vm0, %v9623_v44  ;;  %8162 = vmatprep.mubr.msk.f32.mxu1 %vm252_vm0, %v9641_v49  ;;  %v10123_v44 = vld [vmem:[%s13693_s1 + $0x40] sm:$0xff] }
  0xb7   : > { %8318 = vmatprep.mubr.msk.f32.mxu0 %vm252_vm0, %v9631_v47  ;;  %v10131_v47 = vld [vmem:[#allocation2 + $0x32] sm:$0xff]  ;;  %v10142_v49 = vld [vmem:[#allocation2 + $0x3a] sm:$0xff] }
  0xb9   : > { %8163 = vmatmul.mubr.msk.f32.gmra.mrb[2].mxu1 %vm252_vm0, %v9653_v52  ;;  %v10153_v52 = vld [vmem:[#allocation2 + $0x52] sm:$0xff] }
  0xba   : > { %8319 = vmatmul.mubr.msk.f32.gmra.mrb[6].mxu0 %vm252_vm0, %v9645_v50  ;;  %8165 = vmatprep.mubr.msk.f32.mxu1 %vm252_vm0, %v9657_v53  ;;  %v10144_v50 = vld [vmem:[#allocation2 + $0x4a] sm:$0xff]  ;;  %v10155_v53 = vld [vmem:[#allocation2 + $0x62] sm:$0xff] }
  0xbb   : > { %8321 = vmatprep.mubr.msk.f32.mxu0 %vm252_vm0, %v9647_v51  ;;  %v408_v51 = vld [vmem:[#allocation2 + $0x1a0] sm:$0xff] }
  0xbd   : > { %8166 = vmatmul.mubr.msk.f32.gmra.mrb[4].mxu1 %vm252_vm0, %v9669_v56  ;;  %v10170_v56 = vld [vmem:[#allocation2 + $0x82] sm:$0xff] }
  0xbe   : > { %8322 = vmatmul.mubr.msk.f32.gmra.mrb[8].mxu0 %vm252_vm0, %v9661_v54  ;;  %8168 = vmatprep.mubr.msk.f32.mxu1 %vm252_vm0, %v9673_v57  ;;  %v10162_v54 = vld [vmem:[#allocation2 + $0x6a] sm:$0xff]  ;;  %v10172_v57 = vld [vmem:[#allocation2 + $0x92] sm:$0xff] }
  0xbf   : > { %8324 = vmatprep.mubr.msk.f32.mxu0 %vm252_vm0, %v9663_v55  ;;  %v10164_v55 = vld [vmem:[#allocation2 + $0x7a] sm:$0xff] }
  0xc1   : > { %8169 = vmatmul.mubr.msk.f32.gmra.mrb[6].mxu1 %vm252_vm0, %v9697_v0  ;;  %v10186_v0 = vld [vmem:[#allocation2 + $0xb2] sm:$0xff] }
  0xc2   : > { %8325 = vmatmul.mubr.msk.f32.gmra.mrb[10].mxu0 %vm252_vm0, %v9678_v59  ;;  %8171 = vmatprep.mubr.msk.f32.mxu1 %vm252_vm0, %v9701_v1  ;;  %v10178_v59 = vld [vmem:[#allocation2 + $0x9a] sm:$0xff]  ;;  %v10188_v1 = vld [vmem:[#allocation2 + $0xc2] sm:$0xff] }
  0xc3   : > { %8327 = vmatprep.mubr.msk.f32.mxu0 %vm252_vm0, %v9685_v62  ;;  %v10180_v62 = vld [vmem:[#allocation2 + $0xaa] sm:$0xff] }
  0xc5   : > { %8172 = vmatmul.mubr.msk.f32.gmra.mrb[8].mxu1 %vm252_vm0, %v9714_v5  ;;  %v10202_v5 = vld [vmem:[#allocation2 + $0xe2] sm:$0xff] }
  0xc6   : > { %8328 = vmatmul.mubr.msk.f32.gmra.mrb[12].mxu0 %vm252_vm0, %v9706_v3  ;;  %8174 = vmatprep.mubr.msk.f32.mxu1 %vm252_vm0, %v9718_v6  ;;  %v10194_v3 = vld [vmem:[#allocation2 + $0xca] sm:$0xff]  ;;  %v10204_v6 = vld [vmem:[#allocation2 + $0xf2] sm:$0xff] }
  0xc7   : > { %8330 = vmatprep.mubr.msk.f32.mxu0 %vm252_vm0, %v9708_v4  ;;  %v10196_v4 = vld [vmem:[#allocation2 + $0xda] sm:$0xff] }
  0xc9   : > { %8175 = vmatmul.mubr.msk.f32.gmra.mrb[10].mxu1 %vm252_vm0, %v9730_v9  ;;  %v10218_v9 = vld [vmem:[#allocation2 + $0x112] sm:$0xff] }
  0xca   : > { %8331 = vmatmul.mubr.msk.f32.gmra.mrb[14].mxu0 %vm252_vm0, %v9722_v7  ;;  %8177 = vmatprep.mubr.msk.f32.mxu1 %vm252_vm0, %v9734_v10  ;;  %v10210_v7 = vld [vmem:[#allocation2 + $0xfa] sm:$0xff]  ;;  %v10220_v10 = vld [vmem:[#allocation2 + $0x122] sm:$0xff] }
  0xcb   : > { %8333 = vmatprep.mubr.msk.f32.mxu0 %vm252_vm0, %v9724_v8  ;;  %v10212_v8 = vld [vmem:[#allocation2 + $0x10a] sm:$0xff] }
  0xcd   : > { %8178 = vmatmul.mubr.msk.f32.gmra.mrb[12].mxu1 %vm252_vm0, %v9746_v13  ;;  %v10234_v13 = vld [vmem:[#allocation2 + $0x142] sm:$0xff] }
  0xce   : > { %8334 = vmatmul.mubr.msk.f32.gmra.mrb[16].mxu0 %vm252_vm0, %v9738_v11  ;;  %8180 = vmatprep.mubr.msk.f32.mxu1 %vm252_vm0, %v9750_v14  ;;  %v10226_v11 = vld [vmem:[#allocation2 + $0x12a] sm:$0xff]  ;;  %v10236_v14 = vld [vmem:[#allocation2 + $0x152] sm:$0xff] }
  0xcf   : > { %8336 = vmatprep.mubr.msk.f32.mxu0 %vm252_vm0, %v9740_v12  ;;  %v10228_v12 = vld [vmem:[#allocation2 + $0x13a] sm:$0xff] }
  0xd1   : > { %8181 = vmatmul.mubr.msk.f32.gmra.mrb[14].mxu1 %vm252_vm0, %v9762_v17  ;;  %v10250_v17 = vld [vmem:[#allocation2 + $0x172] sm:$0xff] }
  0xd2   : > { %8337 = vmatmul.mubr.msk.f32.gmra.mrb[18].mxu0 %vm252_vm0, %v9754_v15  ;;  %8183 = vmatprep.mubr.msk.f32.mxu1 %vm252_vm0, %v9766_v18  ;;  %v10242_v15 = vld [vmem:[#allocation2 + $0x15a] sm:$0xff]  ;;  %v2182_v18 = vld [vmem:[#allocation2 + $0x182] sm:$0xff] }
  0xd3   : > { %8339 = vmatprep.mubr.msk.f32.mxu0 %vm252_vm0, %v9756_v16  ;;  %v10244_v16 = vld [vmem:[#allocation2 + $0x16a] sm:$0xff] }
  0xd5   : > { %8184 = vmatmul.mubr.msk.f32.gmra.mrb[16].mxu1 %vm252_vm0, %v9778_v21 }
  0xd6   : > { %8340 = vmatmul.mubr.msk.f32.gmra.mrb[20].mxu0 %vm252_vm0, %v9770_v19  ;;  %8186 = vmatprep.mubr.msk.f32.mxu1 %vm252_vm0, %v9782_v22  ;;  %v2183_v19 = vld [vmem:[#allocation2 + $0x18a] sm:$0xff] }
  0xd7   : > { %8342 = vmatprep.mubr.msk.f32.mxu0 %vm252_vm0, %v9772_v20 }
  0xd9   : > { %8187 = vmatmul.mubr.msk.f32.gmra.mrb[18].mxu1 %vm252_vm0, %v9794_v25 }
  0xda   : > { %8343 = vmatmul.mubr.msk.f32.gmra.mrb[22].mxu0 %vm252_vm0, %v9786_v23  ;;  %8189 = vmatprep.mubr.msk.f32.mxu1 %vm252_vm0, %v9798_v26 }
  0xdb   : > { %8345 = vmatprep.mubr.msk.f32.mxu0 %vm252_vm0, %v9788_v24 }
  0xdd   : > { %8190 = vmatmul.mubr.msk.f32.gmra.mrb[20].mxu1 %vm252_vm0, %v9810_v32 }
  0xde   : > { %8346 = vmatmul.mubr.msk.f32.gmra.mrb[24].mxu0 %vm252_vm0, %v9802_v27  ;;  %8192 = vmatprep.mubr.msk.f32.mxu1 %vm252_vm0, %v9814_v37 }
  0xdf   : > { %8348 = vmatprep.mubr.msk.f32.mxu0 %vm252_vm0, %v9804_v31 }
  0xe1   : > { %8193 = vmatmul.mubr.msk.f32.gmra.mrb[22].mxu1 %vm252_vm0, %v9824_v39 }
  0xe2   : > { %8349 = vmatmul.mubr.msk.f32.gmra.mrb[26].mxu0 %vm252_vm0, %v9818_v38  ;;  %8195 = vmatprep.mubr.msk.f32.mxu1 %vm252_vm0, %v9828_v40  ;;  %v2184_v38 = vld [vmem:[#allocation2 + $0x19a] sm:$0xff]  ;;  %v2185_v40 = vld [vmem:[#allocation2 + $0x1a2] sm:$0xff] }
  0xe3   : > { %8351 = vmatprep.mubr.msk.f32.mxu0 %vm252_vm0, %v9962_v2 }
  0xe5   : > { %8196 = vmatmul.mubr.msk.f32.gmra.mrb[24].mxu1 %vm252_vm0, %v9839_v42 }
  0xe6   : > { %8352 = vmatmul.mubr.msk.f32.gmra.mrb[28].mxu0 %vm252_vm0, %v9972_v43  ;;  %8198 = vmatprep.mubr.msk.f32.mxu1 %vm252_vm0, %v9848_v60 }
  0xe7   : > { %8354 = vmatprep.mubr.msk.f32.mxu0 %vm252_vm0, %v1263_v30 }
  0xe9   : > { %8199 = vmatmul.mubr.msk.f32.gmra.mrb[26].mxu1 %vm252_vm0, %v9858_v28 }
  0xea   : > { %8355 = vmatmul.mubr.msk.f32.gmra.mrb[30].mxu0 %vm252_vm0, %v1264_v33  ;;  %8201 = vmatprep.mubr.msk.f32.mxu1 %vm252_vm0, %v9862_v29 }
  0xeb   : > { %8359 = vmatprep.mubr.msk.f32.mxu0 %vm252_vm0, %v2150_v34 }
  0xed   : > { %8202 = vmatmul.mubr.msk.f32.gmra.mrb[28].mxu1 %vm252_vm0, %v9870_v61 }
  0xee   : > { %8360 = vmatmul.mubr.msk.f32.vlgmr.msra.gmra.mrb[0].mxu0 %vm252_vm0, %v2151_v35  ;;  %8204 = vmatprep.mubr.msk.f32.mxu1 %vm252_vm0, %v407_v48 }
  0xef   : > { %8362 = vmatprep.mubr.msk.f32.mxu0 %vm252_vm0, %v10114_v36  ;;  %8408 = vmatpush3.msra.mxu0 %v9989_v45 }
  0xf0   : > { %8457 = vmatprep.subr.mxu0 %v10123_v44 }
  0xf1   : > { %8205 = vmatmul.mubr.msk.f32.gmra.mrb[30].mxu1 %vm252_vm0, %v408_v51 }
  0xf2   : > { %8363 = vmatmul.mubr.msk.f32.gmra.mrb[2].mxu0 %vm252_vm0, %v10128_v46 }
  0xf3   : > { %8365 = vmatprep.mubr.msk.f32.mxu0 %vm252_vm0, %v10131_v47 }
  0xf6   : > { %8366 = vmatmul.mubr.msk.f32.gmra.mrb[4].mxu0 %vm252_vm0, %v10142_v49 }
  0xf7   : > { %8368 = vmatprep.mubr.msk.f32.mxu0 %vm252_vm0, %v10144_v50 }
  0xfa   : > { %8369 = vmatmul.mubr.msk.f32.gmra.mrb[6].mxu0 %vm252_vm0, %v10153_v52 }
  0xfb   : > { %8371 = vmatprep.mubr.msk.f32.mxu0 %vm252_vm0, %v10155_v53 }
  0xfe   : > { %8372 = vmatmul.mubr.msk.f32.gmra.mrb[8].mxu0 %vm252_vm0, %v10162_v54 }
  0xff   : > { %8374 = vmatprep.mubr.msk.f32.mxu0 %vm252_vm0, %v10164_v55 }
 0x102   : > { %8375 = vmatmul.mubr.msk.f32.gmra.mrb[10].mxu0 %vm252_vm0, %v10170_v56 }
 0x103   : > { %8377 = vmatprep.mubr.msk.f32.mxu0 %vm252_vm0, %v10172_v57 }
 0x106   : > { %8378 = vmatmul.mubr.msk.f32.gmra.mrb[12].mxu0 %vm252_vm0, %v10178_v59 }
 0x107   : > { %8380 = vmatprep.mubr.msk.f32.mxu0 %vm252_vm0, %v10180_v62 }
 0x10a   : > { %8381 = vmatmul.mubr.msk.f32.gmra.mrb[14].mxu0 %vm252_vm0, %v10186_v0 }
 0x10b   : > { %8383 = vmatprep.mubr.msk.f32.mxu0 %vm252_vm0, %v10188_v1 }
 0x10e   : > { %8384 = vmatmul.mubr.msk.f32.gmra.mrb[16].mxu0 %vm252_vm0, %v10194_v3 }
 0x10f   : > { %8386 = vmatprep.mubr.msk.f32.mxu0 %vm252_vm0, %v10196_v4 }
 0x112   : > { %8387 = vmatmul.mubr.msk.f32.gmra.mrb[18].mxu0 %vm252_vm0, %v10202_v5 }
 0x113   : > { %8389 = vmatprep.mubr.msk.f32.mxu0 %vm252_vm0, %v10204_v6 }
 0x116   : > { %8390 = vmatmul.mubr.msk.f32.gmra.mrb[20].mxu0 %vm252_vm0, %v10210_v7 }
 0x117   : > { %8392 = vmatprep.mubr.msk.f32.mxu0 %vm252_vm0, %v10212_v8 }
 0x11a   : > { %8393 = vmatmul.mubr.msk.f32.gmra.mrb[22].mxu0 %vm252_vm0, %v10218_v9 }
 0x11b   : > { %8395 = vmatprep.mubr.msk.f32.mxu0 %vm252_vm0, %v10220_v10 }
 0x11e   : > { %8396 = vmatmul.mubr.msk.f32.gmra.mrb[24].mxu0 %vm252_vm0, %v10226_v11 }
 0x11f   : > { %8398 = vmatprep.mubr.msk.f32.mxu0 %vm252_vm0, %v10228_v12 }
 0x122   : > { %8399 = vmatmul.mubr.msk.f32.gmra.mrb[26].mxu0 %vm252_vm0, %v10234_v13 }
 0x123   : > { %8401 = vmatprep.mubr.msk.f32.mxu0 %vm252_vm0, %v10236_v14 }
 0x126   : > { %8402 = vmatmul.mubr.msk.f32.gmra.mrb[28].mxu0 %vm252_vm0, %v10242_v15 }
 0x127   : > { %8404 = vmatprep.mubr.msk.f32.mxu0 %vm252_vm0, %v10244_v16 }
 0x12a   : > { %8405 = vmatmul.mubr.msk.f32.gmra.mrb[30].mxu0 %vm252_vm0, %v10250_v17 }
 0x12b   : > { %8409 = vmatprep.mubr.msk.f32.mxu0 %vm252_vm0, %v10114_v36 }
 0x12e   : > { %8410 = vmatmul.mubr.msk.f32.vlgmr.msra.gmra.mrb[0].mxu0 %vm252_vm0, %v10128_v46 }
 0x12f   : > { %8412 = vmatprep.mubr.msk.f32.mxu0 %vm252_vm0, %v10131_v47  ;;  %8458 = vmatpush3.msra.mxu0 %v10123_v44 }
 0x132   : > { %8413 = vmatmul.mubr.msk.f32.gmra.mrb[2].mxu0 %vm252_vm0, %v10142_v49 }
 0x133   : > { %8415 = vmatprep.mubr.msk.f32.mxu0 %vm252_vm0, %v10144_v50 }
 0x136   : > { %8416 = vmatmul.mubr.msk.f32.gmra.mrb[4].mxu0 %vm252_vm0, %v10153_v52 }
 0x137   : > { %8418 = vmatprep.mubr.msk.f32.mxu0 %vm252_vm0, %v10155_v53 }
 0x13a   : > { %8419 = vmatmul.mubr.msk.f32.gmra.mrb[6].mxu0 %vm252_vm0, %v10162_v54 }
 0x13b   : > { %8421 = vmatprep.mubr.msk.f32.mxu0 %vm252_vm0, %v10164_v55 }
 0x13e   : > { %8422 = vmatmul.mubr.msk.f32.gmra.mrb[8].mxu0 %vm252_vm0, %v10170_v56 }
 0x13f   : > { %8424 = vmatprep.mubr.msk.f32.mxu0 %vm252_vm0, %v10172_v57 }
 0x142   : > { %8425 = vmatmul.mubr.msk.f32.gmra.mrb[10].mxu0 %vm252_vm0, %v10178_v59 }
 0x143   : > { %8427 = vmatprep.mubr.msk.f32.mxu0 %vm252_vm0, %v10180_v62 }
 0x146   : > { %8428 = vmatmul.mubr.msk.f32.gmra.mrb[12].mxu0 %vm252_vm0, %v10186_v0 }
 0x147   : > { %8430 = vmatprep.mubr.msk.f32.mxu0 %vm252_vm0, %v10188_v1 }
 0x14a   : > { %8431 = vmatmul.mubr.msk.f32.gmra.mrb[14].mxu0 %vm252_vm0, %v10194_v3 }
 0x14b   : > { %8433 = vmatprep.mubr.msk.f32.mxu0 %vm252_vm0, %v10196_v4 }
 0x14e   : > { %8434 = vmatmul.mubr.msk.f32.gmra.mrb[16].mxu0 %vm252_vm0, %v10202_v5 }
 0x14f   : > { %8436 = vmatprep.mubr.msk.f32.mxu0 %vm252_vm0, %v10204_v6 }
 0x152   : > { %8437 = vmatmul.mubr.msk.f32.gmra.mrb[18].mxu0 %vm252_vm0, %v10210_v7 }
 0x153   : > { %8439 = vmatprep.mubr.msk.f32.mxu0 %vm252_vm0, %v10212_v8 }
 0x156   : > { %8440 = vmatmul.mubr.msk.f32.gmra.mrb[20].mxu0 %vm252_vm0, %v10218_v9 }
 0x157   : > { %8442 = vmatprep.mubr.msk.f32.mxu0 %vm252_vm0, %v10220_v10 }
 0x15a   : > { %8443 = vmatmul.mubr.msk.f32.gmra.mrb[22].mxu0 %vm252_vm0, %v10226_v11 }
 0x15b   : > { %8445 = vmatprep.mubr.msk.f32.mxu0 %vm252_vm0, %v10228_v12 }
 0x15e   : > { %8446 = vmatmul.mubr.msk.f32.gmra.mrb[24].mxu0 %vm252_vm0, %v10234_v13 }
 0x15f   : > { %8448 = vmatprep.mubr.msk.f32.mxu0 %vm252_vm0, %v10236_v14 }
 0x162   : > { %8449 = vmatmul.mubr.msk.f32.gmra.mrb[26].mxu0 %vm252_vm0, %v10242_v15 }
 0x163   : > { %8451 = vmatprep.mubr.msk.f32.mxu0 %vm252_vm0, %v10244_v16 }
 0x166   : > { %8452 = vmatmul.mubr.msk.f32.gmra.mrb[28].mxu0 %vm252_vm0, %v10250_v17 }
 0x167   : > { %8454 = vmatprep.mubr.msk.f32.mxu0 %vm252_vm0, %v2182_v18 }
 0x16a   : > { %8455 = vmatmul.mubr.msk.f32.gmra.mrb[30].mxu0 %vm252_vm0, %v2183_v19 }
 0x16b   : > { %8459 = vmatprep.mubr.msk.f32.mxu0 %vm252_vm0, %v10131_v47 }
 0x16e   : > { %8460 = vmatmul.mubr.msk.f32.vlgmr.msra.gmra.mrb[0].mxu0 %vm252_vm0, %v10142_v49  ;;  %v13850_v49 = vmov 0.0  }
 0x16f   : > { %8462 = vmatprep.mubr.msk.f32.mxu0 %vm252_vm0, %v10144_v50  ;;  %3188 = vst.msk [vmem:[#allocation3] sm:$0xf] %vm3187_vm2, %v13850_v49  ;;  %3189 = vst.msk [vmem:[#allocation3 + $0x4] sm:$0xf] %vm3187_vm2, %v13850_v49 }
 0x170   : > { %3190 = vst.msk [vmem:[#allocation3 + $0x8] sm:$0xf] %vm3187_vm2, %v13850_v49  ;;  %3191 = vst.msk [vmem:[#allocation3 + $0xc] sm:$0xf] %vm3187_vm2, %v13850_v49 }
 0x172   : > { %8463 = vmatmul.mubr.msk.f32.gmra.mrb[2].mxu0 %vm252_vm0, %v10153_v52 }
 0x173   : > { %8465 = vmatprep.mubr.msk.f32.mxu0 %vm252_vm0, %v10155_v53 }
 0x176   : > { %8466 = vmatmul.mubr.msk.f32.gmra.mrb[4].mxu0 %vm252_vm0, %v10162_v54 }
 0x177   : > { %8468 = vmatprep.mubr.msk.f32.mxu0 %vm252_vm0, %v10164_v55 }
 0x17a   : > { %8469 = vmatmul.mubr.msk.f32.gmra.mrb[6].mxu0 %vm252_vm0, %v10170_v56 }
 0x17b   : > { %8471 = vmatprep.mubr.msk.f32.mxu0 %vm252_vm0, %v10172_v57 }
 0x17e   : > { %8472 = vmatmul.mubr.msk.f32.gmra.mrb[8].mxu0 %vm252_vm0, %v10178_v59 }
 0x17f   : > { %8474 = vmatprep.mubr.msk.f32.mxu0 %vm252_vm0, %v10180_v62 }
 0x182   : > { %8475 = vmatmul.mubr.msk.f32.gmra.mrb[10].mxu0 %vm252_vm0, %v10186_v0 }
 0x183   : > { %8477 = vmatprep.mubr.msk.f32.mxu0 %vm252_vm0, %v10188_v1 }
 0x186   : > { %8478 = vmatmul.mubr.msk.f32.gmra.mrb[12].mxu0 %vm252_vm0, %v10194_v3 }
 0x187   : > { %8480 = vmatprep.mubr.msk.f32.mxu0 %vm252_vm0, %v10196_v4 }
 0x188   : > { %v8161_v20 = vpop.f32.mrb[0].mxu1 }
 0x189   : > { %v1038_v21 = vpop.f32.mrb[1].mxu1 }
 0x18a   : > { %8481 = vmatmul.mubr.msk.f32.gmra.mrb[14].mxu0 %vm252_vm0, %v10202_v5 }
 0x18b   : > { %8483 = vmatprep.mubr.msk.f32.mxu0 %vm252_vm0, %v10204_v6 }
 0x18c   : > { %v8164_v22 = vpop.f32.mrb[2].mxu1 }
 0x18d   : > { %v1048_v23 = vpop.f32.mrb[3].mxu1 }
 0x18e   : > { %8484 = vmatmul.mubr.msk.f32.gmra.mrb[16].mxu0 %vm252_vm0, %v10210_v7 }
 0x18f   : > { %8486 = vmatprep.mubr.msk.f32.mxu0 %vm252_vm0, %v10212_v8 }
 0x190   : > { %v8167_v24 = vpop.f32.mrb[4].mxu1 }
 0x191   : > { %v1058_v25 = vpop.f32.mrb[5].mxu1 }
 0x192   : > { %8487 = vmatmul.mubr.msk.f32.gmra.mrb[18].mxu0 %vm252_vm0, %v10218_v9 }
 0x193   : > { %8489 = vmatprep.mubr.msk.f32.mxu0 %vm252_vm0, %v10220_v10 }
 0x194   : > { %v8170_v26 = vpop.f32.mrb[6].mxu1 }
 0x195   : > { %v1068_v27 = vpop.f32.mrb[7].mxu1 }
 0x196   : > { %8490 = vmatmul.mubr.msk.f32.gmra.mrb[20].mxu0 %vm252_vm0, %v10226_v11 }
 0x197   : > { %8492 = vmatprep.mubr.msk.f32.mxu0 %vm252_vm0, %v10228_v12 }
 0x198   : > { %v8173_v31 = vpop.f32.mrb[8].mxu1 }
 0x199   : > { %v1078_v32 = vpop.f32.mrb[9].mxu1 }
 0x19a   : > { %8493 = vmatmul.mubr.msk.f32.gmra.mrb[22].mxu0 %vm252_vm0, %v10234_v13 }
 0x19b   : > { %8495 = vmatprep.mubr.msk.f32.mxu0 %vm252_vm0, %v10236_v14 }
 0x19c   : > { %v8176_v37 = vpop.f32.mrb[10].mxu1 }
 0x19d   : > { %v10374_v39 = vpop.f32.mrb[11].mxu1 }
 0x19e   : > { %8496 = vmatmul.mubr.msk.f32.gmra.mrb[24].mxu0 %vm252_vm0, %v10242_v15 }
 0x19f   : > { %8498 = vmatprep.mubr.msk.f32.mxu0 %vm252_vm0, %v10244_v16 }
 0x1a0   : > { %v10378_v41 = vpop.f32.mrb[12].mxu1 }
 0x1a1   : > { %v10380_v42 = vpop.f32.mrb[13].mxu1 }
 0x1a2   : > { %8499 = vmatmul.mubr.msk.f32.gmra.mrb[26].mxu0 %vm252_vm0, %v10250_v17 }
 0x1a3   : > { %8501 = vmatprep.mubr.msk.f32.mxu0 %vm252_vm0, %v2182_v18 }
 0x1a4   : > { %v10383_v58 = vpop.f32.mrb[14].mxu1 }
 0x1a5   : > { %v10385_v60 = vpop.f32.mrb[15].mxu1 }
 0x1a6   : > { %8502 = vmatmul.mubr.msk.f32.gmra.mrb[28].mxu0 %vm252_vm0, %v2183_v19 }
 0x1a7   : > { %8504 = vmatprep.mubr.msk.f32.mxu0 %vm252_vm0, %v2184_v38 }
 0x1a8   : > { %v10387_v28 = vpop.f32.mrb[16].mxu1 }
 0x1a9   : > { %v10389_v29 = vpop.f32.mrb[17].mxu1 }
 0x1aa   : > { %8505 = vmatmul.mubr.msk.f32.gmra.mrb[30].mxu0 %vm252_vm0, %v2185_v40 }
 0x1ac   : > { %v10391_v61 = vpop.f32.mrb[18].mxu1 }
 0x1ad   : > { %v10393_v63 = vpop.f32.mrb[19].mxu1 }
 0x1b0   : > { %v10395_v2 = vpop.f32.mrb[20].mxu1 }
 0x1b1   : > { %v10397_v43 = vpop.f32.mrb[21].mxu1 }
 0x1b4   : > { %v10399_v45 = vpop.f32.mrb[22].mxu1 }
 0x1b5   : > { %v10401_v30 = vpop.f32.mrb[23].mxu1 }
 0x1b8   : > { %v10403_v33 = vpop.f32.mrb[24].mxu1 }
 0x1b9   : > { %v10405_v34 = vpop.f32.mrb[25].mxu1 }
 0x1bc   : > { %v10407_v35 = vpop.f32.mrb[26].mxu1 }
 0x1bd   : > { %v10409_v36 = vpop.f32.mrb[27].mxu1 }
 0x1c0   : > { %v10411_v44 = vpop.f32.mrb[28].mxu1 }
 0x1c1   : > { %v10413_v46 = vpop.f32.mrb[29].mxu1 }
 0x1c4   : > { %v10415_v47 = vpop.f32.mrb[30].mxu1 }
 0x1c5   : > { %v10417_v48 = vpop.f32.mrb[31].mxu1 }
 0x241   : > { %v8461_v50 = vpop.f32.mrb[0].mxu0 }
 0x242   : > { %v10423_v51 = vadd.f32 %v8461_v50, %v8161_v20  ;;  %v2880_v52 = vpop.f32.mrb[1].mxu0 }
 0x243   : > { %v10425_v53 = vadd.f32 %v2880_v52, %v1038_v21 }
 0x244   : > { %13851 = vst [vmem:[#allocation4_spill] sm:$0xff] %v10423_v51 }
 0x245   : > { %13852 = vst [vmem:[#allocation5_spill] sm:$0xff] %v10425_v53  ;;  %v8464_v54 = vpop.f32.mrb[2].mxu0 }
 0x246   : > { %v10427_v55 = vadd.f32 %v8464_v54, %v8164_v22  ;;  %v2890_v56 = vpop.f32.mrb[3].mxu0 }
 0x247   : > { %v10429_v57 = vadd.f32 %v2890_v56, %v1048_v23 }
 0x248   : > { %13853 = vst [vmem:[#allocation6_spill] sm:$0xff] %v10427_v55 }
 0x249   : > { %13854 = vst [vmem:[#allocation7_spill] sm:$0xff] %v10429_v57  ;;  %v8467_v59 = vpop.f32.mrb[4].mxu0  ;;  %v3071_v50 = vmax.f32 %v10425_v53, %v10429_v57 }
 0x24a   : > { %v2900_v62 = vpop.f32.mrb[5].mxu0  ;;  %v10431_v1 = vadd.f32 %v8467_v59, %v8167_v24 }
 0x24b   : > { %v10433_v4 = vadd.f32 %v2900_v62, %v1058_v25 }
 0x24c   : > { %13855 = vst [vmem:[#allocation8_spill] sm:$0xff] %v10431_v1 }
 0x24d   : > { %v8470_v0 = vpop.f32.mrb[6].mxu0  ;;  %13856 = vst [vmem:[#allocation9_spill] sm:$0xff] %v10433_v4 }
 0x24e   : > { %v2910_v3 = vpop.f32.mrb[7].mxu0  ;;  %v10435_v7 = vadd.f32 %v8470_v0, %v8170_v26  ;;  %v3072_v26 = vmax.f32 %v10423_v51, %v10427_v55 }
 0x24f   : > { %v10437_v8 = vadd.f32 %v2910_v3, %v1068_v27 }
 0x250   : > { %13857 = vst [vmem:[#allocation10_spill] sm:$0xff] %v10435_v7 }
 0x251   : > { %v8473_v5 = vpop.f32.mrb[8].mxu0  ;;  %13858 = vst [vmem:[#allocation11_spill] sm:$0xff] %v10437_v8 }
 0x252   : > { %v2920_v6 = vpop.f32.mrb[9].mxu0  ;;  %v10439_v14 = vadd.f32 %v8473_v5, %v8173_v31  ;;  %v3076_v31 = vmax.f32 %v3072_v26, %v10431_v1 }
 0x253   : > { %v10441_v15 = vadd.f32 %v2920_v6, %v1078_v32 }
 0x254   : > { %13859 = vst [vmem:[#allocation12_spill] sm:$0xff] %v10439_v14 }
 0x255   : > { %v8476_v9 = vpop.f32.mrb[10].mxu0  ;;  %13860 = vst [vmem:[#allocation13_spill] sm:$0xff] %v10441_v15 }
 0x256   : > { %v2930_v10 = vpop.f32.mrb[11].mxu0  ;;  %v10443_v19 = vadd.f32 %v8476_v9, %v8176_v37 }
 0x257   : > { %v10454_v24 = vadd.f32 %v2930_v10, %v10374_v39  ;;  %v3080_v39 = vmax.f32 %v3076_v31, %v10435_v7 }
 0x258   : > { %13861 = vst [vmem:[#allocation14_spill] sm:$0xff] %v10443_v19 }
 0x259   : > { %v8479_v11 = vpop.f32.mrb[12].mxu0  ;;  %13862 = vst [vmem:[#allocation15_spill] sm:$0xff] %v10454_v24  ;;  %v3084_v49 = vmax.f32 %v3080_v39, %v10439_v14 }
 0x25a   : > { %v2940_v12 = vpop.f32.mrb[13].mxu0  ;;  %v10464_v32 = vadd.f32 %v8479_v11, %v10378_v41  ;;  %v3075_v41 = vmax.f32 %v3071_v50, %v10433_v4 }
 0x25b   : > { %v10467_v37 = vadd.f32 %v2940_v12, %v10380_v42  ;;  %v3088_v54 = vmax.f32 %v3084_v49, %v10443_v19 }
 0x25c   : > { %13863 = vst [vmem:[#allocation16_spill] sm:$0xff] %v10464_v32  ;;  %v3079_v62 = vmax.f32 %v3075_v41, %v10437_v8 }
 0x25d   : > { %v8482_v13 = vpop.f32.mrb[14].mxu0  ;;  %13864 = vst [vmem:[#allocation17_spill] sm:$0xff] %v10467_v37  ;;  %v3092_v59 = vmax.f32 %v3088_v54, %v10464_v32 }
 0x25e   : > { %v2950_v16 = vpop.f32.mrb[15].mxu0  ;;  %v10479_v42 = vadd.f32 %v8482_v13, %v10383_v58  ;;  %v3083_v9 = vmax.f32 %v3079_v62, %v10441_v15 }
 0x25f   : > { %v10483_v0 = vadd.f32 %v2950_v16, %v10385_v60 }
 0x260   : > { %13865 = vst [vmem:[#allocation18_spill] sm:$0xff] %v10479_v42  ;;  %v3096_v5 = vmax.f32 %v3092_v59, %v10479_v42  ;;  %v3087_v11 = vmax.f32 %v3083_v9, %v10454_v24 }
 0x261   : > { %v8485_v17 = vpop.f32.mrb[16].mxu0  ;;  %13866 = vst [vmem:[#allocation19_spill] sm:$0xff] %v10483_v0 }
 0x262   : > { %v2960_v18 = vpop.f32.mrb[17].mxu0  ;;  %v3104_v10 = vrot.slane %v3096_v5, 1  ;;  %v3116_v31 = vrot.slane %v3096_v5, 2  ;;  %v3091_v58 = vmax.f32 %v3087_v11, %v10467_v37  ;;  %v3128_v49 = vrot.slane %v3096_v5, 3 }
 0x263   : > { %v3140_v50 = vrot.slane %v3096_v5, 4  ;;  %v3152_v59 = vrot.slane %v3096_v5, 5  ;;  %v3164_v9 = vrot.slane %v3096_v5, 6  ;;  %v10493_v19 = vadd.f32 %v8485_v17, %v10387_v28 }
 0x264   : > { %v3112_v26 = vmax.f32 %v3096_v5, %v3104_v10  ;;  %v3095_v60 = vmax.f32 %v3091_v58, %v10483_v0  ;;  %v3176_v11 = vrot.slane %v3096_v5, 7 }
 0x265   : > { %v10445_v20 = vpop.f32.mrb[18].mxu0  ;;  %13867 = vst [vmem:[#allocation20_spill] sm:$0xff] %v10493_v19 }
 0x266   : > { %v10447_v21 = vpop.f32.mrb[19].mxu0  ;;  %v3124_v13 = vmax.f32 %v3112_v26, %v3116_v31  ;;  %v3103_v54 = vrot.slane %v3095_v60, 1  ;;  %v3115_v42 = vrot.slane %v3095_v60, 2  ;;  %v3127_v10 = vrot.slane %v3095_v60, 3 }
 0x267   : > { %v3139_v31 = vrot.slane %v3095_v60, 4  ;;  %v10504_v28 = vadd.f32 %v10447_v21, %v10393_v63 }
 0x268   : > { %v3136_v16 = vmax.f32 %v3124_v13, %v3128_v49  ;;  %v3111_v62 = vmax.f32 %v3095_v60, %v3103_v54  ;;  %v3151_v13 = vrot.slane %v3095_v60, 5  ;;  %v10496_v49 = vadd.f32 %v2960_v18, %v10389_v29 }
 0x269   : > { %v10449_v22 = vpop.f32.mrb[20].mxu0  ;;  %v3175_v54 = vrot.slane %v3095_v60, 7  ;;  %13870 = vst [vmem:[#allocation23_spill] sm:$0xff] %v10504_v28 }
 0x26a   : > { %v10451_v23 = vpop.f32.mrb[21].mxu0  ;;  %v3148_v41 = vmax.f32 %v3136_v16, %v3140_v50  ;;  %v3123_v24 = vmax.f32 %v3111_v62, %v3115_v42  ;;  %13868 = vst [vmem:[#allocation21_spill] sm:$0xff] %v10496_v49  ;;  %v3163_v50 = vrot.slane %v3095_v60, 6  ;;  %v10500_v42 = vadd.f32 %v10445_v20, %v10391_v61 }
 0x26b   : > { %v10510_v29 = vadd.f32 %v10449_v22, %v10395_v2  ;;  %v10514_v18 = vadd.f32 %v10451_v23, %v10397_v43 }
 0x26c   : > { %v3160_v32 = vmax.f32 %v3148_v41, %v3152_v59  ;;  %v3135_v26 = vmax.f32 %v3123_v24, %v3127_v10  ;;  %13869 = vst [vmem:[#allocation22_spill] sm:$0xff] %v10500_v42 }
 0x26d   : > { %v10456_v25 = vpop.f32.mrb[22].mxu0  ;;  %13871 = vst [vmem:[#allocation24_spill] sm:$0xff] %v10510_v29  ;;  %13872 = vst [vmem:[#allocation25_spill] sm:$0xff] %v10514_v18 }
 0x26e   : > { %v10460_v27 = vpop.f32.mrb[23].mxu0  ;;  %v3172_v15 = vmax.f32 %v3160_v32, %v3164_v9  ;;  %v3147_v58 = vmax.f32 %v3135_v26, %v3139_v31  ;;  %v10518_v61 = vadd.f32 %v10456_v25, %v10399_v45  ;;  %v7551_v26 = vld [vmem:[%s13694_s2 + $0x1] ss:$0 sm:$0xff] }
 0x26f   : > { %v10522_v63 = vadd.f32 %v10460_v27, %v10401_v30  ;;  %v3074_v30 = vmax.f32 %v10493_v19, %v10500_v42 }
 0x270   : > { %v3184_v37 = vmax.f32 %v3172_v15, %v3176_v11  ;;  %v3159_v16 = vmax.f32 %v3147_v58, %v3151_v13  ;;  %13873 = vst [vmem:[#allocation26_spill] sm:$0xff] %v10518_v61  ;;  %v3207_v11 = vld [vmem:[#allocation3] sm:$0xf] }
 0x271   : > { %v10469_v38 = vpop.f32.mrb[24].mxu0  ;;  %13874 = vst [vmem:[#allocation27_spill] sm:$0xff] %v10522_v63  ;;  %v3078_v22 = vmax.f32 %v3074_v30, %v10510_v29 }
 0x272   : > { %v3000_v40 = vpop.f32.mrb[25].mxu0  ;;  %v3196_v41 = vrot.slane %v3184_v37, 7  ;;  %v3171_v59 = vmax.f32 %v3159_v16, %v3163_v50  ;;  %v10526_v20 = vadd.f32 %v10469_v38, %v10403_v33  ;;  %v3223_v50 = vmul.f32 %v7551_v26, %v3207_v11 }
 0x273   : > { %v10529_v21 = vadd.f32 %v3000_v40, %v10405_v34  ;;  %v3082_v33 = vmax.f32 %v3078_v22, %v10518_v61 }
 0x274   : > { %v3183_v15 = vmax.f32 %v3171_v59, %v3175_v54  ;;  %13875 = vst [vmem:[#allocation28_spill] sm:$0xff] %v10526_v20  ;;  %v7552_v59 = vld [vmem:[%s13694_s2 + $0x2] ss:$0 sm:$0xff] }
 0x275   : > { %v8500_v52 = vpop.f32.mrb[26].mxu0  ;;  %13876 = vst [vmem:[#allocation29_spill] sm:$0xff] %v10529_v21  ;;  %v3086_v23 = vmax.f32 %v3082_v33, %v10526_v20  ;;  %v3227_v33 = vrot.slane %v3223_v50, 1 }
 0x276   : > { %v3010_v56 = vpop.f32.mrb[27].mxu0  ;;  %v3198_v17 = vsel %vm3197_vm3, %v3196_v41, %v3183_v15  ;;  %v10532_v2 = vadd.f32 %v8500_v52, %v10407_v35  ;;  %v7550_v41 = vld [vmem:[%s13694_s2] ss:$0 sm:$0xff] }
 0x277   : > { %3205 = vst.msk [vmem:[#allocation3 + $0x5] sm:$0x3] %vm3204_vm4, %v3198_v17  ;;  %v10535_v43 = vadd.f32 %v3010_v56, %v10409_v36  ;;  %v3216_v22 = vmul.f32 %v7550_v41, %v3207_v11 }
 0x278   : > { %13877 = vst [vmem:[#allocation30_spill] sm:$0xff] %v10532_v2  ;;  %v3090_v36 = vmax.f32 %v3086_v23, %v10532_v2  ;;  %v3238_v23 = vmul.f32 %v7552_v59, %v3207_v11 }
 0x279   : > { %v8503_v3 = vpop.f32.mrb[28].mxu0  ;;  %13878 = vst [vmem:[#allocation31_spill] sm:$0xff] %v10535_v43 }
 0x27a   : > { %v3020_v6 = vpop.f32.mrb[29].mxu0  ;;  %v10538_v45 = vadd.f32 %v8503_v3, %v10411_v44  ;;  %v3073_v44 = vmax.f32 %v10496_v49, %v10504_v28 }
 0x27b   : > { %v10546_v34 = vadd.f32 %v3020_v6, %v10413_v46 }
 0x27c   : > { %13879 = vst [vmem:[#allocation32_spill] sm:$0xff] %v10538_v45  ;;  %v3094_v24 = vmax.f32 %v3090_v36, %v10538_v45  ;;  %v3077_v25 = vmax.f32 %v3073_v44, %v10514_v18 }
 0x27d   : > { %v8506_v12 = vpop.f32.mrb[30].mxu0  ;;  %13880 = vst [vmem:[#allocation33_spill] sm:$0xff] %v10546_v34 }
 0x27e   : > { %v10488_v39 = vpop.f32.mrb[31].mxu0  ;;  %v10549_v35 = vadd.f32 %v8506_v12, %v10415_v47  ;;  %v3081_v32 = vmax.f32 %v3077_v25, %v10522_v63  ;;  %v3208_v25 = vld [vmem:[#allocation3 + $0x4] sm:$0xf] }
 0x27f   : > { %v10563_v5 = vadd.f32 %v10488_v39, %v10417_v48 }
 0x280   : > { %13881 = vst [vmem:[#allocation34_spill] sm:$0xff] %v10549_v35  ;;  %v3098_v27 = vmax.f32 %v3094_v24, %v10549_v35  ;;  %v3085_v46 = vmax.f32 %v3081_v32, %v10529_v21 }
 0x281   : > { %13882 = vst [vmem:[#allocation35_spill] sm:$0xff] %v10563_v5 }
 0x282   : > { %v3106_v37 = vrot.slane %v3098_v27, 1  ;;  %v3089_v47 = vmax.f32 %v3085_v46, %v10535_v43  ;;  %v3118_v40 = vrot.slane %v3098_v27, 2  ;;  %v3130_v3 = vrot.slane %v3098_v27, 3 }
 0x283   : > { %v3142_v12 = vrot.slane %v3098_v27, 4  ;;  %v3154_v9 = vrot.slane %v3098_v27, 5  ;;  %v3166_v58 = vrot.slane %v3098_v27, 6  ;;  %v3178_v15 = vrot.slane %v3098_v27, 7 }
 0x284   : > { %v3114_v38 = vmax.f32 %v3098_v27, %v3106_v37  ;;  %v3093_v52 = vmax.f32 %v3089_v47, %v10546_v34  ;;  %v3231_v46 = vadd.f32 %v3227_v33, %v3216_v22  ;;  %v7553_v27 = vld [vmem:[%s13694_s2 + $0x3] ss:$0 sm:$0xff] }
 0x286   : > { %v3126_v56 = vmax.f32 %v3114_v38, %v3118_v40  ;;  %v3097_v60 = vmax.f32 %v3093_v52, %v10563_v5  ;;  %v3242_v38 = vrot.slane %v3238_v23, 2 }
 0x288   : > { %v3138_v6 = vmax.f32 %v3126_v56, %v3130_v3  ;;  %v3105_v10 = vrot.slane %v3097_v60, 1  ;;  %v3117_v16 = vrot.slane %v3097_v60, 2  ;;  %v3129_v39 = vrot.slane %v3097_v60, 3  ;;  %v7554_v3 = vld [vmem:[%s13694_s2 + $0x4] ss:$0 sm:$0xff] }
 0x289   : > { %v3141_v30 = vrot.slane %v3097_v60, 4  ;;  %v3153_v24 = vrot.slane %v3097_v60, 5  ;;  %v3165_v37 = vrot.slane %v3097_v60, 6  ;;  %v3177_v52 = vrot.slane %v3097_v60, 7 }
 0x28a   : > { %v3150_v62 = vmax.f32 %v3138_v6, %v3142_v12  ;;  %v3113_v13 = vmax.f32 %v3097_v60, %v3105_v10  ;;  %v3224_v56 = vmul.f32 %v7551_v26, %v3208_v25  ;;  %v3246_v12 = vadd.f32 %v3242_v38, %v3231_v46  ;;  %v3326_v10 = vld [vmem:[%s13695_s3] sm:$0xff]  ;;  %v7558_v38 = vld [vmem:[%s13694_s2 + $0x8] ss:$0 sm:$0xff] }
 0x28b   : > { %v7555_v26 = vld [vmem:[%s13694_s2 + $0x5] ss:$0 sm:$0xff]  ;;  %8509 = vmatprep.mubr.msk.f32.mxu1 %vm3368_vm5, %v3326_v10 }
 0x28c   : > { %v3162_v31 = vmax.f32 %v3150_v62, %v3154_v9  ;;  %v3125_v48 = vmax.f32 %v3113_v13, %v3117_v16  ;;  %v3253_v62 = vmul.f32 %v7553_v27, %v3208_v25  ;;  %v3262_v9 = vmul.f32 %v7554_v3, %v3208_v25 }
 0x28d   : > { %v3228_v60 = vrot.slane %v3224_v56, 1 }
 0x28e   : > { %v3174_v54 = vmax.f32 %v3162_v31, %v3166_v58  ;;  %v3137_v17 = vmax.f32 %v3125_v48, %v3129_v39  ;;  %v3217_v31 = vmul.f32 %v7550_v41, %v3208_v25  ;;  %v3239_v58 = vmul.f32 %v7552_v59, %v3208_v25  ;;  %v7556_v39 = vld [vmem:[%s13694_s2 + $0x6] ss:$0 sm:$0xff] }
 0x28f   : > { %v3255_v13 = vadd.f32 %v3253_v62, %v3246_v12  ;;  %v3266_v16 = vrot.slane %v3262_v9, 1 }
 0x290   : > { %v3186_v36 = vmax.f32 %v3174_v54, %v3178_v15  ;;  %v3149_v44 = vmax.f32 %v3137_v17, %v3141_v30  ;;  %v3232_v50 = vadd.f32 %v3228_v60, %v3217_v31  ;;  %v3277_v54 = vmul.f32 %v7555_v26, %v3208_v25  ;;  %v3210_v15 = vld [vmem:[#allocation3 + $0xc] sm:$0xf]  ;;  %v7557_v30 = vld [vmem:[%s13694_s2 + $0x7] ss:$0 sm:$0xff] }
 0x291   : > { %v3243_v48 = vrot.slane %v3239_v58, 2  ;;  %v3270_v17 = vadd.f32 %v3266_v16, %v3255_v13  ;;  %v3302_v46 = vmul.f32 %v7557_v30, %v3210_v15 }
 0x292   : > { %v3161_v32 = vmax.f32 %v3149_v44, %v3153_v24  ;;  %v3199_v47 = vrot.slane %v3186_v36, 7  ;;  %v3281_v59 = vrot.slane %v3277_v54, 2 }
 0x293   : > { %v3247_v41 = vadd.f32 %v3243_v48, %v3232_v50  ;;  %v3306_v10 = vrot.slane %v3302_v46, 1  ;;  %v3337_v46 = vld [vmem:[%s13695_s3 + $0x58] sm:$0xff] }
 0x294   : > { %v3173_v40 = vmax.f32 %v3161_v32, %v3165_v37  ;;  %v3285_v37 = vadd.f32 %v3281_v59, %v3270_v17  ;;  %v3330_v59 = vld [vmem:[%s13695_s3 + $0x20] sm:$0xff] }
 0x296   : > { %v3185_v6 = vmax.f32 %v3173_v40, %v3177_v52  ;;  %v3317_v40 = vmul.f32 %v7558_v38, %v3210_v15  ;;  %v9349_v52 = vmov 1983009808  }
 0x297   : > { %v3362_v56 = vunpack.c.l.s4 %v9349_v52  ;;  %v3340_v52 = vld [vmem:[%s13695_s3 + $0x70] sm:$0xff] }
 0x298   : > { %v3200_v11 = vsel %vm3197_vm3, %v3199_v47, %v3185_v6  ;;  %v3293_v47 = vmul.f32 %v7556_v39, %v3210_v15  ;;  %v3364_v6 = vlaneseq  ;;  %v3321_v60 = vrot.slane %v3317_v40, 2  ;;  %v3339_v40 = vld [vmem:[%s13695_s3 + $0x68] sm:$0xff] }
 0x299   : > { %3206 = vst.msk [vmem:[#allocation3 + $0x9] sm:$0x3] %vm3204_vm4, %v3200_v11  ;;  %v3363_v58 = vunpack.c.0.s8 %v3362_v56 }
 0x29a   : > { %v3365_v13 = vshrl.u32 %v3364_v6, 7  ;;  %v3341_v6 = vld [vmem:[%s13695_s3 + $0x78] sm:$0xff] }
 0x2a0   : > { %v3209_v22 = vld [vmem:[#allocation3 + $0x8] sm:$0xf] }
 0x2a1   : > { %v3254_v33 = vmul.f32 %v7553_v27, %v3209_v22  ;;  %v3263_v23 = vmul.f32 %v7554_v3, %v3209_v22  ;;  %v3278_v36 = vmul.f32 %v7555_v26, %v3209_v22  ;;  %v3292_v44 = vmul.f32 %v7556_v39, %v3209_v22 }
 0x2a2   : > { %v3301_v24 = vmul.f32 %v7557_v30, %v3209_v22  ;;  %v3316_v11 = vmul.f32 %v7558_v38, %v3209_v22  ;;  %v3366_v39 = vsub.s32 %v3363_v58, %v3365_v13  ;;  %v3327_v30 = vld [vmem:[%s13695_s3 + $0x8] sm:$0xff]  ;;  %v3328_v22 = vld [vmem:[%s13695_s3 + $0x10] sm:$0xff]  ;;  %v3338_v38 = vld [vmem:[%s13695_s3 + $0x60] sm:$0xff] }
 0x2a3   : > { %v3256_v25 = vadd.f32 %v3254_v33, %v3247_v41  ;;  %v3267_v32 = vrot.slane %v3263_v23, 1  ;;  %v3282_v62 = vrot.slane %v3278_v36, 2  ;;  %v3294_v27 = vadd.f32 %v3292_v44, %v3285_v37  ;;  %v3329_v41 = vld [vmem:[%s13695_s3 + $0x18] sm:$0xff]  ;;  %v3331_v33 = vld [vmem:[%s13695_s3 + $0x28] sm:$0xff]  ;;  %v3332_v23 = vld [vmem:[%s13695_s3 + $0x30] sm:$0xff] }
 0x2a4   : > { %v3305_v3 = vrot.slane %v3301_v24, 1  ;;  %v3320_v50 = vrot.slane %v3316_v11, 2  ;;  %v3333_v36 = vld [vmem:[%s13695_s3 + $0x38] sm:$0xff]  ;;  %v3334_v44 = vld [vmem:[%s13695_s3 + $0x40] sm:$0xff]  ;;  %v10631_v24 = vmul.f32 0.70710677, %v10423_v51 }
 0x2a5   : > { %v3271_v12 = vadd.f32 %v3267_v32, %v3256_v25  ;;  %v3335_v25 = vld [vmem:[%s13695_s3 + $0x48] sm:$0xff]  ;;  %v3336_v32 = vld [vmem:[%s13695_s3 + $0x50] sm:$0xff]  ;;  %v3350_v58 = vld [vmem:[%s13695_s3 + $0xc0] sm:$0xff] }
 0x2a6   : > { %v3309_v31 = vadd.f32 %v3305_v3, %v3294_v27  ;;  %v10642_v37 = vand.u32 2147483647, %v10631_v24  ;;  %v3344_v27 = vld [vmem:[%s13695_s3 + $0x90] sm:$0xff]  ;;  %v3345_v3 = vld [vmem:[%s13695_s3 + $0x98] sm:$0xff]  ;;  %v3351_v13 = vld [vmem:[%s13695_s3 + $0xc8] sm:$0xff]  ;;  %vm4718_vm7 = vcmp.ge.f32.partialorder %v10631_v24, 0.0 }
 0x2a7   : > { %v3286_v9 = vadd.f32 %v3282_v62, %v3271_v12  ;;  %v3342_v12 = vld [vmem:[%s13695_s3 + $0x80] sm:$0xff]  ;;  %v3343_v62 = vld [vmem:[%s13695_s3 + $0x88] sm:$0xff]  ;;  %v3348_v11 = vld [vmem:[%s13695_s3 + $0xb0] sm:$0xff] }
 0x2a8   : > { %v3324_v54 = vadd.f32 %v3320_v50, %v3309_v31  ;;  %v3352_v50 = vld [vmem:[%s13695_s3 + $0xd0] sm:$0xff] }
 0x2a9   : > { %v3295_v26 = vadd.f32 %v3293_v47, %v3286_v9  ;;  %v4814_v47 = vmul.f32 0.3275911, %v10642_v37  ;;  %v3346_v9 = vld [vmem:[%s13695_s3 + $0xa0] sm:$0xff] }
 0x2ab   : > { %v3310_v16 = vadd.f32 %v3306_v10, %v3295_v26  ;;  %v4846_v56 = vadd.f32 1.0, %v4814_v47  ;;  %v3347_v10 = vld [vmem:[%s13695_s3 + $0xa8] sm:$0xff]  ;;  %v3349_v26 = vld [vmem:[%s13695_s3 + $0xb8] sm:$0xff]  ;;  %v5294_v47 = vsub.f32 0.0, %v10642_v37 }
 0x2ad   : > { %v3325_v48 = vadd.f32 %v3321_v60, %v3310_v16  ;;  %8956 = vrcp.f32 %v4846_v56 }
 0x2af   : > { %v3360_v15 = vcombine.low %v3324_v54, %v3325_v48  ;;  %v10709_v54 = vmul.f32 0.70710677, %v10425_v53  ;;  %v3353_v48 = vld [vmem:[%s13695_s3 + $0xd8] sm:$0xff] }
 0x2b1   : > { %v3367_v17 = vrot.slane %v3360_v15, %v3366_v39  ;;  %13883 = vst [vmem:[#allocation36_spill] sm:$0xff] %v10709_v54  ;;  %v10719_v15 = vmul.f32 0.70710677, %v10427_v55 }
 0x2b3   : > { %8507 = vmatprep.subr.msk.mxu1 %vm3465_vm6, %v3367_v17  ;;  %13884 = vst [vmem:[#allocation37_spill] sm:$0xff] %v10719_v15 }
 0x2b4   : > { %8508 = vmatpush3.msk.msra.mxu1 %vm3465_vm6, %v3367_v17  ;;  %v3354_v17 = vld [vmem:[%s13695_s3 + $0xe0] sm:$0xff] }
 0x2b5   : > { %8510 = vmatmul.mubr.msk.f32.vlgmr.msra.gmra.mrb[32].mxu1 %vm3368_vm5, %v3327_v30  ;;  %v4781_v30 = vand.u32 2147483647, %v10709_v54 }
 0x2b6   : > { %8512 = vmatprep.mubr.msk.f32.mxu1 %vm3368_vm5, %v3328_v22  ;;  %v10726_v22 = vmul.f32 0.70710677, %v10429_v57 }
 0x2b7   : > { %v8957_v60 = vpop.eup %8956 }
 0x2b8   : > { %v4910_v31 = vmul.f32 %v8957_v60, %v4846_v56  ;;  %13885 = vst [vmem:[#allocation38_spill] sm:$0xff] %v10726_v22  ;;  %v10750_v56 = vmul.f32 0.70710677, %v10433_v4 }
 0x2b9   : > { %8513 = vmatmul.mubr.msk.f32.gmra.mrb[34].mxu1 %vm3368_vm5, %v3329_v41  ;;  %v3355_v41 = vld [vmem:[%s13695_s3 + $0xe8] sm:$0xff] }
 0x2ba   : > { %8515 = vmatprep.mubr.msk.f32.mxu1 %vm3368_vm5, %v3330_v59  ;;  %v4942_v16 = vsub.f32 2.0, %v4910_v31  ;;  %13887 = vst [vmem:[#allocation40_spill] sm:$0xff] %v10750_v56 }
 0x2bc   : > { %v10716_v39 = vmul.f32 %v8957_v60, %v4942_v16  ;;  %v4785_v60 = vand.u32 2147483647, %v10750_v56 }
 0x2bd   : > { %8516 = vmatmul.mubr.msk.f32.gmra.mrb[36].mxu1 %vm3368_vm5, %v3331_v33  ;;  %v4784_v33 = vand.u32 2147483647, %v10719_v15 }
 0x2be   : > { %8518 = vmatprep.mubr.msk.f32.mxu1 %vm3368_vm5, %v3332_v23  ;;  %v5006_v59 = vmul.f32 1.0614054, %v10716_v39  ;;  %v3356_v23 = vld [vmem:[%s13695_s3 + $0xf0] sm:$0xff] }
 0x2c1   : > { %8519 = vmatmul.mubr.msk.f32.gmra.mrb[38].mxu1 %vm3368_vm5, %v3333_v36  ;;  %v4813_v36 = vmul.f32 0.3275911, %v4781_v30 }
 0x2c2   : > { %8521 = vmatprep.mubr.msk.f32.mxu1 %vm3368_vm5, %v3334_v44  ;;  %v4783_v44 = vand.u32 2147483647, %v10726_v22 }
 0x2c4   : > { %v5295_v16 = vsub.f32 0.0, %v4783_v44 }
 0x2c5   : > { %8522 = vmatmul.mubr.msk.f32.gmra.mrb[40].mxu1 %vm3368_vm5, %v3335_v25  ;;  %v3357_v25 = vld [vmem:[%s13695_s3 + $0xf8] sm:$0xff] }
 0x2c6   : > { %8524 = vmatprep.mubr.msk.f32.mxu1 %vm3368_vm5, %v3336_v32  ;;  %v5038_v32 = vadd.f32 -1.4531521, %v5006_v59  ;;  %v4817_v59 = vmul.f32 0.3275911, %v4785_v60 }
 0x2c9   : > { %8525 = vmatmul.mubr.msk.f32.gmra.mrb[42].mxu1 %vm3368_vm5, %v3337_v46  ;;  %v4816_v46 = vmul.f32 0.3275911, %v4784_v33 }
 0x2ca   : > { %8527 = vmatprep.mubr.msk.f32.mxu1 %vm3368_vm5, %v3338_v38  ;;  %v4845_v38 = vadd.f32 1.0, %v4813_v36 }
 0x2cc   : > { %8958 = vrcp.f32 %v4845_v38 }
 0x2cd   : > { %8528 = vmatmul.mubr.msk.f32.gmra.mrb[44].mxu1 %vm3368_vm5, %v3339_v40  ;;  %v4815_v40 = vmul.f32 0.3275911, %v4783_v44 }
 0x2ce   : > { %8530 = vmatprep.mubr.msk.f32.mxu1 %vm3368_vm5, %v3340_v52  ;;  %v10746_v52 = vmul.f32 0.70710677, %v10431_v1 }
 0x2d0   : > { %13886 = vst [vmem:[#allocation39_spill] sm:$0xff] %v10746_v52 }
 0x2d1   : > { %8531 = vmatmul.mubr.msk.f32.gmra.mrb[46].mxu1 %vm3368_vm5, %v3341_v6  ;;  %v10753_v6 = vmul.f32 0.70710677, %v10435_v7 }
 0x2d2   : > { %8533 = vmatprep.mubr.msk.f32.mxu1 %vm3368_vm5, %v3342_v12  ;;  %v5070_v12 = vmul.f32 %v5038_v32, %v10716_v39 }
 0x2d3   : > { %13888 = vst [vmem:[#allocation41_spill] sm:$0xff] %v10753_v6 }
 0x2d4   : > { %v5102_v31 = vadd.f32 1.4214138, %v5070_v12 }
 0x2d5   : > { %8534 = vmatmul.mubr.msk.f32.gmra.mrb[48].mxu1 %vm3368_vm5, %v3343_v62  ;;  %v5293_v62 = vsub.f32 0.0, %v4781_v30 }
 0x2d6   : > { %8536 = vmatprep.mubr.msk.f32.mxu1 %vm3368_vm5, %v3344_v27  ;;  %v4848_v27 = vadd.f32 1.0, %v4816_v46  ;;  %v10787_v46 = vmul.f32 0.5, %v10427_v55 }
 0x2d8   : > { %8960 = vrcp.f32 %v4848_v27  ;;  %13892 = vst [vmem:[#allocation45_spill] sm:$0xff] %v10787_v46 }
 0x2d9   : > { %8537 = vmatmul.mubr.msk.f32.gmra.mrb[50].mxu1 %vm3368_vm5, %v3345_v3  ;;  %v5326_v3 = vmul.f32 %v5294_v47, %v10642_v37  ;;  %v10790_v47 = vmul.f32 0.5, %v10429_v57 }
 0x2da   : > { %8539 = vmatprep.mubr.msk.f32.mxu1 %vm3368_vm5, %v3346_v9  ;;  %v5296_v9 = vsub.f32 0.0, %v4784_v33 }
 0x2db   : > { %v5359_v37 = vmul.f32 1.442695, %v5326_v3  ;;  %13893 = vst [vmem:[#allocation46_spill] sm:$0xff] %v10790_v47 }
 0x2dd   : > { %8540 = vmatmul.mubr.msk.f32.gmra.mrb[52].mxu1 %vm3368_vm5, %v3347_v10  ;;  %v10757_v10 = vadd.f32 1.0, %v4815_v40  ;;  %v5327_v40 = vmul.f32 %v5295_v16, %v4783_v44 }
 0x2de   : > { %8542 = vmatprep.mubr.msk.f32.mxu1 %vm3368_vm5, %v3348_v11  ;;  %v4786_v11 = vand.u32 2147483647, %v10746_v52 }
 0x2df   : > { %8962 = vrcp.f32 %v10757_v10  ;;  %v5361_v16 = vmul.f32 1.442695, %v5327_v40 }
 0x2e0   : > { %8964 = vpow2.f32 %v5359_v37  ;;  %v5298_v3 = vsub.f32 0.0, %v4786_v11  ;;  %v10806_v37 = vmul.f32 0.5, %v10431_v1 }
 0x2e1   : > { %8543 = vmatmul.mubr.msk.f32.gmra.mrb[54].mxu1 %vm3368_vm5, %v3349_v26  ;;  %v10762_v26 = vand.u32 2147483647, %v10753_v6 }
 0x2e2   : > { %8545 = vmatprep.mubr.msk.f32.mxu1 %vm3368_vm5, %v3350_v58  ;;  %v5325_v58 = vmul.f32 %v5293_v62, %v4781_v30  ;;  %13896 = vst [vmem:[#allocation48_spill] sm:$0xff] %v10806_v37 }
 0x2e3   : > { %v4820_v30 = vmul.f32 0.3275911, %v10762_v26  ;;  %v5300_v1 = vsub.f32 0.0, %v10762_v26 }
 0x2e4   : > { %v5357_v36 = vmul.f32 1.442695, %v5325_v58  ;;  %v5297_v58 = vsub.f32 0.0, %v4785_v60 }
 0x2e5   : > { %8546 = vmatmul.mubr.msk.f32.gmra.mrb[56].mxu1 %vm3368_vm5, %v3351_v13  ;;  %v10765_v13 = vmul.f32 0.70710677, %v10437_v8  ;;  %v5332_v52 = vmul.f32 %v5300_v1, %v10762_v26 }
 0x2e6   : > { %8548 = vmatprep.mubr.msk.f32.mxu1 %vm3368_vm5, %v3352_v50  ;;  %v5328_v50 = vmul.f32 %v5296_v9, %v4784_v33  ;;  %v10781_v33 = vmul.f32 0.70710677, %v10439_v14  ;;  %v8959_v9 = vpop.eup %8958  ;;  %8966 = vpow2.f32 %v5357_v36  ;;  %v13900_v36 = vld [vmem:[#allocation15_spill] sm:$0xff]  ;;  %v5329_v40 = vmul.f32 %v5297_v58, %v4785_v60  ;;  %v13902_v60 = vld [vmem:[#allocation16_spill] sm:$0xff] }
 0x2e7   : > { %13889 = vst [vmem:[#allocation42_spill] sm:$0xff] %v10765_v13  ;;  %v10778_v24 = vand.u32 2147483647, %v10765_v13  ;;  %v4909_v47 = vmul.f32 %v8959_v9, %v4845_v38  ;;  %v10816_v46 = vmul.f32 0.70710677, %v13900_v36 }
 0x2e8   : > { %13891 = vst [vmem:[#allocation44_spill] sm:$0xff] %v10781_v33  ;;  %v5363_v12 = vmul.f32 1.442695, %v5328_v50  ;;  %v10803_v44 = vand.u32 2147483647, %v10781_v33  ;;  %v10809_v50 = vmul.f32 0.5, %v10433_v4 }
 0x2e9   : > { %8549 = vmatmul.mubr.msk.f32.gmra.mrb[58].mxu1 %vm3368_vm5, %v3353_v48  ;;  %v4818_v48 = vmul.f32 0.3275911, %v4786_v11  ;;  %v4819_v57 = vmul.f32 0.3275911, %v10778_v24  ;;  %13901 = vst [vmem:[#allocation51_spill] sm:$0xff] %v10816_v46 }
 0x2ea   : > { %8551 = vmatprep.mubr.msk.f32.mxu1 %vm3368_vm5, %v3354_v17  ;;  %v10770_v17 = vmul.f32 0.5, %v10423_v51  ;;  %13897 = vst [vmem:[#allocation49_spill] sm:$0xff] %v10809_v50  ;;  %v10832_v58 = vmul.f32 0.70710677, %v13902_v60  ;;  %v10835_v33 = vand.u32 2147483647, %v10816_v46 }
 0x2eb   : > { %v10792_v62 = vadd.f32 1.0, %v4818_v48  ;;  %v13898_v48 = vld [vmem:[#allocation14_spill] sm:$0xff]  ;;  %v10825_v38 = vadd.f32 1.0, %v4819_v57  ;;  %v4941_v57 = vsub.f32 2.0, %v4909_v47  ;;  %v5365_v56 = vmul.f32 1.442695, %v5329_v40 }
 0x2ec   : > { %13903 = vst [vmem:[#allocation52_spill] sm:$0xff] %v10832_v58  ;;  %v10847_v46 = vmul.f32 0.5, %v10435_v7  ;;  %v10851_v47 = vand.u32 2147483647, %v10832_v58  ;;  %v4823_v1 = vmul.f32 0.3275911, %v10835_v33 }
 0x2ed   : > { %8552 = vmatmul.mubr.msk.f32.gmra.mrb[60].mxu1 %vm3368_vm5, %v3355_v41  ;;  %v10773_v41 = vmul.f32 0.5, %v10425_v53  ;;  %v10796_v53 = vadd.f32 1.0, %v4820_v30  ;;  %v8961_v30 = vpop.eup %8960  ;;  %8968 = vrcp.f32 %v10792_v62  ;;  %v10862_v40 = vmul.f32 %v8959_v9, %v4941_v57 }
 0x2ee   : > { %8554 = vmatprep.mubr.msk.f32.mxu1 %vm3368_vm5, %v3356_v23  ;;  %v5134_v23 = vmul.f32 %v5102_v31, %v10716_v39  ;;  %v10794_v31 = vadd.f32 1.0, %v4817_v59  ;;  %v10812_v59 = vmul.f32 0.70710677, %v13898_v48  ;;  %v8963_v4 = vpop.eup %8962  ;;  %13906 = vst [vmem:[#allocation54_spill] sm:$0xff] %v10847_v46 }
 0x2ef   : > { %13890 = vst [vmem:[#allocation43_spill] sm:$0xff] %v10773_v41  ;;  %v4911_v6 = vmul.f32 %v8963_v4, %v10757_v10  ;;  %13909 = vst [vmem:[#allocation57_spill] sm:$0xff] %v10862_v40 }
 0x2f0   : > { %v5166_v55 = vadd.f32 -0.28449672, %v5134_v23  ;;  %13899 = vst [vmem:[#allocation50_spill] sm:$0xff] %v10812_v59  ;;  %v5330_v23 = vmul.f32 %v5298_v3, %v4786_v11  ;;  %8970 = vrcp.f32 %v10794_v31  ;;  %v4822_v11 = vmul.f32 0.3275911, %v10803_v44 }
 0x2f1   : > { %8555 = vmatmul.mubr.msk.f32.gmra.mrb[62].mxu1 %vm3368_vm5, %v3357_v25  ;;  %v13714_v25 = vmov -1.0   ;;  %8972 = vrcp.f32 %v10796_v53  ;;  %v4912_v3 = vmul.f32 %v8961_v30, %v4848_v27  ;;  %v10829_v41 = vand.u32 2147483647, %v10812_v59 }
 0x2f2   : > { %v10784_v32 = vsel %vm4718_vm7, 1.0, %v13714_v25  ;;  %v13894_v25 = vld [vmem:[#allocation13_spill] sm:$0xff]  ;;  %v5198_v50 = vmul.f32 %v5166_v55, %v10716_v39  ;;  %8974 = vpow2.f32 %v5363_v12  ;;  %v8965_v12 = vpop.eup %8964 }
 0x2f3   : > { %v10799_v51 = vmul.f32 0.70710677, %v13894_v25  ;;  %8976 = vpow2.f32 %v5361_v16  ;;  %v13904_v55 = vld [vmem:[#allocation17_spill] sm:$0xff]  ;;  %v10844_v16 = vadd.f32 1.0, %v4822_v11  ;;  %v4824_v22 = vmul.f32 0.3275911, %v10829_v41  ;;  %v10853_v10 = vpop.eup %8966 }
 0x2f4   : > { %v10838_v13 = vmul.f32 0.70710677, %v13904_v55  ;;  %v5230_v59 = vadd.f32 0.2548296, %v5198_v50  ;;  %8978 = vrcp.f32 %v10825_v38  ;;  %13907 = vst [vmem:[#allocation55_spill] sm:$0xff] %v10853_v10  ;;  %v10856_v50 = vmul.f32 0.5, %v10437_v8 }
 0x2f5   : > { %13895 = vst [vmem:[#allocation47_spill] sm:$0xff] %v10799_v51  ;;  %v10821_v37 = vand.u32 2147483647, %v10799_v51  ;;  %v5367_v51 = vmul.f32 1.442695, %v5330_v23  ;;  %v4944_v23 = vsub.f32 2.0, %v4912_v3 }
 0x2f6   : > { %13905 = vst [vmem:[#allocation53_spill] sm:$0xff] %v10838_v13  ;;  %13908 = vst [vmem:[#allocation56_spill] sm:$0xff] %v10856_v50  ;;  %v10860_v26 = vand.u32 2147483647, %v10838_v13  ;;  %v4943_v11 = vsub.f32 2.0, %v4911_v6  ;;  %v5299_v3 = vsub.f32 0.0, %v10778_v24  ;;  %v5262_v58 = vmul.f32 %v5230_v59, %v10716_v39 }
 0x2f7   : > { %v4821_v27 = vmul.f32 0.3275911, %v10821_v37  ;;  %8980 = vpow2.f32 %v5367_v51  ;;  %v8969_v46 = vpop.eup %8968  ;;  %v5371_v10 = vmul.f32 1.442695, %v5332_v52  ;;  %v5302_v51 = vsub.f32 0.0, %v10803_v44  ;;  %v13911_v52 = vld [vmem:[#allocation18_spill] sm:$0xff] }
 0x2f8   : > { %8982 = vrcp.f32 %v10844_v16  ;;  %v10870_v50 = vmul.f32 %v8961_v30, %v4944_v23  ;;  %v10872_v13 = vadd.f32 1.0, %v4824_v22  ;;  %v4826_v6 = vmul.f32 0.3275911, %v10851_v47 }
 0x2f9   : > { %v10865_v7 = vadd.f32 1.0, %v4821_v27  ;;  %8984 = vpow2.f32 %v5365_v56  ;;  %v5301_v57 = vsub.f32 0.0, %v10821_v37  ;;  %v10876_v27 = vadd.f32 1.0, %v4823_v1 }
 0x2fa   : > { %v8971_v8 = vpop.eup %8970  ;;  %13910 = vst [vmem:[#allocation58_spill] sm:$0xff] %v10870_v50  ;;  %v4825_v39 = vmul.f32 0.3275911, %v10860_v26  ;;  %v10880_v59 = vmul.f32 0.70710677, %v13911_v52  ;;  %v10884_v54 = vmul.f32 %v8963_v4, %v4943_v11  ;;  %v4914_v56 = vmul.f32 %v8969_v46, %v10792_v62 }
 0x2fb   : > { %v8973_v9 = vpop.eup %8972  ;;  %v5331_v22 = vmul.f32 %v5299_v3, %v10778_v24  ;;  %8986 = vrcp.f32 %v10865_v7  ;;  %v5422_v23 = vmul.f32 %v8965_v12, %v5262_v58  ;;  %v4913_v1 = vmul.f32 %v8971_v8, %v10794_v31 }
 0x2fc   : > { %13912 = vst [vmem:[#allocation59_spill] sm:$0xff] %v10880_v59  ;;  %v10882_v15 = vpop.eup %8974  ;;  %8988 = vpow2.f32 %v5371_v10  ;;  %v5334_v50 = vmul.f32 %v5302_v51, %v10803_v44  ;;  %v4916_v40 = vmul.f32 %v8973_v9, %v10796_v53  ;;  %v10898_v4 = vadd.f32 1.0, %v4826_v6 }
 0x2fd   : > { %13913 = vst [vmem:[#allocation60_spill] sm:$0xff] %v10882_v15  ;;  %v10889_v30 = vpop.eup %8976  ;;  %v10895_v15 = vmul.f32 0.5, %v10439_v14  ;;  %8990 = vrcp.f32 %v10872_v13  ;;  %v5333_v62 = vmul.f32 %v5301_v57, %v10821_v37  ;;  %v10902_v58 = vadd.f32 1.0, %v4825_v39 }
 0x2fe   : > { %13914 = vst [vmem:[#allocation61_spill] sm:$0xff] %v10889_v30  ;;  %v8979_v24 = vpop.eup %8978  ;;  %8992 = vrcp.f32 %v10876_v27  ;;  %v10905_v31 = vand.u32 2147483647, %v10880_v59  ;;  %v4946_v44 = vsub.f32 2.0, %v4914_v56  ;;  %v5369_v12 = vmul.f32 1.442695, %v5331_v22 }
 0x2ff   : > { %13915 = vst [vmem:[#allocation62_spill] sm:$0xff] %v10895_v15  ;;  %v10908_v53 = vmul.f32 0.5, %v13894_v25  ;;  %v5304_v10 = vsub.f32 0.0, %v10829_v41  ;;  %v5454_v3 = vsub.f32 1.0, %v5422_v23  ;;  %v4945_v51 = vsub.f32 2.0, %v4913_v1 }
 0x300   : > { %v5375_v6 = vmul.f32 1.442695, %v5334_v50  ;;  %v5303_v37 = vsub.f32 0.0, %v10835_v33  ;;  %v4948_v57 = vsub.f32 2.0, %v4916_v40  ;;  %v4915_v39 = vmul.f32 %v8979_v24, %v10825_v38 }
 0x301   : > { %13916 = vst [vmem:[#allocation63_spill] sm:$0xff] %v10908_v53  ;;  %v10911_v11 = vpop.eup %8980  ;;  %8994 = vrcp.f32 %v10898_v4  ;;  %v10917_v56 = vmul.f32 0.70710677, %v10483_v0  ;;  %v5373_v25 = vmul.f32 1.442695, %v5333_v62  ;;  %v5306_v14 = vsub.f32 0.0, %v10851_v47 }
 0x302   : > { %13917 = vst [vmem:[#allocation64_spill] sm:$0xff] %v10911_v11  ;;  %v8983_v22 = vpop.eup %8982  ;;  %8996 = vrcp.f32 %v10902_v58  ;;  %v4828_v23 = vmul.f32 0.3275911, %v10905_v31  ;;  %v10924_v50 = vmul.f32 %v8969_v46, %v4946_v44  ;;  %v10927_v38 = vmul.f32 0.5, %v13898_v48 }
 0x303   : > { %v10922_v1 = vpop.eup %8984  ;;  %8998 = vpow2.f32 %v5369_v12  ;;  %v5336_v40 = vmul.f32 %v5304_v10, %v10829_v41  ;;  %v5486_v15 = vmul.f32 %v5454_v3, %v10784_v32  ;;  %v10931_v53 = vmul.f32 %v8971_v8, %v4945_v51 }
 0x304   : > { %13918 = vst [vmem:[#allocation65_spill] sm:$0xff] %v10922_v1  ;;  %13919 = vst [vmem:[#allocation66_spill] sm:$0xff] %v10927_v38  ;;  %v5335_v62 = vmul.f32 %v5303_v37, %v10835_v33  ;;  %v5305_v11 = vsub.f32 0.0, %v10860_v26  ;;  %v4947_v59 = vsub.f32 2.0, %v4915_v39  ;;  %v4918_v1 = vmul.f32 %v8983_v22, %v10844_v16 }
 0x305   : > { %v8987_v30 = vpop.eup %8986  ;;  %9000 = vpow2.f32 %v5375_v6  ;;  %v4795_v46 = vand.u32 2147483647, %v10917_v56  ;;  %v10939_v12 = vmul.f32 %v8973_v9, %v4948_v57  ;;  %v5338_v41 = vmul.f32 %v5306_v14, %v10851_v47 }
 0x306   : > { %v10937_v44 = vpop.eup %8988  ;;  %9002 = vpow2.f32 %v5373_v25  ;;  %v10942_v8 = vadd.f32 1.0, %v4828_v23  ;;  %v5379_v33 = vmul.f32 1.442695, %v5336_v40  ;;  %v10945_v10 = vmul.f32 0.5, %v13900_v36 }
 0x307   : > { %13920 = vst [vmem:[#allocation67_spill] sm:$0xff] %v10937_v44  ;;  %v8991_v32 = vpop.eup %8990  ;;  %v10948_v3 = vmul.f32 0.5, %v13902_v60  ;;  %v10951_v16 = vmul.f32 0.70710677, %v10493_v19  ;;  %v5518_v6 = vadd.f32 1.0, %v5486_v15  ;;  %v4917_v9 = vmul.f32 %v8987_v30, %v10865_v7 }
 0x308   : > { %13921 = vst [vmem:[#allocation68_spill] sm:$0xff] %v10945_v10  ;;  %v8993_v51 = vpop.eup %8992  ;;  %v5377_v25 = vmul.f32 1.442695, %v5335_v62  ;;  %v5337_v14 = vmul.f32 %v5305_v11, %v10860_v26  ;;  %v10955_v47 = vmul.f32 %v8979_v24, %v4947_v59  ;;  %v4950_v37 = vsub.f32 2.0, %v4918_v1 }
 0x309   : > { %13922 = vst [vmem:[#allocation69_spill] sm:$0xff] %v10948_v3  ;;  %v4827_v57 = vmul.f32 0.3275911, %v4795_v46  ;;  %v10958_v39 = vmul.f32 0.70710677, %v10496_v49  ;;  %v4920_v23 = vmul.f32 %v8991_v32, %v10872_v13  ;;  %9004 = vrcp.f32 %v10942_v8 }
 0x30a   : > { %v5383_v40 = vmul.f32 1.442695, %v5338_v41  ;;  %v5308_v3 = vsub.f32 0.0, %v10905_v31  ;;  %9006 = vpow2.f32 %v5379_v33  ;;  %v4919_v7 = vmul.f32 %v8993_v51, %v10876_v27 }
 0x30b   : > { %v8995_v15 = vpop.eup %8994  ;;  %v10965_v26 = vmul.f32 0.5, %v13904_v55  ;;  %v4798_v59 = vand.u32 2147483647, %v10951_v16  ;;  %v10969_v11 = vmul.f32 %v5518_v6, %v10770_v17  ;;  %v4949_v1 = vsub.f32 2.0, %v4917_v9 }
 0x30c   : > { %v8997_v24 = vpop.eup %8996  ;;  %9008 = vpow2.f32 %v5377_v25  ;;  %v5381_v13 = vmul.f32 1.442695, %v5337_v14  ;;  %v10973_v41 = vmul.f32 %v8983_v22, %v4950_v37  ;;  %v10975_v60 = vadd.f32 1.0, %v4827_v57 }
 0x30d   : > { %13923 = vst [vmem:[#allocation70_spill] sm:$0xff] %v10965_v26  ;;  %13924 = vst [vmem:[#allocation71_spill] sm:$0xff] %v10969_v11  ;;  %v10971_v62 = vpop.eup %8998  ;;  %v4797_v27 = vand.u32 2147483647, %v10958_v39  ;;  %v10979_v33 = vmul.f32 0.70710677, %v10500_v42  ;;  %9010 = vpow2.f32 %v5383_v40  ;;  %v5340_v55 = vmul.f32 %v5308_v3, %v10905_v31 }
 0x30e   : > { %v4952_v26 = vsub.f32 2.0, %v4920_v23  ;;  %v5307_v17 = vsub.f32 0.0, %v4795_v46  ;;  %v4951_v9 = vsub.f32 2.0, %v4919_v7  ;;  %v4922_v25 = vmul.f32 %v8995_v15, %v10898_v4 }
 0x30f   : > { %13925 = vst [vmem:[#allocation72_spill] sm:$0xff] %v10979_v33  ;;  %v10982_v6 = vpop.eup %9000  ;;  %v4921_v22 = vmul.f32 %v8997_v24, %v10902_v58  ;;  %v5310_v14 = vsub.f32 0.0, %v4798_v59  ;;  %v10988_v57 = vmul.f32 %v8987_v30, %v4949_v1  ;;  %9012 = vpow2.f32 %v5381_v13 }
 0x310   : > { %13926 = vst [vmem:[#allocation73_spill] sm:$0xff] %v10982_v6  ;;  %v10986_v37 = vpop.eup %9002  ;;  %v10991_v11 = vmul.f32 0.5, %v13911_v52  ;;  %v4830_v23 = vmul.f32 0.3275911, %v4798_v59  ;;  %v10994_v31 = vmul.f32 0.5, %v10483_v0  ;;  %9014 = vrcp.f32 %v10975_v60 }
 0x311   : > { %13927 = vst [vmem:[#allocation74_spill] sm:$0xff] %v10986_v37  ;;  %v4829_v3 = vmul.f32 0.3275911, %v4797_v27  ;;  %v4800_v4 = vand.u32 2147483647, %v10979_v33  ;;  %v10998_v40 = vmul.f32 %v8991_v32, %v4952_v26  ;;  %v5339_v7 = vmul.f32 %v5307_v17, %v4795_v46 }
 0x312   : > { %13928 = vst [vmem:[#allocation75_spill] sm:$0xff] %v10991_v11  ;;  %13929 = vst [vmem:[#allocation76_spill] sm:$0xff] %v10994_v31  ;;  %v5387_v58 = vmul.f32 1.442695, %v5340_v55  ;;  %v11001_v30 = vmul.f32 0.70710677, %v10504_v28  ;;  %v11003_v1 = vmul.f32 %v8993_v51, %v4951_v9  ;;  %v5342_v52 = vmul.f32 %v5310_v14, %v4798_v59 }
 0x313   : > { %v4954_v13 = vsub.f32 2.0, %v4922_v25  ;;  %v4953_v11 = vsub.f32 2.0, %v4921_v22  ;;  %v9005_v36 = vpop.eup %9004  ;;  %v11006_v31 = vmul.f32 0.5, %v10493_v19  ;;  %v11008_v0 = vadd.f32 1.0, %v4830_v23 }
 0x314   : > { %13930 = vst [vmem:[#allocation77_spill] sm:$0xff] %v11001_v30  ;;  %v5309_v48 = vsub.f32 0.0, %v4797_v27  ;;  %v11011_v32 = vmul.f32 0.70710677, %v10510_v29  ;;  %v11013_v55 = vpop.eup %9006  ;;  %v11015_v46 = vadd.f32 1.0, %v4829_v3  ;;  %v5312_v51 = vsub.f32 0.0, %v4800_v4 }
 0x315   : > { %13931 = vst [vmem:[#allocation78_spill] sm:$0xff] %v11006_v31  ;;  %13933 = vst [vmem:[#allocation80_spill] sm:$0xff] %v11013_v55  ;;  %v4832_v26 = vmul.f32 0.3275911, %v4800_v4  ;;  %v11018_v17 = vmul.f32 0.70710677, %v10514_v18  ;;  %9016 = vpow2.f32 %v5387_v58  ;;  %v11026_v14 = vmul.f32 %v8995_v15, %v4954_v13 }
 0x316   : > { %13932 = vst [vmem:[#allocation79_spill] sm:$0xff] %v11011_v32  ;;  %v11020_v59 = vpop.eup %9008  ;;  %v5385_v9 = vmul.f32 1.442695, %v5339_v7  ;;  %v4799_v25 = vand.u32 2147483647, %v11001_v30  ;;  %v11028_v23 = vmul.f32 %v8997_v24, %v4953_v11  ;;  %v4924_v3 = vmul.f32 %v9005_v36, %v10942_v8 }
 0x317   : > { %13934 = vst [vmem:[#allocation81_spill] sm:$0xff] %v11018_v17  ;;  %13935 = vst [vmem:[#allocation82_spill] sm:$0xff] %v11020_v59  ;;  %v11024_v22 = vmul.f32 0.70710677, %v10518_v61  ;;  %v5391_v31 = vmul.f32 1.442695, %v5342_v52  ;;  %v11031_v33 = vpop.eup %9010  ;;  %9018 = vrcp.f32 %v11008_v0  ;;  %v5341_v58 = vmul.f32 %v5309_v48, %v4797_v27 }
 0x318   : > { %13937 = vst [vmem:[#allocation84_spill] sm:$0xff] %v11031_v33  ;;  %v11035_v19 = vmul.f32 0.5, %v10496_v49  ;;  %v4802_v7 = vand.u32 2147483647, %v11011_v32  ;;  %9020 = vrcp.f32 %v11015_v46  ;;  %v11039_v30 = vadd.f32 1.0, %v4832_v26 }
 0x319   : > { %13936 = vst [vmem:[#allocation83_spill] sm:$0xff] %v11024_v22  ;;  %v5344_v15 = vmul.f32 %v5312_v51, %v4800_v4  ;;  %v11042_v24 = vand.u32 2147483647, %v11018_v17  ;;  %v11044_v8 = vpop.eup %9012  ;;  %9022 = vpow2.f32 %v5385_v9  ;;  %v4831_v52 = vmul.f32 0.3275911, %v4799_v25 }
 0x31a   : > { %13938 = vst [vmem:[#allocation85_spill] sm:$0xff] %v11035_v19  ;;  %13939 = vst [vmem:[#allocation86_spill] sm:$0xff] %v11044_v8  ;;  %v11047_v11 = vand.u32 2147483647, %v11024_v22  ;;  %v11050_v13 = vmul.f32 0.70710677, %v10522_v63  ;;  %v9015_v48 = vpop.eup %9014  ;;  %9024 = vpow2.f32 %v5391_v31 }
 0x31b   : > { %v4956_v27 = vsub.f32 2.0, %v4924_v3  ;;  %v11053_v26 = vmul.f32 0.5, %v10500_v42  ;;  %v11056_v4 = vmul.f32 0.70710677, %v10526_v20  ;;  %v5389_v51 = vmul.f32 1.442695, %v5341_v58 }
 0x31c   : > { %13940 = vst [vmem:[#allocation87_spill] sm:$0xff] %v11050_v13  ;;  %v11059_v19 = vmul.f32 0.5, %v10504_v28  ;;  %v5311_v9 = vsub.f32 0.0, %v4799_v25  ;;  %v4834_v32 = vmul.f32 0.3275911, %v4802_v7  ;;  %9026 = vrcp.f32 %v11039_v30 }
 0x31d   : > { %13941 = vst [vmem:[#allocation88_spill] sm:$0xff] %v11053_v26  ;;  %13942 = vst [vmem:[#allocation89_spill] sm:$0xff] %v11056_v4  ;;  %v5395_v22 = vmul.f32 1.442695, %v5344_v15  ;;  %v4833_v17 = vmul.f32 0.3275911, %v11042_v24  ;;  %v4923_v31 = vmul.f32 %v9015_v48, %v10975_v60  ;;  %9028 = vpow2.f32 %v5389_v51 }
 0x31e   : > { %13943 = vst [vmem:[#allocation90_spill] sm:$0xff] %v11059_v19  ;;  %v11064_v3 = vmul.f32 0.70710677, %v10529_v21  ;;  %v11067_v26 = vadd.f32 1.0, %v4831_v52  ;;  %v4836_v20 = vmul.f32 0.3275911, %v11047_v11  ;;  %v11073_v19 = vmul.f32 %v9005_v36, %v4956_v27 }
 0x31f   : > { %v11071_v58 = vand.u32 2147483647, %v11050_v13  ;;  %v5314_v61 = vsub.f32 0.0, %v4802_v7  ;;  %v11076_v28 = vand.u32 2147483647, %v11056_v4  ;;  %v11081_v21 = vpop.eup %9016  ;;  %v5343_v60 = vmul.f32 %v5311_v9, %v4799_v25 }
 0x320   : > { %13944 = vst [vmem:[#allocation91_spill] sm:$0xff] %v11064_v3  ;;  %13945 = vst [vmem:[#allocation92_spill] sm:$0xff] %v11073_v19  ;;  %v11079_v15 = vmul.f32 0.70710677, %v10532_v2  ;;  %v11083_v52 = vadd.f32 1.0, %v4834_v32  ;;  %9030 = vpow2.f32 %v5395_v22  ;;  %v11088_v13 = vadd.f32 1.0, %v4833_v17 }
 0x321   : > { %13947 = vst [vmem:[#allocation94_spill] sm:$0xff] %v11081_v21  ;;  %v11086_v42 = vmul.f32 0.70710677, %v10535_v43  ;;  %v11091_v36 = vand.u32 2147483647, %v11064_v3  ;;  %v9019_v4 = vpop.eup %9018  ;;  %v4955_v2 = vsub.f32 2.0, %v4923_v31  ;;  %9032 = vrcp.f32 %v11067_v26 }
 0x322   : > { %13946 = vst [vmem:[#allocation93_spill] sm:$0xff] %v11079_v15  ;;  %v11094_v27 = vmul.f32 0.70710677, %v10538_v45  ;;  %v11097_v51 = vadd.f32 1.0, %v4836_v20  ;;  %v4835_v32 = vmul.f32 0.3275911, %v11071_v58  ;;  %v9021_v25 = vpop.eup %9020  ;;  %v5346_v17 = vmul.f32 %v5314_v61, %v4802_v7 }
 0x323   : > { %13948 = vst [vmem:[#allocation95_spill] sm:$0xff] %v11086_v42  ;;  %v11101_v9 = vmul.f32 0.5, %v10510_v29  ;;  %v4838_v22 = vmul.f32 0.3275911, %v11076_v28  ;;  %v11105_v3 = vand.u32 2147483647, %v11079_v15  ;;  %v11107_v21 = vpop.eup %9022  ;;  %9034 = vrcp.f32 %v11083_v52 }
 0x324   : > { %13949 = vst [vmem:[#allocation96_spill] sm:$0xff] %v11094_v27  ;;  %13951 = vst [vmem:[#allocation98_spill] sm:$0xff] %v11107_v21  ;;  %v5393_v45 = vmul.f32 1.442695, %v5343_v60  ;;  %v11111_v20 = vand.u32 2147483647, %v11086_v42  ;;  %v11116_v43 = vpop.eup %9024  ;;  %v4926_v61 = vmul.f32 %v9019_v4, %v11008_v0  ;;  %9036 = vrcp.f32 %v11088_v13 }
 0x325   : > { %13950 = vst [vmem:[#allocation97_spill] sm:$0xff] %v11101_v9  ;;  %v11114_v31 = vmul.f32 0.70710677, %v10546_v34  ;;  %13953 = vst [vmem:[#allocation100_spill] sm:$0xff] %v11116_v43  ;;  %v4837_v7 = vmul.f32 0.3275911, %v11091_v36  ;;  %v11124_v60 = vmul.f32 %v9015_v48, %v4955_v2  ;;  %v4925_v15 = vmul.f32 %v9021_v25, %v11015_v46 }
 0x326   : > { %v11122_v9 = vand.u32 2147483647, %v11094_v27  ;;  %9038 = vrcp.f32 %v11097_v51  ;;  %v11128_v42 = vadd.f32 1.0, %v4835_v32  ;;  %v9027_v34 = vpop.eup %9026  ;;  %v5399_v29 = vmul.f32 1.442695, %v5346_v17 }
 0x327   : > { %13952 = vst [vmem:[#allocation99_spill] sm:$0xff] %v11114_v31  ;;  %v5313_v43 = vsub.f32 0.0, %v11042_v24  ;;  %v11131_v0 = vadd.f32 1.0, %v4838_v22  ;;  %v4840_v49 = vmul.f32 0.3275911, %v11105_v3  ;;  %9040 = vpow2.f32 %v5393_v45  ;;  %v11147_v22 = vpop.eup %9028 }
 0x328   : > { %v4839_v27 = vmul.f32 0.3275911, %v11111_v20  ;;  %v11136_v2 = vand.u32 2147483647, %v11114_v31  ;;  %v11139_v46 = vmul.f32 0.70710677, %v10549_v35  ;;  %v4928_v45 = vmul.f32 %v9027_v34, %v11039_v30 }
 0x329   : > { %v4958_v48 = vsub.f32 2.0, %v4926_v61  ;;  %v11141_v32 = vadd.f32 1.0, %v4837_v7  ;;  %v4842_v17 = vmul.f32 0.3275911, %v11122_v9  ;;  %v11145_v38 = vmul.f32 0.70710677, %v10563_v5 }
 0x32a   : > { %13954 = vst [vmem:[#allocation101_spill] sm:$0xff] %v11139_v46  ;;  %13956 = vst [vmem:[#allocation103_spill] sm:$0xff] %v11147_v22  ;;  %v4957_v21 = vsub.f32 2.0, %v4925_v15  ;;  %v5316_v10 = vsub.f32 0.0, %v11047_v11  ;;  %9042 = vrcp.f32 %v11128_v42  ;;  %v11152_v31 = vpop.eup %9030  ;;  %v11155_v61 = vmul.f32 0.5, %v10514_v18 }
 0x32b   : > { %13955 = vst [vmem:[#allocation102_spill] sm:$0xff] %v11145_v38  ;;  %13957 = vst [vmem:[#allocation104_spill] sm:$0xff] %v11152_v31  ;;  %v5345_v7 = vmul.f32 %v5313_v43, %v11042_v24  ;;  %9044 = vrcp.f32 %v11131_v0  ;;  %v11159_v5 = vadd.f32 1.0, %v4840_v49  ;;  %v9033_v35 = vpop.eup %9032  ;;  %v11161_v15 = vadd.f32 1.0, %v4839_v27 }
 0x32c   : > { %13958 = vst [vmem:[#allocation105_spill] sm:$0xff] %v11155_v61  ;;  %9046 = vpow2.f32 %v5399_v29  ;;  %v4841_v30 = vmul.f32 0.3275911, %v11136_v2  ;;  %v11165_v22 = vand.u32 2147483647, %v11139_v46  ;;  %v11167_v33 = vmul.f32 %v9019_v4, %v4958_v48 }
 0x32d   : > { %9048 = vrcp.f32 %v11141_v32  ;;  %v11170_v61 = vadd.f32 1.0, %v4842_v17  ;;  %v11173_v43 = vand.u32 2147483647, %v11145_v38  ;;  %v9035_v49 = vpop.eup %9034  ;;  %v11175_v24 = vmul.f32 %v9021_v25, %v4957_v21 }
 0x32e   : > { %13959 = vst [vmem:[#allocation106_spill] sm:$0xff] %v11167_v33  ;;  %v4960_v29 = vsub.f32 2.0, %v4928_v45  ;;  %v5348_v27 = vmul.f32 %v5316_v10, %v11047_v11  ;;  %v5315_v31 = vsub.f32 0.0, %v11071_v58  ;;  %v9037_v18 = vpop.eup %9036  ;;  %v4927_v46 = vmul.f32 %v9033_v35, %v11067_v26 }
 0x32f   : > { %13960 = vst [vmem:[#allocation107_spill] sm:$0xff] %v11175_v24  ;;  %v5397_v4 = vmul.f32 1.442695, %v5345_v7  ;;  %v5318_v48 = vsub.f32 0.0, %v11076_v28  ;;  %9050 = vrcp.f32 %v11159_v5  ;;  %v5317_v38 = vsub.f32 0.0, %v11091_v36 }
 0x330   : > { %v9039_v17 = vpop.eup %9038  ;;  %9052 = vrcp.f32 %v11161_v15  ;;  %v11184_v21 = vadd.f32 1.0, %v4841_v30  ;;  %v4844_v25 = vmul.f32 0.3275911, %v11165_v22  ;;  %v11188_v10 = vmul.f32 0.5, %v10522_v63 }
 0x331   : > { %v5320_v11 = vsub.f32 0.0, %v11105_v3  ;;  %9054 = vrcp.f32 %v11170_v61  ;;  %v4843_v26 = vmul.f32 0.3275911, %v11173_v43  ;;  %v11193_v45 = vpop.eup %9040  ;;  %v4930_v7 = vmul.f32 %v9035_v49, %v11083_v52 }
 0x332   : > { %13961 = vst [vmem:[#allocation108_spill] sm:$0xff] %v11188_v10  ;;  %13962 = vst [vmem:[#allocation109_spill] sm:$0xff] %v11193_v45  ;;  %v4929_v33 = vmul.f32 %v9037_v18, %v11088_v13  ;;  %v5403_v8 = vmul.f32 1.442695, %v5348_v27  ;;  %v5347_v30 = vmul.f32 %v5315_v31, %v11071_v58  ;;  %v11198_v55 = vmul.f32 %v9027_v34, %v4960_v29 }
 0x333   : > { %v4959_v59 = vsub.f32 2.0, %v4927_v46  ;;  %v4932_v10 = vmul.f32 %v9039_v17, %v11097_v51  ;;  %v5350_v63 = vmul.f32 %v5318_v48, %v11076_v28  ;;  %v5349_v37 = vmul.f32 %v5317_v38, %v11091_v36 }
 0x334   : > { %13963 = vst [vmem:[#allocation110_spill] sm:$0xff] %v11198_v55  ;;  %v9043_v6 = vpop.eup %9042  ;;  %v5319_v44 = vsub.f32 0.0, %v11111_v20  ;;  %9056 = vrcp.f32 %v11184_v21  ;;  %v11205_v52 = vadd.f32 1.0, %v4844_v25  ;;  %v5352_v58 = vmul.f32 %v5320_v11, %v11105_v3 }
 0x335   : > { %v9045_v13 = vpop.eup %9044  ;;  %9058 = vpow2.f32 %v5397_v4  ;;  %v5322_v34 = vsub.f32 0.0, %v11122_v9  ;;  %v11209_v31 = vadd.f32 1.0, %v4843_v26  ;;  %v4962_v28 = vsub.f32 2.0, %v4930_v7 }
 0x336   : > { %v11211_v51 = vpop.eup %9046  ;;  %v4961_v46 = vsub.f32 2.0, %v4929_v33  ;;  %9060 = vpow2.f32 %v5403_v8  ;;  %v5401_v38 = vmul.f32 1.442695, %v5347_v30  ;;  %v11213_v29 = vmul.f32 %v9033_v35, %v4959_v59 }
 0x337   : > { %13964 = vst [vmem:[#allocation111_spill] sm:$0xff] %v11211_v51  ;;  %v9049_v36 = vpop.eup %9048  ;;  %v4964_v27 = vsub.f32 2.0, %v4932_v10  ;;  %v4931_v48 = vmul.f32 %v9043_v6, %v11128_v42  ;;  %v5407_v25 = vmul.f32 1.442695, %v5350_v63  ;;  %v4934_v4 = vmul.f32 %v9045_v13, %v11131_v0 }
 0x338   : > { %13965 = vst [vmem:[#allocation112_spill] sm:$0xff] %v11213_v29  ;;  %v5405_v3 = vmul.f32 1.442695, %v5349_v37  ;;  %v5351_v11 = vmul.f32 %v5319_v44, %v11111_v20  ;;  %9062 = vrcp.f32 %v11205_v52  ;;  %v5411_v51 = vmul.f32 1.442695, %v5352_v58 }
 0x339   : > { %v9051_v26 = vpop.eup %9050  ;;  %v5354_v33 = vmul.f32 %v5322_v34, %v11122_v9  ;;  %v5321_v8 = vsub.f32 0.0, %v11136_v2  ;;  %9064 = vrcp.f32 %v11209_v31  ;;  %v11224_v59 = vmul.f32 %v9035_v49, %v4962_v28  ;;  %v13968_v9 = vld [vmem:[#allocation57_spill] sm:$0xff] }
 0x33a   : > { %v11222_v35 = vpop.eup %9052  ;;  %v11226_v42 = vmul.f32 %v9037_v18, %v4961_v46  ;;  %9066 = vpow2.f32 %v5401_v38  ;;  %v4933_v63 = vmul.f32 %v9049_v36, %v11141_v32  ;;  %v4963_v37 = vsub.f32 2.0, %v4931_v48 }
 0x33b   : > { %13966 = vst [vmem:[#allocation113_spill] sm:$0xff] %v11224_v59  ;;  %v11229_v44 = vpop.eup %9054  ;;  %9068 = vpow2.f32 %v5407_v25  ;;  %v5324_v20 = vsub.f32 0.0, %v11165_v22  ;;  %v5005_v0 = vmul.f32 1.0614054, %v13968_v9  ;;  %v4966_v10 = vsub.f32 2.0, %v4934_v4  ;;  %v13974_v4 = vld [vmem:[#allocation36_spill] sm:$0xff] }
 0x33c   : > { %13967 = vst [vmem:[#allocation114_spill] sm:$0xff] %v11226_v42  ;;  %9070 = vpow2.f32 %v5405_v3  ;;  %v4936_v7 = vmul.f32 %v9051_v26, %v11159_v5  ;;  %v5409_v30 = vmul.f32 1.442695, %v5351_v11  ;;  %v11234_v49 = vmul.f32 %v9039_v17, %v4964_v27  ;;  %v13972_v27 = vld [vmem:[#allocation58_spill] sm:$0xff] }
 0x33d   : > { %9072 = vpow2.f32 %v5411_v51  ;;  %v5415_v18 = vmul.f32 1.442695, %v5354_v33  ;;  %v5353_v58 = vmul.f32 %v5321_v8, %v11136_v2  ;;  %v4965_v34 = vsub.f32 2.0, %v4933_v63  ;;  %v13976_v8 = vld [vmem:[#allocation37_spill] sm:$0xff] }
 0x33e   : > { %13969 = vst [vmem:[#allocation57_spill] sm:$0xff] %v11234_v49  ;;  %v11237_v32 = vpop.eup %9056  ;;  %v4935_v28 = vmul.f32 %v11222_v35, %v11161_v15  ;;  %v4938_v46 = vmul.f32 %v11229_v44, %v11170_v61  ;;  %v5323_v38 = vsub.f32 0.0, %v11173_v43  ;;  %v11246_v5 = vmul.f32 %v9043_v6, %v4963_v37 }
 0x33f   : > { %v11244_v48 = vpop.eup %9058  ;;  %v5356_v17 = vmul.f32 %v5324_v20, %v11165_v22  ;;  %v5037_v51 = vadd.f32 -1.4531521, %v5005_v0  ;;  %v5008_v2 = vmul.f32 1.0614054, %v13972_v27  ;;  %vm4717_vm8 = vcmp.ge.f32.partialorder %v13974_v4, 0.0 }
 0x340   : > { %13970 = vst [vmem:[#allocation115_spill] sm:$0xff] %v11244_v48  ;;  %13971 = vst [vmem:[#allocation116_spill] sm:$0xff] %v11246_v5  ;;  %v11250_v25 = vpop.eup %9060  ;;  %v11253_v3 = vmul.f32 %v9045_v13, %v4966_v10  ;;  %v4968_v15 = vsub.f32 2.0, %v4936_v7  ;;  %9074 = vpow2.f32 %v5409_v30  ;;  %v5007_v61 = vmul.f32 1.0614054, %v10884_v54  ;;  %v13978_v10 = vld [vmem:[#allocation38_spill] sm:$0xff] }
 0x341   : > { %13973 = vst [vmem:[#allocation58_spill] sm:$0xff] %v11250_v25  ;;  %9076 = vpow2.f32 %v5415_v18  ;;  %v4937_v6 = vmul.f32 %v11237_v32, %v11184_v21  ;;  %v5413_v11 = vmul.f32 1.442695, %v5353_v58  ;;  %v5010_v22 = vmul.f32 1.0614054, %v10924_v50  ;;  %v13979_v7 = vld [vmem:[#allocation39_spill] sm:$0xff] }
 0x342   : > { %13975 = vst [vmem:[#allocation36_spill] sm:$0xff] %v11253_v3  ;;  %v11259_v33 = vpop.eup %9062  ;;  %vm4720_vm9 = vcmp.ge.f32.partialorder %v13976_v8, 0.0  ;;  %v11262_v63 = vmul.f32 %v9049_v36, %v4965_v34  ;;  %v4967_v37 = vsub.f32 2.0, %v4935_v28  ;;  %v4970_v13 = vsub.f32 2.0, %v4938_v46  ;;  %v13980_v21 = vld [vmem:[#allocation40_spill] sm:$0xff]  ;;  %v13982_v34 = vld [vmem:[#allocation41_spill] sm:$0xff] }
 0x343   : > { %v5355_v20 = vmul.f32 %v5323_v38, %v11173_v43  ;;  %v11265_v0 = vpop.eup %9064  ;;  %vm4719_vm10 = vcmp.ge.f32.partialorder %v13978_v10, 0.0  ;;  %vm4722_vm11 = vcmp.ge.f32.partialorder %v13979_v7, 0.0  ;;  %vm4721_vm12 = vcmp.ge.f32.partialorder %v13980_v21, 0.0  ;;  %v13986_v3 = vld [vmem:[#allocation42_spill] sm:$0xff] }
 0x344   : > { %13977 = vst [vmem:[#allocation37_spill] sm:$0xff] %v11262_v63  ;;  %v5419_v30 = vmul.f32 1.442695, %v5356_v17  ;;  %v5069_v18 = vmul.f32 %v5037_v51, %v13968_v9  ;;  %v5040_v58 = vadd.f32 -1.4531521, %v5008_v2  ;;  %v11272_v36 = vpop.eup %9066  ;;  %vm4724_vm13 = vcmp.ge.f32.partialorder %v13982_v34, 0.0 }
 0x345   : > { %v5009_v25 = vmul.f32 1.0614054, %v10931_v53  ;;  %13981 = vst [vmem:[#allocation38_spill] sm:$0xff] %v11272_v36  ;;  %v11275_v28 = vmul.f32 %v9051_v26, %v4968_v15  ;;  %v5039_v43 = vadd.f32 -1.4531521, %v5007_v61  ;;  %v11279_v48 = vpop.eup %9068  ;;  %v4969_v45 = vsub.f32 2.0, %v4937_v6 }
 0x346   : > { %v5011_v46 = vmul.f32 1.0614054, %v10955_v47  ;;  %v5012_v38 = vmul.f32 1.0614054, %v10939_v12  ;;  %13984 = vst [vmem:[#allocation40_spill] sm:$0xff] %v11279_v48  ;;  %9078 = vpow2.f32 %v5413_v11  ;;  %v11282_v2 = vpop.eup %9070  ;;  %vm4723_vm14 = vcmp.ge.f32.partialorder %v13986_v3, 0.0 }
 0x347   : > { %13983 = vst [vmem:[#allocation39_spill] sm:$0xff] %v11275_v28  ;;  %v5042_v17 = vadd.f32 -1.4531521, %v5010_v22  ;;  %v5013_v51 = vmul.f32 1.0614054, %v10988_v57  ;;  %13985 = vst [vmem:[#allocation41_spill] sm:$0xff] %v11282_v2  ;;  %v11286_v36 = vmul.f32 %v11222_v35, %v4967_v37  ;;  %v11290_v26 = vmul.f32 %v11259_v33, %v11205_v52  ;;  %v11296_v6 = vpop.eup %9072 }
 0x348   : > { %v11294_v15 = vmul.f32 %v11265_v0, %v11209_v31  ;;  %v5417_v61 = vmul.f32 1.442695, %v5355_v20  ;;  %13988 = vst [vmem:[#allocation117_spill] sm:$0xff] %v11296_v6  ;;  %v13989_v11 = vld [vmem:[#allocation44_spill] sm:$0xff]  ;;  %v13990_v22 = vld [vmem:[#allocation47_spill] sm:$0xff]  ;;  %v11301_v48 = vmul.f32 %v11229_v44, %v4970_v13  ;;  %v5072_v37 = vmul.f32 %v5040_v58, %v13972_v27  ;;  %v13992_v52 = vld [vmem:[#allocation50_spill] sm:$0xff] }
 0x349   : > { %13987 = vst [vmem:[#allocation42_spill] sm:$0xff] %v11286_v36  ;;  %vm4726_vm15 = vcmp.ge.f32.partialorder %v13989_v11, 0.0  ;;  %vm4725_vm1 = vcmp.ge.f32.partialorder %v13990_v22, 0.0  ;;  %v5101_v35 = vadd.f32 1.4214138, %v5069_v18  ;;  %vm4728_vm2 = vcmp.ge.f32.partialorder %v13992_v52, 0.0 }
 0x34a   : > { %13991 = vst [vmem:[#allocation44_spill] sm:$0xff] %v11301_v48  ;;  %v5041_v2 = vadd.f32 -1.4531521, %v5009_v25  ;;  %v5071_v28 = vmul.f32 %v5039_v43, %v10884_v54  ;;  %v5043_v31 = vadd.f32 -1.4531521, %v5011_v46  ;;  %v11308_v6 = vmul.f32 %v11237_v32, %v4969_v45  ;;  %v11311_v13 = vpop.eup %9074  ;;  %v13996_v46 = vld [vmem:[#allocation51_spill] sm:$0xff] }
 0x34b   : > { %v5044_v36 = vadd.f32 -1.4531521, %v5012_v38  ;;  %v5014_v20 = vmul.f32 1.0614054, %v10973_v41  ;;  %9080 = vpow2.f32 %v5419_v30  ;;  %v5074_v63 = vmul.f32 %v5042_v17, %v10924_v50  ;;  %13994 = vst [vmem:[#allocation50_spill] sm:$0xff] %v11311_v13  ;;  %v11316_v43 = vpop.eup %9076  ;;  %v13997_v38 = vld [vmem:[#allocation52_spill] sm:$0xff] }
 0x34c   : > { %13993 = vst [vmem:[#allocation47_spill] sm:$0xff] %v11308_v6  ;;  %v5045_v44 = vadd.f32 -1.4531521, %v5013_v51  ;;  %9082 = vpow2.f32 %v5417_v61  ;;  %v5015_v58 = vmul.f32 1.0614054, %v11003_v1  ;;  %13995 = vst [vmem:[#allocation118_spill] sm:$0xff] %v11316_v43  ;;  %v5133_v30 = vmul.f32 %v5101_v35, %v13968_v9 }
 0x34d   : > { %vm4727_vm3 = vcmp.ge.f32.partialorder %v13996_v46, 0.0  ;;  %vm4730_vm4 = vcmp.ge.f32.partialorder %v13997_v38, 0.0  ;;  %v13998_v45 = vmov -1.0   ;;  %v5104_v17 = vadd.f32 1.4214138, %v5072_v37  ;;  %v13999_v25 = vld [vmem:[#allocation53_spill] sm:$0xff] }
 0x34e   : > { %v11323_v32 = vsel %vm4717_vm8, 1.0, %v13998_v45  ;;  %v5073_v51 = vmul.f32 %v5041_v2, %v10931_v53  ;;  %vm4729_vm5 = vcmp.ge.f32.partialorder %v13999_v25, 0.0  ;;  %v5103_v61 = vadd.f32 1.4214138, %v5071_v28  ;;  %v14001_v37 = vld [vmem:[#allocation59_spill] sm:$0xff] }
 0x34f   : > { %v5075_v18 = vmul.f32 %v5043_v31, %v10955_v47  ;;  %v5076_v43 = vmul.f32 %v5044_v36, %v10939_v12  ;;  %v5046_v13 = vadd.f32 -1.4531521, %v5014_v20  ;;  %v11333_v48 = vsel %vm4720_vm9, 1.0, %v13998_v45 }
 0x350   : > { %v5106_v4 = vadd.f32 1.4214138, %v5074_v63  ;;  %v5077_v6 = vmul.f32 %v5045_v44, %v10988_v57  ;;  %v5016_v35 = vmul.f32 1.0614054, %v10998_v40  ;;  %v11340_v2 = vsel %vm4719_vm10, 1.0, %v13998_v45  ;;  %v11352_v28 = vpop.eup %9078 }
 0x351   : > { %v11345_v36 = vsel %vm4721_vm12, 1.0, %v13998_v45  ;;  %v11350_v8 = vsel %vm4722_vm11, 1.0, %v13998_v45  ;;  %v5047_v63 = vadd.f32 -1.4531521, %v5015_v58  ;;  %14000 = vst [vmem:[#allocation51_spill] sm:$0xff] %v11352_v28  ;;  %vm4732_vm6 = vcmp.ge.f32.partialorder %v14001_v37, 0.0 }
 0x352   : > { %v5165_v31 = vadd.f32 -0.28449672, %v5133_v30  ;;  %v5136_v10 = vmul.f32 %v5104_v17, %v13972_v27  ;;  %v5105_v20 = vadd.f32 1.4214138, %v5073_v51  ;;  %v11359_v21 = vsel %vm4724_vm13, 1.0, %v13998_v45 }
 0x353   : > { %vm4731_vm7 = vcmp.ge.f32.partialorder %v10917_v56, 0.0  ;;  %v5135_v7 = vmul.f32 %v5103_v61, %v10884_v54  ;;  %v5107_v44 = vadd.f32 1.4214138, %v5075_v18  ;;  %v5108_v49 = vadd.f32 1.4214138, %v5076_v43 }
 0x354   : > { %v5078_v58 = vmul.f32 %v5046_v13, %v10973_v41  ;;  %v5138_v28 = vmul.f32 %v5106_v4, %v10924_v50  ;;  %v11368_v30 = vsel %vm4723_vm14, 1.0, %v13998_v45  ;;  %v5109_v17 = vadd.f32 1.4214138, %v5077_v6 }
 0x355   : > { %v5048_v51 = vadd.f32 -1.4531521, %v5016_v35  ;;  %v11373_v34 = vsel %vm4725_vm1, 1.0, %v13998_v45  ;;  %v11378_v18 = vsel %vm4726_vm15, 1.0, %v13998_v45  ;;  %v5079_v13 = vmul.f32 %v5047_v63, %v11003_v1  ;;  %v11382_v61 = vpop.eup %9080 }
 0x356   : > { %v5017_v43 = vmul.f32 1.0614054, %v11028_v23  ;;  %14002 = vst [vmem:[#allocation52_spill] sm:$0xff] %v11382_v61  ;;  %v5197_v3 = vmul.f32 %v5165_v31, %v13968_v9  ;;  %v5168_v6 = vadd.f32 -0.28449672, %v5136_v10  ;;  %v5137_v4 = vmul.f32 %v5105_v20, %v10931_v53  ;;  %v11391_v35 = vpop.eup %9082 }
 0x357   : > { %v11389_v22 = vsel %vm4728_vm2, 1.0, %v13998_v45  ;;  %14003 = vst [vmem:[#allocation53_spill] sm:$0xff] %v11391_v35  ;;  %vm4734_vm8 = vcmp.ge.f32.partialorder %v10951_v16, 0.0  ;;  %v5167_v11 = vadd.f32 -0.28449672, %v5135_v7  ;;  %v5139_v63 = vmul.f32 %v5107_v44, %v10955_v47 }
 0x358   : > { %v5140_v5 = vmul.f32 %v5108_v49, %v10939_v12  ;;  %v5110_v61 = vadd.f32 1.4214138, %v5078_v58  ;;  %v5170_v59 = vadd.f32 -0.28449672, %v5138_v28  ;;  %v5141_v31 = vmul.f32 %v5109_v17, %v10988_v57 }
 0x359   : > { %v5080_v10 = vmul.f32 %v5048_v51, %v10998_v40  ;;  %v5018_v20 = vmul.f32 1.0614054, %v11026_v14  ;;  %v11402_v52 = vsel %vm4727_vm3, 1.0, %v13998_v45  ;;  %v5111_v35 = vadd.f32 1.4214138, %v5079_v13 }
 0x35a   : > { %v5049_v42 = vadd.f32 -1.4531521, %v5017_v43  ;;  %v11407_v7 = vsel %vm4730_vm4, 1.0, %v13998_v45  ;;  %vm4733_vm9 = vcmp.ge.f32.partialorder %v10958_v39, 0.0  ;;  %v5229_v49 = vadd.f32 0.2548296, %v5197_v3 }
 0x35b   : > { %14004 = vst [vmem:[#allocation59_spill] sm:$0xff] %v11407_v7  ;;  %v5200_v28 = vmul.f32 %v5168_v6, %v13972_v27  ;;  %v5169_v44 = vadd.f32 -0.28449672, %v5137_v4  ;;  %v11414_v58 = vsel %vm4729_vm5, 1.0, %v13998_v45  ;;  %v5199_v46 = vmul.f32 %v5167_v11, %v10884_v54 }
 0x35c   : > { %v5171_v17 = vadd.f32 -0.28449672, %v5139_v63  ;;  %v5172_v51 = vadd.f32 -0.28449672, %v5140_v5  ;;  %v5142_v13 = vmul.f32 %v5110_v61, %v10973_v41  ;;  %v5202_v38 = vmul.f32 %v5170_v59, %v10924_v50 }
 0x35d   : > { %v5173_v43 = vadd.f32 -0.28449672, %v5141_v31  ;;  %v5112_v55 = vadd.f32 1.4214138, %v5080_v10  ;;  %v5050_v7 = vadd.f32 -1.4531521, %v5018_v20  ;;  %v5143_v3 = vmul.f32 %v5111_v35, %v11003_v1 }
 0x35e   : > { %v5081_v6 = vmul.f32 %v5049_v42, %v11028_v23  ;;  %v5019_v4 = vmul.f32 1.0614054, %v11124_v60  ;;  %v11425_v25 = vsel %vm4732_vm6, 1.0, %v13998_v45  ;;  %v5261_v5 = vmul.f32 %v5229_v49, %v13968_v9 }
 0x35f   : > { %14005 = vst [vmem:[#allocation119_spill] sm:$0xff] %v11425_v25  ;;  %v5232_v11 = vadd.f32 0.2548296, %v5200_v28  ;;  %v5201_v61 = vmul.f32 %v5169_v44, %v10931_v53  ;;  %v11432_v59 = vsel %vm4731_vm7, 1.0, %v13998_v45  ;;  %v5231_v35 = vadd.f32 0.2548296, %v5199_v46 }
 0x360   : > { %14006 = vst [vmem:[#allocation120_spill] sm:$0xff] %v11432_v59  ;;  %v5203_v42 = vmul.f32 %v5171_v17, %v10955_v47  ;;  %v5204_v63 = vmul.f32 %v5172_v51, %v10939_v12  ;;  %v5174_v31 = vadd.f32 -0.28449672, %v5142_v13  ;;  %v5234_v10 = vadd.f32 0.2548296, %v5202_v38  ;;  %v14009_v25 = vld [vmem:[#allocation55_spill] sm:$0xff] }
 0x361   : > { %v5205_v37 = vmul.f32 %v5173_v43, %v10988_v57  ;;  %v5144_v20 = vmul.f32 %v5112_v55, %v10998_v40  ;;  %v5082_v9 = vmul.f32 %v5050_v7, %v11026_v14  ;;  %v14007_v49 = vsub.f32 2.0, %v11290_v26 }
 0x362   : > { %v5175_v56 = vadd.f32 -0.28449672, %v5143_v3  ;;  %v5113_v44 = vadd.f32 1.4214138, %v5081_v6  ;;  %v5051_v46 = vadd.f32 -1.4531521, %v5019_v4  ;;  %v5421_v17 = vmul.f32 %v14009_v25, %v5261_v5 }
 0x363   : > { %v11442_v28 = vmul.f32 %v11259_v33, %v14007_v49  ;;  %v5264_v51 = vmul.f32 %v5232_v11, %v13972_v27  ;;  %v5233_v13 = vadd.f32 0.2548296, %v5201_v61  ;;  %v11449_v38 = vsel %vm4734_vm8, 1.0, %v13998_v45  ;;  %v14012_v11 = vld [vmem:[#allocation60_spill] sm:$0xff] }
 0x364   : > { %14010 = vst [vmem:[#allocation55_spill] sm:$0xff] %v11449_v38  ;;  %v5263_v55 = vmul.f32 %v5231_v35, %v10884_v54  ;;  %v5235_v7 = vadd.f32 0.2548296, %v5203_v42  ;;  %v5236_v26 = vadd.f32 0.2548296, %v5204_v63  ;;  %v5206_v33 = vmul.f32 %v5174_v31, %v10973_v41  ;;  %v14013_v42 = vld [vmem:[#allocation61_spill] sm:$0xff] }
 0x365   : > { %14008 = vst [vmem:[#allocation121_spill] sm:$0xff] %v11442_v28  ;;  %v5266_v43 = vmul.f32 %v5234_v10, %v10924_v50  ;;  %v5237_v3 = vadd.f32 0.2548296, %v5205_v37  ;;  %v5176_v6 = vadd.f32 -0.28449672, %v5144_v20  ;;  %v5207_v25 = vmul.f32 %v5175_v56, %v11003_v1  ;;  %v14014_v20 = vld [vmem:[#allocation64_spill] sm:$0xff] }
 0x366   : > { %v5114_v4 = vadd.f32 1.4214138, %v5082_v9  ;;  %v5145_v27 = vmul.f32 %v5113_v44, %v11028_v23  ;;  %v5083_v5 = vmul.f32 %v5051_v46, %v11124_v60  ;;  %v11460_v16 = vsel %vm4733_vm9, 1.0, %v13998_v45 }
 0x367   : > { %14011 = vst [vmem:[#allocation122_spill] sm:$0xff] %v11460_v16  ;;  %v5453_v54 = vsub.f32 1.0, %v5421_v17  ;;  %v5424_v61 = vmul.f32 %v14012_v11, %v5264_v51  ;;  %v5265_v35 = vmul.f32 %v5233_v13, %v10931_v53  ;;  %v5020_v50 = vmul.f32 1.0614054, %v11073_v19  ;;  %v14017_v13 = vld [vmem:[#allocation65_spill] sm:$0xff] }
 0x368   : > { %v5423_v63 = vmul.f32 %v14013_v42, %v5263_v55  ;;  %v5267_v31 = vmul.f32 %v5235_v7, %v10955_v47  ;;  %v5268_v10 = vmul.f32 %v5236_v26, %v10939_v12  ;;  %v5238_v37 = vadd.f32 0.2548296, %v5206_v33  ;;  %v14018_v33 = vld [vmem:[#allocation67_spill] sm:$0xff] }
 0x369   : > { %v5426_v9 = vmul.f32 %v14014_v20, %v5266_v43  ;;  %v5269_v39 = vmul.f32 %v5237_v3, %v10988_v57  ;;  %v5208_v49 = vmul.f32 %v5176_v6, %v10998_v40  ;;  %v5146_v56 = vmul.f32 %v5114_v4, %v11026_v14  ;;  %v14019_v6 = vld [vmem:[#allocation74_spill] sm:$0xff] }
 0x36a   : > { %v14015_v44 = vsub.f32 2.0, %v11294_v15  ;;  %v5239_v46 = vadd.f32 0.2548296, %v5207_v25  ;;  %v5177_v17 = vadd.f32 -0.28449672, %v5145_v27  ;;  %v5456_v47 = vsub.f32 1.0, %v5424_v61 }
 0x36b   : > { %v5115_v51 = vadd.f32 1.4214138, %v5083_v5  ;;  %v5425_v12 = vmul.f32 %v14017_v13, %v5265_v35  ;;  %v5052_v55 = vadd.f32 -1.4531521, %v5020_v50  ;;  %v5021_v7 = vmul.f32 1.0614054, %v11175_v24 }
 0x36c   : > { %v11475_v53 = vmul.f32 %v11265_v0, %v14015_v44  ;;  %v5455_v26 = vsub.f32 1.0, %v5423_v63  ;;  %v5427_v57 = vmul.f32 %v10971_v62, %v5267_v31  ;;  %v5428_v43 = vmul.f32 %v14018_v33, %v5268_v10  ;;  %v14020_v10 = vld [vmem:[#allocation73_spill] sm:$0xff] }
 0x36d   : > { %v5270_v3 = vmul.f32 %v5238_v37, %v10973_v41  ;;  %v5458_v15 = vsub.f32 1.0, %v5426_v9  ;;  %v5429_v0 = vmul.f32 %v14019_v6, %v5269_v39  ;;  %v5240_v4 = vadd.f32 0.2548296, %v5208_v49  ;;  %v14021_v39 = vld [vmem:[#allocation82_spill] sm:$0xff] }
 0x36e   : > { %14016 = vst [vmem:[#allocation60_spill] sm:$0xff] %v11475_v53  ;;  %v5178_v25 = vadd.f32 -0.28449672, %v5146_v56  ;;  %v5485_v27 = vmul.f32 %v5453_v54, %v11323_v32  ;;  %v5271_v5 = vmul.f32 %v5239_v46, %v11003_v1  ;;  %v5209_v11 = vmul.f32 %v5177_v17, %v11028_v23 }
 0x36f   : > { %v5147_v61 = vmul.f32 %v5115_v51, %v11124_v60  ;;  %v5488_v35 = vmul.f32 %v5456_v47, %v11333_v48  ;;  %v5457_v62 = vsub.f32 1.0, %v5425_v12  ;;  %v5084_v50 = vmul.f32 %v5052_v55, %v11073_v19  ;;  %v14022_v55 = vld [vmem:[#allocation80_spill] sm:$0xff] }
 0x370   : > { %v5053_v42 = vadd.f32 -1.4531521, %v5021_v7  ;;  %v5487_v41 = vmul.f32 %v5455_v26, %v11340_v2  ;;  %v5459_v63 = vsub.f32 1.0, %v5427_v57  ;;  %v5460_v31 = vsub.f32 1.0, %v5428_v43  ;;  %v14023_v57 = vld [vmem:[#allocation43_spill] sm:$0xff] }
 0x371   : > { %v5430_v37 = vmul.f32 %v14020_v10, %v5270_v3  ;;  %v5490_v32 = vmul.f32 %v5458_v15, %v11350_v8  ;;  %v5461_v54 = vsub.f32 1.0, %v5429_v0  ;;  %v5272_v1 = vmul.f32 %v5240_v4, %v10998_v40  ;;  %v14025_v15 = vld [vmem:[#allocation45_spill] sm:$0xff]  ;;  %v14027_v4 = vld [vmem:[#allocation46_spill] sm:$0xff] }
 0x372   : > { %v5210_v20 = vmul.f32 %v5178_v25, %v11026_v14  ;;  %v5517_v9 = vadd.f32 1.0, %v5485_v27  ;;  %v5431_v48 = vmul.f32 %v14021_v39, %v5271_v5  ;;  %v5241_v49 = vadd.f32 0.2548296, %v5209_v11 }
 0x373   : > { %v5179_v56 = vadd.f32 -0.28449672, %v5147_v61  ;;  %v5520_v44 = vadd.f32 1.0, %v5488_v35  ;;  %v5489_v46 = vmul.f32 %v5457_v62, %v11345_v36  ;;  %v5116_v2 = vadd.f32 1.4214138, %v5084_v50  ;;  %v14029_v61 = vld [vmem:[#allocation48_spill] sm:$0xff] }
 0x374   : > { %v5085_v17 = vmul.f32 %v5053_v42, %v11175_v24  ;;  %v5519_v51 = vadd.f32 1.0, %v5487_v41  ;;  %v5491_v47 = vmul.f32 %v5459_v63, %v11368_v30  ;;  %v5492_v8 = vmul.f32 %v5460_v31, %v11359_v21  ;;  %v14031_v31 = vld [vmem:[#allocation86_spill] sm:$0xff] }
 0x375   : > { %v5462_v13 = vsub.f32 1.0, %v5430_v37  ;;  %v5522_v40 = vadd.f32 1.0, %v5490_v32  ;;  %v5493_v12 = vmul.f32 %v5461_v54, %v11373_v34  ;;  %v5432_v7 = vmul.f32 %v14022_v55, %v5272_v1  ;;  %v14032_v32 = vld [vmem:[#allocation49_spill] sm:$0xff] }
 0x376   : > { %v5242_v26 = vadd.f32 0.2548296, %v5210_v20  ;;  %v11502_v33 = vmul.f32 %v5517_v9, %v14023_v57  ;;  %v5463_v43 = vsub.f32 1.0, %v5431_v48  ;;  %v5273_v36 = vmul.f32 %v5241_v49, %v11028_v23  ;;  %v14034_v9 = vld [vmem:[#allocation56_spill] sm:$0xff]  ;;  %v14036_v48 = vld [vmem:[#allocation54_spill] sm:$0xff] }
 0x377   : > { %v5211_v3 = vmul.f32 %v5179_v56, %v11124_v60  ;;  %v11507_v6 = vmul.f32 %v5520_v44, %v14025_v15  ;;  %v5521_v30 = vadd.f32 1.0, %v5489_v46  ;;  %v5148_v21 = vmul.f32 %v5116_v2, %v11073_v19  ;;  %v14038_v46 = vld [vmem:[#allocation63_spill] sm:$0xff] }
 0x378   : > { %14024 = vst [vmem:[#allocation61_spill] sm:$0xff] %v11502_v33  ;;  %v5117_v0 = vadd.f32 1.4214138, %v5085_v17  ;;  %v11511_v34 = vmul.f32 %v5519_v51, %v14027_v4  ;;  %v5523_v25 = vadd.f32 1.0, %v5491_v47  ;;  %v5524_v27 = vadd.f32 1.0, %v5492_v8  ;;  %v14040_v51 = vld [vmem:[#allocation84_spill] sm:$0xff] }
 0x379   : > { %14026 = vst [vmem:[#allocation64_spill] sm:$0xff] %v11507_v6  ;;  %v5494_v5 = vmul.f32 %v5462_v13, %v11378_v18  ;;  %v11517_v23 = vmul.f32 %v5522_v40, %v14029_v61  ;;  %v5525_v35 = vadd.f32 1.0, %v5493_v12  ;;  %v5464_v62 = vsub.f32 1.0, %v5432_v7  ;;  %v14044_v61 = vld [vmem:[#allocation68_spill] sm:$0xff] }
 0x37a   : > { %14028 = vst [vmem:[#allocation65_spill] sm:$0xff] %v11511_v34  ;;  %v5274_v50 = vmul.f32 %v5242_v26, %v11026_v14  ;;  %v5495_v63 = vmul.f32 %v5463_v43, %v11402_v52  ;;  %v5433_v10 = vmul.f32 %v14031_v31, %v5273_v36  ;;  %v5243_v37 = vadd.f32 0.2548296, %v5211_v3 }
 0x37b   : > { %14030 = vst [vmem:[#allocation67_spill] sm:$0xff] %v11517_v23  ;;  %v11531_v54 = vmul.f32 %v5521_v30, %v14032_v32  ;;  %v5180_v1 = vadd.f32 -0.28449672, %v5148_v21  ;;  %v5149_v20 = vmul.f32 %v5117_v0, %v11175_v24  ;;  %v11536_v39 = vmul.f32 %v5523_v25, %v14034_v9  ;;  %v14043_v30 = vld [vmem:[#allocation106_spill] sm:$0xff] }
 0x37c   : > { %v11539_v49 = vmul.f32 %v5524_v27, %v14036_v48  ;;  %v5526_v52 = vadd.f32 1.0, %v5494_v5  ;;  %v11545_v2 = vmul.f32 %v5525_v35, %v14038_v46  ;;  %v5496_v17 = vmul.f32 %v5464_v62, %v11389_v22  ;;  %v14041_v22 = vld [vmem:[#allocation62_spill] sm:$0xff] }
 0x37d   : > { %14033 = vst [vmem:[#allocation74_spill] sm:$0xff] %v11531_v54  ;;  %14035 = vst [vmem:[#allocation73_spill] sm:$0xff] %v11536_v39  ;;  %v5434_v47 = vmul.f32 %v14040_v51, %v5274_v50  ;;  %v5527_v40 = vadd.f32 1.0, %v5495_v63  ;;  %v5465_v12 = vsub.f32 1.0, %v5433_v10  ;;  %v5275_v55 = vmul.f32 %v5243_v37, %v11124_v60  ;;  %v14047_v50 = vld [vmem:[#allocation98_spill] sm:$0xff] }
 0x37e   : > { %14037 = vst [vmem:[#allocation82_spill] sm:$0xff] %v11539_v49  ;;  %14039 = vst [vmem:[#allocation80_spill] sm:$0xff] %v11545_v2  ;;  %v5212_v57 = vmul.f32 %v5180_v1, %v11073_v19  ;;  %v5181_v43 = vadd.f32 -0.28449672, %v5149_v20  ;;  %v11560_v15 = vmul.f32 %v5526_v52, %v14041_v22  ;;  %v5022_v21 = vmul.f32 1.0614054, %v14043_v30 }
 0x37f   : > { %v5528_v25 = vadd.f32 1.0, %v5496_v17  ;;  %v5466_v27 = vsub.f32 1.0, %v5434_v47  ;;  %v11569_v35 = vmul.f32 %v5527_v40, %v14044_v61  ;;  %v11572_v62 = vmul.f32 %v5465_v12, %v11414_v58  ;;  %v14052_v17 = vld [vmem:[#allocation66_spill] sm:$0xff]  ;;  %v14054_v40 = vld [vmem:[#allocation59_spill] sm:$0xff] }
 0x380   : > { %14042 = vst [vmem:[#allocation43_spill] sm:$0xff] %v11560_v15  ;;  %v11575_v63 = vmul.f32 %v14047_v50, %v5275_v55  ;;  %v11577_v37 = vadd.f32 0.2548296, %v5212_v57  ;;  %v11583_v1 = vmul.f32 %v5181_v43, %v11175_v24  ;;  %v11585_v20 = vadd.f32 -1.4531521, %v5022_v21  ;;  %v14057_v21 = vld [vmem:[#allocation110_spill] sm:$0xff] }
 0x381   : > { %14045 = vst [vmem:[#allocation45_spill] sm:$0xff] %v11569_v35  ;;  %14046 = vst [vmem:[#allocation46_spill] sm:$0xff] %v11572_v62  ;;  %v5023_v9 = vmul.f32 1.0614054, %v11213_v29  ;;  %v11594_v51 = vmul.f32 %v5528_v25, %v14052_v17  ;;  %v11602_v12 = vmul.f32 %v5466_v27, %v14054_v40  ;;  %v11616_v25 = vmul.f32 1.0614054, %v14057_v21 }
 0x382   : > { %14048 = vst [vmem:[#allocation48_spill] sm:$0xff] %v11575_v63  ;;  %14049 = vst [vmem:[#allocation86_spill] sm:$0xff] %v11577_v37 }
 0x383   : > { %14050 = vst [vmem:[#allocation49_spill] sm:$0xff] %v11583_v1  ;;  %14051 = vst [vmem:[#allocation56_spill] sm:$0xff] %v11585_v20  ;;  %v11613_v22 = vadd.f32 -1.4531521, %v5023_v9 }
 0x384   : > { %14053 = vst [vmem:[#allocation54_spill] sm:$0xff] %v11594_v51  ;;  %14055 = vst [vmem:[#allocation63_spill] sm:$0xff] %v11602_v12 }
 0x385   : > { %14056 = vst [vmem:[#allocation84_spill] sm:$0xff] %v11613_v22  ;;  %14058 = vst [vmem:[#allocation62_spill] sm:$0xff] %v11616_v25 }
 0x388   : > { %v11514_v11 = vpop.f32.mrb[32].mxu1 }
 0x389   : > { %v11521_v42 = vmul.f32 0.70710677, %v11514_v11  ;;  %v11523_v41 = vpop.f32.mrb[33].mxu1  ;;  %v11611_v43 = vmul.f32 0.5, %v11514_v11 }
 0x38a   : > { %v11528_v18 = vmul.f32 0.70710677, %v11523_v41 }
 0x38b   : > { %v3822_v14 = vand.u32 2147483647, %v11521_v42  ;;  %vm3758_vm10 = vcmp.ge.f32.partialorder %v11521_v42, 0.0 }
 0x38c   : > { %v3821_v56 = vand.u32 2147483647, %v11528_v18  ;;  %v11542_v44 = vpop.f32.mrb[34].mxu1  ;;  %vm3757_vm11 = vcmp.ge.f32.partialorder %v11528_v18, 0.0  ;;  %v11619_v27 = vsel %vm3758_vm10, 1.0, %v13998_v45  ;;  %v11622_v18 = vmul.f32 0.5, %v11523_v41 }
 0x38d   : > { %v3854_v8 = vmul.f32 0.3275911, %v3822_v14  ;;  %v11549_v13 = vpop.f32.mrb[35].mxu1  ;;  %v11553_v26 = vmul.f32 0.70710677, %v11542_v44  ;;  %v4334_v31 = vsub.f32 0.0, %v3822_v14 }
 0x38e   : > { %v3853_v7 = vmul.f32 0.3275911, %v3821_v56  ;;  %v11557_v3 = vmul.f32 0.70710677, %v11549_v13  ;;  %v4333_v58 = vsub.f32 0.0, %v3821_v56  ;;  %v11628_v11 = vsel %vm3757_vm11, 1.0, %v13998_v45 }
 0x38f   : > { %v3886_v36 = vadd.f32 1.0, %v3854_v8  ;;  %v3824_v4 = vand.u32 2147483647, %v11553_v26  ;;  %v4366_v55 = vmul.f32 %v4334_v31, %v3822_v14  ;;  %vm3760_vm12 = vcmp.ge.f32.partialorder %v11553_v26, 0.0 }
 0x390   : > { %v3885_v0 = vadd.f32 1.0, %v3853_v7  ;;  %v11564_v60 = vpop.f32.mrb[36].mxu1  ;;  %v11580_v32 = vand.u32 2147483647, %v11557_v3  ;;  %v4365_v14 = vmul.f32 %v4333_v58, %v3821_v56  ;;  %v11645_v40 = vmul.f32 0.5, %v11549_v13 }
 0x391   : > { %9084 = vrcp.f32 %v3886_v36  ;;  %v11566_v5 = vpop.f32.mrb[37].mxu1  ;;  %v3856_v10 = vmul.f32 0.3275911, %v3824_v4  ;;  %v11589_v52 = vmul.f32 0.70710677, %v11564_v60  ;;  %v4336_v31 = vsub.f32 0.0, %v3824_v4 }
 0x392   : > { %9086 = vrcp.f32 %v3885_v0  ;;  %v3855_v47 = vmul.f32 0.3275911, %v11580_v32  ;;  %v11599_v8 = vmul.f32 0.70710677, %v11566_v5  ;;  %v4399_v17 = vmul.f32 1.442695, %v4366_v55 }
 0x393   : > { %v3888_v48 = vadd.f32 1.0, %v3856_v10  ;;  %v11606_v7 = vand.u32 2147483647, %v11589_v52  ;;  %vm3759_vm13 = vcmp.ge.f32.partialorder %v11557_v3, 0.0  ;;  %v4397_v35 = vmul.f32 1.442695, %v4365_v14 }
 0x394   : > { %v11591_v46 = vpop.f32.mrb[38].mxu1  ;;  %v3887_v42 = vadd.f32 1.0, %v3855_v47  ;;  %v11631_v10 = vand.u32 2147483647, %v11599_v8  ;;  %v11642_v47 = vmul.f32 0.5, %v11542_v44  ;;  %v11656_v44 = vsel %vm3760_vm12, 1.0, %v13998_v45 }
 0x395   : > { %9088 = vrcp.f32 %v3888_v48  ;;  %v11608_v57 = vpop.f32.mrb[39].mxu1  ;;  %v3858_v61 = vmul.f32 0.3275911, %v11606_v7  ;;  %v11639_v56 = vmul.f32 0.70710677, %v11591_v46  ;;  %v4368_v13 = vmul.f32 %v4336_v31, %v3824_v4 }
 0x396   : > { %9090 = vrcp.f32 %v3887_v42  ;;  %v3857_v38 = vmul.f32 0.3275911, %v11631_v10  ;;  %v11651_v26 = vmul.f32 0.70710677, %v11608_v57  ;;  %v4335_v16 = vsub.f32 0.0, %v11580_v32 }
 0x397   : > { %v11636_v41 = vadd.f32 1.0, %v3858_v61  ;;  %v11666_v14 = vand.u32 2147483647, %v11639_v56  ;;  %v4403_v28 = vmul.f32 1.442695, %v4368_v13  ;;  %vm3762_vm14 = vcmp.ge.f32.partialorder %v11589_v52, 0.0 }
 0x398   : > { %v11625_v50 = vpop.f32.mrb[40].mxu1  ;;  %v11658_v2 = vadd.f32 1.0, %v3857_v38  ;;  %v11695_v13 = vsel %vm3762_vm14, 1.0, %v13998_v45  ;;  %vm3761_vm15 = vcmp.ge.f32.partialorder %v11599_v8, 0.0  ;;  %v11719_v19 = vmul.f32 0.5, %v11591_v46 }
 0x399   : > { %v11633_v9 = vpop.f32.mrb[41].mxu1  ;;  %9092 = vrcp.f32 %v11636_v41  ;;  %v3860_v31 = vmul.f32 0.3275911, %v11666_v14  ;;  %v4337_v8 = vsub.f32 0.0, %v11631_v10  ;;  %v11730_v22 = vmul.f32 0.5, %v11608_v57 }
 0x39a   : > { %9094 = vpow2.f32 %v4399_v17  ;;  %v11677_v17 = vand.u32 2147483647, %v11651_v26  ;;  %vm3764_vm1 = vcmp.ge.f32.partialorder %v11639_v56, 0.0  ;;  %vm3763_vm2 = vcmp.ge.f32.partialorder %v11651_v26, 0.0 }
 0x39b   : > { %v9085_v58 = vpop.eup %9084  ;;  %9096 = vrcp.f32 %v11658_v2  ;;  %v11800_v56 = vsel %vm3763_vm2, 1.0, %v13998_v45 }
 0x39c   : > { %v9087_v51 = vpop.eup %9086  ;;  %v3950_v55 = vmul.f32 %v9085_v58, %v3886_v36  ;;  %v11653_v61 = vpop.f32.mrb[42].mxu1  ;;  %v11663_v36 = vsel %vm3759_vm13, 1.0, %v13998_v45  ;;  %9098 = vpow2.f32 %v4397_v35  ;;  %v3892_v35 = vadd.f32 1.0, %v3860_v31 }
 0x39d   : > { %v3949_v15 = vmul.f32 %v9087_v51, %v3885_v0  ;;  %v11660_v3 = vpop.f32.mrb[43].mxu1  ;;  %v11670_v0 = vmul.f32 0.5, %v11564_v60 }
 0x39e   : > { %v3982_v49 = vsub.f32 2.0, %v3950_v55  ;;  %9100 = vrcp.f32 %v3892_v35 }
 0x39f   : > { %v3981_v39 = vsub.f32 2.0, %v3949_v15  ;;  %v9089_v38 = vpop.eup %9088  ;;  %9102 = vpow2.f32 %v4403_v28 }
 0x3a0   : > { %v11673_v4 = vmul.f32 %v9085_v58, %v3982_v49  ;;  %v11679_v55 = vpop.f32.mrb[44].mxu1  ;;  %v3952_v15 = vmul.f32 %v9089_v38, %v3888_v48  ;;  %v4338_v49 = vsub.f32 0.0, %v11606_v7  ;;  %v3859_v58 = vmul.f32 0.3275911, %v11677_v17  ;;  %v9091_v6 = vpop.eup %9090 }
 0x3a1   : > { %v11681_v23 = vmul.f32 %v9087_v51, %v3981_v39  ;;  %v11684_v60 = vpop.f32.mrb[45].mxu1  ;;  %v4367_v39 = vmul.f32 %v4335_v16, %v11580_v32  ;;  %v11692_v48 = vmul.f32 0.5, %v11566_v5  ;;  %v3951_v52 = vmul.f32 %v9091_v6, %v3887_v42 }
 0x3a2   : > { %v4046_v54 = vmul.f32 1.0614054, %v11673_v4  ;;  %v3984_v34 = vsub.f32 2.0, %v3952_v15  ;;  %v3891_v59 = vadd.f32 1.0, %v3859_v58  ;;  %v4370_v32 = vmul.f32 %v4338_v49, %v11606_v7 }
 0x3a3   : > { %v4045_v53 = vmul.f32 1.0614054, %v11681_v23  ;;  %v9093_v16 = vpop.eup %9092  ;;  %v4401_v58 = vmul.f32 1.442695, %v4367_v39 }
 0x3a4   : > { %v4078_v51 = vadd.f32 -1.4531521, %v4046_v54  ;;  %v11697_v33 = vpop.f32.mrb[46].mxu1  ;;  %v11699_v24 = vmul.f32 %v9089_v38, %v3984_v34  ;;  %v3983_v54 = vsub.f32 2.0, %v3951_v52  ;;  %9104 = vrcp.f32 %v3891_v59  ;;  %v9095_v34 = vpop.eup %9094 }
 0x3a5   : > { %v4077_v31 = vadd.f32 -1.4531521, %v4045_v53  ;;  %v11702_v15 = vpop.f32.mrb[47].mxu1  ;;  %v3954_v53 = vmul.f32 %v9093_v16, %v11636_v41  ;;  %v9097_v7 = vpop.eup %9096  ;;  %9106 = vpow2.f32 %v4401_v58 }
 0x3a6   : > { %v4110_v5 = vmul.f32 %v4078_v51, %v11673_v4  ;;  %v4048_v21 = vmul.f32 1.0614054, %v11699_v24  ;;  %v11709_v37 = vmul.f32 %v9091_v6, %v3983_v54  ;;  %v11714_v51 = vsel %vm3761_vm15, 1.0, %v13998_v45  ;;  %v9099_v41 = vpop.eup %9098 }
 0x3a7   : > { %v4109_v42 = vmul.f32 %v4077_v31, %v11681_v23  ;;  %v3986_v31 = vsub.f32 2.0, %v3954_v53  ;;  %v3953_v39 = vmul.f32 %v9097_v7, %v11658_v2 }
 0x3a8   : > { %v4142_v38 = vadd.f32 1.4214138, %v4110_v5  ;;  %v11716_v28 = vpop.f32.mrb[48].mxu1  ;;  %v4080_v52 = vadd.f32 -1.4531521, %v4048_v21  ;;  %v9101_v20 = vpop.eup %9100 }
 0x3a9   : > { %v4141_v49 = vadd.f32 1.4214138, %v4109_v42  ;;  %v4047_v6 = vmul.f32 1.0614054, %v11709_v37  ;;  %v11727_v25 = vmul.f32 %v9093_v16, %v3986_v31  ;;  %v4407_v21 = vmul.f32 1.442695, %v4370_v32 }
 0x3aa   : > { %v4174_v5 = vmul.f32 %v4142_v38, %v11673_v4  ;;  %v4112_v12 = vmul.f32 %v4080_v52, %v11699_v24  ;;  %v3985_v46 = vsub.f32 2.0, %v3953_v39  ;;  %v4369_v16 = vmul.f32 %v4337_v8, %v11631_v10 }
 0x3ab   : > { %v4173_v54 = vmul.f32 %v4141_v49, %v11681_v23  ;;  %v4079_v53 = vadd.f32 -1.4531521, %v4047_v6  ;;  %v4050_v2 = vmul.f32 1.0614054, %v11727_v25  ;;  %v9103_v6 = vpop.eup %9102  ;;  %9108 = vpow2.f32 %v4407_v21 }
 0x3ac   : > { %v4206_v42 = vadd.f32 -0.28449672, %v4174_v5  ;;  %v4144_v29 = vadd.f32 1.4214138, %v4112_v12  ;;  %v11735_v52 = vmul.f32 %v9097_v7, %v3985_v46  ;;  %v3956_v5 = vmul.f32 %v9101_v20, %v3892_v35 }
 0x3ad   : > { %v4205_v38 = vadd.f32 -0.28449672, %v4173_v54  ;;  %v4111_v49 = vmul.f32 %v4079_v53, %v11709_v37  ;;  %v4082_v57 = vadd.f32 -1.4531521, %v4050_v2 }
 0x3ae   : > { %v4238_v30 = vmul.f32 %v4206_v42, %v11673_v4  ;;  %v4176_v31 = vmul.f32 %v4144_v29, %v11699_v24  ;;  %v4049_v39 = vmul.f32 1.0614054, %v11735_v52  ;;  %v9105_v54 = vpop.eup %9104  ;;  %v3988_v53 = vsub.f32 2.0, %v3956_v5 }
 0x3af   : > { %v4237_v32 = vmul.f32 %v4205_v38, %v11681_v23  ;;  %v4143_v58 = vadd.f32 1.4214138, %v4111_v49  ;;  %v4114_v7 = vmul.f32 %v4082_v57, %v11727_v25  ;;  %v3955_v29 = vmul.f32 %v9105_v54, %v3891_v59  ;;  %v11744_v38 = vpop.f32.mrb[49].mxu1 }
 0x3b0   : > { %v4270_v12 = vadd.f32 0.2548296, %v4238_v30  ;;  %v4208_v1 = vadd.f32 -0.28449672, %v4176_v31  ;;  %v4081_v46 = vadd.f32 -1.4531521, %v4049_v39  ;;  %v11748_v2 = vmul.f32 %v9101_v20, %v3988_v53 }
 0x3b1   : > { %v4269_v42 = vadd.f32 0.2548296, %v4237_v32  ;;  %v4175_v8 = vmul.f32 %v4143_v58, %v11709_v37  ;;  %v4146_v21 = vadd.f32 1.4214138, %v4114_v7  ;;  %v4405_v57 = vmul.f32 1.442695, %v4369_v16 }
 0x3b2   : > { %v4302_v10 = vmul.f32 %v4270_v12, %v11673_v4  ;;  %v4240_v35 = vmul.f32 %v4208_v1, %v11699_v24  ;;  %v4113_v31 = vmul.f32 %v4081_v46, %v11735_v52  ;;  %v4052_v59 = vmul.f32 1.0614054, %v11748_v2  ;;  %v9107_v1 = vpop.eup %9106 }
 0x3b3   : > { %v4301_v30 = vmul.f32 %v4269_v42, %v11681_v23  ;;  %v4207_v32 = vadd.f32 -0.28449672, %v4175_v8  ;;  %v4178_v12 = vmul.f32 %v4146_v21, %v11727_v25  ;;  %v3987_v42 = vsub.f32 2.0, %v3955_v29 }
 0x3b4   : > { %v4462_v49 = vmul.f32 %v9095_v34, %v4302_v10  ;;  %v4272_v4 = vadd.f32 0.2548296, %v4240_v35  ;;  %v4145_v23 = vadd.f32 1.4214138, %v4113_v31  ;;  %v4084_v53 = vadd.f32 -1.4531521, %v4052_v59 }
 0x3b5   : > { %v4461_v5 = vmul.f32 %v9099_v41, %v4301_v30  ;;  %v4239_v39 = vmul.f32 %v4207_v32, %v11709_v37  ;;  %v4210_v34 = vadd.f32 -0.28449672, %v4178_v12  ;;  %v4340_v8 = vsub.f32 0.0, %v11666_v14  ;;  %v9109_v35 = vpop.eup %9108 }
 0x3b6   : > { %v4494_v58 = vsub.f32 1.0, %v4462_v49  ;;  %v4304_v20 = vmul.f32 %v4272_v4, %v11699_v24  ;;  %v4177_v10 = vmul.f32 %v4145_v23, %v11735_v52  ;;  %9110 = vpow2.f32 %v4405_v57 }
 0x3b7   : > { %v4493_v7 = vsub.f32 1.0, %v4461_v5  ;;  %v4271_v16 = vadd.f32 0.2548296, %v4239_v39  ;;  %v4242_v29 = vmul.f32 %v4210_v34, %v11727_v25  ;;  %v11762_v32 = vmul.f32 %v9105_v54, %v3987_v42  ;;  %v14059_v39 = vld [vmem:[#allocation4_spill] sm:$0xff] }
 0x3b8   : > { %v4526_v41 = vmul.f32 %v4494_v58, %v11619_v27  ;;  %v4464_v30 = vmul.f32 %v9103_v6, %v4304_v20  ;;  %v4209_v49 = vadd.f32 -0.28449672, %v4177_v10  ;;  %v4116_v4 = vmul.f32 %v4084_v53, %v11748_v2  ;;  %v11768_v6 = vpop.f32.mrb[50].mxu1 }
 0x3b9   : > { %v4525_v46 = vmul.f32 %v4493_v7, %v11628_v11  ;;  %v4303_v24 = vmul.f32 %v4271_v16, %v11709_v37  ;;  %v4274_v5 = vadd.f32 0.2548296, %v4242_v29  ;;  %v4372_v58 = vmul.f32 %v4340_v8, %v11666_v14 }
 0x3ba   : > { %v4558_v21 = vadd.f32 1.0, %v4526_v41  ;;  %v4496_v27 = vsub.f32 1.0, %v4464_v30  ;;  %v4241_v11 = vmul.f32 %v4209_v49, %v11735_v52  ;;  %v4148_v41 = vadd.f32 1.4214138, %v4116_v4 }
 0x3bb   : > { %v4557_v31 = vadd.f32 1.0, %v4525_v46  ;;  %v4463_v59 = vmul.f32 %v9107_v1, %v4303_v24  ;;  %v4306_v54 = vmul.f32 %v4274_v5, %v11727_v25  ;;  %v14060_v1 = vld [vmem:[#allocation5_spill] sm:$0xff]  ;;  %v3734_v25 = vmul.f32 0.70710677, %v11625_v50 }
 0x3bc   : > { %v4590_v12 = vmul.f32 %v4558_v21, %v11611_v43  ;;  %v4528_v37 = vmul.f32 %v4496_v27, %v11656_v44  ;;  %v4273_v7 = vadd.f32 0.2548296, %v4241_v11  ;;  %v4051_v43 = vmul.f32 1.0614054, %v11762_v32 }
 0x3bd   : > { %v4589_v57 = vmul.f32 %v4557_v31, %v11622_v18  ;;  %v4495_v42 = vsub.f32 1.0, %v4463_v59  ;;  %v4466_v53 = vmul.f32 %v9109_v35, %v4306_v54  ;;  %v4339_v44 = vsub.f32 0.0, %v11677_v17  ;;  %v14061_v31 = vld [vmem:[#allocation6_spill] sm:$0xff]  ;;  %v14062_v54 = vld [vmem:[#allocation7_spill] sm:$0xff] }
 0x3be   : > { %v4622_v23 = vmul.f32 %v14059_v39, %v4590_v12  ;;  %v4560_v34 = vadd.f32 1.0, %v4528_v37  ;;  %v4305_v8 = vmul.f32 %v4273_v7, %v11735_v52  ;;  %v4411_v46 = vmul.f32 1.442695, %v4372_v58 }
 0x3bf   : > { %v4621_v20 = vmul.f32 %v14060_v1, %v4589_v57  ;;  %v4527_v18 = vmul.f32 %v4495_v42, %v11663_v36  ;;  %v4498_v21 = vsub.f32 1.0, %v4466_v53  ;;  %v11787_v35 = vsel %vm3764_vm1, 1.0, %v13998_v45  ;;  %v11789_v36 = vpop.f32.mrb[51].mxu1 }
 0x3c0   : > { %v5615_v16 = vmul.f32 0.70710677, %v4622_v23  ;;  %v4592_v14 = vmul.f32 %v4560_v34, %v11642_v47  ;;  %v9111_v24 = vpop.eup %9110  ;;  %v4180_v47 = vmul.f32 %v4148_v41, %v11748_v2  ;;  %v4083_v52 = vadd.f32 -1.4531521, %v4051_v43 }
 0x3c1   : > { %v11780_v10 = vmul.f32 0.70710677, %v4621_v20  ;;  %v4559_v29 = vadd.f32 1.0, %v4527_v18  ;;  %v4371_v12 = vmul.f32 %v4339_v44, %v11677_v17  ;;  %v4465_v11 = vmul.f32 %v9111_v24, %v4305_v8 }
 0x3c2   : > { %v5711_v30 = vand.u32 2147483647, %v5615_v16  ;;  %v11793_v27 = vmul.f32 %v14061_v31, %v4592_v14  ;;  %9112 = vpow2.f32 %v4411_v46  ;;  %vm3766_vm3 = vcmp.ge.f32.partialorder %v3734_v25, 0.0 }
 0x3c3   : > { %v5710_v49 = vand.u32 2147483647, %v11780_v10  ;;  %v4591_v4 = vmul.f32 %v4559_v29, %v11645_v40  ;;  %v4530_v40 = vmul.f32 %v4498_v21, %v11695_v13  ;;  %v4212_v39 = vadd.f32 -0.28449672, %v4180_v47 }
 0x3c4   : > { %v5743_v5 = vmul.f32 0.3275911, %v5711_v30  ;;  %v11804_v59 = vmul.f32 0.70710677, %v11793_v27  ;;  %v4115_v26 = vmul.f32 %v4083_v52, %v11762_v32  ;;  %v11812_v42 = vmul.f32 0.5, %v11625_v50 }
 0x3c5   : > { %v5742_v37 = vmul.f32 0.3275911, %v5710_v49  ;;  %v11807_v58 = vmul.f32 %v14062_v54, %v4591_v4  ;;  %v11814_v17 = vand.u32 2147483647, %v3734_v25  ;;  %v6223_v7 = vsub.f32 0.0, %v5711_v30  ;;  %v11831_v25 = vpop.f32.mrb[52].mxu1 }
 0x3c6   : > { %v5775_v57 = vadd.f32 1.0, %v5743_v5  ;;  %v4409_v43 = vmul.f32 1.442695, %v4371_v12  ;;  %v11817_v1 = vsel %vm3766_vm3, 1.0, %v13998_v45  ;;  %vm5647_vm4 = vcmp.ge.f32.partialorder %v5615_v16, 0.0 }
 0x3c7   : > { %v5713_v34 = vand.u32 2147483647, %v11804_v59  ;;  %v11821_v53 = vmul.f32 0.5, %v11633_v9  ;;  %v11824_v13 = vmul.f32 0.5, %v11653_v61  ;;  %v11826_v41 = vadd.f32 1.0, %v5742_v37 }
 0x3c8   : > { %9114 = vrcp.f32 %v5775_v57  ;;  %v11829_v50 = vmul.f32 0.70710677, %v11807_v58  ;;  %v4562_v18 = vadd.f32 1.0, %v4530_v40  ;;  %v4497_v44 = vsub.f32 1.0, %v4465_v11  ;;  %v14064_v11 = vld [vmem:[#allocation8_spill] sm:$0xff] }
 0x3c9   : > { %v11833_v14 = vmul.f32 0.5, %v4622_v23  ;;  %v4244_v8 = vmul.f32 %v4212_v39, %v11748_v2  ;;  %v4147_v46 = vadd.f32 1.4214138, %v4115_v26  ;;  %v3862_v29 = vmul.f32 0.3275911, %v11814_v17 }
 0x3ca   : > { %v6255_v21 = vmul.f32 %v6223_v7, %v5711_v30  ;;  %v6222_v24 = vsub.f32 0.0, %v5710_v49  ;;  %v4594_v31 = vmul.f32 %v4562_v18, %v11670_v0  ;;  %v4529_v47 = vmul.f32 %v4497_v44, %v11714_v51  ;;  %v11856_v7 = vpop.f32.mrb[53].mxu1 }
 0x3cb   : > { %v11841_v52 = vsel %vm5647_vm4, 1.0, %v13998_v45  ;;  %v11843_v5 = vmul.f32 0.5, %v4621_v20  ;;  %v5745_v4 = vmul.f32 0.3275911, %v5713_v34  ;;  %v4276_v23 = vadd.f32 0.2548296, %v4244_v8 }
 0x3cc   : > { %9116 = vrcp.f32 %v11826_v41  ;;  %v5712_v12 = vand.u32 2147483647, %v11829_v50  ;;  %v11848_v37 = vmul.f32 %v14064_v11, %v4594_v31  ;;  %v4561_v30 = vadd.f32 1.0, %v4529_v47  ;;  %v9113_v54 = vpop.eup %9112 }
 0x3cd   : > { %14063 = vst [vmem:[#allocation68_spill] sm:$0xff] %v11843_v5  ;;  %vm5646_vm5 = vcmp.ge.f32.partialorder %v11780_v10, 0.0  ;;  %v4308_v0 = vmul.f32 %v4276_v23, %v11748_v2  ;;  %v4179_v51 = vmul.f32 %v4147_v46, %v11762_v32  ;;  %v3894_v16 = vadd.f32 1.0, %v3862_v29 }
 0x3ce   : > { %v6288_v20 = vmul.f32 1.442695, %v6255_v21  ;;  %v6254_v40 = vmul.f32 %v6222_v24, %v5710_v49  ;;  %v6225_v39 = vsub.f32 0.0, %v5713_v34  ;;  %v11854_v26 = vmul.f32 0.70710677, %v11848_v37  ;;  %v14066_v21 = vld [vmem:[#allocation9_spill] sm:$0xff] }
 0x3cf   : > { %v11858_v18 = vadd.f32 1.0, %v5745_v4  ;;  %v4593_v44 = vmul.f32 %v4561_v30, %v11692_v48  ;;  %v4468_v8 = vmul.f32 %v9113_v54, %v4308_v0  ;;  %9118 = vrcp.f32 %v3894_v16 }
 0x3d0   : > { %v5744_v47 = vmul.f32 0.3275911, %v5712_v12  ;;  %v11862_v2 = vand.u32 2147483647, %v11854_v26  ;;  %v4211_v46 = vadd.f32 -0.28449672, %v4179_v51  ;;  %9120 = vpow2.f32 %v4409_v43 }
 0x3d1   : > { %v11867_v29 = vsel %vm5646_vm5, 1.0, %v13998_v45  ;;  %v11870_v24 = vmul.f32 %v14066_v21, %v4593_v44  ;;  %v4500_v4 = vsub.f32 1.0, %v4468_v8  ;;  %9122 = vpow2.f32 %v6288_v20 }
 0x3d2   : > { %v9115_v31 = vpop.eup %9114  ;;  %14065 = vst [vmem:[#allocation98_spill] sm:$0xff] %v11867_v29  ;;  %v6286_v48 = vmul.f32 1.442695, %v6254_v40  ;;  %vm5649_vm6 = vcmp.ge.f32.partialorder %v11804_v59, 0.0  ;;  %v5747_v23 = vmul.f32 0.3275911, %v11862_v2  ;;  %9124 = vrcp.f32 %v11858_v18 }
 0x3d3   : > { %v5839_v49 = vmul.f32 %v9115_v31, %v5775_v57  ;;  %v6224_v30 = vsub.f32 0.0, %v5712_v12  ;;  %v11875_v43 = vmul.f32 0.70710677, %v11870_v24  ;;  %v4532_v57 = vmul.f32 %v4500_v4, %v11787_v35  ;;  %v11905_v4 = vpop.f32.mrb[54].mxu1 }
 0x3d4   : > { %v6257_v10 = vmul.f32 %v6225_v39, %v5713_v34  ;;  %v11879_v54 = vadd.f32 1.0, %v5744_v47  ;;  %v4243_v0 = vmul.f32 %v4211_v46, %v11762_v32  ;;  %v11884_v20 = vadd.f32 1.0, %v5747_v23 }
 0x3d5   : > { %v5871_v11 = vsub.f32 2.0, %v5839_v49  ;;  %v11887_v40 = vand.u32 2147483647, %v11875_v43  ;;  %v4564_v44 = vadd.f32 1.0, %v4532_v57  ;;  %9126 = vpow2.f32 %v6286_v48 }
 0x3d6   : > { %v9117_v8 = vpop.eup %9116  ;;  %v11890_v49 = vmul.f32 0.5, %v11793_v27  ;;  %v11895_v35 = vsel %vm5649_vm6, 1.0, %v13998_v45  ;;  %v11898_v34 = vmul.f32 0.5, %v11807_v58  ;;  %vm5648_vm7 = vcmp.ge.f32.partialorder %v11829_v50, 0.0 }
 0x3d7   : > { %v11882_v51 = vmul.f32 %v9115_v31, %v5871_v11  ;;  %14068 = vst [vmem:[#allocation59_spill] sm:$0xff] %v11895_v35  ;;  %v6256_v31 = vmul.f32 %v6224_v30, %v5712_v12  ;;  %v5746_v47 = vmul.f32 0.3275911, %v11887_v40  ;;  %v6292_v46 = vmul.f32 1.442695, %v6257_v10  ;;  %v14070_v11 = vld [vmem:[#allocation10_spill] sm:$0xff] }
 0x3d8   : > { %14067 = vst [vmem:[#allocation66_spill] sm:$0xff] %v11890_v49  ;;  %14069 = vst [vmem:[#allocation4_spill] sm:$0xff] %v11898_v34  ;;  %9128 = vrcp.f32 %v11879_v54  ;;  %v4596_v27 = vmul.f32 %v4564_v44, %v11719_v19  ;;  %v4275_v21 = vadd.f32 0.2548296, %v4243_v0  ;;  %v5838_v58 = vmul.f32 %v9117_v8, %v11826_v41 }
 0x3d9   : > { %v5935_v39 = vmul.f32 1.0614054, %v11882_v51  ;;  %v9119_v59 = vpop.eup %9118  ;;  %vm5651_vm8 = vcmp.ge.f32.partialorder %v11854_v26, 0.0  ;;  %9130 = vrcp.f32 %v11884_v20  ;;  %v11910_v12 = vadd.f32 1.0, %v5746_v47 }
 0x3da   : > { %v9121_v23 = vpop.eup %9120  ;;  %v11913_v30 = vmul.f32 %v14070_v11, %v4596_v27  ;;  %v4307_v57 = vmul.f32 %v4275_v21, %v11762_v32  ;;  %v3958_v19 = vmul.f32 %v9119_v59, %v3894_v16  ;;  %v11920_v0 = vsel %vm5648_vm7, 1.0, %v13998_v45 }
 0x3db   : > { %v5967_v48 = vadd.f32 -1.4531521, %v5935_v39  ;;  %14071 = vst [vmem:[#allocation5_spill] sm:$0xff] %v11920_v0  ;;  %v6290_v41 = vmul.f32 1.442695, %v6256_v31  ;;  %v4342_v44 = vsub.f32 0.0, %v11814_v17  ;;  %v11925_v47 = vpop.eup %9122  ;;  %9132 = vpow2.f32 %v6292_v46 }
 0x3dc   : > { %v11923_v39 = vpop.f32.mrb[55].mxu1  ;;  %v6227_v27 = vsub.f32 0.0, %v11862_v2  ;;  %v11929_v11 = vmul.f32 0.70710677, %v11913_v30  ;;  %v4467_v32 = vmul.f32 %v9121_v23, %v4307_v57  ;;  %v3990_v16 = vsub.f32 2.0, %v3958_v19 }
 0x3dd   : > { %v5999_v10 = vmul.f32 %v5967_v48, %v11882_v51  ;;  %v11932_v50 = vmul.f32 0.5, %v11848_v37  ;;  %v11937_v31 = vsel %vm5651_vm8, 1.0, %v13998_v45  ;;  %v9125_v48 = vpop.eup %9124  ;;  %v5870_v63 = vsub.f32 2.0, %v5838_v58 }
 0x3de   : > { %14073 = vst [vmem:[#allocation7_spill] sm:$0xff] %v11937_v31  ;;  %9134 = vrcp.f32 %v11910_v12  ;;  %v4499_v62 = vsub.f32 1.0, %v4467_v32  ;;  %v11940_v49 = vmul.f32 %v9119_v59, %v3990_v16  ;;  %v5717_v46 = vand.u32 2147483647, %v11929_v11 }
 0x3df   : > { %v6031_v21 = vadd.f32 1.4214138, %v5999_v10  ;;  %14072 = vst [vmem:[#allocation6_spill] sm:$0xff] %v11932_v50  ;;  %9136 = vpow2.f32 %v6290_v41  ;;  %v4374_v37 = vmul.f32 %v4342_v44, %v11814_v17  ;;  %v11945_v57 = vpop.eup %9126  ;;  %v6259_v26 = vmul.f32 %v6227_v27, %v11862_v2 }
 0x3e0   : > { %v11949_v19 = vmul.f32 0.5, %v11870_v24  ;;  %v4531_v58 = vmul.f32 %v4499_v62, %v11800_v56  ;;  %v4054_v10 = vmul.f32 1.0614054, %v11940_v49  ;;  %vm5650_vm9 = vcmp.ge.f32.partialorder %v11875_v43, 0.0 }
 0x3e1   : > { %v6063_v23 = vmul.f32 %v6031_v21, %v11882_v51  ;;  %v6226_v41 = vsub.f32 0.0, %v11887_v40  ;;  %v11956_v32 = vmul.f32 0.70710677, %v11633_v9  ;;  %v11958_v44 = vmul.f32 %v9117_v8, %v5870_v63 }
 0x3e2   : > { %14074 = vst [vmem:[#allocation8_spill] sm:$0xff] %v11949_v19  ;;  %v9129_v17 = vpop.eup %9128  ;;  %v5841_v2 = vmul.f32 %v9125_v48, %v11858_v18  ;;  %v4563_v27 = vadd.f32 1.0, %v4531_v58  ;;  %v4086_v24 = vadd.f32 -1.4531521, %v4054_v10  ;;  %v5749_v56 = vmul.f32 0.3275911, %v5717_v46 }
 0x3e3   : > { %v6095_v59 = vadd.f32 -0.28449672, %v6063_v23  ;;  %v9131_v16 = vpop.eup %9130  ;;  %v4415_v21 = vmul.f32 1.442695, %v4374_v37  ;;  %v3829_v23 = vand.u32 2147483647, %v11956_v32  ;;  %v6258_v18 = vmul.f32 %v6226_v41, %v11887_v40 }
 0x3e4   : > { %v6296_v43 = vmul.f32 1.442695, %v6259_v26  ;;  %v11964_v50 = vsel %vm5650_vm9, 1.0, %v13998_v45  ;;  %v4595_v9 = vmul.f32 %v4563_v27, %v11730_v22  ;;  %v4118_v63 = vmul.f32 %v4086_v24, %v11940_v49  ;;  %v14076_v19 = vld [vmem:[#allocation11_spill] sm:$0xff] }
 0x3e5   : > { %v6127_v62 = vmul.f32 %v6095_v59, %v11882_v51  ;;  %14075 = vst [vmem:[#allocation9_spill] sm:$0xff] %v11964_v50  ;;  %v6229_v58 = vsub.f32 0.0, %v5717_v46  ;;  %v3861_v10 = vmul.f32 0.3275911, %v3829_v23  ;;  %v5873_v31 = vsub.f32 2.0, %v5841_v2  ;;  %v11971_v34 = vpop.eup %9132 }
 0x3e6   : > { %v5840_v59 = vmul.f32 %v9129_v17, %v11879_v54  ;;  %v4627_v37 = vmul.f32 %v14076_v19, %v4595_v9  ;;  %v4150_v35 = vadd.f32 1.4214138, %v4118_v63  ;;  %14077 = vst [vmem:[#allocation10_spill] sm:$0xff] %v11971_v34  ;;  %v5843_v26 = vmul.f32 %v9131_v16, %v11884_v20 }
 0x3e7   : > { %v6159_v8 = vadd.f32 0.2548296, %v6127_v62  ;;  %v11974_v50 = vadd.f32 1.0, %v5749_v56  ;;  %9138 = vpow2.f32 %v4415_v21  ;;  %v3893_v22 = vadd.f32 1.0, %v3861_v10 }
 0x3e8   : > { %v9135_v27 = vpop.eup %9134  ;;  %9140 = vpow2.f32 %v6296_v43  ;;  %v11976_v24 = vmul.f32 0.70710677, %v4627_v37  ;;  %v4182_v40 = vmul.f32 %v4150_v35, %v11940_v49  ;;  %v11980_v41 = vmul.f32 0.70710677, %v11653_v61 }
 0x3e9   : > { %v11982_v54 = vpop.eup %9136  ;;  %v6191_v19 = vmul.f32 %v6159_v8, %v11882_v51  ;;  %v6294_v2 = vmul.f32 1.442695, %v6258_v18  ;;  %v6261_v62 = vmul.f32 %v6229_v58, %v5717_v46  ;;  %9142 = vrcp.f32 %v3893_v22 }
 0x3ea   : > { %14078 = vst [vmem:[#allocation11_spill] sm:$0xff] %v11982_v54  ;;  %v11985_v20 = vmul.f32 %v9125_v48, %v5873_v31  ;;  %v11988_v56 = vmul.f32 0.5, %v11913_v30  ;;  %v5716_v21 = vand.u32 2147483647, %v11976_v24  ;;  %v4214_v43 = vadd.f32 -0.28449672, %v4182_v40 }
 0x3eb   : > { %v5872_v9 = vsub.f32 2.0, %v5840_v59  ;;  %v5875_v35 = vsub.f32 2.0, %v5843_v26  ;;  %v5842_v61 = vmul.f32 %v9135_v27, %v11910_v12  ;;  %9144 = vrcp.f32 %v11974_v50 }
 0x3ec   : > { %14079 = vst [vmem:[#allocation123_spill] sm:$0xff] %v11988_v56  ;;  %vm5653_vm10 = vcmp.ge.f32.partialorder %v11929_v11, 0.0  ;;  %v4246_v51 = vmul.f32 %v4214_v43, %v11940_v49  ;;  %v4341_v46 = vsub.f32 0.0, %v3829_v23  ;;  %v3832_v31 = vand.u32 2147483647, %v11980_v41 }
 0x3ed   : > { %v6351_v48 = vmul.f32 %v11925_v47, %v6191_v19  ;;  %v6300_v30 = vmul.f32 1.442695, %v6261_v62  ;;  %v5748_v63 = vmul.f32 0.3275911, %v5716_v21  ;;  %vm3765_vm11 = vcmp.ge.f32.partialorder %v11956_v32, 0.0 }
 0x3ee   : > { %9146 = vpow2.f32 %v6294_v2  ;;  %v4278_v8 = vadd.f32 0.2548296, %v4246_v51  ;;  %v3864_v18 = vmul.f32 0.3275911, %v3832_v31  ;;  %v11999_v12 = vmul.f32 0.70710677, %v11660_v3 }
 0x3ef   : > { %v12001_v58 = vmul.f32 %v9129_v17, %v5872_v9  ;;  %v12003_v11 = vmul.f32 %v9131_v16, %v5875_v35  ;;  %v5874_v10 = vsub.f32 2.0, %v5842_v61  ;;  %v12006_v59 = vsel %vm5653_vm10, 1.0, %v13998_v45 }
 0x3f0   : > { %14081 = vst [vmem:[#allocation125_spill] sm:$0xff] %v12006_v59  ;;  %v4310_v47 = vmul.f32 %v4278_v8, %v11940_v49  ;;  %v12010_v26 = vsel %vm3765_vm11, 1.0, %v13998_v45  ;;  %v4373_v32 = vmul.f32 %v4341_v46, %v3829_v23  ;;  %v12012_v40 = vadd.f32 1.0, %v3864_v18 }
 0x3f1   : > { %14080 = vst [vmem:[#allocation124_spill] sm:$0xff] %v12003_v11  ;;  %v9139_v19 = vpop.eup %9138  ;;  %v6383_v2 = vsub.f32 1.0, %v6351_v48  ;;  %9148 = vpow2.f32 %v6300_v30  ;;  %v12014_v62 = vmul.f32 0.5, %v4627_v37  ;;  %v6228_v17 = vsub.f32 0.0, %v5716_v21  ;;  %v12029_v37 = vpop.f32.mrb[56].mxu1 }
 0x3f2   : > { %v12016_v16 = vpop.eup %9140  ;;  %v12018_v43 = vadd.f32 1.0, %v5748_v63  ;;  %v4470_v9 = vmul.f32 %v9139_v19, %v4310_v47  ;;  %vm3768_vm12 = vcmp.ge.f32.partialorder %v11980_v41, 0.0  ;;  %v3831_v49 = vand.u32 2147483647, %v11999_v12 }
 0x3f3   : > { %14082 = vst [vmem:[#allocation126_spill] sm:$0xff] %v12014_v62  ;;  %14083 = vst [vmem:[#allocation127_spill] sm:$0xff] %v12016_v16  ;;  %v9143_v35 = vpop.eup %9142  ;;  %v12022_v61 = vmul.f32 %v9135_v27, %v5874_v10  ;;  %vm5652_vm13 = vcmp.ge.f32.partialorder %v11976_v24, 0.0  ;;  %9150 = vrcp.f32 %v12012_v40  ;;  %v12027_v23 = vmul.f32 0.70710677, %v11679_v55 }
 0x3f4   : > { %v4502_v51 = vsub.f32 1.0, %v4470_v9  ;;  %v3957_v46 = vmul.f32 %v9143_v35, %v3893_v22  ;;  %v4413_v48 = vmul.f32 1.442695, %v4373_v32  ;;  %v3863_v30 = vmul.f32 0.3275911, %v3831_v49 }
 0x3f5   : > { %14084 = vst [vmem:[#allocation128_spill] sm:$0xff] %v12022_v61  ;;  %v9145_v63 = vpop.eup %9144  ;;  %v6415_v8 = vmul.f32 %v6383_v2, %v11841_v52  ;;  %v6260_v18 = vmul.f32 %v6228_v17, %v5716_v21  ;;  %v4344_v47 = vsub.f32 0.0, %v3832_v31  ;;  %v3834_v27 = vand.u32 2147483647, %v12027_v23 }
 0x3f6   : > { %9152 = vrcp.f32 %v12018_v43  ;;  %v4534_v10 = vmul.f32 %v4502_v51, %v11817_v1  ;;  %v3989_v19 = vsub.f32 2.0, %v3957_v46  ;;  %v3895_v56 = vadd.f32 1.0, %v3863_v30 }
 0x3f7   : > { %v12038_v9 = vsel %vm5652_vm13, 1.0, %v13998_v45  ;;  %v12043_v22 = vsel %vm3768_vm12, 1.0, %v13998_v45  ;;  %v3866_v52 = vmul.f32 0.3275911, %v3834_v27  ;;  %v12046_v21 = vmul.f32 0.70710677, %v11684_v60 }
 0x3f8   : > { %14085 = vst [vmem:[#allocation129_spill] sm:$0xff] %v12038_v9  ;;  %v12048_v32 = vpop.eup %9146  ;;  %v5845_v1 = vmul.f32 %v9145_v63, %v11974_v50  ;;  %v12051_v2 = vmul.f32 %v9143_v35, %v3989_v19  ;;  %9154 = vrcp.f32 %v3895_v56  ;;  %v4343_v17 = vsub.f32 0.0, %v3831_v49 }
 0x3f9   : > { %14086 = vst [vmem:[#allocation130_spill] sm:$0xff] %v12048_v32  ;;  %v4566_v24 = vadd.f32 1.0, %v4534_v10  ;;  %v4376_v51 = vmul.f32 %v4344_v47, %v3832_v31  ;;  %v3898_v46 = vadd.f32 1.0, %v3866_v52  ;;  %v12054_v30 = vand.u32 2147483647, %v12046_v21 }
 0x3fa   : > { %v6447_v41 = vadd.f32 1.0, %v6415_v8  ;;  %v6298_v62 = vmul.f32 1.442695, %v6260_v18  ;;  %v4053_v59 = vmul.f32 1.0614054, %v12051_v2  ;;  %9156 = vpow2.f32 %v4413_v48 }
 0x3fb   : > { %v12057_v9 = vpop.eup %9148  ;;  %v12060_v16 = vmul.f32 0.5, %v11660_v3  ;;  %vm3767_vm14 = vcmp.ge.f32.partialorder %v11999_v12, 0.0  ;;  %9158 = vrcp.f32 %v3898_v46  ;;  %v3865_v50 = vmul.f32 0.3275911, %v12054_v30 }
 0x3fc   : > { %14087 = vst [vmem:[#allocation131_spill] sm:$0xff] %v12057_v9  ;;  %v5877_v31 = vsub.f32 2.0, %v5845_v1  ;;  %v4085_v35 = vadd.f32 -1.4531521, %v4053_v59  ;;  %v4375_v47 = vmul.f32 %v4343_v17, %v3831_v49  ;;  %v4346_v10 = vsub.f32 0.0, %v3834_v27 }
 0x3fd   : > { %v9151_v19 = vpop.eup %9150  ;;  %v4598_v8 = vmul.f32 %v4566_v24, %v11812_v42  ;;  %v4419_v18 = vmul.f32 1.442695, %v4376_v51  ;;  %v3897_v52 = vadd.f32 1.0, %v3865_v50  ;;  %v12066_v48 = vmul.f32 0.70710677, %v11697_v33  ;;  %v14090_v51 = vld [vmem:[#allocation12_spill] sm:$0xff] }
 0x3fe   : > { %v12069_v3 = vmul.f32 %v6447_v41, %v11833_v14  ;;  %9160 = vpow2.f32 %v6298_v62  ;;  %v4117_v9 = vmul.f32 %v4085_v35, %v12051_v2  ;;  %v3960_v32 = vmul.f32 %v9151_v19, %v12012_v40 }
 0x3ff   : > { %v12076_v59 = vsel %vm3767_vm14, 1.0, %v13998_v45  ;;  %v12079_v42 = vmul.f32 0.5, %v11679_v55  ;;  %vm3770_vm15 = vcmp.ge.f32.partialorder %v12027_v23, 0.0  ;;  %9162 = vrcp.f32 %v3897_v52 }
 0x400   : > { %14088 = vst [vmem:[#allocation132_spill] sm:$0xff] %v12069_v3  ;;  %v9153_v49 = vpop.eup %9152  ;;  %v4149_v1 = vadd.f32 1.4214138, %v4117_v9  ;;  %v3992_v14 = vsub.f32 2.0, %v3960_v32  ;;  %v4417_v17 = vmul.f32 1.442695, %v4375_v47  ;;  %v4378_v62 = vmul.f32 %v4346_v10, %v3834_v27 }
 0x401   : > { %v12082_v24 = vmul.f32 %v9145_v63, %v5877_v31  ;;  %v4630_v40 = vmul.f32 %v14090_v51, %v4598_v8  ;;  %9164 = vpow2.f32 %v4419_v18  ;;  %v12086_v12 = vand.u32 2147483647, %v12066_v48 }
 0x402   : > { %v9155_v41 = vpop.eup %9154  ;;  %v4181_v55 = vmul.f32 %v4149_v1, %v12051_v2  ;;  %v12089_v50 = vmul.f32 %v9151_v19, %v3992_v14  ;;  %v12092_v35 = vmul.f32 0.5, %v11684_v60  ;;  %vm3769_vm1 = vcmp.ge.f32.partialorder %v12046_v21, 0.0 }
 0x403   : > { %14089 = vst [vmem:[#allocation133_spill] sm:$0xff] %v12082_v24  ;;  %v5844_v27 = vmul.f32 %v9153_v49, %v12018_v43  ;;  %v3959_v63 = vmul.f32 %v9155_v41, %v3895_v56  ;;  %v12099_v9 = vsel %vm3770_vm15, 1.0, %v13998_v45  ;;  %v3868_v32 = vmul.f32 0.3275911, %v12086_v12 }
 0x404   : > { %v9157_v31 = vpop.eup %9156  ;;  %v4213_v47 = vadd.f32 -0.28449672, %v4181_v55  ;;  %v4056_v10 = vmul.f32 1.0614054, %v12089_v50  ;;  %9166 = vpow2.f32 %v4417_v17  ;;  %v4423_v19 = vmul.f32 1.442695, %v4378_v62 }
 0x405   : > { %v9159_v60 = vpop.eup %9158  ;;  %v5623_v8 = vmul.f32 0.70710677, %v4630_v40  ;;  %v3991_v18 = vsub.f32 2.0, %v3959_v63  ;;  %v12104_v21 = vsel %vm3769_vm1, 1.0, %v13998_v45  ;;  %v3900_v56 = vadd.f32 1.0, %v3868_v32  ;;  %v12113_v62 = vpop.f32.mrb[57].mxu1 }
 0x406   : > { %v4245_v43 = vmul.f32 %v4213_v47, %v12051_v2  ;;  %v4088_v23 = vadd.f32 -1.4531521, %v4056_v10  ;;  %v4345_v1 = vsub.f32 0.0, %v12054_v30  ;;  %v12109_v14 = vmul.f32 0.5, %v11697_v33 }
 0x407   : > { %v5876_v51 = vsub.f32 2.0, %v5844_v27  ;;  %v12111_v55 = vmul.f32 %v9155_v41, %v3991_v18  ;;  %v3962_v17 = vmul.f32 %v9159_v60, %v3898_v46  ;;  %9168 = vrcp.f32 %v3900_v56 }
 0x408   : > { %v12115_v63 = vpop.eup %9160  ;;  %v4277_v24 = vadd.f32 0.2548296, %v4245_v43  ;;  %v4120_v32 = vmul.f32 %v4088_v23, %v12089_v50  ;;  %9170 = vpow2.f32 %v4423_v19  ;;  %v12119_v47 = vmul.f32 0.70710677, %v11702_v15 }
 0x409   : > { %14091 = vst [vmem:[#allocation12_spill] sm:$0xff] %v12115_v63  ;;  %v9163_v10 = vpop.eup %9162  ;;  %v12121_v34 = vmul.f32 0.5, %v4630_v40  ;;  %vm5655_vm2 = vcmp.ge.f32.partialorder %v5623_v8, 0.0  ;;  %v4055_v33 = vmul.f32 1.0614054, %v12111_v55  ;;  %v3994_v41 = vsub.f32 2.0, %v3962_v17 }
 0x40a   : > { %v5719_v46 = vand.u32 2147483647, %v5623_v8  ;;  %v4309_v27 = vmul.f32 %v4277_v24, %v12051_v2  ;;  %v4152_v18 = vadd.f32 1.4214138, %v4120_v32  ;;  %v3961_v3 = vmul.f32 %v9163_v10, %v3897_v52 }
 0x40b   : > { %14092 = vst [vmem:[#allocation134_spill] sm:$0xff] %v12121_v34  ;;  %v9165_v63 = vpop.eup %9164  ;;  %v12125_v43 = vmul.f32 %v9153_v49, %v5876_v51  ;;  %v4087_v23 = vadd.f32 -1.4531521, %v4055_v33  ;;  %v12127_v19 = vmul.f32 %v9159_v60, %v3994_v41  ;;  %v12130_v0 = vand.u32 2147483647, %v12119_v47 }
 0x40c   : > { %v4469_v40 = vmul.f32 %v9157_v31, %v4309_v27  ;;  %v4184_v34 = vmul.f32 %v4152_v18, %v12089_v50  ;;  %v3993_v5 = vsub.f32 2.0, %v3961_v3  ;;  %v4377_v17 = vmul.f32 %v4345_v1, %v12054_v30 }
 0x40d   : > { %14093 = vst [vmem:[#allocation135_spill] sm:$0xff] %v12125_v43  ;;  %v12136_v2 = vsel %vm5655_vm2, 1.0, %v13998_v45  ;;  %v4119_v52 = vmul.f32 %v4087_v23, %v12111_v55  ;;  %v4058_v49 = vmul.f32 1.0614054, %v12127_v19  ;;  %vm3772_vm3 = vcmp.ge.f32.partialorder %v12066_v48, 0.0 }
 0x40e   : > { %14094 = vst [vmem:[#allocation136_spill] sm:$0xff] %v12136_v2  ;;  %v3867_v24 = vmul.f32 0.3275911, %v12130_v0  ;;  %v9167_v60 = vpop.eup %9166  ;;  %v5751_v51 = vmul.f32 0.3275911, %v5719_v46  ;;  %v4501_v31 = vsub.f32 1.0, %v4469_v40  ;;  %v12142_v33 = vmul.f32 %v9163_v10, %v3993_v5 }
 0x40f   : > { %v4216_v32 = vadd.f32 -0.28449672, %v4184_v34  ;;  %v6231_v3 = vsub.f32 0.0, %v5719_v46  ;;  %v4151_v30 = vadd.f32 1.4214138, %v4119_v52  ;;  %v4348_v34 = vsub.f32 0.0, %v12086_v12 }
 0x410   : > { %v4090_v1 = vadd.f32 -1.4531521, %v4058_v49  ;;  %v3899_v8 = vadd.f32 1.0, %v3867_v24  ;;  %v4533_v41 = vmul.f32 %v4501_v31, %v12010_v26  ;;  %v4057_v18 = vmul.f32 1.0614054, %v12142_v33 }
 0x411   : > { %v4248_v27 = vmul.f32 %v4216_v32, %v12089_v50  ;;  %v4421_v23 = vmul.f32 1.442695, %v4377_v17  ;;  %v9169_v2 = vpop.eup %9168  ;;  %v4183_v43 = vmul.f32 %v4151_v30, %v12111_v55  ;;  %v12150_v24 = vadd.f32 1.0, %v5751_v51  ;;  %v14095_v51 = vld [vmem:[#allocation13_spill] sm:$0xff] }
 0x412   : > { %v4122_v54 = vmul.f32 %v4090_v1, %v12127_v19  ;;  %9172 = vrcp.f32 %v3899_v8  ;;  %v9171_v5 = vpop.eup %9170  ;;  %v4565_v10 = vadd.f32 1.0, %v4533_v41  ;;  %v4089_v52 = vadd.f32 -1.4531521, %v4057_v18 }
 0x413   : > { %v4280_v40 = vadd.f32 0.2548296, %v4248_v27  ;;  %v3964_v49 = vmul.f32 %v9169_v2, %v3900_v56  ;;  %v6263_v26 = vmul.f32 %v6231_v3, %v5719_v46  ;;  %v4215_v31 = vadd.f32 -0.28449672, %v4183_v43  ;;  %v12158_v56 = vpop.f32.mrb[58].mxu1 }
 0x414   : > { %v4154_v32 = vadd.f32 1.4214138, %v4122_v54  ;;  %v4597_v17 = vmul.f32 %v4565_v10, %v11821_v53  ;;  %v4121_v30 = vmul.f32 %v4089_v52, %v12142_v33  ;;  %9174 = vpow2.f32 %v4421_v23 }
 0x415   : > { %v4312_v11 = vmul.f32 %v4280_v40, %v12089_v50  ;;  %v3996_v1 = vsub.f32 2.0, %v3964_v49  ;;  %v4247_v29 = vmul.f32 %v4215_v31, %v12111_v55  ;;  %v4380_v41 = vmul.f32 %v4348_v34, %v12086_v12  ;;  %v12183_v49 = vpop.f32.mrb[59].mxu1 }
 0x416   : > { %v4186_v61 = vmul.f32 %v4154_v32, %v12127_v19  ;;  %v12161_v46 = vmul.f32 %v14095_v51, %v4597_v17  ;;  %v4153_v43 = vadd.f32 1.4214138, %v4121_v30  ;;  %9176 = vrcp.f32 %v12150_v24 }
 0x417   : > { %v4472_v54 = vmul.f32 %v9165_v63, %v4312_v11  ;;  %v12163_v53 = vmul.f32 %v9169_v2, %v3996_v1  ;;  %v6304_v50 = vmul.f32 1.442695, %v6263_v26  ;;  %v4279_v3 = vadd.f32 0.2548296, %v4247_v29 }
 0x418   : > { %v4218_v27 = vadd.f32 -0.28449672, %v4186_v61  ;;  %v12167_v18 = vmul.f32 0.70710677, %v12161_v46  ;;  %v4185_v12 = vmul.f32 %v4153_v43, %v12142_v33  ;;  %v12173_v34 = vsel %vm3772_vm3, 1.0, %v13998_v45 }
 0x419   : > { %v4504_v23 = vsub.f32 1.0, %v4472_v54  ;;  %v4311_v11 = vmul.f32 %v4279_v3, %v12111_v55  ;;  %v4060_v2 = vmul.f32 1.0614054, %v12163_v53  ;;  %v4427_v10 = vmul.f32 1.442695, %v4380_v41 }
 0x41a   : > { %v4250_v63 = vmul.f32 %v4218_v27, %v12127_v19  ;;  %v5718_v29 = vand.u32 2147483647, %v12167_v18  ;;  %v4217_v40 = vadd.f32 -0.28449672, %v4185_v12  ;;  %v12181_v52 = vmul.f32 0.5, %v11702_v15 }
 0x41b   : > { %v4536_v61 = vmul.f32 %v4504_v23, %v12043_v22  ;;  %9178 = vpow2.f32 %v6304_v50  ;;  %v4471_v26 = vmul.f32 %v9167_v60, %v4311_v11  ;;  %v4092_v55 = vadd.f32 -1.4531521, %v4060_v2  ;;  %v14096_v11 = vld [vmem:[#allocation14_spill] sm:$0xff] }
 0x41c   : > { %v9173_v48 = vpop.eup %9172  ;;  %v4282_v31 = vadd.f32 0.2548296, %v4250_v63  ;;  %v4249_v17 = vmul.f32 %v4217_v40, %v12142_v33  ;;  %v4347_v30 = vsub.f32 0.0, %v12130_v0  ;;  %v12188_v1 = vmul.f32 0.70710677, %v11716_v28 }
 0x41d   : > { %v4568_v32 = vadd.f32 1.0, %v4536_v61  ;;  %v4503_v22 = vsub.f32 1.0, %v4471_v26  ;;  %v4124_v15 = vmul.f32 %v4092_v55, %v12163_v53  ;;  %v3963_v51 = vmul.f32 %v9173_v48, %v3899_v8 }
 0x41e   : > { %v4314_v41 = vmul.f32 %v4282_v31, %v12127_v19  ;;  %v5750_v54 = vmul.f32 0.3275911, %v5718_v29  ;;  %v4281_v60 = vadd.f32 0.2548296, %v4249_v17  ;;  %9180 = vpow2.f32 %v4427_v10  ;;  %v9175_v50 = vpop.eup %9174 }
 0x41f   : > { %v4600_v43 = vmul.f32 %v4568_v32, %v11824_v13  ;;  %v4535_v3 = vmul.f32 %v4503_v22, %v12076_v59  ;;  %v4156_v23 = vadd.f32 1.4214138, %v4124_v15  ;;  %vm3771_vm4 = vcmp.ge.f32.partialorder %v12119_v47, 0.0  ;;  %v14100_v47 = vld [vmem:[#allocation17_spill] sm:$0xff] }
 0x420   : > { %v4474_v27 = vmul.f32 %v9171_v5, %v4314_v41  ;;  %v3995_v12 = vsub.f32 2.0, %v3963_v51  ;;  %v4313_v19 = vmul.f32 %v4281_v60, %v12142_v33  ;;  %v4379_v8 = vmul.f32 %v4347_v30, %v12130_v0  ;;  %v9177_v13 = vpop.eup %9176  ;;  %v12204_v5 = vpop.f32.mrb[60].mxu1  ;;  %v14098_v51 = vld [vmem:[#allocation15_spill] sm:$0xff] }
 0x421   : > { %v12196_v63 = vmul.f32 %v14096_v11, %v4600_v43  ;;  %vm3774_vm5 = vcmp.ge.f32.partialorder %v12188_v1, 0.0  ;;  %v4567_v2 = vadd.f32 1.0, %v4535_v3  ;;  %v4188_v61 = vmul.f32 %v4156_v23, %v12163_v53  ;;  %v12226_v11 = vpop.f32.mrb[61].mxu1 }
 0x422   : > { %v4506_v10 = vsub.f32 1.0, %v4474_v27  ;;  %v12202_v59 = vmul.f32 %v9173_v48, %v3995_v12  ;;  %v12206_v40 = vadd.f32 1.0, %v5750_v54  ;;  %v6230_v26 = vsub.f32 0.0, %v5718_v29 }
 0x423   : > { %v12209_v31 = vmul.f32 0.70710677, %v12196_v63  ;;  %v4473_v33 = vmul.f32 %v9175_v50, %v4313_v19  ;;  %v4599_v0 = vmul.f32 %v4567_v2, %v12060_v16  ;;  %v4220_v32 = vadd.f32 -0.28449672, %v4188_v61 }
 0x424   : > { %v4538_v55 = vmul.f32 %v4506_v10, %v12099_v9  ;;  %v4059_v17 = vmul.f32 1.0614054, %v12202_v59  ;;  %v5847_v30 = vmul.f32 %v9177_v13, %v12150_v24  ;;  %v4425_v41 = vmul.f32 1.442695, %v4379_v8 }
 0x425   : > { %v5721_v48 = vand.u32 2147483647, %v12209_v31  ;;  %v4505_v22 = vsub.f32 1.0, %v4473_v33  ;;  %v12216_v15 = vpop.eup %9178  ;;  %v4631_v54 = vmul.f32 %v14098_v51, %v4599_v0  ;;  %v4252_v60 = vmul.f32 %v4220_v32, %v12163_v53  ;;  %v14099_v0 = vld [vmem:[#allocation16_spill] sm:$0xff] }
 0x426   : > { %14097 = vst [vmem:[#allocation13_spill] sm:$0xff] %v12216_v15  ;;  %v4570_v43 = vadd.f32 1.0, %v4538_v55  ;;  %v12221_v16 = vand.u32 2147483647, %v12188_v1  ;;  %9182 = vrcp.f32 %v12206_v40  ;;  %v4091_v24 = vadd.f32 -1.4531521, %v4059_v17 }
 0x427   : > { %v5753_v9 = vmul.f32 0.3275911, %v5721_v48  ;;  %v4537_v50 = vmul.f32 %v4505_v22, %v12104_v21  ;;  %v6262_v3 = vmul.f32 %v6230_v26, %v5718_v29  ;;  %v5624_v27 = vmul.f32 0.70710677, %v4631_v54 }
 0x428   : > { %v4602_v23 = vmul.f32 %v4570_v43, %v12079_v42  ;;  %v4284_v12 = vadd.f32 0.2548296, %v4252_v60  ;;  %v9181_v19 = vpop.eup %9180  ;;  %v5879_v8 = vsub.f32 2.0, %v5847_v30  ;;  %v12231_v61 = vmul.f32 0.5, %v11716_v28 }
 0x429   : > { %v12228_v2 = vadd.f32 1.0, %v5753_v9  ;;  %v4569_v10 = vadd.f32 1.0, %v4537_v50  ;;  %v5720_v33 = vand.u32 2147483647, %v5624_v27  ;;  %v4123_v29 = vmul.f32 %v4091_v24, %v12202_v59 }
 0x42a   : > { %v4634_v55 = vmul.f32 %v14099_v0, %v4602_v23  ;;  %v4316_v21 = vmul.f32 %v4284_v12, %v12163_v53  ;;  %v6233_v26 = vsub.f32 0.0, %v5721_v48  ;;  %v12240_v32 = vsel %vm3771_vm4, 1.0, %v13998_v45  ;;  %v12277_v0 = vpop.f32.mrb[62].mxu1 }
 0x42b   : > { %v4601_v42 = vmul.f32 %v4569_v10, %v12092_v35  ;;  %v12245_v28 = vsel %vm3774_vm5, 1.0, %v13998_v45  ;;  %v6302_v17 = vmul.f32 1.442695, %v6262_v3  ;;  %9184 = vpow2.f32 %v4425_v41 }
 0x42c   : > { %v3870_v30 = vmul.f32 0.3275911, %v12221_v16  ;;  %v12249_v53 = vmul.f32 0.5, %v11744_v38  ;;  %vm5654_vm6 = vcmp.ge.f32.partialorder %v12167_v18, 0.0  ;;  %v5752_v35 = vmul.f32 0.3275911, %v5720_v33 }
 0x42d   : > { %v12252_v22 = vmul.f32 0.70710677, %v4634_v55  ;;  %v4633_v51 = vmul.f32 %v14100_v47, %v4601_v42  ;;  %v12255_v43 = vmul.f32 %v9177_v13, %v5879_v8  ;;  %9186 = vrcp.f32 %v12228_v2 }
 0x42e   : > { %v4476_v1 = vmul.f32 %v9181_v19, %v4316_v21  ;;  %v4155_v60 = vadd.f32 1.4214138, %v4123_v29  ;;  %v12259_v41 = vmul.f32 0.5, %v12161_v46  ;;  %v6265_v9 = vmul.f32 %v6233_v26, %v5721_v48 }
 0x42f   : > { %v5723_v50 = vand.u32 2147483647, %v12252_v22  ;;  %v12262_v24 = vmul.f32 0.70710677, %v4633_v51  ;;  %v12265_v18 = vsel %vm5654_vm6, 1.0, %v13998_v45  ;;  %9188 = vpow2.f32 %v6302_v17 }
 0x430   : > { %14101 = vst [vmem:[#allocation14_spill] sm:$0xff] %v12259_v41  ;;  %14102 = vst [vmem:[#allocation15_spill] sm:$0xff] %v12265_v18  ;;  %vm5657_vm7 = vcmp.ge.f32.partialorder %v12209_v31, 0.0  ;;  %v12268_v13 = vadd.f32 1.0, %v3870_v30  ;;  %v9183_v3 = vpop.eup %9182  ;;  %v12271_v23 = vmul.f32 0.5, %v12196_v63  ;;  %v12273_v12 = vadd.f32 1.0, %v5752_v35 }
 0x431   : > { %v5755_v46 = vmul.f32 0.3275911, %v5723_v50  ;;  %v5722_v48 = vand.u32 2147483647, %v12262_v24  ;;  %vm5656_vm8 = vcmp.ge.f32.partialorder %v5624_v27, 0.0  ;;  %v6232_v19 = vsub.f32 0.0, %v5720_v33 }
 0x432   : > { %14103 = vst [vmem:[#allocation16_spill] sm:$0xff] %v12271_v23  ;;  %v4508_v8 = vsub.f32 1.0, %v4476_v1  ;;  %v4187_v10 = vmul.f32 %v4155_v60, %v12202_v59  ;;  %v12280_v31 = vsel %vm5657_vm7, 1.0, %v13998_v45  ;;  %v6308_v21 = vmul.f32 1.442695, %v6265_v9 }
 0x433   : > { %14104 = vst [vmem:[#allocation17_spill] sm:$0xff] %v12280_v31  ;;  %v12282_v29 = vmul.f32 0.5, %v4631_v54  ;;  %v5754_v63 = vmul.f32 0.3275911, %v5722_v48  ;;  %v5846_v26 = vmul.f32 %v9183_v3, %v12206_v40  ;;  %9190 = vrcp.f32 %v12268_v13 }
 0x434   : > { %v4540_v42 = vmul.f32 %v4508_v8, %v12173_v34  ;;  %v4219_v17 = vadd.f32 -0.28449672, %v4187_v10  ;;  %v12288_v27 = vsel %vm5656_vm8, 1.0, %v13998_v45  ;;  %9192 = vrcp.f32 %v12273_v12 }
 0x435   : > { %14105 = vst [vmem:[#allocation137_spill] sm:$0xff] %v12282_v29  ;;  %14106 = vst [vmem:[#allocation138_spill] sm:$0xff] %v12288_v27  ;;  %v12291_v30 = vadd.f32 1.0, %v5755_v46  ;;  %v6235_v35 = vsub.f32 0.0, %v5723_v50  ;;  %v9185_v47 = vpop.eup %9184  ;;  %v6264_v1 = vmul.f32 %v6232_v19, %v5720_v33  ;;  %v6234_v54 = vsub.f32 0.0, %v5722_v48 }
 0x436   : > { %v4572_v60 = vadd.f32 1.0, %v4540_v42  ;;  %v4251_v9 = vmul.f32 %v4219_v17, %v12202_v59  ;;  %9194 = vpow2.f32 %v6308_v21  ;;  %v12294_v40 = vmul.f32 0.5, %v4634_v55  ;;  %v14109_v42 = vld [vmem:[#allocation18_spill] sm:$0xff] }
 0x437   : > { %v12296_v34 = vadd.f32 1.0, %v5754_v63  ;;  %v3741_v8 = vmul.f32 0.70710677, %v11744_v38  ;;  %v9187_v10 = vpop.eup %9186  ;;  %v5878_v23 = vsub.f32 2.0, %v5846_v26  ;;  %v4350_v31 = vsub.f32 0.0, %v12221_v16 }
 0x438   : > { %14107 = vst [vmem:[#allocation139_spill] sm:$0xff] %v12294_v40  ;;  %v4604_v29 = vmul.f32 %v4572_v60, %v12109_v14  ;;  %v4283_v46 = vadd.f32 0.2548296, %v4251_v9  ;;  %vm5659_vm9 = vcmp.ge.f32.partialorder %v12252_v22, 0.0  ;;  %9196 = vrcp.f32 %v12291_v30  ;;  %v12311_v9 = vpop.f32.mrb[63].mxu1 }
 0x439   : > { %v6267_v33 = vmul.f32 %v6235_v35, %v5723_v50  ;;  %v3837_v19 = vand.u32 2147483647, %v3741_v8  ;;  %v12303_v21 = vpop.eup %9188  ;;  %v6306_v55 = vmul.f32 1.442695, %v6264_v1  ;;  %v6266_v63 = vmul.f32 %v6234_v54, %v5722_v48 }
 0x43a   : > { %14108 = vst [vmem:[#allocation140_spill] sm:$0xff] %v12303_v21  ;;  %v4636_v17 = vmul.f32 %v14109_v42, %v4604_v29  ;;  %v4315_v38 = vmul.f32 %v4283_v46, %v12202_v59  ;;  %v5849_v26 = vmul.f32 %v9187_v10, %v12228_v2  ;;  %v12308_v14 = vmul.f32 0.5, %v4633_v51 }
 0x43b   : > { %9198 = vrcp.f32 %v12296_v34  ;;  %v3869_v60 = vmul.f32 0.3275911, %v3837_v19  ;;  %v12313_v40 = vmul.f32 %v9183_v3, %v5878_v23  ;;  %v4382_v48 = vmul.f32 %v4350_v31, %v12221_v16 }
 0x43c   : > { %14110 = vst [vmem:[#allocation18_spill] sm:$0xff] %v12308_v14  ;;  %v12315_v50 = vmul.f32 0.70710677, %v4636_v17  ;;  %v4475_v35 = vmul.f32 %v9185_v47, %v4315_v38  ;;  %v6312_v1 = vmul.f32 1.442695, %v6267_v33  ;;  %vm5658_vm10 = vcmp.ge.f32.partialorder %v12262_v24, 0.0 }
 0x43d   : > { %v3901_v59 = vadd.f32 1.0, %v3869_v60  ;;  %v12320_v2 = vmul.f32 0.70710677, %v11768_v6  ;;  %v9191_v51 = vpop.eup %9190  ;;  %9200 = vpow2.f32 %v6306_v55  ;;  %v12325_v29 = vsel %vm5659_vm9, 1.0, %v13998_v45 }
 0x43e   : > { %14111 = vst [vmem:[#allocation141_spill] sm:$0xff] %v12325_v29  ;;  %v6310_v3 = vmul.f32 1.442695, %v6266_v63  ;;  %v4507_v23 = vsub.f32 1.0, %v4475_v35  ;;  %v9193_v54 = vpop.eup %9192  ;;  %v5881_v47 = vsub.f32 2.0, %v5849_v26  ;;  %v3966_v31 = vmul.f32 %v9191_v51, %v12268_v13 }
 0x43f   : > { %v5725_v16 = vand.u32 2147483647, %v12315_v50  ;;  %9202 = vrcp.f32 %v3901_v59  ;;  %v12330_v24 = vsel %vm5658_vm10, 1.0, %v13998_v45  ;;  %v4431_v33 = vmul.f32 1.442695, %v4382_v48 }
 0x440   : > { %14112 = vst [vmem:[#allocation142_spill] sm:$0xff] %v12330_v24  ;;  %v4539_v46 = vmul.f32 %v4507_v23, %v12240_v32  ;;  %v4349_v55 = vsub.f32 0.0, %v3837_v19  ;;  %v12333_v42 = vpop.eup %9194  ;;  %9204 = vpow2.f32 %v6312_v1  ;;  %v3998_v22 = vsub.f32 2.0, %v3966_v31 }
 0x441   : > { %14113 = vst [vmem:[#allocation143_spill] sm:$0xff] %v12333_v42  ;;  %vm3773_vm11 = vcmp.ge.f32.partialorder %v3741_v8, 0.0  ;;  %v12336_v63 = vand.u32 2147483647, %v12320_v2  ;;  %v5848_v38 = vmul.f32 %v9193_v54, %v12273_v12  ;;  %9206 = vpow2.f32 %v6310_v3 }
 0x442   : > { %v4571_v13 = vadd.f32 1.0, %v4539_v46  ;;  %v12340_v26 = vmul.f32 0.5, %v11768_v6  ;;  %v9197_v60 = vpop.eup %9196  ;;  %v12342_v35 = vmul.f32 %v9187_v10, %v5881_v47  ;;  %v6237_v32 = vsub.f32 0.0, %v5725_v16 }
 0x443   : > { %v12344_v48 = vmul.f32 %v9191_v51, %v3998_v22  ;;  %v3872_v1 = vmul.f32 0.3275911, %v12336_v63  ;;  %9208 = vpow2.f32 %v4431_v33  ;;  %v12349_v23 = vsel %vm3773_vm11, 1.0, %v13998_v45  ;;  %v14116_v33 = vld [vmem:[#allocation19_spill] sm:$0xff] }
 0x444   : > { %14114 = vst [vmem:[#allocation144_spill] sm:$0xff] %v12342_v35  ;;  %v4603_v8 = vmul.f32 %v4571_v13, %v12181_v52  ;;  %v4381_v12 = vmul.f32 %v4349_v55, %v3837_v19  ;;  %v12351_v31 = vmul.f32 0.5, %v4636_v17  ;;  %v5757_v6 = vmul.f32 0.3275911, %v5725_v16 }
 0x445   : > { %v9199_v3 = vpop.eup %9198  ;;  %v4062_v46 = vmul.f32 1.0614054, %v12344_v48  ;;  %v3904_v10 = vadd.f32 1.0, %v3872_v1  ;;  %v5880_v47 = vsub.f32 2.0, %v5848_v38  ;;  %v5851_v51 = vmul.f32 %v9197_v60, %v12291_v30 }
 0x446   : > { %14115 = vst [vmem:[#allocation145_spill] sm:$0xff] %v12351_v31  ;;  %vm5661_vm12 = vcmp.ge.f32.partialorder %v12315_v50, 0.0  ;;  %v12357_v22 = vmul.f32 0.70710677, %v11789_v36  ;;  %v6269_v52 = vmul.f32 %v6237_v32, %v5725_v16  ;;  %v4635_v13 = vmul.f32 %v14116_v33, %v4603_v8 }
 0x447   : > { %v4094_v14 = vadd.f32 -1.4531521, %v4062_v46  ;;  %9210 = vrcp.f32 %v3904_v10  ;;  %v12360_v19 = vpop.eup %9200  ;;  %v5850_v17 = vmul.f32 %v9199_v3, %v12296_v34  ;;  %v4429_v55 = vmul.f32 1.442695, %v4381_v12 }
 0x448   : > { %14117 = vst [vmem:[#allocation19_spill] sm:$0xff] %v12360_v19  ;;  %v12364_v1 = vmul.f32 0.5, %v11789_v36  ;;  %v3839_v30 = vand.u32 2147483647, %v12357_v22  ;;  %v12367_v31 = vadd.f32 1.0, %v5757_v6  ;;  %vm3776_vm13 = vcmp.ge.f32.partialorder %v12320_v2, 0.0 }
 0x449   : > { %v9203_v38 = vpop.eup %9202  ;;  %v4126_v29 = vmul.f32 %v4094_v14, %v12344_v48  ;;  %v12372_v16 = vmul.f32 0.70710677, %v11831_v25  ;;  %v5883_v32 = vsub.f32 2.0, %v5851_v51  ;;  %v12377_v34 = vsel %vm5661_vm12, 1.0, %v13998_v45 }
 0x44a   : > { %14118 = vst [vmem:[#allocation146_spill] sm:$0xff] %v12377_v34  ;;  %v3965_v36 = vmul.f32 %v9203_v38, %v3901_v59  ;;  %v3871_v8 = vmul.f32 0.3275911, %v3839_v30  ;;  %v12379_v12 = vpop.eup %9204  ;;  %v12381_v46 = vmul.f32 %v9193_v54, %v5880_v47  ;;  %v6316_v6 = vmul.f32 1.442695, %v6269_v52 }
 0x44b   : > { %14119 = vst [vmem:[#allocation147_spill] sm:$0xff] %v12379_v12  ;;  %v5628_v33 = vmul.f32 0.70710677, %v4635_v13  ;;  %v4158_v14 = vadd.f32 1.4214138, %v4126_v29  ;;  %v12383_v24 = vpop.eup %9206  ;;  %v5882_v27 = vsub.f32 2.0, %v5850_v17  ;;  %9212 = vpow2.f32 %v4429_v55 }
 0x44c   : > { %14120 = vst [vmem:[#allocation148_spill] sm:$0xff] %v12383_v24  ;;  %v3997_v42 = vsub.f32 2.0, %v3965_v36  ;;  %v3903_v51 = vadd.f32 1.0, %v3871_v8  ;;  %9214 = vrcp.f32 %v12367_v31  ;;  %v4352_v59 = vsub.f32 0.0, %v12336_v63 }
 0x44d   : > { %v4190_v50 = vmul.f32 %v4158_v14, %v12344_v48  ;;  %v12389_v34 = vand.u32 2147483647, %v12372_v16  ;;  %v9209_v54 = vpop.eup %9208  ;;  %v12391_v47 = vmul.f32 %v9197_v60, %v5883_v32  ;;  %v12398_v29 = vsel %vm3776_vm13, 1.0, %v13998_v45 }
 0x44e   : > { %v12393_v52 = vmul.f32 %v9203_v38, %v3997_v42  ;;  %9216 = vrcp.f32 %v3903_v51  ;;  %v5724_v17 = vand.u32 2147483647, %v5628_v33  ;;  %v4351_v36 = vsub.f32 0.0, %v3839_v30 }
 0x44f   : > { %14121 = vst [vmem:[#allocation149_spill] sm:$0xff] %v12391_v47  ;;  %9218 = vpow2.f32 %v6316_v6  ;;  %v4222_v55 = vadd.f32 -0.28449672, %v4190_v50  ;;  %v12400_v8 = vmul.f32 %v9199_v3, %v5882_v27  ;;  %v12404_v12 = vmul.f32 0.5, %v11831_v25 }
 0x450   : > { %v4061_v14 = vmul.f32 1.0614054, %v12393_v52  ;;  %v3874_v42 = vmul.f32 0.3275911, %v12389_v34  ;;  %v12407_v38 = vmul.f32 0.5, %v4635_v13  ;;  %v4384_v32 = vmul.f32 %v4352_v59, %v12336_v63 }
 0x451   : > { %14122 = vst [vmem:[#allocation150_spill] sm:$0xff] %v12400_v8  ;;  %v9211_v60 = vpop.eup %9210  ;;  %v4254_v2 = vmul.f32 %v4222_v55, %v12344_v48  ;;  %vm3775_vm14 = vcmp.ge.f32.partialorder %v12357_v22, 0.0  ;;  %vm5660_vm15 = vcmp.ge.f32.partialorder %v5628_v33, 0.0  ;;  %v5756_v50 = vmul.f32 0.3275911, %v5724_v17 }
 0x452   : > { %14123 = vst [vmem:[#allocation151_spill] sm:$0xff] %v12407_v38  ;;  %v4093_v6 = vadd.f32 -1.4531521, %v4061_v14  ;;  %v3968_v27 = vmul.f32 %v9211_v60, %v3904_v10  ;;  %v3906_v3 = vadd.f32 1.0, %v3874_v42  ;;  %v6236_v24 = vsub.f32 0.0, %v5724_v17 }
 0x453   : > { %v4286_v19 = vadd.f32 0.2548296, %v4254_v2  ;;  %v4383_v25 = vmul.f32 %v4351_v36, %v3839_v30  ;;  %v12414_v13 = vmul.f32 0.70710677, %v11856_v7  ;;  %v4435_v63 = vmul.f32 1.442695, %v4384_v32 }
 0x454   : > { %v4125_v41 = vmul.f32 %v4093_v6, %v12393_v52  ;;  %v4000_v15 = vsub.f32 2.0, %v3968_v27  ;;  %9220 = vrcp.f32 %v3906_v3  ;;  %v12418_v22 = vsel %vm3775_vm14, 1.0, %v13998_v45 }
 0x455   : > { %v4318_v55 = vmul.f32 %v4286_v19, %v12344_v48  ;;  %v12421_v10 = vmul.f32 0.70710677, %v11905_v4  ;;  %v9213_v59 = vpop.eup %9212  ;;  %v12425_v30 = vsel %vm5660_vm15, 1.0, %v13998_v45  ;;  %v12430_v42 = vand.u32 2147483647, %v12414_v13 }
 0x456   : > { %14124 = vst [vmem:[#allocation152_spill] sm:$0xff] %v12425_v30  ;;  %v4157_v36 = vadd.f32 1.4214138, %v4125_v41  ;;  %v12427_v14 = vmul.f32 %v9211_v60, %v4000_v15  ;;  %v9215_v2 = vpop.eup %9214  ;;  %v12432_v48 = vadd.f32 1.0, %v5756_v50  ;;  %v6268_v19 = vmul.f32 %v6236_v24, %v5724_v17 }
 0x457   : > { %v4478_v32 = vmul.f32 %v9209_v54, %v4318_v55  ;;  %vm3778_vm1 = vcmp.ge.f32.partialorder %v12372_v16, 0.0  ;;  %v4433_v38 = vmul.f32 1.442695, %v4383_v25  ;;  %v3873_v41 = vmul.f32 0.3275911, %v12430_v42 }
 0x458   : > { %v9217_v6 = vpop.eup %9216  ;;  %v4189_v27 = vmul.f32 %v4157_v36, %v12393_v52  ;;  %v4064_v33 = vmul.f32 1.0614054, %v12427_v14  ;;  %v4354_v18 = vsub.f32 0.0, %v12389_v34  ;;  %v12442_v50 = vand.u32 2147483647, %v12421_v10 }
 0x459   : > { %v12438_v15 = vpop.eup %9218  ;;  %v4510_v60 = vsub.f32 1.0, %v4478_v32  ;;  %v3967_v30 = vmul.f32 %v9217_v6, %v3903_v51  ;;  %v5853_v24 = vmul.f32 %v9215_v2, %v12367_v31  ;;  %v3905_v55 = vadd.f32 1.0, %v3873_v41 }
 0x45a   : > { %14125 = vst [vmem:[#allocation153_spill] sm:$0xff] %v12438_v15  ;;  %v4221_v54 = vadd.f32 -0.28449672, %v4189_v27  ;;  %v4096_v17 = vadd.f32 -1.4531521, %v4064_v33  ;;  %9222 = vrcp.f32 %v12432_v48  ;;  %v12453_v15 = vsel %vm3778_vm1, 1.0, %v13998_v45 }
 0x45b   : > { %v4542_v25 = vmul.f32 %v4510_v60, %v12245_v28  ;;  %v3999_v36 = vsub.f32 2.0, %v3967_v30  ;;  %v3876_v21 = vmul.f32 0.3275911, %v12442_v50  ;;  %9224 = vrcp.f32 %v3905_v55 }
 0x45c   : > { %v4253_v32 = vmul.f32 %v4221_v54, %v12393_v52  ;;  %v4128_v51 = vmul.f32 %v4096_v17, %v12427_v14  ;;  %v4386_v33 = vmul.f32 %v4354_v18, %v12389_v34  ;;  %v6314_v30 = vmul.f32 1.442695, %v6268_v19  ;;  %v14126_v18 = vld [vmem:[#allocation20_spill] sm:$0xff] }
 0x45d   : > { %v4574_v31 = vadd.f32 1.0, %v4542_v25  ;;  %v12455_v27 = vmul.f32 %v9217_v6, %v3999_v36  ;;  %v12458_v41 = vadd.f32 1.0, %v3876_v21  ;;  %9226 = vpow2.f32 %v4435_v63 }
 0x45e   : > { %v9221_v28 = vpop.eup %9220  ;;  %v4285_v60 = vadd.f32 0.2548296, %v4253_v32  ;;  %v4160_v47 = vadd.f32 1.4214138, %v4128_v51  ;;  %9228 = vpow2.f32 %v4433_v38  ;;  %v5885_v8 = vsub.f32 2.0, %v5853_v24 }
 0x45f   : > { %v4606_v54 = vmul.f32 %v4574_v31, %v12231_v61  ;;  %v4063_v17 = vmul.f32 1.0614054, %v12455_v27  ;;  %v3970_v16 = vmul.f32 %v9221_v28, %v3906_v3  ;;  %9230 = vrcp.f32 %v12458_v41 }
 0x460   : > { %v4317_v25 = vmul.f32 %v4285_v60, %v12393_v52  ;;  %v4192_v6 = vmul.f32 %v4160_v47, %v12427_v14  ;;  %v4439_v36 = vmul.f32 1.442695, %v4386_v33  ;;  %9232 = vpow2.f32 %v6314_v30 }
 0x461   : > { %v12466_v21 = vmul.f32 %v14126_v18, %v4606_v54  ;;  %v4095_v34 = vadd.f32 -1.4531521, %v4063_v17  ;;  %v4002_v19 = vsub.f32 2.0, %v3970_v16  ;;  %vm3777_vm2 = vcmp.ge.f32.partialorder %v12414_v13, 0.0 }
 0x462   : > { %v4477_v63 = vmul.f32 %v9213_v59, %v4317_v25  ;;  %v4224_v61 = vadd.f32 -0.28449672, %v4192_v6  ;;  %v4353_v47 = vsub.f32 0.0, %v12430_v42  ;;  %v12476_v24 = vmul.f32 %v9215_v2, %v5885_v8 }
 0x463   : > { %v12470_v38 = vmul.f32 0.70710677, %v12466_v21  ;;  %v4127_v52 = vmul.f32 %v4095_v34, %v12455_v27  ;;  %v12473_v3 = vmul.f32 %v9221_v28, %v4002_v19  ;;  %v12480_v31 = vmul.f32 0.70710677, %v11923_v39 }
 0x464   : > { %14127 = vst [vmem:[#allocation20_spill] sm:$0xff] %v12476_v24  ;;  %v4509_v32 = vsub.f32 1.0, %v4477_v63  ;;  %v4256_v51 = vmul.f32 %v4224_v61, %v12427_v14  ;;  %v12482_v59 = vpop.eup %9222  ;;  %9234 = vpow2.f32 %v4439_v36  ;;  %v12485_v30 = vmul.f32 0.5, %v11856_v7 }
 0x465   : > { %v4159_v33 = vadd.f32 1.4214138, %v4127_v52  ;;  %v12488_v28 = vmul.f32 0.5, %v11905_v4  ;;  %v9225_v60 = vpop.eup %9224  ;;  %v4066_v54 = vmul.f32 1.0614054, %v12473_v3  ;;  %v12495_v17 = vsel %vm3777_vm2, 1.0, %v13998_v45 }
 0x466   : > { %v4541_v8 = vmul.f32 %v4509_v32, %v12349_v23  ;;  %v4288_v2 = vadd.f32 0.2548296, %v4256_v51  ;;  %v12498_v16 = vand.u32 2147483647, %v12470_v38  ;;  %v3969_v25 = vmul.f32 %v9225_v60, %v3905_v55 }
 0x467   : > { %v4191_v7 = vmul.f32 %v4159_v33, %v12455_v27  ;;  %v4385_v4 = vmul.f32 %v4353_v47, %v12430_v42  ;;  %v9227_v6 = vpop.eup %9226  ;;  %v4098_v34 = vadd.f32 -1.4531521, %v4066_v54  ;;  %v12504_v19 = vand.u32 2147483647, %v12480_v31 }
 0x468   : > { %v4573_v18 = vadd.f32 1.0, %v4541_v8  ;;  %v4320_v23 = vmul.f32 %v4288_v2, %v12427_v14  ;;  %v9229_v36 = vpop.eup %9228  ;;  %v5852_v13 = vmul.f32 %v12482_v59, %v12432_v48  ;;  %v4001_v61 = vsub.f32 2.0, %v3969_v25  ;;  %v14129_v2 = vld [vmem:[#allocation21_spill] sm:$0xff] }
 0x469   : > { %v4223_v63 = vadd.f32 -0.28449672, %v4191_v7  ;;  %vm3780_vm3 = vcmp.ge.f32.partialorder %v12421_v10, 0.0  ;;  %v9231_v52 = vpop.eup %9230  ;;  %v4130_v47 = vmul.f32 %v4098_v34, %v12473_v3  ;;  %v3875_v14 = vmul.f32 0.3275911, %v12504_v19 }
 0x46a   : > { %v4605_v55 = vmul.f32 %v4573_v18, %v12249_v53  ;;  %v4480_v42 = vmul.f32 %v9227_v6, %v4320_v23  ;;  %v5759_v32 = vmul.f32 0.3275911, %v12498_v16  ;;  %v12514_v33 = vmul.f32 %v9225_v60, %v4001_v61  ;;  %v12516_v48 = vpop.eup %9232 }
 0x46b   : > { %v4255_v51 = vmul.f32 %v4223_v63, %v12455_v27  ;;  %v4437_v8 = vmul.f32 1.442695, %v4385_v4  ;;  %14128 = vst [vmem:[#allocation154_spill] sm:$0xff] %v12516_v48  ;;  %v4162_v25 = vadd.f32 1.4214138, %v4130_v47  ;;  %v3972_v53 = vmul.f32 %v9231_v52, %v12458_v41 }
 0x46c   : > { %v12519_v54 = vmul.f32 %v14129_v2, %v4605_v55  ;;  %v4512_v7 = vsub.f32 1.0, %v4480_v42  ;;  %v4065_v18 = vmul.f32 1.0614054, %v12514_v33  ;;  %v12526_v23 = vsel %vm3780_vm3, 1.0, %v13998_v45 }
 0x46d   : > { %v4287_v6 = vadd.f32 0.2548296, %v4255_v51  ;;  %v3907_v60 = vadd.f32 1.0, %v3875_v14  ;;  %v4194_v63 = vmul.f32 %v4162_v25, %v12473_v3  ;;  %v4356_v61 = vsub.f32 0.0, %v12442_v50 }
 0x46e   : > { %v12529_v4 = vmul.f32 0.70710677, %v12519_v54  ;;  %v4544_v34 = vmul.f32 %v4512_v7, %v12398_v29  ;;  %v9235_v55 = vpop.eup %9234  ;;  %v4097_v42 = vadd.f32 -1.4531521, %v4065_v18  ;;  %v4004_v47 = vsub.f32 2.0, %v3972_v53 }
 0x46f   : > { %v4319_v41 = vmul.f32 %v4287_v6, %v12455_v27  ;;  %9236 = vrcp.f32 %v3907_v60  ;;  %v5884_v51 = vsub.f32 2.0, %v5852_v13  ;;  %v12535_v10 = vadd.f32 1.0, %v5759_v32 }
 0x470   : > { %v4576_v2 = vadd.f32 1.0, %v4544_v34  ;;  %v4226_v14 = vadd.f32 -0.28449672, %v4194_v63  ;;  %v5726_v48 = vand.u32 2147483647, %v12529_v4  ;;  %v4129_v29 = vmul.f32 %v4097_v42, %v12514_v33 }
 0x471   : > { %v4479_v24 = vmul.f32 %v9229_v36, %v4319_v41  ;;  %v12539_v7 = vmul.f32 %v9231_v52, %v4004_v47  ;;  %v6239_v25 = vsub.f32 0.0, %v12498_v16  ;;  %v4388_v53 = vmul.f32 %v4356_v61, %v12442_v50  ;;  %v14130_v36 = vld [vmem:[#allocation22_spill] sm:$0xff] }
 0x472   : > { %v4608_v35 = vmul.f32 %v4576_v2, %v12340_v26  ;;  %v4258_v27 = vmul.f32 %v4226_v14, %v12473_v3  ;;  %v4161_v32 = vadd.f32 1.4214138, %v4129_v29  ;;  %9238 = vpow2.f32 %v4437_v8 }
 0x473   : > { %v4511_v13 = vsub.f32 1.0, %v4479_v24  ;;  %v4068_v6 = vmul.f32 1.0614054, %v12539_v7  ;;  %v12547_v18 = vmul.f32 %v12482_v59, %v5884_v51  ;;  %9240 = vrcp.f32 %v12535_v10 }
 0x474   : > { %v4640_v52 = vmul.f32 %v14130_v36, %v4608_v35  ;;  %v4290_v34 = vadd.f32 0.2548296, %v4258_v27  ;;  %v5758_v63 = vmul.f32 0.3275911, %v5726_v48  ;;  %v4193_v41 = vmul.f32 %v4161_v32, %v12514_v33  ;;  %v14132_v32 = vld [vmem:[#allocation23_spill] sm:$0xff] }
 0x475   : > { %v4543_v26 = vmul.f32 %v4511_v13, %v12418_v22  ;;  %v4100_v42 = vadd.f32 -1.4531521, %v4068_v6  ;;  %v6271_v50 = vmul.f32 %v6239_v25, %v12498_v16  ;;  %v4443_v24 = vmul.f32 1.442695, %v4388_v53 }
 0x476   : > { %v12555_v8 = vmul.f32 0.5, %v11923_v39  ;;  %vm3779_vm4 = vcmp.ge.f32.partialorder %v12480_v31, 0.0  ;;  %v12558_v59 = vmul.f32 0.70710677, %v4640_v52  ;;  %v4322_v35 = vmul.f32 %v4290_v34, %v12473_v3 }
 0x477   : > { %v4575_v61 = vadd.f32 1.0, %v4543_v26  ;;  %v4225_v47 = vadd.f32 -0.28449672, %v4193_v41  ;;  %v12562_v51 = vmul.f32 0.5, %v12466_v21  ;;  %vm5663_vm5 = vcmp.ge.f32.partialorder %v12470_v38, 0.0 }
 0x478   : > { %v6238_v22 = vsub.f32 0.0, %v5726_v48  ;;  %v4132_v16 = vmul.f32 %v4100_v42, %v12539_v7  ;;  %v12566_v14 = vadd.f32 1.0, %v5758_v63  ;;  %v5729_v39 = vand.u32 2147483647, %v12558_v59 }
 0x479   : > { %14131 = vst [vmem:[#allocation21_spill] sm:$0xff] %v12562_v51  ;;  %v9237_v2 = vpop.eup %9236  ;;  %v4607_v29 = vmul.f32 %v4575_v61, %v12364_v1  ;;  %v4482_v25 = vmul.f32 %v9235_v55, %v4322_v35  ;;  %v4257_v27 = vmul.f32 %v4225_v47, %v12514_v33  ;;  %9242 = vpow2.f32 %v4443_v24 }
 0x47a   : > { %v4164_v3 = vadd.f32 1.4214138, %v4132_v16  ;;  %v12574_v21 = vsel %vm3779_vm4, 1.0, %v13998_v45  ;;  %v6320_v53 = vmul.f32 1.442695, %v6271_v50  ;;  %v12582_v1 = vsel %vm5663_vm5, 1.0, %v13998_v45 }
 0x47b   : > { %v5761_v13 = vmul.f32 0.3275911, %v5729_v39  ;;  %v12577_v6 = vmul.f32 %v14132_v32, %v4607_v29  ;;  %v4514_v36 = vsub.f32 1.0, %v4482_v25  ;;  %14133 = vst [vmem:[#allocation22_spill] sm:$0xff] %v12582_v1  ;;  %v4289_v55 = vadd.f32 0.2548296, %v4257_v27 }
 0x47c   : > { %v4196_v34 = vmul.f32 %v4164_v3, %v12539_v7  ;;  %v3971_v63 = vmul.f32 %v9237_v2, %v3907_v60  ;;  %v9239_v26 = vpop.eup %9238  ;;  %vm5662_vm6 = vcmp.ge.f32.partialorder %v12529_v4, 0.0  ;;  %9244 = vrcp.f32 %v12566_v14 }
 0x47d   : > { %v6270_v31 = vmul.f32 %v6238_v22, %v5726_v48  ;;  %v12588_v41 = vmul.f32 0.70710677, %v12577_v6  ;;  %v9241_v42 = vpop.eup %9240  ;;  %v4546_v50 = vmul.f32 %v4514_v36, %v12453_v15  ;;  %v4321_v38 = vmul.f32 %v4289_v55, %v12514_v33 }
 0x47e   : > { %v4228_v24 = vadd.f32 -0.28449672, %v4196_v34  ;;  %v4003_v61 = vsub.f32 2.0, %v3971_v63  ;;  %9246 = vpow2.f32 %v6320_v53  ;;  %v12592_v35 = vadd.f32 1.0, %v5761_v13  ;;  %v14137_v34 = vld [vmem:[#allocation24_spill] sm:$0xff] }
 0x47f   : > { %v5728_v60 = vand.u32 2147483647, %v12588_v41  ;;  %v4355_v47 = vsub.f32 0.0, %v12504_v19  ;;  %v12597_v16 = vmul.f32 0.5, %v12519_v54  ;;  %v4578_v48 = vadd.f32 1.0, %v4546_v50 }
 0x480   : > { %v4481_v22 = vmul.f32 %v9239_v26, %v4321_v38  ;;  %v4260_v29 = vmul.f32 %v4228_v24, %v12539_v7  ;;  %v5855_v15 = vmul.f32 %v9241_v42, %v12535_v10  ;;  %v12604_v33 = vsel %vm5662_vm6, 1.0, %v13998_v45 }
 0x481   : > { %14134 = vst [vmem:[#allocation23_spill] sm:$0xff] %v12597_v16  ;;  %14135 = vst [vmem:[#allocation155_spill] sm:$0xff] %v12604_v33  ;;  %v6318_v25 = vmul.f32 1.442695, %v6270_v31  ;;  %v5760_v27 = vmul.f32 0.3275911, %v5728_v60  ;;  %v4610_v3 = vmul.f32 %v4578_v48, %v12404_v12  ;;  %v12607_v32 = vmul.f32 %v9237_v2, %v4003_v61 }
 0x482   : > { %v4513_v53 = vsub.f32 1.0, %v4481_v22  ;;  %v4292_v13 = vadd.f32 0.2548296, %v4260_v29  ;;  %v12609_v54 = vmul.f32 0.5, %v4640_v52  ;;  %9248 = vrcp.f32 %v12592_v35 }
 0x483   : > { %v6241_v36 = vsub.f32 0.0, %v5729_v39  ;;  %v4387_v10 = vmul.f32 %v4355_v47, %v12504_v19  ;;  %v9243_v55 = vpop.eup %9242  ;;  %v12614_v4 = vmul.f32 %v14137_v34, %v4610_v3  ;;  %v4067_v12 = vmul.f32 1.0614054, %v12607_v32 }
 0x484   : > { %14136 = vst [vmem:[#allocation156_spill] sm:$0xff] %v12609_v54  ;;  %v4545_v63 = vmul.f32 %v4513_v53, %v12495_v17  ;;  %v4324_v26 = vmul.f32 %v4292_v13, %v12539_v7  ;;  %v5887_v31 = vsub.f32 2.0, %v5855_v15  ;;  %9250 = vpow2.f32 %v6318_v25 }
 0x485   : > { %vm5665_vm7 = vcmp.ge.f32.partialorder %v12558_v59, 0.0  ;;  %v12621_v52 = vmul.f32 0.70710677, %v12029_v37  ;;  %v12623_v2 = vadd.f32 1.0, %v5760_v27  ;;  %v12626_v19 = vmul.f32 0.70710677, %v12614_v4 }
 0x486   : > { %v4577_v50 = vadd.f32 1.0, %v4545_v63  ;;  %v4484_v38 = vmul.f32 %v9243_v55, %v4324_v26  ;;  %v9245_v24 = vpop.eup %9244  ;;  %v6273_v17 = vmul.f32 %v6241_v36, %v5729_v39  ;;  %v4099_v61 = vadd.f32 -1.4531521, %v4067_v12 }
 0x487   : > { %v4441_v7 = vmul.f32 1.442695, %v4387_v10  ;;  %v3846_v47 = vand.u32 2147483647, %v12621_v52  ;;  %v6240_v48 = vsub.f32 0.0, %v5728_v60  ;;  %v12633_v27 = vmul.f32 %v9241_v42, %v5887_v31  ;;  %v14139_v10 = vld [vmem:[#allocation25_spill] sm:$0xff] }
 0x488   : > { %v5731_v22 = vand.u32 2147483647, %v12626_v19  ;;  %v4609_v29 = vmul.f32 %v4577_v50, %v12485_v30  ;;  %v4516_v15 = vsub.f32 1.0, %v4484_v38  ;;  %v12631_v25 = vpop.eup %9246  ;;  %v12638_v3 = vsel %vm5665_vm7, 1.0, %v13998_v45 }
 0x489   : > { %14138 = vst [vmem:[#allocation24_spill] sm:$0xff] %v12638_v3  ;;  %v4131_v39 = vmul.f32 %v4099_v61, %v12607_v32  ;;  %v3878_v53 = vmul.f32 0.3275911, %v3846_v47  ;;  %v5854_v13 = vmul.f32 %v9245_v24, %v12566_v14  ;;  %9252 = vrcp.f32 %v12623_v2 }
 0x48a   : > { %v5763_v36 = vmul.f32 0.3275911, %v5731_v22  ;;  %v4641_v30 = vmul.f32 %v14139_v10, %v4609_v29  ;;  %vm5664_vm8 = vcmp.ge.f32.partialorder %v12588_v41, 0.0  ;;  %v4548_v42 = vmul.f32 %v4516_v15, %v12526_v23  ;;  %v14142_v10 = vld [vmem:[#allocation26_spill] sm:$0xff] }
 0x48b   : > { %v4163_v55 = vadd.f32 1.4214138, %v4131_v39  ;;  %v3910_v34 = vadd.f32 1.0, %v3878_v53  ;;  %v6324_v63 = vmul.f32 1.442695, %v6273_v17  ;;  %v6272_v59 = vmul.f32 %v6240_v48, %v5728_v60 }
 0x48c   : > { %v6243_v26 = vsub.f32 0.0, %v5731_v22  ;;  %9254 = vpow2.f32 %v4441_v7  ;;  %v9249_v12 = vpop.eup %9248  ;;  %v12646_v31 = vmul.f32 0.70710677, %v4641_v30  ;;  %v4580_v50 = vadd.f32 1.0, %v4548_v42 }
 0x48d   : > { %v4195_v14 = vmul.f32 %v4163_v55, %v12607_v32  ;;  %9256 = vrcp.f32 %v3910_v34  ;;  %v5886_v38 = vsub.f32 2.0, %v5854_v13  ;;  %v12650_v61 = vmul.f32 0.5, %v12577_v6 }
 0x48e   : > { %v12653_v41 = vsel %vm5664_vm8, 1.0, %v13998_v45  ;;  %v12655_v23 = vadd.f32 1.0, %v5763_v36  ;;  %v12657_v17 = vpop.eup %9250  ;;  %v5730_v60 = vand.u32 2147483647, %v12646_v31  ;;  %v4612_v7 = vmul.f32 %v4580_v50, %v12488_v28 }
 0x48f   : > { %14140 = vst [vmem:[#allocation25_spill] sm:$0xff] %v12650_v61  ;;  %14141 = vst [vmem:[#allocation157_spill] sm:$0xff] %v12653_v41  ;;  %v4227_v48 = vadd.f32 -0.28449672, %v4195_v14  ;;  %v4358_v29 = vsub.f32 0.0, %v3846_v47  ;;  %v5857_v15 = vmul.f32 %v9249_v12, %v12592_v35  ;;  %9258 = vpow2.f32 %v6324_v63 }
 0x490   : > { %v6322_v39 = vmul.f32 1.442695, %v6272_v59  ;;  %v12663_v6 = vmul.f32 0.5, %v12029_v37  ;;  %v6275_v53 = vmul.f32 %v6243_v26, %v5731_v22  ;;  %v5762_v13 = vmul.f32 0.3275911, %v5730_v60 }
 0x491   : > { %v4644_v36 = vmul.f32 %v14142_v10, %v4612_v7  ;;  %v4259_v42 = vmul.f32 %v4227_v48, %v12607_v32  ;;  %v12667_v55 = vmul.f32 %v9245_v24, %v5886_v38  ;;  %vm5667_vm9 = vcmp.ge.f32.partialorder %v12626_v19, 0.0 }
 0x492   : > { %9260 = vrcp.f32 %v12655_v23  ;;  %v12672_v28 = vmul.f32 0.70710677, %v12113_v62  ;;  %v12674_v35 = vadd.f32 1.0, %v5762_v13  ;;  %vm3782_vm10 = vcmp.ge.f32.partialorder %v12621_v52, 0.0 }
 0x493   : > { %v12676_v63 = vmul.f32 0.70710677, %v4644_v36  ;;  %v4390_v37 = vmul.f32 %v4358_v29, %v3846_v47  ;;  %v9253_v22 = vpop.eup %9252  ;;  %9262 = vpow2.f32 %v6322_v39  ;;  %v12680_v59 = vmul.f32 0.5, %v12614_v4 }
 0x494   : > { %v4291_v24 = vadd.f32 0.2548296, %v4259_v42  ;;  %v3845_v19 = vand.u32 2147483647, %v12672_v28  ;;  %v5889_v26 = vsub.f32 2.0, %v5857_v15  ;;  %v12684_v50 = vsel %vm5667_vm9, 1.0, %v13998_v45 }
 0x495   : > { %14143 = vst [vmem:[#allocation158_spill] sm:$0xff] %v12680_v59  ;;  %14144 = vst [vmem:[#allocation159_spill] sm:$0xff] %v12684_v50  ;;  %v6328_v14 = vmul.f32 1.442695, %v6275_v53  ;;  %v5733_v38 = vand.u32 2147483647, %v12676_v63  ;;  %v5856_v39 = vmul.f32 %v9253_v22, %v12623_v2  ;;  %9264 = vrcp.f32 %v12674_v35 }
 0x496   : > { %v9255_v7 = vpop.eup %9254  ;;  %v12687_v48 = vmul.f32 0.5, %v4641_v30  ;;  %v4323_v52 = vmul.f32 %v4291_v24, %v12607_v32  ;;  %v12691_v47 = vsel %vm3782_vm10, 1.0, %v13998_v45  ;;  %v3877_v4 = vmul.f32 0.3275911, %v3845_v19 }
 0x497   : > { %v9257_v29 = vpop.eup %9256  ;;  %v6242_v15 = vsub.f32 0.0, %v5730_v60  ;;  %v4447_v13 = vmul.f32 1.442695, %v4390_v37  ;;  %vm5666_vm11 = vcmp.ge.f32.partialorder %v12646_v31, 0.0  ;;  %v12696_v30 = vmul.f32 %v9249_v12, %v5889_v26 }
 0x498   : > { %14145 = vst [vmem:[#allocation160_spill] sm:$0xff] %v12687_v48  ;;  %v4483_v53 = vmul.f32 %v9255_v7, %v4323_v52  ;;  %v3974_v42 = vmul.f32 %v9257_v29, %v3910_v34  ;;  %v3909_v10 = vadd.f32 1.0, %v3877_v4  ;;  %9266 = vpow2.f32 %v6328_v14 }
 0x499   : > { %v5765_v32 = vmul.f32 0.3275911, %v5733_v38  ;;  %v6245_v24 = vsub.f32 0.0, %v5733_v38  ;;  %v12698_v59 = vpop.eup %9258  ;;  %v3752_v2 = vmul.f32 0.70710677, %v12158_v56  ;;  %v5888_v54 = vsub.f32 2.0, %v5856_v39 }
 0x49a   : > { %14146 = vst [vmem:[#allocation161_spill] sm:$0xff] %v12698_v59  ;;  %v4515_v48 = vsub.f32 1.0, %v4483_v53  ;;  %v4006_v50 = vsub.f32 2.0, %v3974_v42  ;;  %9268 = vrcp.f32 %v3909_v10  ;;  %v12702_v37 = vsel %vm5666_vm11, 1.0, %v13998_v45 }
 0x49b   : > { %14147 = vst [vmem:[#allocation162_spill] sm:$0xff] %v12702_v37  ;;  %v6274_v31 = vmul.f32 %v6242_v15, %v5730_v60  ;;  %9270 = vpow2.f32 %v4447_v13  ;;  %v12708_v14 = vmul.f32 0.5, %v12113_v62  ;;  %v3848_v7 = vand.u32 2147483647, %v3752_v2 }
 0x49c   : > { %v9261_v34 = vpop.eup %9260  ;;  %v4547_v12 = vmul.f32 %v4515_v48, %v12574_v21  ;;  %v12705_v26 = vmul.f32 %v9257_v29, %v4006_v50  ;;  %v12710_v52 = vmul.f32 0.5, %v4644_v36  ;;  %vm5669_vm12 = vcmp.ge.f32.partialorder %v12676_v63, 0.0 }
 0x49d   : > { %v12713_v4 = vadd.f32 1.0, %v5765_v32  ;;  %v4357_v39 = vsub.f32 0.0, %v3845_v19  ;;  %v12715_v53 = vpop.eup %9262  ;;  %v6277_v60 = vmul.f32 %v6245_v24, %v5733_v38  ;;  %v3880_v21 = vmul.f32 0.3275911, %v3848_v7 }
 0x49e   : > { %14148 = vst [vmem:[#allocation163_spill] sm:$0xff] %v12710_v52  ;;  %14149 = vst [vmem:[#allocation164_spill] sm:$0xff] %v12715_v53  ;;  %v4579_v15 = vadd.f32 1.0, %v4547_v12  ;;  %v4070_v13 = vmul.f32 1.0614054, %v12705_v26  ;;  %v12718_v50 = vmul.f32 %v9253_v22, %v5888_v54  ;;  %v5859_v62 = vmul.f32 %v9261_v34, %v12655_v23 }
 0x49f   : > { %v6326_v48 = vmul.f32 1.442695, %v6274_v31  ;;  %v3751_v36 = vmul.f32 0.70710677, %v12183_v49  ;;  %vm3781_vm13 = vcmp.ge.f32.partialorder %v12672_v28, 0.0  ;;  %v3912_v32 = vadd.f32 1.0, %v3880_v21  ;;  %v9265_v52 = vpop.eup %9264 }
 0x4a0   : > { %v4611_v29 = vmul.f32 %v4579_v15, %v12555_v8  ;;  %v4102_v42 = vadd.f32 -1.4531521, %v4070_v13  ;;  %v12727_v38 = vsel %vm5669_vm12, 1.0, %v13998_v45  ;;  %9272 = vrcp.f32 %v12713_v4  ;;  %v14152_v21 = vld [vmem:[#allocation27_spill] sm:$0xff] }
 0x4a1   : > { %14150 = vst [vmem:[#allocation165_spill] sm:$0xff] %v12727_v38  ;;  %v4389_v54 = vmul.f32 %v4357_v39, %v3845_v19  ;;  %v3847_v22 = vand.u32 2147483647, %v3751_v36  ;;  %v6332_v23 = vmul.f32 1.442695, %v6277_v60  ;;  %9274 = vrcp.f32 %v3912_v32 }
 0x4a2   : > { %v4134_v24 = vmul.f32 %v4102_v42, %v12705_v26  ;;  %v4360_v31 = vsub.f32 0.0, %v3848_v7  ;;  %v12731_v8 = vpop.eup %9266  ;;  %v5891_v12 = vsub.f32 2.0, %v5859_v62  ;;  %9276 = vpow2.f32 %v6326_v48 }
 0x4a3   : > { %14151 = vst [vmem:[#allocation166_spill] sm:$0xff] %v12731_v8  ;;  %v12734_v28 = vsel %vm3781_vm13, 1.0, %v13998_v45  ;;  %v3879_v15 = vmul.f32 0.3275911, %v3847_v22  ;;  %v5858_v13 = vmul.f32 %v9265_v52, %v12674_v35  ;;  %v4643_v38 = vmul.f32 %v14152_v21, %v4611_v29 }
 0x4a4   : > { %v9269_v63 = vpop.eup %9268  ;;  %v4166_v19 = vadd.f32 1.4214138, %v4134_v24  ;;  %vm3784_vm14 = vcmp.ge.f32.partialorder %v3752_v2, 0.0  ;;  %v12739_v42 = vmul.f32 0.5, %v12158_v56  ;;  %v12742_v62 = vmul.f32 0.70710677, %v12204_v5 }
 0x4a5   : > { %v9271_v39 = vpop.eup %9270  ;;  %v3973_v60 = vmul.f32 %v9269_v63, %v3909_v10  ;;  %v3911_v61 = vadd.f32 1.0, %v3879_v15  ;;  %9278 = vpow2.f32 %v6332_v23  ;;  %v4445_v37 = vmul.f32 1.442695, %v4389_v54 }
 0x4a6   : > { %v4198_v48 = vmul.f32 %v4166_v19, %v12705_v26  ;;  %v4392_v8 = vmul.f32 %v4360_v31, %v3848_v7  ;;  %v12745_v3 = vmul.f32 %v9261_v34, %v5891_v12  ;;  %v12748_v29 = vsel %vm3784_vm14, 1.0, %v13998_v45 }
 0x4a7   : > { %v4005_v35 = vsub.f32 2.0, %v3973_v60  ;;  %9280 = vrcp.f32 %v3911_v61  ;;  %v5890_v10 = vsub.f32 2.0, %v5858_v13  ;;  %v5636_v2 = vmul.f32 0.70710677, %v4643_v38 }
 0x4a8   : > { %v4230_v56 = vadd.f32 -0.28449672, %v4198_v48  ;;  %vm3783_vm15 = vcmp.ge.f32.partialorder %v3751_v36, 0.0  ;;  %v12753_v15 = vmul.f32 0.5, %v12183_v49  ;;  %v4359_v23 = vsub.f32 0.0, %v3847_v22 }
 0x4a9   : > { %v12750_v24 = vmul.f32 %v9269_v63, %v4005_v35  ;;  %v12756_v54 = vand.u32 2147483647, %v12742_v62  ;;  %9282 = vpow2.f32 %v4445_v37  ;;  %v4451_v7 = vmul.f32 1.442695, %v4392_v8 }
 0x4aa   : > { %v4262_v34 = vmul.f32 %v4230_v56, %v12705_v26  ;;  %v12760_v31 = vmul.f32 0.5, %v12204_v5  ;;  %v9273_v12 = vpop.eup %9272  ;;  %v12764_v36 = vsel %vm3783_vm15, 1.0, %v13998_v45  ;;  %vm3786_vm1 = vcmp.ge.f32.partialorder %v12742_v62, 0.0 }
 0x4ab   : > { %v4069_v13 = vmul.f32 1.0614054, %v12750_v24  ;;  %v3882_v49 = vmul.f32 0.3275911, %v12756_v54  ;;  %v9275_v63 = vpop.eup %9274  ;;  %v12768_v21 = vmul.f32 %v9265_v52, %v5890_v10  ;;  %v5732_v19 = vand.u32 2147483647, %v5636_v2 }
 0x4ac   : > { %v4294_v60 = vadd.f32 0.2548296, %v4262_v34  ;;  %v12771_v37 = vmul.f32 0.70710677, %v12226_v11  ;;  %v12773_v5 = vpop.eup %9276  ;;  %v3976_v48 = vmul.f32 %v9275_v63, %v3912_v32  ;;  %v4391_v35 = vmul.f32 %v4359_v23, %v3847_v22 }
 0x4ad   : > { %14153 = vst [vmem:[#allocation27_spill] sm:$0xff] %v12773_v5  ;;  %v4101_v8 = vadd.f32 -1.4531521, %v4069_v13  ;;  %v3914_v56 = vadd.f32 1.0, %v3882_v49  ;;  %v5861_v41 = vmul.f32 %v9273_v12, %v12713_v4  ;;  %vm5668_vm2 = vcmp.ge.f32.partialorder %v5636_v2, 0.0 }
 0x4ae   : > { %v4326_v59 = vmul.f32 %v4294_v60, %v12705_v26  ;;  %v12778_v53 = vand.u32 2147483647, %v12771_v37  ;;  %v12780_v52 = vmul.f32 0.5, %v4643_v38  ;;  %v4008_v34 = vsub.f32 2.0, %v3976_v48 }
 0x4af   : > { %v4133_v10 = vmul.f32 %v4101_v8, %v12750_v24  ;;  %9284 = vrcp.f32 %v3914_v56  ;;  %v12783_v51 = vpop.eup %9278  ;;  %v6244_v13 = vsub.f32 0.0, %v5732_v19  ;;  %v12787_v2 = vsel %vm5668_vm2, 1.0, %v13998_v45 }
 0x4b0   : > { %14154 = vst [vmem:[#allocation167_spill] sm:$0xff] %v12780_v52  ;;  %14155 = vst [vmem:[#allocation168_spill] sm:$0xff] %v12783_v51  ;;  %v4486_v32 = vmul.f32 %v9271_v39, %v4326_v59  ;;  %9286 = vpow2.f32 %v4451_v7  ;;  %v3881_v22 = vmul.f32 0.3275911, %v12778_v53  ;;  %v12789_v23 = vmul.f32 %v9275_v63, %v4008_v34  ;;  %v6510_v52 = vld [vmem:[%s13697_s5] sm:$0x3] }
 0x4b1   : > { %v9281_v4 = vpop.eup %9280  ;;  %14156 = vst [vmem:[#allocation169_spill] sm:$0xff] %v12787_v2  ;;  %v4165_v26 = vadd.f32 1.4214138, %v4133_v10  ;;  %v4449_v38 = vmul.f32 1.442695, %v4391_v35  ;;  %v5893_v49 = vsub.f32 2.0, %v5861_v41  ;;  %v6276_v63 = vmul.f32 %v6244_v13, %v5732_v19 }
 0x4b2   : > { %v4518_v60 = vsub.f32 1.0, %v4486_v32  ;;  %v3975_v8 = vmul.f32 %v9281_v4, %v3911_v61  ;;  %v3913_v48 = vadd.f32 1.0, %v3881_v22  ;;  %v5764_v59 = vmul.f32 0.3275911, %v5732_v19 }
 0x4b3   : > { %v4197_v39 = vmul.f32 %v4165_v26, %v12750_v24  ;;  %v4072_v7 = vmul.f32 1.0614054, %v12789_v23  ;;  %v12797_v51 = vmul.f32 0.70710677, %v12277_v0  ;;  %v9283_v10 = vpop.eup %9282  ;;  %v4362_v32 = vsub.f32 0.0, %v12756_v54 }
 0x4b4   : > { %v4550_v35 = vmul.f32 %v4518_v60, %v12691_v47  ;;  %v4007_v41 = vsub.f32 2.0, %v3975_v8  ;;  %9288 = vrcp.f32 %v3913_v48  ;;  %vm6608_vm3 = vcmask 1041408  }
 0x4b5   : > { %v4229_v61 = vadd.f32 -0.28449672, %v4197_v39  ;;  %v4104_v34 = vadd.f32 -1.4531521, %v4072_v7  ;;  %9290 = vpow2.f32 %v4449_v38  ;;  %v12806_v26 = vsel %vm3786_vm1, 1.0, %v13998_v45  ;;  %8557 = vmatprep.subr.msk.mxu1 %vm6608_vm3, %v6510_v52 }
 0x4b6   : > { %v4582_v22 = vadd.f32 1.0, %v4550_v35  ;;  %v12801_v2 = vmul.f32 %v9281_v4, %v4007_v41  ;;  %v12808_v19 = vadd.f32 1.0, %v5764_v59  ;;  %v12813_v60 = vand.u32 2147483647, %v12797_v51  ;;  %8558 = vmatpush3.msk.msra.mxu1 %vm6608_vm3, %v6510_v52 }
 0x4b7   : > { %v4261_v47 = vmul.f32 %v4229_v61, %v12750_v24  ;;  %v4136_v13 = vmul.f32 %v4104_v34, %v12789_v23  ;;  %v12815_v8 = vmul.f32 %v9273_v12, %v5893_v49  ;;  %v6330_v4 = vmul.f32 1.442695, %v6276_v63  ;;  %v14158_v34 = vld [vmem:[#allocation28_spill] sm:$0xff] }
 0x4b8   : > { %v4614_v38 = vmul.f32 %v4582_v22, %v12663_v6  ;;  %v4071_v62 = vmul.f32 1.0614054, %v12801_v2  ;;  %v4394_v59 = vmul.f32 %v4362_v32, %v12756_v54  ;;  %v12821_v41 = vmul.f32 0.5, %v12226_v11 }
 0x4b9   : > { %14157 = vst [vmem:[#allocation170_spill] sm:$0xff] %v12815_v8  ;;  %v9285_v39 = vpop.eup %9284  ;;  %v4293_v7 = vadd.f32 0.2548296, %v4261_v47  ;;  %v4168_v35 = vadd.f32 1.4214138, %v4136_v13  ;;  %9292 = vrcp.f32 %v12808_v19  ;;  %v4361_v22 = vsub.f32 0.0, %v12778_v53 }
 0x4ba   : > { %v9287_v61 = vpop.eup %9286  ;;  %v12824_v5 = vmul.f32 %v14158_v34, %v4614_v38  ;;  %v4103_v52 = vadd.f32 -1.4531521, %v4071_v62  ;;  %v3978_v12 = vmul.f32 %v9285_v39, %v3914_v56  ;;  %v3884_v49 = vmul.f32 0.3275911, %v12813_v60 }
 0x4bb   : > { %v4325_v6 = vmul.f32 %v4293_v7, %v12750_v24  ;;  %v4200_v63 = vmul.f32 %v4168_v35, %v12789_v23  ;;  %9294 = vpow2.f32 %v6330_v4  ;;  %vm3785_vm4 = vcmp.ge.f32.partialorder %v12771_v37, 0.0 }
 0x4bc   : > { %v12832_v11 = vmul.f32 0.70710677, %v12824_v5  ;;  %v4135_v54 = vmul.f32 %v4103_v52, %v12801_v2  ;;  %v4010_v32 = vsub.f32 2.0, %v3978_v12  ;;  %v12836_v56 = vadd.f32 1.0, %v3884_v49 }
 0x4bd   : > { %v4485_v47 = vmul.f32 %v9283_v10, %v4325_v6  ;;  %v4232_v13 = vadd.f32 -0.28449672, %v4200_v63  ;;  %v4455_v4 = vmul.f32 1.442695, %v4394_v59  ;;  %v4393_v52 = vmul.f32 %v4361_v22, %v12778_v53 }
 0x4be   : > { %v9289_v38 = vpop.eup %9288  ;;  %v12839_v24 = vand.u32 2147483647, %v12832_v11  ;;  %v4167_v62 = vadd.f32 1.4214138, %v4135_v54  ;;  %v12841_v7 = vmul.f32 %v9285_v39, %v4010_v32  ;;  %v12849_v6 = vsel %vm3785_vm4, 1.0, %v13998_v45 }
 0x4bf   : > { %v4517_v35 = vsub.f32 1.0, %v4485_v47  ;;  %v4264_v34 = vmul.f32 %v4232_v13, %v12789_v23  ;;  %v3977_v8 = vmul.f32 %v9289_v38, %v3913_v48  ;;  %v9291_v10 = vpop.eup %9290  ;;  %9296 = vrcp.f32 %v12836_v56 }
 0x4c0   : > { %v5767_v12 = vmul.f32 0.3275911, %v12839_v24  ;;  %v4199_v37 = vmul.f32 %v4167_v62, %v12801_v2  ;;  %v4074_v49 = vmul.f32 1.0614054, %v12841_v7  ;;  %9298 = vpow2.f32 %v4455_v4 }
 0x4c1   : > { %v4549_v39 = vmul.f32 %v4517_v35, %v12734_v28  ;;  %v4296_v63 = vadd.f32 0.2548296, %v4264_v34  ;;  %v4009_v59 = vsub.f32 2.0, %v3977_v8  ;;  %v12854_v53 = vmul.f32 0.5, %v12277_v0 }
 0x4c2   : > { %v4231_v54 = vadd.f32 -0.28449672, %v4199_v37  ;;  %v4106_v48 = vadd.f32 -1.4531521, %v4074_v49  ;;  %v4453_v13 = vmul.f32 1.442695, %v4393_v52 }
 0x4c3   : > { %v4581_v22 = vadd.f32 1.0, %v4549_v39  ;;  %v4328_v32 = vmul.f32 %v4296_v63, %v12789_v23  ;;  %v12857_v47 = vmul.f32 %v9289_v38, %v4009_v59  ;;  %v12859_v62 = vadd.f32 1.0, %v5767_v12  ;;  %v9293_v35 = vpop.eup %9292  ;;  %v14160_v39 = vld [vmem:[#allocation29_spill] sm:$0xff] }
 0x4c4   : > { %v4263_v28 = vmul.f32 %v4231_v54, %v12801_v2  ;;  %v4138_v8 = vmul.f32 %v4106_v48, %v12841_v7  ;;  %v12864_v34 = vmul.f32 0.5, %v12311_v9  ;;  %v12869_v23 = vmul.f32 0.70710677, %v12311_v9 }
 0x4c5   : > { %v4613_v4 = vmul.f32 %v4581_v22, %v12708_v14  ;;  %v4488_v0 = vmul.f32 %v9287_v61, %v4328_v32  ;;  %v4073_v37 = vmul.f32 1.0614054, %v12857_v47  ;;  %v12871_v38 = vpop.eup %9294  ;;  %vm3788_vm5 = vcmp.ge.f32.partialorder %v12797_v51, 0.0 }
 0x4c6   : > { %14159 = vst [vmem:[#allocation171_spill] sm:$0xff] %v12871_v38  ;;  %v4295_v52 = vadd.f32 0.2548296, %v4263_v28  ;;  %v4170_v12 = vadd.f32 1.4214138, %v4138_v8  ;;  %v4364_v49 = vsub.f32 0.0, %v12813_v60  ;;  %9300 = vpow2.f32 %v4453_v13 }
 0x4c7   : > { %v12876_v63 = vmul.f32 %v14160_v39, %v4613_v4  ;;  %v4520_v59 = vsub.f32 1.0, %v4488_v0  ;;  %v4105_v54 = vadd.f32 -1.4531521, %v4073_v37  ;;  %v5860_v14 = vmul.f32 %v9293_v35, %v12808_v19 }
 0x4c8   : > { %9302 = vrcp.f32 %v12859_v62  ;;  %v4327_v9 = vmul.f32 %v4295_v52, %v12801_v2  ;;  %v4202_v61 = vmul.f32 %v4170_v12, %v12841_v7  ;;  %v12888_v28 = vand.u32 2147483647, %v12869_v23 }
 0x4c9   : > { %v12883_v48 = vmul.f32 0.70710677, %v12876_v63  ;;  %v4552_v22 = vmul.f32 %v4520_v59, %v12748_v29  ;;  %v4137_v32 = vmul.f32 %v4105_v54, %v12857_v47  ;;  %v12893_v19 = vsel %vm3788_vm5, 1.0, %v13998_v45  ;;  %v9297_v4 = vpop.eup %9296 }
 0x4ca   : > { %v4487_v8 = vmul.f32 %v9291_v10, %v4327_v9  ;;  %v4234_v13 = vadd.f32 -0.28449672, %v4202_v61  ;;  %v4396_v2 = vmul.f32 %v4364_v49, %v12813_v60  ;;  %v6247_v0 = vsub.f32 0.0, %v12839_v24  ;;  %v9299_v12 = vpop.eup %9298 }
 0x4cb   : > { %v5734_v37 = vand.u32 2147483647, %v12883_v48  ;;  %v4584_v29 = vadd.f32 1.0, %v4552_v22  ;;  %v4169_v52 = vadd.f32 1.4214138, %v4137_v32  ;;  %v3980_v10 = vmul.f32 %v9297_v4, %v12836_v56  ;;  %v14161_v56 = vld [vmem:[#allocation30_spill] sm:$0xff] }
 0x4cc   : > { %v4519_v59 = vsub.f32 1.0, %v4487_v8  ;;  %v4266_v54 = vmul.f32 %v4234_v13, %v12841_v7  ;;  %v5934_v9 = vmul.f32 1.0614054, %v11958_v44  ;;  %v5892_v51 = vsub.f32 2.0, %v5860_v14 }
 0x4cd   : > { %v4616_v61 = vmul.f32 %v4584_v29, %v12739_v42  ;;  %v4201_v60 = vmul.f32 %v4169_v52, %v12857_v47  ;;  %v3883_v49 = vmul.f32 0.3275911, %v12888_v28  ;;  %v4012_v22 = vsub.f32 2.0, %v3980_v10 }
 0x4ce   : > { %v4551_v39 = vmul.f32 %v4519_v59, %v12764_v36  ;;  %v4298_v38 = vadd.f32 0.2548296, %v4266_v54  ;;  %v4459_v32 = vmul.f32 1.442695, %v4396_v2  ;;  %vm5671_vm6 = vcmp.ge.f32.partialorder %v12832_v11, 0.0 }
 0x4cf   : > { %v6279_v8 = vmul.f32 %v6247_v0, %v12839_v24  ;;  %v5766_v13 = vmul.f32 0.3275911, %v5734_v37  ;;  %v12908_v16 = vmul.f32 %v14161_v56, %v4616_v61  ;;  %v4233_v29 = vadd.f32 -0.28449672, %v4201_v60 }
 0x4d0   : > { %v4583_v14 = vadd.f32 1.0, %v4551_v39  ;;  %v4330_v42 = vmul.f32 %v4298_v38, %v12841_v7  ;;  %v12911_v52 = vmul.f32 %v9297_v4, %v4012_v22  ;;  %v9301_v1 = vpop.eup %9300  ;;  %v12913_v33 = vmul.f32 %v9293_v35, %v5892_v51  ;;  %v14163_v51 = vld [vmem:[#allocation31_spill] sm:$0xff] }
 0x4d1   : > { %14162 = vst [vmem:[#allocation172_spill] sm:$0xff] %v12908_v16  ;;  %v12916_v36 = vmul.f32 0.5, %v12824_v5  ;;  %v6246_v2 = vsub.f32 0.0, %v5734_v37  ;;  %v3915_v59 = vadd.f32 1.0, %v3883_v49  ;;  %v12919_v24 = vmul.f32 0.70710677, %v12908_v16 }
 0x4d2   : > { %v9303_v54 = vpop.eup %9302  ;;  %v4615_v0 = vmul.f32 %v4583_v14, %v12753_v15  ;;  %v4490_v39 = vmul.f32 %v9299_v12, %v4330_v42  ;;  %v4265_v7 = vmul.f32 %v4233_v29, %v12857_v47  ;;  %v12926_v38 = vsel %vm5671_vm6, 1.0, %v13998_v45 }
 0x4d3   : > { %v6336_v35 = vmul.f32 1.442695, %v6279_v8  ;;  %v4076_v5 = vmul.f32 1.0614054, %v12911_v52  ;;  %9304 = vpow2.f32 %v4459_v32  ;;  %v12929_v4 = vadd.f32 1.0, %v5766_v13 }
 0x4d4   : > { %v5737_v10 = vand.u32 2147483647, %v12919_v24  ;;  %v12933_v61 = vmul.f32 %v14163_v51, %v4615_v0  ;;  %v4522_v15 = vsub.f32 1.0, %v4490_v39  ;;  %v4297_v12 = vadd.f32 0.2548296, %v4265_v7 }
 0x4d5   : > { %v4108_v60 = vadd.f32 -1.4531521, %v4076_v5  ;;  %vm3787_vm7 = vcmp.ge.f32.partialorder %v12869_v23, 0.0  ;;  %9306 = vrcp.f32 %v3915_v59  ;;  %v5863_v11 = vmul.f32 %v9303_v54, %v12859_v62 }
 0x4d6   : > { %14164 = vst [vmem:[#allocation173_spill] sm:$0xff] %v12933_v61  ;;  %v6278_v49 = vmul.f32 %v6246_v2, %v5734_v37  ;;  %v5769_v22 = vmul.f32 0.3275911, %v5737_v10  ;;  %v12938_v8 = vmul.f32 0.70710677, %v12933_v61  ;;  %9308 = vpow2.f32 %v6336_v35 }
 0x4d7   : > { %v4554_v32 = vmul.f32 %v4522_v15, %v12806_v26  ;;  %v4329_v13 = vmul.f32 %v4297_v12, %v12857_v47  ;;  %v4140_v14 = vmul.f32 %v4108_v60, %v12911_v52  ;;  %9310 = vrcp.f32 %v12929_v4  ;;  %v14165_v60 = vld [vmem:[#allocation32_spill] sm:$0xff] }
 0x4d8   : > { %v12944_v42 = vadd.f32 1.0, %v5769_v22  ;;  %v5736_v29 = vand.u32 2147483647, %v12938_v8  ;;  %v5966_v0 = vadd.f32 -1.4531521, %v5934_v9  ;;  %vm5670_vm8 = vcmp.ge.f32.partialorder %v12883_v48, 0.0 }
 0x4d9   : > { %v4586_v62 = vadd.f32 1.0, %v4554_v32  ;;  %v4489_v37 = vmul.f32 %v9301_v1, %v4329_v13  ;;  %v4172_v2 = vadd.f32 1.4214138, %v4140_v14  ;;  %v5895_v39 = vsub.f32 2.0, %v5863_v11 }
 0x4da   : > { %v6334_v7 = vmul.f32 1.442695, %v6278_v49  ;;  %v12951_v26 = vsel %vm3787_vm7, 1.0, %v13998_v45  ;;  %v4363_v47 = vsub.f32 0.0, %v12888_v28  ;;  %v12955_v35 = vmul.f32 0.5, %v12876_v63 }
 0x4db   : > { %v4618_v5 = vmul.f32 %v4586_v62, %v12760_v31  ;;  %v4521_v9 = vsub.f32 1.0, %v4489_v37  ;;  %v4204_v48 = vmul.f32 %v4172_v2, %v12911_v52  ;;  %v12960_v1 = vsel %vm5670_vm8, 1.0, %v13998_v45 }
 0x4dc   : > { %9312 = vrcp.f32 %v12944_v42  ;;  %v6249_v15 = vsub.f32 0.0, %v5737_v10  ;;  %v5768_v12 = vmul.f32 0.3275911, %v5736_v29  ;;  %v5998_v22 = vmul.f32 %v5966_v0, %v11958_v44 }
 0x4dd   : > { %v9305_v23 = vpop.eup %9304  ;;  %v12964_v11 = vmul.f32 %v14165_v60, %v4618_v5  ;;  %v4553_v49 = vmul.f32 %v4521_v9, %v12849_v6  ;;  %v4236_v63 = vadd.f32 -0.28449672, %v4204_v48  ;;  %v12968_v31 = vmul.f32 %v9303_v54, %v5895_v39 }
 0x4de   : > { %9314 = vpow2.f32 %v6334_v7  ;;  %v4395_v32 = vmul.f32 %v4363_v47, %v12888_v28  ;;  %v5936_v13 = vmul.f32 1.0614054, %v12001_v58  ;;  %vm5673_vm9 = vcmp.ge.f32.partialorder %v12919_v24, 0.0 }
 0x4df   : > { %14166 = vst [vmem:[#allocation174_spill] sm:$0xff] %v12964_v11  ;;  %v9307_v14 = vpop.eup %9306  ;;  %v12974_v62 = vmul.f32 0.70710677, %v12964_v11  ;;  %v4585_v37 = vadd.f32 1.0, %v4553_v49  ;;  %v4268_v2 = vmul.f32 %v4236_v63, %v12911_v52  ;;  %v6281_v6 = vmul.f32 %v6249_v15, %v5737_v10  ;;  %v14167_v15 = vld [vmem:[#allocation33_spill] sm:$0xff] }
 0x4e0   : > { %v6248_v5 = vsub.f32 0.0, %v5736_v29  ;;  %v3979_v9 = vmul.f32 %v9307_v14, %v3915_v59  ;;  %v6030_v0 = vadd.f32 1.4214138, %v5998_v22  ;;  %v12977_v54 = vpop.eup %9308  ;;  %v12979_v39 = vadd.f32 1.0, %v5768_v12 }
 0x4e1   : > { %v5739_v28 = vand.u32 2147483647, %v12974_v62  ;;  %v4617_v7 = vmul.f32 %v4585_v37, %v12821_v41  ;;  %v4300_v47 = vadd.f32 0.2548296, %v4268_v2  ;;  %v9311_v48 = vpop.eup %9310  ;;  %v4457_v56 = vmul.f32 1.442695, %v4395_v32 }
 0x4e2   : > { %v4011_v60 = vsub.f32 2.0, %v3979_v9  ;;  %v6062_v49 = vmul.f32 %v6030_v0, %v11958_v44  ;;  %v5968_v51 = vadd.f32 -1.4531521, %v5936_v13  ;;  %v12987_v59 = vsel %vm5673_vm9, 1.0, %v13998_v45 }
 0x4e3   : > { %v5771_v10 = vmul.f32 0.3275911, %v5739_v28  ;;  %v12990_v12 = vmul.f32 %v14167_v15, %v4617_v7  ;;  %v4332_v63 = vmul.f32 %v4300_v47, %v12911_v52  ;;  %vm5672_vm10 = vcmp.ge.f32.partialorder %v12938_v8, 0.0 }
 0x4e4   : > { %v12994_v41 = vmul.f32 %v9307_v14, %v4011_v60  ;;  %v6094_v22 = vadd.f32 -0.28449672, %v6062_v49  ;;  %v6000_v32 = vmul.f32 %v5968_v51, %v12001_v58  ;;  %v5862_v13 = vmul.f32 %v9311_v48, %v12929_v4 }
 0x4e5   : > { %14168 = vst [vmem:[#allocation175_spill] sm:$0xff] %v12990_v12  ;;  %v6340_v37 = vmul.f32 1.442695, %v6281_v6  ;;  %9316 = vrcp.f32 %v12979_v39  ;;  %v6280_v24 = vmul.f32 %v6248_v5, %v5736_v29  ;;  %v13002_v9 = vmul.f32 0.70710677, %v12990_v12 }
 0x4e6   : > { %v12999_v2 = vpop.eup %9312  ;;  %v4492_v0 = vmul.f32 %v9305_v23, %v4332_v63  ;;  %v4075_v52 = vmul.f32 1.0614054, %v12994_v41  ;;  %9318 = vpow2.f32 %v4457_v56  ;;  %v13005_v60 = vadd.f32 1.0, %v5771_v10 }
 0x4e7   : > { %v6126_v14 = vmul.f32 %v6094_v22, %v11958_v44  ;;  %v6032_v51 = vadd.f32 1.4214138, %v6000_v32  ;;  %v5937_v4 = vmul.f32 1.0614054, %v11985_v20  ;;  %v6251_v7 = vsub.f32 0.0, %v5739_v28 }
 0x4e8   : > { %v13009_v6 = vpop.eup %9314  ;;  %v5738_v29 = vand.u32 2147483647, %v13002_v9  ;;  %v4524_v5 = vsub.f32 1.0, %v4492_v0  ;;  %v4107_v47 = vadd.f32 -1.4531521, %v4075_v52  ;;  %v5894_v49 = vsub.f32 2.0, %v5862_v13 }
 0x4e9   : > { %9320 = vpow2.f32 %v6340_v37  ;;  %v13015_v56 = vsel %vm5672_vm10, 1.0, %v13998_v45  ;;  %v6338_v23 = vmul.f32 1.442695, %v6280_v24  ;;  %v5865_v10 = vmul.f32 %v12999_v2, %v12944_v42 }
 0x4ea   : > { %v5770_v63 = vmul.f32 0.3275911, %v5738_v29  ;;  %v4556_v22 = vmul.f32 %v4524_v5, %v12893_v19  ;;  %v4139_v32 = vmul.f32 %v4107_v47, %v12994_v41  ;;  %9322 = vrcp.f32 %v13005_v60 }
 0x4eb   : > { %v6158_v0 = vadd.f32 0.2548296, %v6126_v14  ;;  %v6064_v13 = vmul.f32 %v6032_v51, %v12001_v58  ;;  %v5969_v37 = vadd.f32 -1.4531521, %v5937_v4  ;;  %v6283_v52 = vmul.f32 %v6251_v7, %v5739_v28 }
 0x4ec   : > { %v13023_v15 = vadd.f32 1.0, %v5770_v63  ;;  %v4588_v8 = vadd.f32 1.0, %v4556_v22  ;;  %v4171_v11 = vadd.f32 1.4214138, %v4139_v32  ;;  %v13025_v24 = vmul.f32 %v9311_v48, %v5894_v49  ;;  %v14169_v48 = vld [vmem:[#allocation128_spill] sm:$0xff]  ;;  %v14170_v22 = vld [vmem:[#allocation34_spill] sm:$0xff] }
 0x4ed   : > { %v6190_v42 = vmul.f32 %v6158_v0, %v11958_v44  ;;  %v6096_v12 = vadd.f32 -0.28449672, %v6064_v13  ;;  %v6001_v19 = vmul.f32 %v5969_v37, %v11985_v20  ;;  %v5897_v5 = vsub.f32 2.0, %v5865_v10 }
 0x4ee   : > { %v6250_v47 = vsub.f32 0.0, %v5738_v29  ;;  %v4620_v16 = vmul.f32 %v4588_v8, %v12854_v53  ;;  %v4203_v14 = vmul.f32 %v4171_v11, %v12994_v41  ;;  %vm6511_vm11 = vcmask 15360  }
 0x4ef   : > { %v9317_v51 = vpop.eup %9316  ;;  %v6350_v28 = vmul.f32 %v11945_v57, %v6190_v42  ;;  %v6128_v4 = vmul.f32 %v6096_v12, %v12001_v58  ;;  %v6033_v7 = vadd.f32 1.4214138, %v6001_v19  ;;  %v5938_v49 = vmul.f32 1.0614054, %v14169_v48  ;;  %v14173_v42 = vld [vmem:[#allocation98_spill] sm:$0xff] }
 0x4f0   : > { %v9319_v63 = vpop.eup %9318  ;;  %v6344_v44 = vmul.f32 1.442695, %v6283_v52  ;;  %9324 = vrcp.f32 %v13023_v15  ;;  %v13036_v10 = vmul.f32 %v14170_v22, %v4620_v16  ;;  %v4235_v32 = vadd.f32 -0.28449672, %v4203_v14  ;;  %v5581_v52 = vld [vmem:[%s13696_s4] sm:$0xff] }
 0x4f1   : > { %v6382_v53 = vsub.f32 1.0, %v6350_v28  ;;  %v6160_v0 = vadd.f32 0.2548296, %v6128_v4  ;;  %v6065_v11 = vmul.f32 %v6033_v7, %v11985_v20  ;;  %v5970_v13 = vadd.f32 -1.4531521, %v5938_v49  ;;  %8607 = vmatprep.subr.mxu1 %v5581_v52 }
 0x4f2   : > { %14171 = vst [vmem:[#allocation128_spill] sm:$0xff] %v13036_v10  ;;  %v5864_v57 = vmul.f32 %v9317_v51, %v12979_v39  ;;  %v6282_v37 = vmul.f32 %v6250_v47, %v5738_v29  ;;  %v13041_v12 = vmul.f32 0.70710677, %v13036_v10  ;;  %v4267_v8 = vmul.f32 %v4235_v32, %v12994_v41  ;;  %v14174_v47 = vld [vmem:[#allocation124_spill] sm:$0xff] }
 0x4f3   : > { %v13047_v16 = vpop.eup %9320  ;;  %v6414_v19 = vmul.f32 %v6382_v53, %v14173_v42  ;;  %v6192_v14 = vmul.f32 %v6160_v0, %v12001_v58  ;;  %v6097_v28 = vadd.f32 -0.28449672, %v6065_v11  ;;  %v6002_v4 = vmul.f32 %v5970_v13, %v14169_v48  ;;  %v14175_v53 = vld [vmem:[#allocation11_spill] sm:$0xff]  ;;  %v14176_v10 = vld [vmem:[#allocation68_spill] sm:$0xff] }
 0x4f4   : > { %14172 = vst [vmem:[#allocation176_spill] sm:$0xff] %v13041_v12  ;;  %9326 = vpow2.f32 %v6338_v23  ;;  %v13053_v39 = vand.u32 2147483647, %v13041_v12  ;;  %v4299_v29 = vadd.f32 0.2548296, %v4267_v8  ;;  %v13056_v49 = vpop.eup %9322  ;;  %v13059_v32 = vmul.f32 %v12999_v2, %v5897_v5 }
 0x4f5   : > { %v5939_v7 = vmul.f32 1.0614054, %v14174_v47  ;;  %v6446_v22 = vadd.f32 1.0, %v6414_v19  ;;  %v6352_v42 = vmul.f32 %v14175_v53, %v6192_v14  ;;  %v6129_v58 = vmul.f32 %v6097_v28, %v11985_v20 }
 0x4f6   : > { %v5896_v0 = vsub.f32 2.0, %v5864_v57  ;;  %v6342_v11 = vmul.f32 1.442695, %v6282_v37  ;;  %v5773_v23 = vmul.f32 0.3275911, %v13053_v39  ;;  %v4331_v13 = vmul.f32 %v4299_v29, %v12994_v41  ;;  %v14177_v57 = vld [vmem:[#allocation5_spill] sm:$0xff] }
 0x4f7   : > { %v6478_v8 = vmul.f32 %v6446_v22, %v14176_v10  ;;  %v6384_v12 = vsub.f32 1.0, %v6352_v42  ;;  %v6161_v45 = vadd.f32 0.2548296, %v6129_v58  ;;  %v6034_v61 = vadd.f32 1.4214138, %v6002_v4  ;;  %v14179_v29 = vld [vmem:[#allocation10_spill] sm:$0xff] }
 0x4f8   : > { %v13068_v2 = vmul.f32 %v13056_v49, %v13005_v60  ;;  %v5805_v5 = vadd.f32 1.0, %v5773_v23  ;;  %v4491_v19 = vmul.f32 %v9319_v63, %v4331_v13  ;;  %v5971_v14 = vadd.f32 -1.4531521, %v5939_v7  ;;  %v14178_v60 = vld [vmem:[#allocation132_spill] sm:$0xff] }
 0x4f9   : > { %9328 = vpow2.f32 %v6344_v44  ;;  %8559 = vmatprep.mubr.msk.f32.mxu1 %vm6511_vm11, %v6478_v8  ;;  %v6416_v37 = vmul.f32 %v6384_v12, %v14177_v57  ;;  %v6193_v28 = vmul.f32 %v6161_v45, %v11985_v20  ;;  %v6066_v41 = vmul.f32 %v6034_v61, %v14169_v48  ;;  %v14181_v58 = vld [vmem:[#allocation4_spill] sm:$0xff] }
 0x4fa   : > { %v13074_v22 = vpop.eup %9324  ;;  %v13076_v10 = vmul.f32 %v9317_v51, %v5896_v0  ;;  %9330 = vrcp.f32 %v5805_v5  ;;  %v4523_v4 = vsub.f32 1.0, %v4491_v19  ;;  %8560 = vmatmul.mubr.msk.f32.vlgmr.msra.gmra.mrb[64].mxu1 %vm6511_vm11, %v14178_v60  ;;  %v6003_v63 = vmul.f32 %v5971_v14, %v14174_v47  ;;  %v14180_v51 = vld [vmem:[#allocation135_spill] sm:$0xff] }
 0x4fb   : > { %9332 = vpow2.f32 %v6342_v11  ;;  %v6448_v44 = vadd.f32 1.0, %v6416_v37  ;;  %v6353_v7 = vmul.f32 %v14179_v29, %v6193_v28  ;;  %v6098_v12 = vadd.f32 -0.28449672, %v6066_v41  ;;  %8608 = vmatpush3.msra.mxu1 %v5581_v52 }
 0x4fc   : > { %v5899_v45 = vsub.f32 2.0, %v13068_v2  ;;  %v4555_v20 = vmul.f32 %v4523_v4, %v12951_v26  ;;  %v6035_v61 = vadd.f32 1.4214138, %v6003_v63  ;;  %v5940_v53 = vmul.f32 1.0614054, %v14180_v51  ;;  %v14182_v2 = vld [vmem:[#allocation133_spill] sm:$0xff] }
 0x4fd   : > { %v5866_v42 = vmul.f32 %v13074_v22, %v13023_v15  ;;  %v6480_v0 = vmul.f32 %v6448_v44, %v14181_v58  ;;  %v6385_v23 = vsub.f32 1.0, %v6353_v7  ;;  %v6130_v11 = vmul.f32 %v6098_v12, %v14169_v48  ;;  %v14183_v26 = vld [vmem:[#allocation59_spill] sm:$0xff] }
 0x4fe   : > { %v13089_v13 = vpop.eup %9326  ;;  %v4587_v8 = vadd.f32 1.0, %v4555_v20  ;;  %v6067_v52 = vmul.f32 %v6035_v61, %v14174_v47  ;;  %v5972_v19 = vadd.f32 -1.4531521, %v5940_v53  ;;  %v5941_v14 = vmul.f32 1.0614054, %v14182_v2  ;;  %v14184_v20 = vld [vmem:[#allocation35_spill] sm:$0xff] }
 0x4ff   : > { %8562 = vmatprep.mubr.msk.f32.mxu1 %vm6511_vm11, %v6480_v0  ;;  %v6417_v57 = vmul.f32 %v6385_v23, %v14183_v26  ;;  %v6162_v37 = vadd.f32 0.2548296, %v6130_v11  ;;  %v5942_v15 = vmul.f32 1.0614054, %v12313_v40  ;;  %v5943_v28 = vmul.f32 1.0614054, %v12255_v43 }
 0x500   : > { %v4619_v41 = vmul.f32 %v4587_v8, %v12864_v34  ;;  %v6099_v4 = vadd.f32 -0.28449672, %v6067_v52  ;;  %v6004_v60 = vmul.f32 %v5972_v19, %v14180_v51  ;;  %v5973_v63 = vadd.f32 -1.4531521, %v5941_v14  ;;  %v14186_v34 = vld [vmem:[#allocation66_spill] sm:$0xff] }
 0x501   : > { %v6253_v44 = vsub.f32 0.0, %v13053_v39  ;;  %v6449_v29 = vadd.f32 1.0, %v6417_v57  ;;  %v6194_v7 = vmul.f32 %v6162_v37, %v14169_v48  ;;  %v5974_v12 = vadd.f32 -1.4531521, %v5942_v15  ;;  %v14187_v8 = vld [vmem:[#allocation130_spill] sm:$0xff] }
 0x502   : > { %v13102_v61 = vmul.f32 %v14184_v20, %v4619_v41  ;;  %v6131_v53 = vmul.f32 %v6099_v4, %v14174_v47  ;;  %v6036_v58 = vadd.f32 1.4214138, %v6004_v60  ;;  %v6005_v0 = vmul.f32 %v5973_v63, %v14182_v2 }
 0x503   : > { %v13106_v23 = vpop.eup %9328  ;;  %v6481_v11 = vmul.f32 %v6449_v29, %v14186_v34  ;;  %v6354_v52 = vmul.f32 %v14187_v8, %v6194_v7  ;;  %v6006_v19 = vmul.f32 %v5974_v12, %v12313_v40  ;;  %v5975_v14 = vadd.f32 -1.4531521, %v5943_v28 }
 0x504   : > { %14185 = vst [vmem:[#allocation98_spill] sm:$0xff] %v13102_v61  ;;  %v9331_v26 = vpop.eup %9330  ;;  %v5898_v48 = vsub.f32 2.0, %v5866_v42  ;;  %v13112_v57 = vmul.f32 0.70710677, %v13102_v61  ;;  %v6163_v37 = vadd.f32 0.2548296, %v6131_v53  ;;  %v6068_v15 = vmul.f32 %v6036_v58, %v14180_v51 }
 0x505   : > { %v13115_v41 = vpop.eup %9332  ;;  %v5869_v4 = vmul.f32 %v9331_v26, %v5805_v5  ;;  %8563 = vmatmul.mubr.msk.f32.gmra.mrb[66].mxu1 %vm6511_vm11, %v6481_v11  ;;  %v6386_v60 = vsub.f32 1.0, %v6354_v52  ;;  %v6037_v63 = vadd.f32 1.4214138, %v6005_v0  ;;  %v6038_v29 = vadd.f32 1.4214138, %v6006_v19  ;;  %v14189_v58 = vld [vmem:[#allocation9_spill] sm:$0xff] }
 0x506   : > { %14188 = vst [vmem:[#allocation124_spill] sm:$0xff] %v13112_v57  ;;  %v13119_v7 = vmul.f32 %v13056_v49, %v5899_v45  ;;  %v5740_v28 = vand.u32 2147483647, %v13112_v57  ;;  %v6195_v42 = vmul.f32 %v6163_v37, %v14174_v47  ;;  %v6100_v12 = vadd.f32 -0.28449672, %v6068_v15  ;;  %v14190_v52 = vld [vmem:[#allocation127_spill] sm:$0xff] }
 0x507   : > { %v13124_v53 = vmul.f32 %v6253_v44, %v13053_v39  ;;  %v6418_v34 = vmul.f32 %v6386_v60, %v14189_v58  ;;  %v6069_v5 = vmul.f32 %v6037_v63, %v14182_v2  ;;  %v6007_v11 = vmul.f32 %v5975_v14, %v12255_v43  ;;  %v14191_v63 = vld [vmem:[#allocation8_spill] sm:$0xff] }
 0x508   : > { %v5901_v8 = vsub.f32 2.0, %v5869_v4  ;;  %v5772_v0 = vmul.f32 0.3275911, %v5740_v28  ;;  %v6355_v19 = vmul.f32 %v14190_v52, %v6195_v42  ;;  %v6132_v49 = vmul.f32 %v6100_v12, %v14180_v51  ;;  %v14192_v12 = vld [vmem:[#allocation7_spill] sm:$0xff] }
 0x509   : > { %v13132_v45 = vmul.f32 %v13074_v22, %v5898_v48  ;;  %v6450_v47 = vadd.f32 1.0, %v6418_v34  ;;  %v6101_v37 = vadd.f32 -0.28449672, %v6069_v5  ;;  %v6070_v39 = vmul.f32 %v6038_v29, %v12313_v40 }
 0x50a   : > { %v5804_v44 = vadd.f32 1.0, %v5772_v0  ;;  %v6252_v15 = vsub.f32 0.0, %v5740_v28  ;;  %v6387_v60 = vsub.f32 1.0, %v6355_v19  ;;  %v6164_v58 = vadd.f32 0.2548296, %v6132_v49  ;;  %v14193_v49 = vld [vmem:[#allocation12_spill] sm:$0xff] }
 0x50b   : > { %v6482_v20 = vmul.f32 %v6450_v47, %v14191_v63  ;;  %v6133_v14 = vmul.f32 %v6101_v37, %v14182_v2  ;;  %v6102_v4 = vadd.f32 -0.28449672, %v6070_v39  ;;  %v6039_v61 = vadd.f32 1.4214138, %v6007_v11 }
 0x50c   : > { %v13137_v42 = vmul.f32 %v9331_v26, %v5901_v8  ;;  %9334 = vrcp.f32 %v5804_v44  ;;  %v6419_v22 = vmul.f32 %v6387_v60, %v14192_v12  ;;  %v6196_v48 = vmul.f32 %v6164_v58, %v14180_v51  ;;  %v14194_v26 = vld [vmem:[#allocation144_spill] sm:$0xff]  ;;  %v14195_v60 = vld [vmem:[#allocation6_spill] sm:$0xff] }
 0x50d   : > { %8565 = vmatprep.mubr.msk.f32.mxu1 %vm6511_vm11, %v6482_v20  ;;  %v6165_v29 = vadd.f32 0.2548296, %v6133_v14  ;;  %v6134_v34 = vmul.f32 %v6102_v4, %v12313_v40  ;;  %v6071_v5 = vmul.f32 %v6039_v61, %v12255_v43  ;;  %v5944_v0 = vmul.f32 1.0614054, %v12381_v46  ;;  %v14196_v14 = vld [vmem:[#allocation150_spill] sm:$0xff]  ;;  %v14197_v61 = vld [vmem:[#allocation131_spill] sm:$0xff] }
 0x50e   : > { %v6284_v52 = vmul.f32 %v6252_v15, %v5740_v28  ;;  %v6451_v19 = vadd.f32 1.0, %v6419_v22  ;;  %v6356_v11 = vmul.f32 %v14193_v49, %v6196_v48  ;;  %v5945_v8 = vmul.f32 1.0614054, %v14194_v26  ;;  %v14200_v49 = vld [vmem:[#allocation140_spill] sm:$0xff] }
 0x50f   : > { %v6197_v47 = vmul.f32 %v6165_v29, %v14182_v2  ;;  %v6166_v37 = vadd.f32 0.2548296, %v6134_v34  ;;  %v6103_v39 = vadd.f32 -0.28449672, %v6071_v5  ;;  %v5976_v51 = vadd.f32 -1.4531521, %v5944_v0 }
 0x510   : > { %v6483_v20 = vmul.f32 %v6451_v19, %v14195_v60  ;;  %v6388_v58 = vsub.f32 1.0, %v6356_v11  ;;  %v5977_v63 = vadd.f32 -1.4531521, %v5945_v8  ;;  %v5946_v4 = vmul.f32 1.0614054, %v14196_v14  ;;  %v14198_v2 = vld [vmem:[#allocation129_spill] sm:$0xff] }
 0x511   : > { %v6357_v12 = vmul.f32 %v14197_v61, %v6197_v47  ;;  %v6198_v28 = vmul.f32 %v6166_v37, %v12313_v40  ;;  %v6135_v15 = vmul.f32 %v6103_v39, %v12255_v43  ;;  %v6008_v22 = vmul.f32 %v5976_v51, %v12381_v46  ;;  %v14199_v5 = vld [vmem:[#allocation149_spill] sm:$0xff] }
 0x512   : > { %8566 = vmatmul.mubr.msk.f32.gmra.mrb[68].mxu1 %vm6511_vm11, %v6483_v20  ;;  %v6420_v48 = vmul.f32 %v6388_v58, %v14198_v2  ;;  %v6009_v29 = vmul.f32 %v5977_v63, %v14194_v26  ;;  %v5978_v34 = vadd.f32 -1.4531521, %v5946_v4  ;;  %v5947_v0 = vmul.f32 1.0614054, %v14199_v5  ;;  %v14201_v51 = vld [vmem:[#allocation125_spill] sm:$0xff]  ;;  %v14202_v2 = vld [vmem:[#allocation126_spill] sm:$0xff] }
 0x513   : > { %v6389_v19 = vsub.f32 1.0, %v6357_v12  ;;  %v6358_v11 = vmul.f32 %v14200_v49, %v6198_v28  ;;  %v6167_v8 = vadd.f32 0.2548296, %v6135_v15  ;;  %v6040_v47 = vadd.f32 1.4214138, %v6008_v22 }
 0x514   : > { %v6452_v60 = vadd.f32 1.0, %v6420_v48  ;;  %v6041_v40 = vadd.f32 1.4214138, %v6009_v29  ;;  %v6010_v37 = vmul.f32 %v5978_v34, %v14196_v14  ;;  %v5979_v39 = vadd.f32 -1.4531521, %v5947_v0  ;;  %v14203_v29 = vld [vmem:[#allocation15_spill] sm:$0xff] }
 0x515   : > { %v6421_v61 = vmul.f32 %v6389_v19, %v14201_v51  ;;  %v6390_v20 = vsub.f32 1.0, %v6358_v11  ;;  %v6199_v58 = vmul.f32 %v6167_v8, %v12255_v43  ;;  %v6072_v63 = vmul.f32 %v6040_v47, %v12381_v46  ;;  %v14204_v0 = vld [vmem:[#allocation13_spill] sm:$0xff] }
 0x516   : > { %v9335_v4 = vpop.eup %9334  ;;  %v6484_v57 = vmul.f32 %v6452_v60, %v14202_v2  ;;  %v6073_v12 = vmul.f32 %v6041_v40, %v14194_v26  ;;  %v6042_v28 = vadd.f32 1.4214138, %v6010_v37  ;;  %v6011_v15 = vmul.f32 %v5979_v39, %v14199_v5  ;;  %v14205_v60 = vld [vmem:[#allocation123_spill] sm:$0xff]  ;;  %v14207_v2 = vld [vmem:[#allocation136_spill] sm:$0xff] }
 0x517   : > { %v5868_v22 = vmul.f32 %v9335_v4, %v5804_v44  ;;  %v6453_v48 = vadd.f32 1.0, %v6421_v61  ;;  %v6422_v34 = vmul.f32 %v6390_v20, %v14203_v29  ;;  %v6359_v49 = vmul.f32 %v14204_v0, %v6199_v58 }
 0x518   : > { %8568 = vmatprep.mubr.msk.f32.mxu1 %vm6511_vm11, %v6484_v57  ;;  %v6104_v19 = vadd.f32 -0.28449672, %v6072_v63  ;;  %v6105_v43 = vadd.f32 -0.28449672, %v6073_v12  ;;  %v6074_v11 = vmul.f32 %v6042_v28, %v14196_v14  ;;  %v6043_v8 = vadd.f32 1.4214138, %v6011_v15 }
 0x519   : > { %v5900_v47 = vsub.f32 2.0, %v5868_v22  ;;  %v6485_v51 = vmul.f32 %v6453_v48, %v14205_v60  ;;  %v6454_v40 = vadd.f32 1.0, %v6422_v34  ;;  %v6391_v37 = vsub.f32 1.0, %v6359_v49  ;;  %v14206_v57 = vld [vmem:[#allocation14_spill] sm:$0xff]  ;;  %v14208_v49 = vld [vmem:[#allocation20_spill] sm:$0xff] }
 0x51a   : > { %v6136_v39 = vmul.f32 %v6104_v19, %v12381_v46  ;;  %v6137_v44 = vmul.f32 %v6105_v43, %v14194_v26  ;;  %v6106_v61 = vadd.f32 -0.28449672, %v6074_v11  ;;  %v6075_v20 = vmul.f32 %v6043_v8, %v14199_v5 }
 0x51b   : > { %v13174_v58 = vmul.f32 1.442695, %v6284_v52  ;;  %8569 = vmatmul.mubr.msk.f32.gmra.mrb[70].mxu1 %vm6511_vm11, %v6485_v51  ;;  %v6486_v63 = vmul.f32 %v6454_v40, %v14206_v57  ;;  %v6423_v12 = vmul.f32 %v6391_v37, %v14207_v2  ;;  %v5948_v28 = vmul.f32 1.0614054, %v12547_v18  ;;  %v14209_v51 = vld [vmem:[#allocation134_spill] sm:$0xff] }
 0x51c   : > { %v6168_v15 = vadd.f32 0.2548296, %v6136_v39  ;;  %v6169_v22 = vadd.f32 0.2548296, %v6137_v44  ;;  %v6138_v48 = vmul.f32 %v6106_v61, %v14196_v14  ;;  %v6107_v29 = vadd.f32 -0.28449672, %v6075_v20 }
 0x51d   : > { %v13181_v34 = vmul.f32 %v9335_v4, %v5900_v47  ;;  %8571 = vmatprep.mubr.msk.f32.mxu1 %vm6511_vm11, %v6486_v63  ;;  %v6455_v0 = vadd.f32 1.0, %v6423_v12  ;;  %v5980_v52 = vadd.f32 -1.4531521, %v5948_v28  ;;  %v5949_v19 = vmul.f32 1.0614054, %v14208_v49  ;;  %v14210_v47 = vld [vmem:[#allocation19_spill] sm:$0xff] }
 0x51e   : > { %v6200_v43 = vmul.f32 %v6168_v15, %v12381_v46  ;;  %v6201_v11 = vmul.f32 %v6169_v22, %v14194_v26  ;;  %v6170_v8 = vadd.f32 0.2548296, %v6138_v48  ;;  %v6139_v60 = vmul.f32 %v6107_v29, %v14199_v5  ;;  %v14211_v61 = vld [vmem:[#allocation143_spill] sm:$0xff]  ;;  %v14212_v22 = vld [vmem:[#allocation148_spill] sm:$0xff] }
 0x51f   : > { %v6487_v40 = vmul.f32 %v6455_v0, %v14209_v51  ;;  %v6012_v37 = vmul.f32 %v5980_v52, %v12547_v18  ;;  %v5981_v39 = vadd.f32 -1.4531521, %v5949_v19  ;;  %v5950_v4 = vmul.f32 1.0614054, %v12667_v55 }
 0x520   : > { %v6360_v44 = vmul.f32 %v14210_v47, %v6200_v43  ;;  %v6361_v20 = vmul.f32 %v14211_v61, %v6201_v11  ;;  %v6202_v57 = vmul.f32 %v6170_v8, %v14196_v14  ;;  %v6171_v63 = vadd.f32 0.2548296, %v6139_v60  ;;  %v14213_v43 = vld [vmem:[#allocation138_spill] sm:$0xff]  ;;  %v14214_v8 = vld [vmem:[#allocation17_spill] sm:$0xff] }
 0x521   : > { %8572 = vmatmul.mubr.msk.f32.gmra.mrb[72].mxu1 %vm6511_vm11, %v6487_v40  ;;  %v6044_v46 = vadd.f32 1.4214138, %v6012_v37  ;;  %v6013_v26 = vmul.f32 %v5981_v39, %v14208_v49  ;;  %v5982_v2 = vadd.f32 -1.4531521, %v5950_v4  ;;  %v5951_v12 = vmul.f32 1.0614054, %v12633_v27 }
 0x522   : > { %v6392_v28 = vsub.f32 1.0, %v6360_v44  ;;  %v6393_v15 = vsub.f32 1.0, %v6361_v20  ;;  %v6362_v48 = vmul.f32 %v14212_v22, %v6202_v57  ;;  %v6203_v29 = vmul.f32 %v6171_v63, %v14199_v5  ;;  %v14215_v40 = vld [vmem:[#allocation147_spill] sm:$0xff]  ;;  %v14216_v20 = vld [vmem:[#allocation142_spill] sm:$0xff]  ;;  %v14218_v22 = vld [vmem:[#allocation16_spill] sm:$0xff] }
 0x523   : > { %v6076_v0 = vmul.f32 %v6044_v46, %v12547_v18  ;;  %v6045_v52 = vadd.f32 1.4214138, %v6013_v26  ;;  %v6014_v14 = vmul.f32 %v5982_v2, %v12667_v55  ;;  %v5983_v19 = vadd.f32 -1.4531521, %v5951_v12 }
 0x524   : > { %v6424_v11 = vmul.f32 %v6392_v28, %v14213_v43  ;;  %v6425_v60 = vmul.f32 %v6393_v15, %v14214_v8  ;;  %v6394_v51 = vsub.f32 1.0, %v6362_v48  ;;  %v6363_v37 = vmul.f32 %v14215_v40, %v6203_v29  ;;  %v14217_v28 = vld [vmem:[#allocation137_spill] sm:$0xff]  ;;  %v14220_v8 = vld [vmem:[#allocation18_spill] sm:$0xff] }
 0x525   : > { %v6108_v39 = vadd.f32 -0.28449672, %v6076_v0  ;;  %v6077_v4 = vmul.f32 %v6045_v52, %v14208_v49  ;;  %v6046_v47 = vadd.f32 1.4214138, %v6014_v14  ;;  %v6015_v44 = vmul.f32 %v5983_v19, %v12633_v27  ;;  %v14219_v0 = vld [vmem:[#allocation141_spill] sm:$0xff] }
 0x526   : > { %v6456_v5 = vadd.f32 1.0, %v6424_v11  ;;  %v6457_v61 = vadd.f32 1.0, %v6425_v60  ;;  %v6426_v57 = vmul.f32 %v6394_v51, %v14216_v20  ;;  %v6395_v63 = vsub.f32 1.0, %v6363_v37 }
 0x527   : > { %v6140_v46 = vmul.f32 %v6108_v39, %v12547_v18  ;;  %v6109_v26 = vadd.f32 -0.28449672, %v6077_v4  ;;  %v6078_v2 = vmul.f32 %v6046_v47, %v12667_v55  ;;  %v6047_v12 = vadd.f32 1.4214138, %v6015_v44 }
 0x528   : > { %v6488_v15 = vmul.f32 %v6456_v5, %v14217_v28  ;;  %v6489_v48 = vmul.f32 %v6457_v61, %v14218_v22  ;;  %v6458_v29 = vadd.f32 1.0, %v6426_v57  ;;  %v6427_v52 = vmul.f32 %v6395_v63, %v14219_v0  ;;  %v14221_v5 = vld [vmem:[#allocation139_spill] sm:$0xff]  ;;  %v14223_v0 = vld [vmem:[#allocation153_spill] sm:$0xff] }
 0x529   : > { %v6172_v14 = vadd.f32 0.2548296, %v6140_v46  ;;  %v6141_v19 = vmul.f32 %v6109_v26, %v14208_v49  ;;  %v6110_v43 = vadd.f32 -0.28449672, %v6078_v2  ;;  %v6079_v11 = vmul.f32 %v6047_v12, %v12633_v27  ;;  %v14222_v46 = vld [vmem:[#allocation154_spill] sm:$0xff] }
 0x52a   : > { %8574 = vmatprep.mubr.msk.f32.mxu1 %vm6511_vm11, %v6488_v15  ;;  %v6490_v60 = vmul.f32 %v6458_v29, %v14220_v8  ;;  %v6459_v51 = vadd.f32 1.0, %v6427_v52  ;;  %v5952_v40 = vmul.f32 1.0614054, %v12718_v50  ;;  %v5953_v37 = vmul.f32 1.0614054, %v12696_v30 }
 0x52b   : > { %8575 = vmatmul.mubr.msk.f32.gmra.mrb[74].mxu1 %vm6511_vm11, %v6489_v48  ;;  %v6204_v39 = vmul.f32 %v6172_v14, %v12547_v18  ;;  %v6173_v4 = vadd.f32 0.2548296, %v6141_v19  ;;  %v6142_v47 = vmul.f32 %v6110_v43, %v12667_v55  ;;  %v6111_v44 = vadd.f32 -0.28449672, %v6079_v11 }
 0x52c   : > { %8577 = vmatprep.mubr.msk.f32.mxu1 %vm6511_vm11, %v6490_v60  ;;  %v6491_v61 = vmul.f32 %v6459_v51, %v14221_v5  ;;  %v5984_v20 = vadd.f32 -1.4531521, %v5952_v40  ;;  %v5985_v57 = vadd.f32 -1.4531521, %v5953_v37  ;;  %v5954_v63 = vmul.f32 1.0614054, %v12768_v21 }
 0x52d   : > { %v6364_v26 = vmul.f32 %v14222_v46, %v6204_v39  ;;  %v6205_v2 = vmul.f32 %v6173_v4, %v14208_v49  ;;  %v6174_v12 = vadd.f32 0.2548296, %v6142_v47  ;;  %v6143_v28 = vmul.f32 %v6111_v44, %v12633_v27  ;;  %v14224_v60 = vld [vmem:[#allocation152_spill] sm:$0xff] }
 0x52e   : > { %v6016_v18 = vmul.f32 %v5984_v20, %v12718_v50  ;;  %v6017_v15 = vmul.f32 %v5985_v57, %v12696_v30  ;;  %v5986_v22 = vadd.f32 -1.4531521, %v5954_v63  ;;  %v5955_v48 = vmul.f32 1.0614054, %v12745_v3 }
 0x52f   : > { %8578 = vmatmul.mubr.msk.f32.gmra.mrb[76].mxu1 %vm6511_vm11, %v6491_v61  ;;  %v6396_v29 = vsub.f32 1.0, %v6364_v26  ;;  %v6365_v52 = vmul.f32 %v14223_v0, %v6205_v2  ;;  %v6206_v14 = vmul.f32 %v6174_v12, %v12667_v55  ;;  %v6175_v19 = vadd.f32 0.2548296, %v6143_v28  ;;  %v14225_v61 = vld [vmem:[#allocation146_spill] sm:$0xff]  ;;  %v14226_v12 = vld [vmem:[#allocation151_spill] sm:$0xff] }
 0x530   : > { %v6048_v43 = vadd.f32 1.4214138, %v6016_v18  ;;  %v6049_v49 = vadd.f32 1.4214138, %v6017_v15  ;;  %v6018_v11 = vmul.f32 %v5986_v22, %v12768_v21  ;;  %v5987_v8 = vadd.f32 -1.4531521, %v5955_v48 }
 0x531   : > { %v6428_v51 = vmul.f32 %v6396_v29, %v14224_v60  ;;  %v6397_v40 = vsub.f32 1.0, %v6365_v52  ;;  %v6366_v37 = vmul.f32 %v12657_v17, %v6206_v14  ;;  %v6207_v39 = vmul.f32 %v6175_v19, %v12633_v27  ;;  %v14227_v18 = vld [vmem:[#allocation155_spill] sm:$0xff] }
 0x532   : > { %v6080_v4 = vmul.f32 %v6048_v43, %v12718_v50  ;;  %v6081_v47 = vmul.f32 %v6049_v49, %v12696_v30  ;;  %v6050_v44 = vadd.f32 1.4214138, %v6018_v11  ;;  %v6019_v55 = vmul.f32 %v5987_v8, %v12745_v3  ;;  %v14229_v43 = vld [vmem:[#allocation22_spill] sm:$0xff] }
 0x533   : > { %v6460_v5 = vadd.f32 1.0, %v6428_v51  ;;  %v6429_v20 = vmul.f32 %v6397_v40, %v14225_v61  ;;  %v6398_v57 = vsub.f32 1.0, %v6366_v37  ;;  %v6367_v63 = vmul.f32 %v12631_v25, %v6207_v39  ;;  %v14228_v25 = vld [vmem:[#allocation145_spill] sm:$0xff]  ;;  %v14230_v37 = vld [vmem:[#allocation23_spill] sm:$0xff] }
 0x534   : > { %v6112_v46 = vadd.f32 -0.28449672, %v6080_v4  ;;  %v6113_v26 = vadd.f32 -0.28449672, %v6081_v47  ;;  %v6082_v2 = vmul.f32 %v6050_v44, %v12768_v21  ;;  %v6051_v17 = vadd.f32 1.4214138, %v6019_v55 }
 0x535   : > { %v6492_v27 = vmul.f32 %v6460_v5, %v14226_v12  ;;  %v6461_v28 = vadd.f32 1.0, %v6429_v20  ;;  %v6430_v15 = vmul.f32 %v6398_v57, %v14227_v18  ;;  %v6399_v22 = vsub.f32 1.0, %v6367_v63  ;;  %v14231_v44 = vld [vmem:[#allocation170_spill] sm:$0xff]  ;;  %v14232_v63 = vld [vmem:[#allocation21_spill] sm:$0xff]  ;;  %v14233_v12 = vld [vmem:[#allocation164_spill] sm:$0xff] }
 0x536   : > { %v6144_v48 = vmul.f32 %v6112_v46, %v12718_v50  ;;  %v6145_v29 = vmul.f32 %v6113_v26, %v12696_v30  ;;  %v6114_v0 = vadd.f32 -0.28449672, %v6082_v2  ;;  %v6083_v52 = vmul.f32 %v6051_v17, %v12745_v3 }
 0x537   : > { %8580 = vmatprep.mubr.msk.f32.mxu1 %vm6511_vm11, %v6492_v27  ;;  %v6493_v14 = vmul.f32 %v6461_v28, %v14228_v25  ;;  %v6462_v19 = vadd.f32 1.0, %v6430_v15  ;;  %v6431_v49 = vmul.f32 %v6399_v22, %v14229_v43  ;;  %v5956_v11 = vmul.f32 1.0614054, %v12913_v33  ;;  %v14234_v28 = vld [vmem:[#allocation161_spill] sm:$0xff]  ;;  %v14235_v25 = vld [vmem:[#allocation27_spill] sm:$0xff] }
 0x538   : > { %v6176_v8 = vadd.f32 0.2548296, %v6144_v48  ;;  %v6177_v60 = vadd.f32 0.2548296, %v6145_v29  ;;  %v6146_v51 = vmul.f32 %v6114_v0, %v12768_v21  ;;  %v6115_v40 = vadd.f32 -0.28449672, %v6083_v52 }
 0x539   : > { %8581 = vmatmul.mubr.msk.f32.gmra.mrb[78].mxu1 %vm6511_vm11, %v6493_v14  ;;  %v6494_v39 = vmul.f32 %v6462_v19, %v14230_v37  ;;  %v6463_v4 = vadd.f32 1.0, %v6431_v49  ;;  %v5988_v47 = vadd.f32 -1.4531521, %v5956_v11  ;;  %v5957_v55 = vmul.f32 1.0614054, %v14231_v44 }
 0x53a   : > { %v6208_v5 = vmul.f32 %v6176_v8, %v12718_v50  ;;  %v6209_v61 = vmul.f32 %v6177_v60, %v12696_v30  ;;  %v6178_v20 = vadd.f32 0.2548296, %v6146_v51  ;;  %v6147_v57 = vmul.f32 %v6115_v40, %v12745_v3  ;;  %v14236_v8 = vld [vmem:[#allocation157_spill] sm:$0xff]  ;;  %v14237_v51 = vld [vmem:[#allocation24_spill] sm:$0xff] }
 0x53b   : > { %8583 = vmatprep.mubr.msk.f32.mxu1 %vm6511_vm11, %v6494_v39  ;;  %v6495_v46 = vmul.f32 %v6463_v4, %v14232_v63  ;;  %v6020_v26 = vmul.f32 %v5988_v47, %v12913_v33  ;;  %v5989_v2 = vadd.f32 -1.4531521, %v5957_v55  ;;  %v5958_v17 = vmul.f32 1.0614054, %v13025_v24  ;;  %v14238_v39 = vld [vmem:[#allocation166_spill] sm:$0xff] }
 0x53c   : > { %v6368_v27 = vmul.f32 %v14233_v12, %v6208_v5  ;;  %v6369_v18 = vmul.f32 %v14234_v28, %v6209_v61  ;;  %v6210_v50 = vmul.f32 %v6178_v20, %v12768_v21  ;;  %v6179_v15 = vadd.f32 0.2548296, %v6147_v57  ;;  %v14239_v57 = vld [vmem:[#allocation162_spill] sm:$0xff] }
 0x53d   : > { %8584 = vmatmul.mubr.msk.f32.gmra.mrb[80].mxu1 %vm6511_vm11, %v6495_v46  ;;  %v6052_v30 = vadd.f32 1.4214138, %v6020_v26  ;;  %v6021_v22 = vmul.f32 %v5989_v2, %v14231_v44  ;;  %v5990_v48 = vadd.f32 -1.4531521, %v5958_v17  ;;  %v5959_v29 = vmul.f32 1.0614054, %v12968_v31 }
 0x53e   : > { %v6400_v0 = vsub.f32 1.0, %v6368_v27  ;;  %v6401_v52 = vsub.f32 1.0, %v6369_v18  ;;  %v6370_v14 = vmul.f32 %v14235_v25, %v6210_v50  ;;  %v6211_v19 = vmul.f32 %v6179_v15, %v12745_v3  ;;  %v14240_v27 = vld [vmem:[#allocation25_spill] sm:$0xff]  ;;  %v14241_v18 = vld [vmem:[#allocation156_spill] sm:$0xff] }
 0x53f   : > { %v6084_v43 = vmul.f32 %v6052_v30, %v12913_v33  ;;  %v6053_v49 = vadd.f32 1.4214138, %v6021_v22  ;;  %v6022_v21 = vmul.f32 %v5990_v48, %v13025_v24  ;;  %v5991_v11 = vadd.f32 -1.4531521, %v5959_v29  ;;  %v14242_v30 = vld [vmem:[#allocation159_spill] sm:$0xff]  ;;  %v14243_v25 = vld [vmem:[#allocation160_spill] sm:$0xff] }
 0x540   : > { %v6432_v60 = vmul.f32 %v6400_v0, %v14236_v8  ;;  %v6433_v40 = vmul.f32 %v6401_v52, %v14237_v51  ;;  %v6402_v37 = vsub.f32 1.0, %v6370_v14  ;;  %v6371_v4 = vmul.f32 %v14238_v39, %v6211_v19  ;;  %v14244_v51 = vld [vmem:[#allocation158_spill] sm:$0xff] }
 0x541   : > { %v6116_v47 = vadd.f32 -0.28449672, %v6084_v43  ;;  %v6085_v55 = vmul.f32 %v6053_v49, %v14231_v44  ;;  %v6054_v5 = vadd.f32 1.4214138, %v6022_v21  ;;  %v6023_v61 = vmul.f32 %v5991_v11, %v12968_v31 }
 0x542   : > { %v6464_v3 = vadd.f32 1.0, %v6432_v60  ;;  %v6465_v20 = vadd.f32 1.0, %v6433_v40  ;;  %v6434_v63 = vmul.f32 %v6402_v37, %v14239_v57  ;;  %v6403_v46 = vsub.f32 1.0, %v6371_v4 }
 0x543   : > { %v6148_v26 = vmul.f32 %v6116_v47, %v12913_v33  ;;  %v6117_v2 = vadd.f32 -0.28449672, %v6085_v55  ;;  %v6086_v17 = vmul.f32 %v6054_v5, %v13025_v24  ;;  %v6055_v12 = vadd.f32 1.4214138, %v6023_v61  ;;  %v14245_v47 = vld [vmem:[#allocation171_spill] sm:$0xff] }
 0x544   : > { %v6496_v28 = vmul.f32 %v6464_v3, %v14240_v27  ;;  %v6497_v50 = vmul.f32 %v6465_v20, %v14241_v18  ;;  %v6466_v15 = vadd.f32 1.0, %v6434_v63  ;;  %v6435_v22 = vmul.f32 %v6403_v46, %v14242_v30 }
 0x545   : > { %v6180_v48 = vadd.f32 0.2548296, %v6148_v26  ;;  %v6149_v29 = vmul.f32 %v6117_v2, %v14231_v44  ;;  %v6118_v0 = vadd.f32 -0.28449672, %v6086_v17  ;;  %v6087_v52 = vmul.f32 %v6055_v12, %v12968_v31  ;;  %v14246_v26 = vld [vmem:[#allocation168_spill] sm:$0xff] }
 0x546   : > { %8586 = vmatprep.mubr.msk.f32.mxu1 %vm6511_vm11, %v6496_v28  ;;  %v6498_v14 = vmul.f32 %v6466_v15, %v14243_v25  ;;  %v6467_v19 = vadd.f32 1.0, %v6435_v22  ;;  %v5960_v43 = vmul.f32 1.0614054, %v13076_v10  ;;  %v5961_v49 = vmul.f32 1.0614054, %v13059_v32 }
 0x547   : > { %8587 = vmatmul.mubr.msk.f32.gmra.mrb[82].mxu1 %vm6511_vm11, %v6497_v50  ;;  %v6212_v21 = vmul.f32 %v6180_v48, %v12913_v33  ;;  %v6181_v11 = vadd.f32 0.2548296, %v6149_v29  ;;  %v6150_v8 = vmul.f32 %v6118_v0, %v13025_v24  ;;  %v6119_v60 = vadd.f32 -0.28449672, %v6087_v52  ;;  %v14247_v50 = vld [vmem:[#allocation169_spill] sm:$0xff] }
 0x548   : > { %8589 = vmatprep.mubr.msk.f32.mxu1 %vm6511_vm11, %v6498_v14  ;;  %v6499_v40 = vmul.f32 %v6467_v19, %v14244_v51  ;;  %v5992_v37 = vadd.f32 -1.4531521, %v5960_v43  ;;  %v5993_v39 = vadd.f32 -1.4531521, %v5961_v49  ;;  %v5962_v4 = vmul.f32 1.0614054, %v13132_v45 }
 0x549   : > { %v6372_v55 = vmul.f32 %v14245_v47, %v6212_v21  ;;  %v6213_v5 = vmul.f32 %v6181_v11, %v14231_v44  ;;  %v6182_v61 = vadd.f32 0.2548296, %v6150_v8  ;;  %v6151_v3 = vmul.f32 %v6119_v60, %v12968_v31  ;;  %v14248_v14 = vld [vmem:[#allocation165_spill] sm:$0xff]  ;;  %v14249_v60 = vld [vmem:[#allocation167_spill] sm:$0xff] }
 0x54a   : > { %v6024_v33 = vmul.f32 %v5992_v37, %v13076_v10  ;;  %v6025_v20 = vmul.f32 %v5993_v39, %v13059_v32  ;;  %v5994_v57 = vadd.f32 -1.4531521, %v5962_v4  ;;  %v5963_v63 = vmul.f32 1.0614054, %v13119_v7 }
 0x54b   : > { %8590 = vmatmul.mubr.msk.f32.gmra.mrb[84].mxu1 %vm6511_vm11, %v6499_v40  ;;  %v6404_v46 = vsub.f32 1.0, %v6372_v55  ;;  %v6373_v2 = vmul.f32 %v14246_v26, %v6213_v5  ;;  %v6214_v17 = vmul.f32 %v6182_v61, %v13025_v24  ;;  %v6183_v12 = vadd.f32 0.2548296, %v6151_v3 }
 0x54c   : > { %v6056_v27 = vadd.f32 1.4214138, %v6024_v33  ;;  %v6057_v44 = vadd.f32 1.4214138, %v6025_v20  ;;  %v6026_v28 = vmul.f32 %v5994_v57, %v13132_v45  ;;  %v5995_v18 = vadd.f32 -1.4531521, %v5963_v63 }
 0x54d   : > { %v6436_v15 = vmul.f32 %v6404_v46, %v14247_v50  ;;  %v6405_v30 = vsub.f32 1.0, %v6373_v2  ;;  %v6374_v22 = vmul.f32 %v13009_v6, %v6214_v17  ;;  %v6215_v48 = vmul.f32 %v6183_v12, %v12968_v31 }
 0x54e   : > { %v6088_v29 = vmul.f32 %v6056_v27, %v13076_v10  ;;  %v6089_v0 = vmul.f32 %v6057_v44, %v13059_v32  ;;  %v6058_v52 = vadd.f32 1.4214138, %v6026_v28  ;;  %v6027_v24 = vmul.f32 %v5995_v18, %v13119_v7 }
 0x54f   : > { %v6468_v25 = vadd.f32 1.0, %v6436_v15  ;;  %v6437_v19 = vmul.f32 %v6405_v30, %v14248_v14  ;;  %v6406_v43 = vsub.f32 1.0, %v6374_v22  ;;  %v6375_v49 = vmul.f32 %v12977_v54, %v6215_v48  ;;  %v14250_v54 = vld [vmem:[#allocation163_spill] sm:$0xff]  ;;  %v14252_v14 = vld [vmem:[#allocation173_spill] sm:$0xff] }
 0x550   : > { %v6120_v21 = vadd.f32 -0.28449672, %v6088_v29  ;;  %v6121_v11 = vadd.f32 -0.28449672, %v6089_v0  ;;  %v6090_v8 = vmul.f32 %v6058_v52, %v13132_v45  ;;  %v6059_v6 = vadd.f32 1.4214138, %v6027_v24 }
 0x551   : > { %v6500_v31 = vmul.f32 %v6468_v25, %v14249_v60  ;;  %v6469_v51 = vadd.f32 1.0, %v6437_v19  ;;  %v6438_v40 = vmul.f32 %v6406_v43, %v12960_v1  ;;  %v6407_v37 = vsub.f32 1.0, %v6375_v49  ;;  %v14251_v0 = vld [vmem:[#allocation77_spill] sm:$0xff]  ;;  %v14254_v60 = vld [vmem:[#allocation172_spill] sm:$0xff] }
 0x552   : > { %v6152_v39 = vmul.f32 %v6120_v21, %v13076_v10  ;;  %v6153_v4 = vmul.f32 %v6121_v11, %v13059_v32  ;;  %v6122_v47 = vadd.f32 -0.28449672, %v6090_v8  ;;  %v6091_v55 = vmul.f32 %v6059_v6, %v13119_v7 }
 0x553   : > { %8592 = vmatprep.mubr.msk.f32.mxu1 %vm6511_vm11, %v6500_v31  ;;  %v6501_v5 = vmul.f32 %v6469_v51, %v14250_v54  ;;  %v6470_v61 = vadd.f32 1.0, %v6438_v40  ;;  %v6439_v3 = vmul.f32 %v6407_v37, %v12926_v38  ;;  %v5964_v33 = vmul.f32 1.0614054, %v13181_v34  ;;  %v14255_v51 = vld [vmem:[#allocation175_spill] sm:$0xff]  ;;  %v14256_v54 = vld [vmem:[#allocation46_spill] sm:$0xff] }
 0x554   : > { %v6184_v20 = vadd.f32 0.2548296, %v6152_v39  ;;  %v6185_v57 = vadd.f32 0.2548296, %v6153_v4  ;;  %v6154_v1 = vmul.f32 %v6122_v47, %v13132_v45  ;;  %v6123_v63 = vadd.f32 -0.28449672, %v6091_v55 }
 0x555   : > { %8593 = vmatmul.mubr.msk.f32.gmra.mrb[86].mxu1 %vm6511_vm11, %v6501_v5  ;;  %v6502_v46 = vmul.f32 %v6470_v61, %v12955_v35  ;;  %v6471_v26 = vadd.f32 1.0, %v6439_v3  ;;  %v5996_v2 = vadd.f32 -1.4531521, %v5964_v33  ;;  %v5965_v17 = vmul.f32 1.0614054, %v13137_v42 }
 0x556   : > { %v6216_v12 = vmul.f32 %v6184_v20, %v13076_v10  ;;  %v6217_v27 = vmul.f32 %v6185_v57, %v13059_v32  ;;  %v6186_v38 = vadd.f32 0.2548296, %v6154_v1  ;;  %v6155_v44 = vmul.f32 %v6123_v63, %v13119_v7  ;;  %v14258_v20 = vld [vmem:[#allocation49_spill] sm:$0xff]  ;;  %v14259_v63 = vld [vmem:[#allocation174_spill] sm:$0xff] }
 0x557   : > { %v6348_v28 = vmul.f32 1.442695, %v13124_v53  ;;  %8595 = vmatprep.mubr.msk.f32.mxu1 %vm6511_vm11, %v6502_v46  ;;  %v6503_v18 = vmul.f32 %v6471_v26, %v12916_v36  ;;  %v6028_v50 = vmul.f32 %v5996_v2, %v13181_v34  ;;  %v5997_v35 = vadd.f32 -1.4531521, %v5965_v17  ;;  %v14260_v17 = vld [vmem:[#allocation114_spill] sm:$0xff] }
 0x558   : > { %v6376_v15 = vmul.f32 %v13089_v13, %v6216_v12  ;;  %v6377_v30 = vmul.f32 %v13047_v16, %v6217_v27  ;;  %v6218_v10 = vmul.f32 %v6186_v38, %v13132_v45  ;;  %v6187_v22 = vadd.f32 0.2548296, %v6155_v44  ;;  %v14261_v27 = vld [vmem:[#allocation72_spill] sm:$0xff]  ;;  %v14262_v38 = vld [vmem:[#allocation106_spill] sm:$0xff] }
 0x559   : > { %vm5674_vm12 = vcmp.ge.f32.partialorder %v13002_v9, 0.0  ;;  %9336 = vpow2.f32 %v13174_v58  ;;  %8596 = vmatmul.mubr.msk.f32.gmra.mrb[88].mxu1 %vm6511_vm11, %v6503_v18  ;;  %v6060_v32 = vadd.f32 1.4214138, %v6028_v50  ;;  %v6029_v53 = vmul.f32 %v5997_v35, %v13137_v42  ;;  %v14263_v44 = vld [vmem:[#allocation56_spill] sm:$0xff] }
 0x55a   : > { %v6408_v36 = vsub.f32 1.0, %v6376_v15  ;;  %v6409_v48 = vsub.f32 1.0, %v6377_v30  ;;  %v6378_v29 = vmul.f32 %v13115_v41, %v6218_v10  ;;  %v6219_v13 = vmul.f32 %v6187_v22, %v13119_v7  ;;  %v14264_v18 = vld [vmem:[#allocation112_spill] sm:$0xff]  ;;  %v14266_v15 = vld [vmem:[#allocation62_spill] sm:$0xff]  ;;  %v14267_v10 = vld [vmem:[#allocation113_spill] sm:$0xff] }
 0x55b   : > { %vm4735_vm13 = vcmp.ge.f32.partialorder %v14251_v0, 0.0  ;;  %vm5675_vm14 = vcmp.ge.f32.partialorder %v12974_v62, 0.0  ;;  %9338 = vpow2.f32 %v6348_v28  ;;  %v6092_v16 = vmul.f32 %v6060_v32, %v13181_v34  ;;  %v14257_v62 = vld [vmem:[#allocation48_spill] sm:$0xff] }
 0x55c   : > { %v6061_v45 = vadd.f32 1.4214138, %v6029_v53  ;;  %v6440_v58 = vmul.f32 %v6408_v36, %v13015_v56  ;;  %v6441_v52 = vmul.f32 %v6409_v48, %v12987_v59  ;;  %v6410_v24 = vsub.f32 1.0, %v6378_v29  ;;  %v14265_v50 = vld [vmem:[#allocation84_spill] sm:$0xff]  ;;  %v14269_v29 = vld [vmem:[#allocation63_spill] sm:$0xff] }
 0x55d   : > { %v6379_v25 = vmul.f32 %v13106_v23, %v6219_v13  ;;  %v5608_v19 = vmul.f32 0.5, %v14252_v14  ;;  %v14253_v41 = vmov -1.0   ;;  %v6124_v43 = vadd.f32 -0.28449672, %v6092_v16  ;;  %v14268_v53 = vld [vmem:[#allocation124_spill] sm:$0xff] }
 0x55e   : > { %v5706_v7 = vsel %vm5674_vm12, 1.0, %v14253_v41  ;;  %v6093_v49 = vmul.f32 %v6061_v45, %v13137_v42  ;;  %v6472_v21 = vadd.f32 1.0, %v6440_v58  ;;  %v6473_v11 = vadd.f32 1.0, %v6441_v52  ;;  %v14270_v16 = vld [vmem:[#allocation92_spill] sm:$0xff]  ;;  %v14271_v45 = vld [vmem:[#allocation86_spill] sm:$0xff] }
 0x55f   : > { %v6442_v8 = vmul.f32 %v6410_v24, %v5706_v7  ;;  %v6411_v6 = vsub.f32 1.0, %v6379_v25  ;;  %v5609_v56 = vmul.f32 0.5, %v14254_v60  ;;  %v5707_v59 = vsel %vm5675_vm14, 1.0, %v14253_v41  ;;  %v14272_v24 = vld [vmem:[#allocation116_spill] sm:$0xff] }
 0x560   : > { %v6156_v23 = vmul.f32 %v6124_v43, %v13181_v34  ;;  %v6125_v31 = vadd.f32 -0.28449672, %v6093_v49  ;;  %v5610_v40 = vmul.f32 0.5, %v14255_v51  ;;  %v6504_v9 = vmul.f32 %v6472_v21, %v5608_v19  ;;  %v14273_v14 = vld [vmem:[#allocation176_spill] sm:$0xff]  ;;  %v14275_v21 = vld [vmem:[#allocation70_spill] sm:$0xff] }
 0x561   : > { %v6474_v37 = vadd.f32 1.0, %v6442_v8  ;;  %v6443_v39 = vmul.f32 %v6411_v6, %v5707_v59  ;;  %v6505_v4 = vmul.f32 %v6473_v11, %v5609_v56  ;;  %v5529_v5 = vadd.f32 1.0, %v14256_v54  ;;  %v14276_v56 = vld [vmem:[#allocation110_spill] sm:$0xff] }
 0x562   : > { %v6188_v47 = vadd.f32 0.2548296, %v6156_v23  ;;  %v6157_v55 = vmul.f32 %v6125_v31, %v13137_v42  ;;  %8598 = vmatprep.mubr.msk.f32.mxu1 %vm6511_vm11, %v6504_v9  ;;  %v5467_v33 = vsub.f32 1.0, %v14257_v62  ;;  %v5245_v57 = vadd.f32 0.2548296, %v14258_v20  ;;  %v14277_v31 = vld [vmem:[#allocation79_spill] sm:$0xff] }
 0x563   : > { %v6506_v61 = vmul.f32 %v6474_v37, %v5610_v40  ;;  %v6475_v3 = vadd.f32 1.0, %v6443_v39  ;;  %v9337_v1 = vpop.eup %9336  ;;  %v5611_v46 = vmul.f32 0.5, %v14259_v63  ;;  %8599 = vmatmul.mubr.msk.f32.gmra.mrb[90].mxu1 %vm6511_vm11, %v6505_v4  ;;  %v5025_v12 = vmul.f32 1.0614054, %v14260_v17  ;;  %v14278_v40 = vld [vmem:[#allocation120_spill] sm:$0xff]  ;;  %v14279_v39 = vld [vmem:[#allocation57_spill] sm:$0xff] }
 0x564   : > { %v6220_v26 = vmul.f32 %v6188_v47, %v13181_v34  ;;  %v6189_v2 = vadd.f32 0.2548296, %v6157_v55  ;;  %vm4736_vm15 = vcmp.ge.f32.partialorder %v14261_v27, 0.0  ;;  %v5086_v28 = vmul.f32 %v14263_v44, %v14262_v38  ;;  %v14280_v47 = vld [vmem:[#allocation98_spill] sm:$0xff]  ;;  %v14282_v63 = vld [vmem:[#allocation37_spill] sm:$0xff] }
 0x565   : > { %8601 = vmatprep.mubr.msk.f32.mxu1 %vm6511_vm11, %v6506_v61  ;;  %v5087_v35 = vmul.f32 %v14265_v50, %v14264_v18  ;;  %v5056_v30 = vadd.f32 -1.4531521, %v14266_v15  ;;  %v5026_v22 = vmul.f32 1.0614054, %v14267_v10  ;;  %v9339_v32 = vpop.eup %9338  ;;  %vm5676_vm1 = vcmp.ge.f32.partialorder %v14268_v53, 0.0  ;;  %v14284_v15 = vld [vmem:[#allocation36_spill] sm:$0xff] }
 0x566   : > { %v6507_v34 = vmul.f32 %v6475_v3, %v5611_v46  ;;  %v6380_v36 = vmul.f32 %v9337_v1, %v6220_v26  ;;  %v6221_v48 = vmul.f32 %v6189_v2, %v13137_v42  ;;  %v5530_v13 = vadd.f32 1.0, %v14269_v29  ;;  %v14274_v42 = vld [vmem:[#allocation81_spill] sm:$0xff]  ;;  %v14281_v3 = vld [vmem:[#allocation107_spill] sm:$0xff]  ;;  %v14283_v26 = vld [vmem:[#allocation128_spill] sm:$0xff] }
 0x567   : > { %v5276_v58 = vmul.f32 %v14271_v45, %v14270_v16  ;;  %v13386_v52 = vsel %vm4735_vm13, 1.0, %v14253_v41  ;;  %v5027_v25 = vmul.f32 1.0614054, %v14272_v24  ;;  %vm5677_vm2 = vcmp.ge.f32.partialorder %v14273_v14, 0.0  ;;  %v14287_v29 = vld [vmem:[#allocation103_spill] sm:$0xff] }
 0x568   : > { %8602 = vmatmul.mubr.msk.f32.gmra.mrb[92].mxu1 %vm6511_vm11, %v6507_v34  ;;  %v6412_v19 = vsub.f32 1.0, %v6380_v36  ;;  %v6381_v7 = vmul.f32 %v9339_v32, %v6221_v48  ;;  %v5057_v43 = vadd.f32 -1.4531521, %v5025_v12  ;;  %vm4737_vm3 = vcmp.ge.f32.partialorder %v14274_v42, 0.0  ;;  %v14286_v36 = vld [vmem:[#allocation69_spill] sm:$0xff] }
 0x569   : > { %v5708_v49 = vsel %vm5676_vm1, 1.0, %v14253_v41  ;;  %v13394_v11 = vmul.f32 %v5529_v5, %v14275_v21  ;;  %v5118_v8 = vadd.f32 1.4214138, %v5086_v28  ;;  %v5119_v0 = vadd.f32 1.4214138, %v5087_v35 }
 0x56a   : > { %v6444_v6 = vmul.f32 %v6412_v19, %v5708_v49  ;;  %v6413_v60 = vsub.f32 1.0, %v6381_v7  ;;  %v5088_v59 = vmul.f32 %v5056_v30, %v14276_v56  ;;  %v5058_v23 = vadd.f32 -1.4531521, %v5026_v22  ;;  %v14285_v22 = vld [vmem:[#allocation94_spill] sm:$0xff]  ;;  %v14289_v49 = vld [vmem:[#allocation61_spill] sm:$0xff] }
 0x56b   : > { %vm4738_vm4 = vcmp.ge.f32.partialorder %v14277_v31, 0.0  ;;  %v5709_v51 = vsel %vm5677_vm2, 1.0, %v14253_v41  ;;  %v5499_v9 = vmul.f32 %v5467_v33, %v14278_v40  ;;  %v5059_v37 = vadd.f32 -1.4531521, %v5027_v25  ;;  %v14288_v25 = vld [vmem:[#allocation42_spill] sm:$0xff] }
 0x56c   : > { %v5028_v4 = vmul.f32 1.0614054, %v14279_v39  ;;  %v5612_v55 = vmul.f32 0.5, %v14280_v47  ;;  %v6476_v54 = vadd.f32 1.0, %v6444_v6  ;;  %v6445_v5 = vmul.f32 %v6413_v60, %v5709_v51  ;;  %v14292_v47 = vld [vmem:[#allocation71_spill] sm:$0xff] }
 0x56d   : > { %v5089_v61 = vmul.f32 %v5057_v43, %v14260_v17  ;;  %v5277_v62 = vmul.f32 %v5245_v57, %v14281_v3  ;;  %v5150_v20 = vmul.f32 %v5118_v8, %v14262_v38  ;;  %v5151_v1 = vmul.f32 %v5119_v0, %v14264_v18 }
 0x56e   : > { %v5029_v46 = vmul.f32 1.0614054, %v14282_v63  ;;  %v5613_v2 = vmul.f32 0.5, %v14283_v26  ;;  %v6508_v33 = vmul.f32 %v6476_v54, %v5612_v55  ;;  %v6477_v12 = vadd.f32 1.0, %v6445_v5 }
 0x56f   : > { %v5120_v44 = vadd.f32 1.4214138, %v5088_v59  ;;  %v5090_v28 = vmul.f32 %v5058_v23, %v14267_v10  ;;  %v5091_v50 = vmul.f32 %v5059_v37, %v14272_v24  ;;  %v5060_v35 = vadd.f32 -1.4531521, %v5028_v4  ;;  %v14290_v59 = vld [vmem:[#allocation39_spill] sm:$0xff] }
 0x570   : > { %v5030_v30 = vmul.f32 1.0614054, %v14284_v15  ;;  %8604 = vmatprep.mubr.msk.f32.mxu1 %vm6511_vm11, %v6508_v33  ;;  %v6509_v57 = vmul.f32 %v6477_v12, %v5613_v2  ;;  %v5436_v32 = vmul.f32 %v14285_v22, %v5276_v58  ;;  %v13416_v53 = vsel %vm4736_vm15, 1.0, %v14253_v41  ;;  %v14291_v37 = vld [vmem:[#allocation47_spill] sm:$0xff]  ;;  %v14295_v12 = vld [vmem:[#allocation44_spill] sm:$0xff] }
 0x571   : > { %v5121_v34 = vadd.f32 1.4214138, %v5089_v61  ;;  %v13419_v48 = vmul.f32 %v5530_v13, %v14286_v36  ;;  %v5437_v16 = vmul.f32 %v14287_v29, %v5277_v62  ;;  %v5061_v45 = vadd.f32 -1.4531521, %v5029_v46  ;;  %v14293_v61 = vld [vmem:[#allocation65_spill] sm:$0xff]  ;;  %v14294_v46 = vld [vmem:[#allocation76_spill] sm:$0xff] }
 0x572   : > { %v5031_v14 = vmul.f32 1.0614054, %v14288_v25  ;;  %8605 = vmatmul.mubr.msk.f32.gmra.mrb[94].mxu1 %vm6511_vm11, %v6509_v57  ;;  %v5531_v19 = vadd.f32 1.0, %v5499_v9  ;;  %v5182_v7 = vadd.f32 -0.28449672, %v5150_v20  ;;  %v5152_v58 = vmul.f32 %v5120_v44, %v14276_v56  ;;  %v14297_v57 = vld [vmem:[#allocation64_spill] sm:$0xff] }
 0x573   : > { %v5183_v43 = vadd.f32 -0.28449672, %v5151_v1  ;;  %8609 = vmatprep.mubr.msk.f32.mxu1 %vm252_vm0, %v14289_v49  ;;  %v5122_v27 = vadd.f32 1.4214138, %v5090_v28  ;;  %v5123_v21 = vadd.f32 1.4214138, %v5091_v50  ;;  %v5092_v13 = vmul.f32 %v5060_v35, %v14279_v39 }
 0x574   : > { %v5062_v8 = vadd.f32 -1.4531521, %v5030_v30  ;;  %v5468_v0 = vsub.f32 1.0, %v5436_v32  ;;  %v13431_v6 = vsel %vm4737_vm3, 1.0, %v14253_v41  ;;  %v5153_v60 = vmul.f32 %v5121_v34, %v14260_v17  ;;  %v14296_v35 = vld [vmem:[#allocation60_spill] sm:$0xff]  ;;  %v14298_v22 = vld [vmem:[#allocation119_spill] sm:$0xff] }
 0x575   : > { %v5032_v23 = vmul.f32 1.0614054, %v14290_v59  ;;  %v5469_v51 = vsub.f32 1.0, %v5437_v16  ;;  %v5093_v40 = vmul.f32 %v5061_v45, %v14282_v63  ;;  %v5063_v9 = vadd.f32 -1.4531521, %v5031_v14  ;;  %v14299_v16 = vld [vmem:[#allocation74_spill] sm:$0xff] }
 0x576   : > { %v5033_v4 = vmul.f32 1.0614054, %v14291_v37  ;;  %8610 = vmatmul.mubr.msk.f32.vlgmr.msra.gmra.mrb[64].mxu1 %vm252_vm0, %v14292_v47  ;;  %v5214_v55 = vmul.f32 %v5182_v7, %v14262_v38  ;;  %v5215_v54 = vmul.f32 %v5183_v43, %v14264_v18  ;;  %v5184_v42 = vadd.f32 -0.28449672, %v5152_v58 }
 0x577   : > { %v13444_v5 = vsel %vm4738_vm4, 1.0, %v14253_v41  ;;  %8612 = vmatprep.mubr.msk.f32.mxu1 %vm252_vm0, %v14293_v61  ;;  %v5154_v3 = vmul.f32 %v5122_v27, %v14267_v10  ;;  %v5155_v62 = vmul.f32 %v5123_v21, %v14272_v24  ;;  %v5124_v20 = vadd.f32 1.4214138, %v5092_v13  ;;  %v14300_v27 = vld [vmem:[#allocation121_spill] sm:$0xff] }
 0x578   : > { %v5094_v1 = vmul.f32 %v5062_v8, %v14284_v15  ;;  %v13452_v26 = vmul.f32 %v5531_v19, %v14294_v46  ;;  %v5185_v2 = vadd.f32 -0.28449672, %v5153_v60  ;;  %v5064_v33 = vadd.f32 -1.4531521, %v5032_v23  ;;  %v14301_v23 = vld [vmem:[#allocation67_spill] sm:$0xff] }
 0x579   : > { %v5034_v44 = vmul.f32 1.0614054, %v14295_v12  ;;  %v5125_v31 = vadd.f32 1.4214138, %v5093_v40  ;;  %v5095_v28 = vmul.f32 %v5063_v9, %v14288_v25  ;;  %v5065_v50 = vadd.f32 -1.4531521, %v5033_v4 }
 0x57a   : > { %v5035_v30 = vmul.f32 1.0614054, %v14296_v35  ;;  %8613 = vmatmul.mubr.msk.f32.gmra.mrb[66].mxu1 %vm252_vm0, %v14297_v57  ;;  %v5500_v32 = vmul.f32 %v5468_v0, %v14298_v22  ;;  %v5246_v34 = vadd.f32 0.2548296, %v5214_v55  ;;  %v5247_v36 = vadd.f32 0.2548296, %v5215_v54 }
 0x57b   : > { %v5216_v29 = vmul.f32 %v5184_v42, %v14276_v56  ;;  %8615 = vmatprep.mubr.msk.f32.mxu1 %vm252_vm0, %v14299_v16  ;;  %v5186_v45 = vadd.f32 -0.28449672, %v5154_v3  ;;  %v5187_v14 = vadd.f32 -0.28449672, %v5155_v62  ;;  %v5156_v19 = vmul.f32 %v5124_v20, %v14279_v39  ;;  %v14302_v40 = vld [vmem:[#allocation122_spill] sm:$0xff]  ;;  %v14303_v54 = vld [vmem:[#allocation73_spill] sm:$0xff] }
 0x57c   : > { %v5126_v7 = vadd.f32 1.4214138, %v5094_v1  ;;  %v5217_v43 = vmul.f32 %v5185_v2, %v14260_v17  ;;  %v5096_v58 = vmul.f32 %v5064_v33, %v14290_v59  ;;  %v5066_v49 = vadd.f32 -1.4531521, %v5034_v44  ;;  %v14304_v44 = vld [vmem:[#allocation82_spill] sm:$0xff] }
 0x57d   : > { %v5036_v21 = vmul.f32 1.0614054, %v14300_v27  ;;  %v5157_v13 = vmul.f32 %v5125_v31, %v14282_v63  ;;  %v5127_v8 = vadd.f32 1.4214138, %v5095_v28  ;;  %v5097_v0 = vmul.f32 %v5065_v50, %v14291_v37  ;;  %v14305_v28 = vld [vmem:[#allocation100_spill] sm:$0xff] }
 0x57e   : > { %v5067_v60 = vadd.f32 -1.4531521, %v5035_v30  ;;  %8616 = vmatmul.mubr.msk.f32.gmra.mrb[68].mxu1 %vm252_vm0, %v14301_v23  ;;  %v5501_v9 = vmul.f32 %v5469_v51, %v14302_v40  ;;  %v5278_v4 = vmul.f32 %v5246_v34, %v14262_v38  ;;  %v5279_v47 = vmul.f32 %v5247_v36, %v14264_v18  ;;  %v14306_v30 = vld [vmem:[#allocation109_spill] sm:$0xff]  ;;  %v14307_v34 = vld [vmem:[#allocation80_spill] sm:$0xff] }
 0x57f   : > { %v5248_v55 = vadd.f32 0.2548296, %v5216_v29  ;;  %8618 = vmatprep.mubr.msk.f32.mxu1 %vm252_vm0, %v14303_v54  ;;  %v5218_v42 = vmul.f32 %v5186_v45, %v14267_v10  ;;  %v5219_v61 = vmul.f32 %v5187_v14, %v14272_v24  ;;  %v5188_v3 = vadd.f32 -0.28449672, %v5156_v19  ;;  %v14311_v40 = vld [vmem:[#allocation45_spill] sm:$0xff] }
 0x580   : > { %v5158_v62 = vmul.f32 %v5126_v7, %v14284_v15  ;;  %v5249_v20 = vadd.f32 0.2548296, %v5217_v43  ;;  %v5128_v1 = vadd.f32 1.4214138, %v5096_v58  ;;  %v5098_v46 = vmul.f32 %v5066_v49, %v14295_v12 }
 0x581   : > { %v5068_v51 = vadd.f32 -1.4531521, %v5036_v21  ;;  %v5189_v2 = vadd.f32 -0.28449672, %v5157_v13  ;;  %v5159_v38 = vmul.f32 %v5127_v8, %v14288_v25  ;;  %v5129_v18 = vadd.f32 1.4214138, %v5097_v0 }
 0x582   : > { %v5099_v33 = vmul.f32 %v5067_v60, %v14296_v35  ;;  %8619 = vmatmul.mubr.msk.f32.gmra.mrb[70].mxu1 %vm252_vm0, %v14304_v44  ;;  %v5532_v31 = vadd.f32 1.0, %v5500_v32  ;;  %v5438_v50 = vmul.f32 %v14305_v28, %v5278_v4  ;;  %v5439_v57 = vmul.f32 %v14306_v30, %v5279_v47  ;;  %v14308_v21 = vld [vmem:[#allocation43_spill] sm:$0xff]  ;;  %v14309_v60 = vld [vmem:[#allocation104_spill] sm:$0xff] }
 0x583   : > { %v5280_v22 = vmul.f32 %v5248_v55, %v14276_v56  ;;  %8621 = vmatprep.mubr.msk.f32.mxu1 %vm252_vm0, %v14307_v34  ;;  %v5250_v36 = vadd.f32 0.2548296, %v5218_v42  ;;  %v5251_v29 = vadd.f32 0.2548296, %v5219_v61  ;;  %v5220_v16 = vmul.f32 %v5188_v3, %v14279_v39  ;;  %v14312_v42 = vld [vmem:[#allocation115_spill] sm:$0xff] }
 0x584   : > { %v5190_v45 = vadd.f32 -0.28449672, %v5158_v62  ;;  %v5281_v14 = vmul.f32 %v5249_v20, %v14260_v17  ;;  %v5160_v19 = vmul.f32 %v5128_v1, %v14290_v59  ;;  %v5130_v7 = vadd.f32 1.4214138, %v5098_v46  ;;  %v14310_v17 = vld [vmem:[#allocation87_spill] sm:$0xff] }
 0x585   : > { %v5100_v32 = vmul.f32 %v5068_v51, %v14300_v27  ;;  %v5221_v43 = vmul.f32 %v5189_v2, %v14282_v63  ;;  %v5191_v58 = vadd.f32 -0.28449672, %v5159_v38  ;;  %v5161_v56 = vmul.f32 %v5129_v18, %v14291_v37  ;;  %v14313_v2 = vld [vmem:[#allocation54_spill] sm:$0xff]  ;;  %v14315_v38 = vld [vmem:[#allocation55_spill] sm:$0xff] }
 0x586   : > { %v5131_v49 = vadd.f32 1.4214138, %v5099_v33  ;;  %8622 = vmatmul.mubr.msk.f32.gmra.mrb[72].mxu1 %vm252_vm0, %v14308_v21  ;;  %v5533_v13 = vadd.f32 1.0, %v5501_v9  ;;  %v5470_v8 = vsub.f32 1.0, %v5438_v50  ;;  %v5471_v0 = vsub.f32 1.0, %v5439_v57  ;;  %v14316_v28 = vld [vmem:[#allocation83_spill] sm:$0xff] }
 0x587   : > { %v5440_v23 = vmul.f32 %v14309_v60, %v5280_v22  ;;  %vm4739_vm5 = vcmp.ge.f32.partialorder %v14310_v17, 0.0  ;;  %8624 = vmatprep.mubr.msk.f32.mxu1 %vm252_vm0, %v14311_v40  ;;  %v5282_v4 = vmul.f32 %v5250_v36, %v14267_v10  ;;  %v5283_v47 = vmul.f32 %v5251_v29, %v14272_v24  ;;  %v14314_v10 = vld [vmem:[#allocation75_spill] sm:$0xff]  ;;  %v14319_v22 = vld [vmem:[#allocation38_spill] sm:$0xff] }
 0x588   : > { %v5252_v55 = vadd.f32 0.2548296, %v5220_v16  ;;  %v5222_v54 = vmul.f32 %v5190_v45, %v14284_v15  ;;  %v5441_v61 = vmul.f32 %v14312_v42, %v5281_v14  ;;  %v5192_v3 = vadd.f32 -0.28449672, %v5160_v19  ;;  %v14317_v50 = vld [vmem:[#allocation91_spill] sm:$0xff] }
 0x589   : > { %v5162_v9 = vmul.f32 %v5130_v7, %v14295_v12  ;;  %v5132_v62 = vadd.f32 1.4214138, %v5100_v32  ;;  %v5253_v20 = vadd.f32 0.2548296, %v5221_v43  ;;  %v5223_v1 = vmul.f32 %v5191_v58, %v14288_v25  ;;  %v14318_v30 = vld [vmem:[#allocation111_spill] sm:$0xff] }
 0x58a   : > { %v5193_v46 = vadd.f32 -0.28449672, %v5161_v56  ;;  %v5163_v51 = vmul.f32 %v5131_v49, %v14296_v35  ;;  %8625 = vmatmul.mubr.msk.f32.gmra.mrb[74].mxu1 %vm252_vm0, %v14313_v2  ;;  %v5564_v24 = vmul.f32 %v5532_v31, %v14314_v10  ;;  %v5502_v18 = vmul.f32 %v5470_v8, %v14315_v38  ;;  %v14321_v49 = vld [vmem:[#allocation89_spill] sm:$0xff]  ;;  %v14322_v8 = vld [vmem:[#allocation58_spill] sm:$0xff] }
 0x58b   : > { %v5503_v33 = vmul.f32 %v5471_v0, %v13386_v52  ;;  %v5472_v44 = vsub.f32 1.0, %v5440_v23  ;;  %vm4740_vm6 = vcmp.ge.f32.partialorder %v14316_v28, 0.0  ;;  %vm4741_vm7 = vcmp.ge.f32.partialorder %v14317_v50, 0.0  ;;  %8627 = vmatprep.mubr.msk.f32.mxu1 %vm252_vm0, %v13394_v11  ;;  %v14320_v11 = vld [vmem:[#allocation85_spill] sm:$0xff]  ;;  %v14327_v38 = vld [vmem:[#allocation50_spill] sm:$0xff] }
 0x58c   : > { %v5442_v57 = vmul.f32 %v14318_v30, %v5282_v4  ;;  %v5443_v34 = vmul.f32 %v14319_v22, %v5283_v47  ;;  %v5284_v36 = vmul.f32 %v5252_v55, %v14279_v39  ;;  %v5254_v29 = vadd.f32 0.2548296, %v5222_v54  ;;  %v14323_v4 = vld [vmem:[#allocation41_spill] sm:$0xff] }
 0x58d   : > { %v5473_v31 = vsub.f32 1.0, %v5441_v61  ;;  %v5224_v16 = vmul.f32 %v5192_v3, %v14290_v59  ;;  %v5194_v45 = vadd.f32 -0.28449672, %v5162_v9  ;;  %v5164_v52 = vmul.f32 %v5132_v62, %v14300_v27  ;;  %v14325_v61 = vld [vmem:[#allocation90_spill] sm:$0xff] }
 0x58e   : > { %v5285_v14 = vmul.f32 %v5253_v20, %v14282_v63  ;;  %v5255_v19 = vadd.f32 0.2548296, %v5223_v1  ;;  %v5225_v7 = vmul.f32 %v5193_v46, %v14291_v37  ;;  %v5195_v32 = vadd.f32 -0.28449672, %v5163_v51  ;;  %8628 = vmatmul.mubr.msk.f32.gmra.mrb[76].mxu1 %vm252_vm0, %v13419_v48  ;;  %v14326_v20 = vld [vmem:[#allocation40_spill] sm:$0xff] }
 0x58f   : > { %v5565_v43 = vmul.f32 %v5533_v13, %v14320_v11  ;;  %v5534_v58 = vadd.f32 1.0, %v5502_v18  ;;  %v5535_v39 = vadd.f32 1.0, %v5503_v33  ;;  %v5504_v56 = vmul.f32 %v5472_v44, %v13416_v53  ;;  %8630 = vmatprep.mubr.msk.f32.mxu1 %vm252_vm0, %v13452_v26  ;;  %v14324_v26 = vld [vmem:[#allocation78_spill] sm:$0xff]  ;;  %v14328_v44 = vld [vmem:[#allocation95_spill] sm:$0xff] }
 0x590   : > { %vm4742_vm8 = vcmp.ge.f32.partialorder %v14321_v49, 0.0  ;;  %v5474_v21 = vsub.f32 1.0, %v5442_v57  ;;  %v5475_v63 = vsub.f32 1.0, %v5443_v34  ;;  %v5444_v0 = vmul.f32 %v14322_v8, %v5284_v36  ;;  %v14333_v11 = vld [vmem:[#allocation26_spill] sm:$0xff] }
 0x591   : > { %v5286_v60 = vmul.f32 %v5254_v29, %v14284_v15  ;;  %v5505_v23 = vmul.f32 %v5473_v31, %v13431_v6  ;;  %v5256_v48 = vadd.f32 0.2548296, %v5224_v16  ;;  %v5226_v13 = vmul.f32 %v5194_v45, %v14295_v12  ;;  %v14330_v29 = vld [vmem:[#allocation105_spill] sm:$0xff] }
 0x592   : > { %v5196_v40 = vadd.f32 -0.28449672, %v5164_v52  ;;  %v5445_v47 = vmul.f32 %v14323_v4, %v5285_v14  ;;  %v5287_v53 = vmul.f32 %v5255_v19, %v14288_v25  ;;  %v5257_v55 = vadd.f32 0.2548296, %v5225_v7  ;;  %8631 = vmatmul.mubr.msk.f32.gmra.mrb[78].mxu1 %vm252_vm0, %v5564_v24  ;;  %v14331_v16 = vld [vmem:[#allocation117_spill] sm:$0xff]  ;;  %v14332_v7 = vld [vmem:[#allocation51_spill] sm:$0xff] }
 0x593   : > { %v5227_v54 = vmul.f32 %v5195_v32, %v14296_v35  ;;  %v5566_v42 = vmul.f32 %v5534_v58, %v14324_v26  ;;  %v5567_v3 = vmul.f32 %v5535_v39, %v14325_v61  ;;  %v5536_v15 = vadd.f32 1.0, %v5504_v56  ;;  %8633 = vmatprep.mubr.msk.f32.mxu1 %vm252_vm0, %v5565_v43  ;;  %v14334_v58 = vld [vmem:[#allocation93_spill] sm:$0xff]  ;;  %v14335_v39 = vld [vmem:[#allocation99_spill] sm:$0xff] }
 0x594   : > { %v4771_v6 = vsel %vm4739_vm5, 1.0, %v14253_v41  ;;  %v5506_v9 = vmul.f32 %v5474_v21, %v13444_v5  ;;  %v5476_v25 = vsub.f32 1.0, %v5444_v0  ;;  %v5446_v1 = vmul.f32 %v14326_v20, %v5286_v60  ;;  %v14329_v5 = vld [vmem:[#allocation88_spill] sm:$0xff] }
 0x595   : > { %v5507_v62 = vmul.f32 %v5475_v63, %v4771_v6  ;;  %v5537_v46 = vadd.f32 1.0, %v5505_v23  ;;  %v5288_v51 = vmul.f32 %v5256_v48, %v14290_v59  ;;  %v5258_v2 = vadd.f32 0.2548296, %v5226_v13  ;;  %v14337_v63 = vld [vmem:[#allocation108_spill] sm:$0xff]  ;;  %v14338_v48 = vld [vmem:[#allocation118_spill] sm:$0xff] }
 0x596   : > { %v5228_v10 = vmul.f32 %v5196_v40, %v14300_v27  ;;  %v5477_v24 = vsub.f32 1.0, %v5445_v47  ;;  %v5447_v18 = vmul.f32 %v14327_v38, %v5287_v53  ;;  %v5289_v17 = vmul.f32 %v5257_v55, %v14291_v37  ;;  %8634 = vmatmul.mubr.msk.f32.gmra.mrb[80].mxu1 %vm252_vm0, %v5566_v42  ;;  %v14339_v53 = vld [vmem:[#allocation53_spill] sm:$0xff]  ;;  %v14345_v38 = vld [vmem:[#allocation31_spill] sm:$0xff] }
 0x597   : > { %v5259_v33 = vadd.f32 0.2548296, %v5227_v54  ;;  %vm4743_vm9 = vcmp.ge.f32.partialorder %v14328_v44, 0.0  ;;  %v5568_v30 = vmul.f32 %v5536_v15, %v14329_v5  ;;  %v4772_v57 = vsel %vm4740_vm6, 1.0, %v14253_v41  ;;  %8636 = vmatprep.mubr.msk.f32.mxu1 %vm252_vm0, %v5567_v3  ;;  %v14340_v54 = vld [vmem:[#allocation28_spill] sm:$0xff]  ;;  %v14341_v42 = vld [vmem:[#allocation29_spill] sm:$0xff] }
 0x598   : > { %v4773_v59 = vsel %vm4741_vm7, 1.0, %v14253_v41  ;;  %v5538_v22 = vadd.f32 1.0, %v5506_v9  ;;  %v5539_v34 = vadd.f32 1.0, %v5507_v62  ;;  %v5508_v37 = vmul.f32 %v5476_v25, %v4772_v57  ;;  %v14342_v3 = vld [vmem:[#allocation96_spill] sm:$0xff]  ;;  %v14343_v15 = vld [vmem:[#allocation102_spill] sm:$0xff] }
 0x599   : > { %v5478_v36 = vsub.f32 1.0, %v5446_v1  ;;  %v5569_v31 = vmul.f32 %v5537_v46, %v14330_v29  ;;  %v5448_v45 = vmul.f32 %v14331_v16, %v5288_v51  ;;  %v5290_v52 = vmul.f32 %v5258_v2, %v14295_v12  ;;  %v14336_v12 = vld [vmem:[#allocation97_spill] sm:$0xff]  ;;  %v14344_v1 = vld [vmem:[#allocation52_spill] sm:$0xff] }
 0x59a   : > { %v5260_v14 = vadd.f32 0.2548296, %v5228_v10  ;;  %v5509_v19 = vmul.f32 %v5477_v24, %v4773_v59  ;;  %v5479_v28 = vsub.f32 1.0, %v5447_v18  ;;  %v5449_v32 = vmul.f32 %v14332_v7, %v5289_v17  ;;  %8637 = vmatmul.mubr.msk.f32.gmra.mrb[82].mxu1 %vm252_vm0, %v5568_v30  ;;  %v14346_v17 = vld [vmem:[#allocation101_spill] sm:$0xff] }
 0x59b   : > { %v5291_v50 = vmul.f32 %v5259_v33, %v14296_v35  ;;  %v4676_v43 = vmul.f32 0.5, %v14333_v11  ;;  %vm4744_vm10 = vcmp.ge.f32.partialorder %v14334_v58, 0.0  ;;  %vm4745_vm11 = vcmp.ge.f32.partialorder %v14335_v39, 0.0  ;;  %8639 = vmatprep.mubr.msk.f32.mxu1 %vm252_vm0, %v5569_v31  ;;  %v14348_v31 = vld [vmem:[#allocation33_spill] sm:$0xff]  ;;  %v14350_v11 = vld [vmem:[#allocation35_spill] sm:$0xff] }
 0x59c   : > { %v4774_v56 = vsel %vm4742_vm8, 1.0, %v14253_v41  ;;  %v5570_v21 = vmul.f32 %v5538_v22, %v14336_v12  ;;  %v5571_v8 = vmul.f32 %v5539_v34, %v14337_v63  ;;  %v5540_v0 = vadd.f32 1.0, %v5508_v37  ;;  %v14351_v12 = vld [vmem:[#allocation34_spill] sm:$0xff] }
 0x59d   : > { %v5510_v35 = vmul.f32 %v5478_v36, %v4774_v56  ;;  %v4775_v60 = vsel %vm4743_vm9, 1.0, %v14253_v41  ;;  %v5480_v23 = vsub.f32 1.0, %v5448_v45  ;;  %v5450_v13 = vmul.f32 %v14338_v48, %v5290_v52  ;;  %v14347_v36 = vld [vmem:[#allocation30_spill] sm:$0xff] }
 0x59e   : > { %v5292_v40 = vmul.f32 %v5260_v14, %v14300_v27  ;;  %v5541_v4 = vadd.f32 1.0, %v5509_v19  ;;  %v5511_v49 = vmul.f32 %v5479_v28, %v4775_v60  ;;  %v5481_v47 = vsub.f32 1.0, %v5449_v32  ;;  %8640 = vmatmul.mubr.msk.f32.gmra.mrb[84].mxu1 %vm252_vm0, %v5570_v21  ;;  %v14349_v32 = vld [vmem:[#allocation32_spill] sm:$0xff] }
 0x59f   : > { %v5451_v55 = vmul.f32 %v14339_v53, %v5291_v50  ;;  %v4678_v26 = vmul.f32 0.5, %v14340_v54  ;;  %v4677_v61 = vmul.f32 0.5, %v14341_v42  ;;  %vm4746_vm12 = vcmp.ge.f32.partialorder %v14342_v3, 0.0  ;;  %8642 = vmatprep.mubr.msk.f32.mxu1 %vm252_vm0, %v5571_v8 }
 0x5a0   : > { %vm4747_vm13 = vcmp.ge.f32.partialorder %v14343_v15, 0.0  ;;  %v5572_v6 = vmul.f32 %v5540_v0, %v4676_v43  ;;  %v5542_v9 = vadd.f32 1.0, %v5510_v35  ;;  %v4776_v27 = vsel %vm4744_vm10, 1.0, %v14253_v41 }
 0x5a1   : > { %v5512_v62 = vmul.f32 %v5480_v23, %v4776_v27  ;;  %v4777_v25 = vsel %vm4745_vm11, 1.0, %v14253_v41  ;;  %v5482_v20 = vsub.f32 1.0, %v5450_v13  ;;  %v5452_v46 = vmul.f32 %v14344_v1, %v5292_v40 }
 0x5a2   : > { %v5573_v51 = vmul.f32 %v5541_v4, %v4677_v61  ;;  %v5543_v2 = vadd.f32 1.0, %v5511_v49  ;;  %v5513_v10 = vmul.f32 %v5481_v47, %v4777_v25  ;;  %v5483_v24 = vsub.f32 1.0, %v5451_v55  ;;  %8643 = vmatmul.mubr.msk.f32.gmra.mrb[86].mxu1 %vm252_vm0, %v5572_v6 }
 0x5a3   : > { %v4679_v18 = vmul.f32 0.5, %v14345_v38  ;;  %vm4748_vm14 = vcmp.ge.f32.partialorder %v14346_v17, 0.0  ;;  %v5574_v33 = vmul.f32 %v5542_v9, %v4678_v26  ;;  %v4778_v44 = vsel %vm4746_vm12, 1.0, %v14253_v41 }
 0x5a4   : > { %8645 = vmatprep.mubr.msk.f32.mxu1 %vm252_vm0, %v5573_v51  ;;  %v5544_v5 = vadd.f32 1.0, %v5512_v62  ;;  %v5514_v30 = vmul.f32 %v5482_v20, %v4778_v44  ;;  %v4779_v57 = vsel %vm4747_vm13, 1.0, %v14253_v41  ;;  %v5484_v59 = vsub.f32 1.0, %v5452_v46 }
 0x5a5   : > { %v5575_v22 = vmul.f32 %v5543_v2, %v4679_v18  ;;  %v5545_v34 = vadd.f32 1.0, %v5513_v10  ;;  %v5515_v37 = vmul.f32 %v5483_v24, %v4779_v57  ;;  %v4680_v29 = vmul.f32 0.5, %v14347_v36 }
 0x5a6   : > { %8646 = vmatmul.mubr.msk.f32.gmra.mrb[88].mxu1 %vm252_vm0, %v5574_v33  ;;  %v4681_v16 = vmul.f32 0.5, %v14348_v31  ;;  %v4780_v45 = vsel %vm4748_vm14, 1.0, %v14253_v41  ;;  %v5546_v14 = vadd.f32 1.0, %v5514_v30  ;;  %v4682_v50 = vmul.f32 0.5, %v14349_v32 }
 0x5a7   : > { %8648 = vmatprep.mubr.msk.f32.mxu1 %vm252_vm0, %v5575_v22  ;;  %v5576_v52 = vmul.f32 %v5544_v5, %v4680_v29  ;;  %v5516_v19 = vmul.f32 %v5484_v59, %v4780_v45  ;;  %v5547_v7 = vadd.f32 1.0, %v5515_v37  ;;  %v4683_v43 = vmul.f32 0.5, %v14350_v11 }
 0x5a8   : > { %v5577_v28 = vmul.f32 %v5545_v34, %v4681_v16  ;;  %v5578_v58 = vmul.f32 %v5546_v14, %v4682_v50  ;;  %v4684_v21 = vmul.f32 0.5, %v14351_v12 }
 0x5a9   : > { %v5548_v39 = vadd.f32 1.0, %v5516_v19  ;;  %v5579_v56 = vmul.f32 %v5547_v7, %v4683_v43 }
 0x5aa   : > { %8649 = vmatmul.mubr.msk.f32.gmra.mrb[90].mxu1 %vm252_vm0, %v5576_v52 }
 0x5ab   : > { %8651 = vmatprep.mubr.msk.f32.mxu1 %vm252_vm0, %v5577_v28  ;;  %v5580_v41 = vmul.f32 %v5548_v39, %v4684_v21 }
 0x5ae   : > { %8652 = vmatmul.mubr.msk.f32.gmra.mrb[92].mxu1 %vm252_vm0, %v5578_v58 }
 0x5af   : > { %8654 = vmatprep.mubr.msk.f32.mxu1 %vm252_vm0, %v5579_v56 }
 0x5b2   : > { %8655 = vmatmul.mubr.msk.f32.gmra.mrb[94].mxu1 %vm252_vm0, %v5580_v41 }
 0x649   : > { %v8611_v63 = vpop.f32.mrb[64].mxu1 }
 0x64a   : > { %7159 = vst.msk [vmem:[%s13623_s28 + $0x8] sm:$0xff] %vm252_vm0, %v8611_v63  ;;  %v6999_v8 = vpop.f32.mrb[65].mxu1 }
 0x64b   : > { %7158 = vst.msk [vmem:[%s13623_s28] sm:$0xff] %vm252_vm0, %v6999_v8 }
 0x64d   : > { %v8614_v0 = vpop.f32.mrb[66].mxu1 }
 0x64e   : > { %7161 = vst.msk [vmem:[%s13623_s28 + $0x18] sm:$0xff] %vm252_vm0, %v8614_v0  ;;  %v7009_v35 = vpop.f32.mrb[67].mxu1 }
 0x64f   : > { %7160 = vst.msk [vmem:[%s13623_s28 + $0x10] sm:$0xff] %vm252_vm0, %v7009_v35 }
 0x651   : > { %v8617_v60 = vpop.f32.mrb[68].mxu1 }
 0x652   : > { %7163 = vst.msk [vmem:[%s13623_s28 + $0x28] sm:$0xff] %vm252_vm0, %v8617_v60  ;;  %v7019_v23 = vpop.f32.mrb[69].mxu1 }
 0x653   : > { %7162 = vst.msk [vmem:[%s13623_s28 + $0x20] sm:$0xff] %vm252_vm0, %v7019_v23 }
 0x655   : > { %v8620_v48 = vpop.f32.mrb[70].mxu1 }
 0x656   : > { %7165 = vst.msk [vmem:[%s13623_s28 + $0x38] sm:$0xff] %vm252_vm0, %v8620_v48  ;;  %v7029_v13 = vpop.f32.mrb[71].mxu1 }
 0x657   : > { %7164 = vst.msk [vmem:[%s13623_s28 + $0x30] sm:$0xff] %vm252_vm0, %v7029_v13 }
 0x659   : > { %v8623_v40 = vpop.f32.mrb[72].mxu1 }
 0x65a   : > { %7167 = vst.msk [vmem:[%s13623_s28 + $0x48] sm:$0xff] %vm252_vm0, %v8623_v40  ;;  %v7039_v4 = vpop.f32.mrb[73].mxu1 }
 0x65b   : > { %7166 = vst.msk [vmem:[%s13623_s28 + $0x40] sm:$0xff] %vm252_vm0, %v7039_v4 }
 0x65d   : > { %v8626_v49 = vpop.f32.mrb[74].mxu1 }
 0x65e   : > { %7169 = vst.msk [vmem:[%s13623_s28 + $0x58] sm:$0xff] %vm252_vm0, %v8626_v49  ;;  %v7049_v47 = vpop.f32.mrb[75].mxu1 }
 0x65f   : > { %7168 = vst.msk [vmem:[%s13623_s28 + $0x50] sm:$0xff] %vm252_vm0, %v7049_v47 }
 0x661   : > { %v8629_v53 = vpop.f32.mrb[76].mxu1 }
 0x662   : > { %7171 = vst.msk [vmem:[%s13623_s28 + $0x68] sm:$0xff] %vm252_vm0, %v8629_v53  ;;  %v7059_v55 = vpop.f32.mrb[77].mxu1 }
 0x663   : > { %7170 = vst.msk [vmem:[%s13623_s28 + $0x60] sm:$0xff] %vm252_vm0, %v7059_v55 }
 0x665   : > { %v8632_v54 = vpop.f32.mrb[78].mxu1 }
 0x666   : > { %7173 = vst.msk [vmem:[%s13623_s28 + $0x78] sm:$0xff] %vm252_vm0, %v8632_v54  ;;  %v7069_v26 = vpop.f32.mrb[79].mxu1 }
 0x667   : > { %7172 = vst.msk [vmem:[%s13623_s28 + $0x70] sm:$0xff] %vm252_vm0, %v7069_v26 }
 0x669   : > { %v8635_v42 = vpop.f32.mrb[80].mxu1 }
 0x66a   : > { %7175 = vst.msk [vmem:[%s13623_s28 + $0x88] sm:$0xff] %vm252_vm0, %v8635_v42  ;;  %v7079_v61 = vpop.f32.mrb[81].mxu1 }
 0x66b   : > { %7174 = vst.msk [vmem:[%s13623_s28 + $0x80] sm:$0xff] %vm252_vm0, %v7079_v61 }
 0x66d   : > { %v8638_v3 = vpop.f32.mrb[82].mxu1 }
 0x66e   : > { %7177 = vst.msk [vmem:[%s13623_s28 + $0x98] sm:$0xff] %vm252_vm0, %v8638_v3  ;;  %v7089_v15 = vpop.f32.mrb[83].mxu1 }
 0x66f   : > { %7176 = vst.msk [vmem:[%s13623_s28 + $0x90] sm:$0xff] %vm252_vm0, %v7089_v15 }
 0x671   : > { %v8641_v6 = vpop.f32.mrb[84].mxu1 }
 0x672   : > { %7179 = vst.msk [vmem:[%s13623_s28 + $0xa8] sm:$0xff] %vm252_vm0, %v8641_v6  ;;  %v7099_v9 = vpop.f32.mrb[85].mxu1 }
 0x673   : > { %7178 = vst.msk [vmem:[%s13623_s28 + $0xa0] sm:$0xff] %vm252_vm0, %v7099_v9 }
 0x675   : > { %v8644_v27 = vpop.f32.mrb[86].mxu1 }
 0x676   : > { %7181 = vst.msk [vmem:[%s13623_s28 + $0xb8] sm:$0xff] %vm252_vm0, %v8644_v27  ;;  %v7109_v62 = vpop.f32.mrb[87].mxu1 }
 0x677   : > { %7180 = vst.msk [vmem:[%s13623_s28 + $0xb0] sm:$0xff] %vm252_vm0, %v7109_v62 }
 0x679   : > { %v8647_v25 = vpop.f32.mrb[88].mxu1 }
 0x67a   : > { %7183 = vst.msk [vmem:[%s13623_s28 + $0xc8] sm:$0xff] %vm252_vm0, %v8647_v25  ;;  %v7119_v20 = vpop.f32.mrb[89].mxu1 }
 0x67b   : > { %7182 = vst.msk [vmem:[%s13623_s28 + $0xc0] sm:$0xff] %vm252_vm0, %v7119_v20 }
 0x67d   : > { %v8650_v1 = vpop.f32.mrb[90].mxu1 }
 0x67e   : > { %7185 = vst.msk [vmem:[%s13623_s28 + $0xd8] sm:$0xff] %vm252_vm0, %v8650_v1  ;;  %v7129_v46 = vpop.f32.mrb[91].mxu1 }
 0x67f   : > { %7184 = vst.msk [vmem:[%s13623_s28 + $0xd0] sm:$0xff] %vm252_vm0, %v7129_v46 }
 0x681   : > { %v8653_v51 = vpop.f32.mrb[92].mxu1 }
 0x682   : > { %7187 = vst.msk [vmem:[%s13623_s28 + $0xe8] sm:$0xff] %vm252_vm0, %v8653_v51  ;;  %v7139_v2 = vpop.f32.mrb[93].mxu1 }
 0x683   : > { %7186 = vst.msk [vmem:[%s13623_s28 + $0xe0] sm:$0xff] %vm252_vm0, %v7139_v2 }
 0x685   : > { %v8656_v10 = vpop.f32.mrb[94].mxu1 }
 0x686   : > { %7189 = vst.msk [vmem:[%s13623_s28 + $0xf8] sm:$0xff] %vm252_vm0, %v8656_v10  ;;  %v7149_v24 = vpop.f32.mrb[95].mxu1 }
 0x687   : > { %7188 = vst.msk [vmem:[%s13623_s28 + $0xf0] sm:$0xff] %vm252_vm0, %v7149_v24 }
 0x688 PF: > { %s16_s21 = sadd.s32 1, %s9346_s21  }
 0x689   : > { %p13_p4 = scmp.ge.s32.totalorder %s16_s21, 4  }
 0x68b   :  { %15 = sbr.rel (!%p13_p4) target bundleno = 1 (0x1), region = 84 }

</bundles_post_ra>
